<compile_context>
chip_gen: v7x
topology: tpu7x:2x2x1
jax: 0.10.0
libtpu: 0.0.40
codegen_flags: <defaults>
</compile_context>

<pallas_src>
import functools

import jax
import jax.numpy as jnp
from jax import lax
from jax.experimental import pallas as pl
from jax.experimental.pallas import tpu as pltpu


def _round_up(x, m):
    return (x + m - 1) // m * m


def _device_vmem_bytes():
    try:
        return int(pltpu.get_tpu_info().vmem_capacity_bytes)
    except Exception:  # pragma: no cover - conservative fallback (v7x per-core)
        return 64 * 1024 * 1024


def _encoder_text_kernel(tmax_ref, last_ref, emb_ref, w_ih_ref, w_hh_ref,
                         b_i_ref, b_hn_ref, out_ref,
                         seq_ref, gi_ref, h_ref, acc_ref, *, t_chunk):
    """GRU recurrence + masked last-step select + l2norm (one batch tile).

    tmax_ref : SMEM (n_tiles,)       int32, per-tile number of valid timesteps
    last_ref : VMEM (B, 1)           int32, last valid time index per row
    emb_ref  : VMEM (Tp, B, Wp)      bf16, embedded tokens (time-major, padded)
    w_ih_ref : VMEM (L, Wp, 3Wp)     bf16, fused (r|z|n) input-to-hidden weights
    w_hh_ref : VMEM (L, Wp, 3Wp)     bf16, fused (r|z|n) hidden-to-hidden weights
    b_i_ref  : VMEM (L, 1, 3Wp)      f32, (b_ih_r+b_hh_r | b_ih_z+b_hh_z | b_ih_n)
    b_hn_ref : VMEM (L, 1, Wp)       f32, b_hh_n
    out_ref  : VMEM (B, Wp)          f32
    seq_ref  : VMEM scratch (Tp,B,Wp)  bf16, layer-to-layer sequence buffer
    gi_ref   : VMEM scratch (Tc,B,3Wp) f32, per-chunk input projections
    h_ref    : VMEM scratch (B,Wp)     f32, hidden-state carry across chunks
    acc_ref  : VMEM scratch (B,Wp)     f32, masked last-step accumulator
    """
    Tp, B, Wp = seq_ref.shape
    H3 = 3 * Wp
    L = w_ih_ref.shape[0]
    Tc = t_chunk

    tmax = tmax_ref[pl.program_id(0)]       # valid steps in this batch tile
    n_active = pl.cdiv(tmax, Tc)            # chunks containing any valid step
    last_b = last_ref[...]                  # (B, 1) int32, read once

    acc_ref[...] = jnp.zeros_like(acc_ref)

    for l in range(L):                      # layers are serial; L small & static
        is_last = l == L - 1
        w_ih_l = w_ih_ref[l]                # (Wp, 3Wp) bf16, hoisted
        w_hh_l = w_hh_ref[l]                # (Wp, 3Wp) bf16, hoisted
        b_i_l = b_i_ref[l]                  # (1, 3Wp)  f32
        bhn = jnp.broadcast_to(b_hn_ref[l], (B, Wp))   # hoisted out of step loop
        src = emb_ref if l == 0 else seq_ref

        h_ref[...] = jnp.zeros_like(h_ref)  # h_0 = 0 for every layer

        def gates(gi_t, h):
            gh = jnp.dot(h.astype(jnp.bfloat16), w_hh_l,
                         preferred_element_type=jnp.float32)            # (B, 3Wp)
            rz = jax.nn.sigmoid(gi_t[:, :2 * Wp] + gh[:, :2 * Wp])      # fused r|z
            r, z = rz[:, :Wp], rz[:, Wp:]
            n = jnp.tanh(gi_t[:, 2 * Wp:] + r * (gh[:, 2 * Wp:] + bhn))
            return h + (1.0 - z) * (n - h)  # == (1-z)*n + z*h, one fewer vec op

        # Dynamic chunk loop: skips fully padded time chunks, keeps code size
        # O(Tc) per layer, and bounds the gi scratch independent of T.
        @pl.loop(0, n_active)
        def _chunk(c):
            t0 = pl.multiple_of(c * Tc, Tc)
            # Chunked input->hidden projection: one (Tc*B, Wp) @ (Wp, 3Wp) matmul.
            x_c = src[pl.ds(t0, Tc)]                                    # (Tc,B,Wp) bf16
            gi = jnp.dot(x_c.reshape(Tc * B, Wp), w_ih_l,
                         preferred_element_type=jnp.float32) + b_i_l
            gi_ref[...] = gi.reshape(Tc, B, H3)

            if is_last:
                def step(t, carry):
                    h, acc = carry
                    h_new = gates(gi_ref[t], h)
                    # masked last-valid-step select (packed-sequence semantics)
                    return h_new, jnp.where(last_b == t0 + t, h_new, acc)
                h_fin, acc_fin = lax.fori_loop(
                    0, Tc, step, (h_ref[...], acc_ref[...]), unroll=True)
                h_ref[...] = h_fin
                acc_ref[...] = acc_fin
            else:
                def step(t, h):
                    h_new = gates(gi_ref[t], h)
                    # gi for this chunk is already staged, in-place write is safe
                    seq_ref[t0 + t] = h_new.astype(seq_ref.dtype)
                    return h_new
                h_ref[...] = lax.fori_loop(0, Tc, step, h_ref[...], unroll=True)

    # l2norm over features; padded lanes are exactly zero so they do not perturb
    # the norm, eps guards an all-zero row against divide-by-zero.
    out = acc_ref[...]
    norm = jnp.sqrt(jnp.sum(out * out, axis=1, keepdims=True))
    out_ref[...] = out / jnp.maximum(norm, 1e-12)


def _prepare_params(params, w_pad):
    """Fuse per-gate (r,z,n) weights into lane-padded concatenated matrices."""
    w_hh = jnp.asarray(params["w_hh"], jnp.float32)            # (L, 3, H, H)
    L, _, H, _ = w_hh.shape
    w_ih = params["w_ih"]
    if not isinstance(w_ih, (list, tuple)):                    # stacked (L,3,D,H)
        w_ih = [w_ih[l] for l in range(L)]
    b_ih = jnp.asarray(params["b_ih"], jnp.float32).reshape(L, 3, H)
    b_hh = jnp.asarray(params["b_hh"], jnp.float32).reshape(L, 3, H)

    def fuse(w3, in_dim):
        # (3, in_dim, H) -> (Wp, 3*Wp), gates contiguous along lanes (r|z|n)
        buf = jnp.zeros((3, w_pad, w_pad), jnp.float32)
        buf = buf.at[:, :in_dim, :H].set(w3)
        return jnp.transpose(buf, (1, 0, 2)).reshape(w_pad, 3 * w_pad)

    w_ih_cat = jnp.stack([fuse(jnp.asarray(w_ih[l], jnp.float32),
                               int(w_ih[l].shape[-2])) for l in range(L)])
    w_hh_cat = jnp.stack([fuse(w_hh[l], H) for l in range(L)])

    def pad_b(b):
        buf = jnp.zeros((L, 3, w_pad), jnp.float32)
        return buf.at[:, :, :H].set(b)

    b_ih_p, b_hh_p = pad_b(b_ih), pad_b(b_hh)
    # r,z: b_ih+b_hh folded before the sigmoid; n: b_ih only (b_hh_n kept apart)
    b_i = jnp.concatenate(
        [b_ih_p[:, 0] + b_hh_p[:, 0], b_ih_p[:, 1] + b_hh_p[:, 1], b_ih_p[:, 2]],
        axis=-1)[:, None, :]                                   # (L, 1, 3Wp)
    b_hn = b_hh_p[:, 2][:, None, :]                            # (L, 1, Wp)
    # MXU operands go in bf16 (2-3x throughput, half the VMEM/DMA); biases f32.
    return (w_ih_cat.astype(jnp.bfloat16), w_hh_cat.astype(jnp.bfloat16),
            b_i, b_hn)


def encoder_text_forward(x_ids, lengths, params, *, t_chunk=8):
    emb_table = jnp.asarray(params["embedding"], jnp.float32)   # (V, D)
    B, T = x_ids.shape
    D = emb_table.shape[1]
    w_hh = jnp.asarray(params["w_hh"])
    L, _, H, _ = w_hh.shape

    # Shared lane-padded feature width for embeddings and hidden states; padded
    # lanes stay exactly zero through the recurrence (zero weight rows/cols).
    Wp = _round_up(max(D, H, 128), 128)
    H3 = 3 * Wp

    # Batch tiling: sublane aligned, capped at 128 (MXU fill vs VMEM trade-off),
    # and split into >=2 tiles once B>=16 so ("parallel",) can use both TCs.
    b_ru = _round_up(B, 8)
    b_tile = min(b_ru, 128)
    if b_ru >= 16:
        b_tile = min(b_tile, _round_up(b_ru // 2, 8))
    Bp = _round_up(B, b_tile)
    n_tiles = Bp // b_tile

    # Time chunking: chunk = recurrence unroll window = gi-scratch granularity.
    Tc = max(1, min(t_chunk, T))
    Tp = _round_up(T, Tc)

    w_ih_cat, w_hh_cat, b_i, b_hn = _prepare_params(params, Wp)

    # Host-side glue: gather directly in time-major order (no separate
    # (B,T,D)->(T,B,D) HBM transpose), store bf16 (halves HBM->VMEM DMA).
    emb_t = jnp.take(emb_table.astype(jnp.bfloat16), x_ids.T, axis=0)  # (T,B,D)
    emb_p = jnp.zeros((Tp, Bp, Wp), jnp.bfloat16).at[:T, :B, :D].set(emb_t)

    lengths = jnp.asarray(lengths, jnp.int32)
    last_t = jnp.clip(lengths, 1, T) - 1        # clamp: no t=-1 OOB reads
    last_p = jnp.zeros((Bp, 1), jnp.int32).at[:B, 0].set(last_t)
    # Per-tile number of valid steps -> the kernel skips padded time chunks.
    tile_tmax = (jnp.max(last_p.reshape(n_tiles, b_tile), axis=1) + 1
                 ).astype(jnp.int32)

    # Explicit VMEM budget: weights single-buffered, emb/out double-buffered by
    # the pipeline, plus scratch; clamped to the device's VMEM capacity.
    need = (2 * L * Wp * H3 * 2            # w_ih + w_hh (bf16, 1 buffer)
            + L * (H3 + Wp) * 4            # biases (f32, 1 buffer)
            + 2 * Tp * b_tile * Wp * 2     # emb block (bf16, 2 buffers)
            + 2 * b_tile * 4               # last-index block
            + 2 * b_tile * Wp * 4          # out block (f32, 2 buffers)
            + Tp * b_tile * Wp * 2         # seq scratch (bf16)
            + Tc * b_tile * H3 * 4         # gi scratch (f32, bounded by Tc)
            + 2 * b_tile * Wp * 4)         # h / acc scratch
    vmem_limit = int(min(max(need * 13 // 10, 16 << 20),
                         _device_vmem_bytes() * 7 // 8))

    kernel = functools.partial(_encoder_text_kernel, t_chunk=Tc)

    def make_call(single_buffer_weights):
        # Constant index maps -> the second pipeline buffer is pure waste.
        w_kw = (dict(pipeline_mode=pl.Buffered(1))
                if single_buffer_weights else {})
        return pl.pallas_call(
            kernel,
            out_shape=jax.ShapeDtypeStruct((Bp, Wp), jnp.float32),
            grid_spec=pltpu.PrefetchScalarGridSpec(
                num_scalar_prefetch=1,                       # tile_tmax -> SMEM
                grid=(n_tiles,),
                in_specs=[
                    pl.BlockSpec((b_tile, 1), lambda i, tm: (i, 0)),
                    pl.BlockSpec((Tp, b_tile, Wp), lambda i, tm: (0, i, 0)),
                    pl.BlockSpec((L, Wp, H3), lambda i, tm: (0, 0, 0), **w_kw),
                    pl.BlockSpec((L, Wp, H3), lambda i, tm: (0, 0, 0), **w_kw),
                    pl.BlockSpec((L, 1, H3), lambda i, tm: (0, 0, 0), **w_kw),
                    pl.BlockSpec((L, 1, Wp), lambda i, tm: (0, 0, 0), **w_kw),
                ],
                out_specs=pl.BlockSpec((b_tile, Wp), lambda i, tm: (i, 0)),
                scratch_shapes=[
                    pltpu.VMEM((Tp, b_tile, Wp), jnp.bfloat16),  # seq buffer
                    pltpu.VMEM((Tc, b_tile, H3), jnp.float32),   # chunked gi
                    pltpu.VMEM((b_tile, Wp), jnp.float32),       # h carry
                    pltpu.VMEM((b_tile, Wp), jnp.float32),       # last-step acc
                ],
            ),
            compiler_params=pltpu.CompilerParams(
                dimension_semantics=("parallel",),   # batch tiles across TCs
                vmem_limit_bytes=vmem_limit,
            ),
        )

    args = (tile_tmax, last_p, emb_p, w_ih_cat, w_hh_cat, b_i, b_hn)
    try:
        out_p = make_call(True)(*args)
    except Exception:
        # Fallback for Pallas builds without BlockSpec pipeline_mode support:
        # identical math, just default double-buffered weights (more VMEM).
        out_p = make_call(False)(*args)

    return out_p[:B, :H]


def encoder_text_reference(x_ids, lengths, params):
    """Pure-JAX f32 reference mirroring the PyTorch forward (for validation)."""
    emb_table = jnp.asarray(params["embedding"], jnp.float32)
    emb = jnp.take(emb_table, x_ids, axis=0)
    B, T, _ = emb.shape
    w_hh = jnp.asarray(params["w_hh"], jnp.float32)
    L, _, H, _ = w_hh.shape
    w_ih = params["w_ih"]
    if not isinstance(w_ih, (list, tuple)):
        w_ih = [w_ih[l] for l in range(L)]
    b_ih = jnp.asarray(params["b_ih"], jnp.float32).reshape(L, 3, H)
    b_hh = jnp.asarray(params["b_hh"], jnp.float32).reshape(L, 3, H)
    seq = emb
    for l in range(L):
        w_i = jnp.asarray(w_ih[l], jnp.float32)
        h = jnp.zeros((B, H), jnp.float32)
        outs = []
        for t in range(T):
            x_t = seq[:, t, :]
            r = jax.nn.sigmoid(x_t @ w_i[0] + b_ih[l, 0] + h @ w_hh[l, 0] + b_hh[l, 0])
            z = jax.nn.sigmoid(x_t @ w_i[1] + b_ih[l, 1] + h @ w_hh[l, 1] + b_hh[l, 1])
            n = jnp.tanh(x_t @ w_i[2] + b_ih[l, 2] + r * (h @ w_hh[l, 2] + b_hh[l, 2]))
            h = (1.0 - z) * n + z * h
            outs.append(h)
        seq = jnp.stack(outs, axis=1)
    out = seq[jnp.arange(B), jnp.asarray(lengths, jnp.int32) - 1]
    norm = jnp.sqrt(jnp.sum(out * out, axis=1, keepdims=True))
    return out / jnp.maximum(norm, 1e-12)


if __name__ == "__main__":
    vocab_size, word_dim, embed_size, num_layers = 50, 24, 32, 2
    B, T = 3, 8

    key = jax.random.PRNGKey(0)
    k_emb, k_w0, k_w1, k_whh, k_bih, k_bhh, k_x = jax.random.split(key, 7)
    bound = 1.0 / (embed_size ** 0.5)         # PyTorch GRU init range

    params = {
        # nn.Embedding default init ~ N(0, 1)
        "embedding": jax.random.normal(k_emb, (vocab_size, word_dim), jnp.float32),
        # nn.GRU default init ~ U(-1/sqrt(H), 1/sqrt(H)); gate order (r, z, n).
        # Layer 0 maps word_dim -> H, deeper layers map H -> H (word_dim != H ok).
        "w_ih": [
            jax.random.uniform(k_w0, (3, word_dim, embed_size), jnp.float32, -bound, bound),
            jax.random.uniform(k_w1, (3, embed_size, embed_size), jnp.float32, -bound, bound),
        ],
        "w_hh": jax.random.uniform(k_whh, (num_layers, 3, embed_size, embed_size),
                                   jnp.float32, -bound, bound),
        "b_ih": jax.random.uniform(k_bih, (num_layers, 3, embed_size),
                                   jnp.float32, -bound, bound),
        "b_hh": jax.random.uniform(k_bhh, (num_layers, 3, embed_size),
                                   jnp.float32, -bound, bound),
    }

    x_ids = jax.random.randint(k_x, (B, T), 0, vocab_size)
    # pack_padded_sequence requires lengths sorted decreasing; the kernel itself
    # only uses the per-tile max, so ordering is not required for correctness.
    lengths = jnp.array([8, 5, 3], dtype=jnp.int32)

    out = encoder_text_forward(x_ids, lengths, params)
    out = jax.block_until_ready(out)

    ref = encoder_text_reference(x_ids, lengths, params)
    assert out.shape == (B, embed_size)
    # Tolerance loosened vs the all-f32 version because the kernel feeds the
    # MXU bf16 operands (gate math / accumulation stay f32).
    assert bool(jnp.allclose(out, ref, atol=5e-2, rtol=5e-2)), \
        "mismatch vs pure-JAX reference"
    print("KERNEL_OK")
</pallas_src>

<mosaic_0001>
module attributes {stable_mosaic.version = 11 : i64} {
  func.func @_encoder_text_kernel(%arg0: i32, %arg1: memref<1xi32, #tpu.memory_space<smem>>, %arg2: memref<8x1xi32, #tpu.memory_space<vmem>>, %arg3: memref<8x8x128xbf16, #tpu.memory_space<vmem>>, %arg4: memref<2x128x384xbf16, #tpu.memory_space<vmem>>, %arg5: memref<2x128x384xbf16, #tpu.memory_space<vmem>>, %arg6: memref<2x1x384xf32, #tpu.memory_space<vmem>>, %arg7: memref<2x1x128xf32, #tpu.memory_space<vmem>>, %arg8: memref<8x128xf32, #tpu.memory_space<vmem>>, %arg9: memref<8x8x128xbf16, #tpu.memory_space<vmem>>, %arg10: memref<8x8x384xf32, #tpu.memory_space<vmem>>, %arg11: memref<8x128xf32, #tpu.memory_space<vmem>>, %arg12: memref<8x128xf32, #tpu.memory_space<vmem>>) attributes {dimension_semantics = [#tpu.dimension_semantics<parallel>], iteration_bounds = array<i64: 1>, scalar_prefetch = 1 : i64, scratch_operands = 4 : i64, tpu.core_type = #tpu.core_type<tc>, window_params = [{transform_indices = @transform_0, window_bounds = array<i64: 8, 1>}, {transform_indices = @transform_1, window_bounds = array<i64: 8, 8, 128>}, {pipeline_mode = #tpu.pipeline_mode<synchronous>, transform_indices = @transform_2, window_bounds = array<i64: 2, 128, 384>}, {pipeline_mode = #tpu.pipeline_mode<synchronous>, transform_indices = @transform_3, window_bounds = array<i64: 2, 128, 384>}, {pipeline_mode = #tpu.pipeline_mode<synchronous>, transform_indices = @transform_4, window_bounds = array<i64: 2, 1, 384>}, {pipeline_mode = #tpu.pipeline_mode<synchronous>, transform_indices = @transform_5, window_bounds = array<i64: 2, 1, 128>}, {transform_indices = @transform_6, window_bounds = array<i64: 8, 128>}]} {
    %0 = arith.index_cast %arg0 : i32 to index
    %1 = memref.load %arg1[%0] : memref<1xi32, #tpu.memory_space<smem>>
    %c7_i32 = arith.constant 7 : i32
    %2 = arith.addi %1, %c7_i32 : i32
    %c8_i32 = arith.constant 8 : i32
    %3 = arith.divsi %2, %c8_i32 : i32
    %c0 = arith.constant 0 : index
    %c0_0 = arith.constant 0 : index
    %4 = vector.load %arg2[%c0, %c0_0] : memref<8x1xi32, #tpu.memory_space<vmem>>, vector<8x1xi32>
    %cst = arith.constant 0.000000e+00 : f32
    %5 = vector.broadcast %cst : f32 to vector<8x128xf32>
    %c0_1 = arith.constant 0 : index
    %c0_2 = arith.constant 0 : index
    %6 = vector.load %arg12[%c0_1, %c0_2] : memref<8x128xf32, #tpu.memory_space<vmem>>, vector<8x128xf32>
    tpu.vector_store %arg12[%c0_1, %c0_2], %5 {strides = array<i32>} : memref<8x128xf32, #tpu.memory_space<vmem>>, vector<8x128xf32>,
    %c0_3 = arith.constant 0 : index
    %c0_4 = arith.constant 0 : index
    %c0_5 = arith.constant 0 : index
    %7 = vector.load %arg4[%c0_3, %c0_4, %c0_5] : memref<2x128x384xbf16, #tpu.memory_space<vmem>>, vector<1x128x384xbf16>
    %8 = vector.shape_cast %7 : vector<1x128x384xbf16> to vector<128x384xbf16>
    %c0_6 = arith.constant 0 : index
    %c0_7 = arith.constant 0 : index
    %c0_8 = arith.constant 0 : index
    %9 = vector.load %arg5[%c0_6, %c0_7, %c0_8] : memref<2x128x384xbf16, #tpu.memory_space<vmem>>, vector<1x128x384xbf16>
    %10 = vector.shape_cast %9 : vector<1x128x384xbf16> to vector<128x384xbf16>
    %c0_9 = arith.constant 0 : index
    %c0_10 = arith.constant 0 : index
    %c0_11 = arith.constant 0 : index
    %11 = vector.load %arg6[%c0_9, %c0_10, %c0_11] : memref<2x1x384xf32, #tpu.memory_space<vmem>>, vector<1x1x384xf32>
    %12 = vector.shape_cast %11 : vector<1x1x384xf32> to vector<1x384xf32>
    %c0_12 = arith.constant 0 : index
    %c0_13 = arith.constant 0 : index
    %c0_14 = arith.constant 0 : index
    %13 = vector.load %arg7[%c0_12, %c0_13, %c0_14] : memref<2x1x128xf32, #tpu.memory_space<vmem>>, vector<1x1x128xf32>
    %14 = vector.shape_cast %13 : vector<1x1x128xf32> to vector<1x128xf32>
    %15 = vector.shape_cast %14 : vector<1x128xf32> to vector<1x128xf32>
    %16 = vector.broadcast %15 : vector<1x128xf32> to vector<8x128xf32>
    %cst_15 = arith.constant 0.000000e+00 : f32
    %17 = vector.broadcast %cst_15 : f32 to vector<8x128xf32>
    %c0_16 = arith.constant 0 : index
    %c0_17 = arith.constant 0 : index
    %18 = vector.load %arg11[%c0_16, %c0_17] : memref<8x128xf32, #tpu.memory_space<vmem>>, vector<8x128xf32>
    tpu.vector_store %arg11[%c0_16, %c0_17], %17 {strides = array<i32>} : memref<8x128xf32, #tpu.memory_space<vmem>>, vector<8x128xf32>,
    %c0_i32 = arith.constant 0 : i32
    %19 = arith.subi %3, %c0_i32 : i32
    %c1_i32 = arith.constant 1 : i32
    %c1_i32_18 = arith.constant 1 : i32
    %20 = arith.subi %c1_i32, %c1_i32_18 : i32
    %21 = arith.addi %19, %20 : i32
    %c1_i32_19 = arith.constant 1 : i32
    %22 = arith.divsi %21, %c1_i32_19 : i32
    %c1_i32_20 = arith.constant 1 : i32
    %c0_i32_21 = arith.constant 0 : i32
    %c0_i32_22 = arith.constant 0 : i32
    %23 = arith.subi %22, %c0_i32_22 : i32
    %24 = arith.addi %c0_i32_22, %23 : i32
    %c1_i32_23 = arith.constant 1 : i32
    scf.for %arg13 = %c0_i32_22 to %24 step %c1_i32_23  : i32 {
      %53 = arith.muli %arg13, %c1_i32_20 : i32
      %54 = arith.addi %c0_i32_21, %53 : i32
      %c8_i32_52 = arith.constant 8 : i32
      %55 = arith.muli %54, %c8_i32_52 : i32
      %56 = tpu.assume_multiple %55, 8 : i32
      %57 = arith.index_cast %56 : i32 to index
      %c0_53 = arith.constant 0 : index
      %c0_54 = arith.constant 0 : index
      %58 = vector.load %arg3[%57, %c0_53, %c0_54] : memref<8x8x128xbf16, #tpu.memory_space<vmem>>, vector<8x8x128xbf16>
      %59 = vector.shape_cast %58 : vector<8x8x128xbf16> to vector<64x128xbf16>
      %cst_55 = arith.constant dense<0.000000e+00> : vector<64x384xf32>
      %60 = tpu.matmul %59, %8, %cst_55 {dimension_numbers = #tpu.dot_dimension_numbers<[1], [0], [0], [1], [0, 0, 1, 1], [], []>} : vector<64x128xbf16>, vector<128x384xbf16>, vector<64x384xf32> -> vector<64x384xf32>
      %61 = vector.broadcast %12 : vector<1x384xf32> to vector<64x384xf32>
      %62 = arith.addf %60, %61 : vector<64x384xf32>
      %63 = vector.shape_cast %62 : vector<64x384xf32> to vector<8x8x384xf32>
      %c0_56 = arith.constant 0 : index
      %c0_57 = arith.constant 0 : index
      %c0_58 = arith.constant 0 : index
      %64 = vector.load %arg10[%c0_56, %c0_57, %c0_58] : memref<8x8x384xf32, #tpu.memory_space<vmem>>, vector<8x8x384xf32>
      tpu.vector_store %arg10[%c0_56, %c0_57, %c0_58], %63 {strides = array<i32>} : memref<8x8x384xf32, #tpu.memory_space<vmem>>, vector<8x8x384xf32>,
      %c0_59 = arith.constant 0 : index
      %c0_60 = arith.constant 0 : index
      %65 = vector.load %arg11[%c0_59, %c0_60] : memref<8x128xf32, #tpu.memory_space<vmem>>, vector<8x128xf32>
      %c0_i32_61 = arith.constant 0 : i32
      %66 = arith.index_cast %c0_i32_61 : i32 to index
      %c0_62 = arith.constant 0 : index
      %c0_63 = arith.constant 0 : index
      %67 = vector.load %arg10[%66, %c0_62, %c0_63] : memref<8x8x384xf32, #tpu.memory_space<vmem>>, vector<1x8x384xf32>
      %68 = vector.shape_cast %67 : vector<1x8x384xf32> to vector<8x384xf32>
      %69 = arith.truncf %65 : vector<8x128xf32> to vector<8x128xbf16>
      %cst_64 = arith.constant dense<0.000000e+00> : vector<8x384xf32>
      %70 = tpu.matmul %69, %10, %cst_64 {dimension_numbers = #tpu.dot_dimension_numbers<[1], [0], [0], [1], [0, 0, 1, 1], [], []>} : vector<8x128xbf16>, vector<128x384xbf16>, vector<8x384xf32> -> vector<8x384xf32>
      %71 = vector.extract_strided_slice %68 {offsets = [0, 0], sizes = [8, 256], strides = [1, 1]} : vector<8x384xf32> to vector<8x256xf32>
      %72 = vector.extract_strided_slice %70 {offsets = [0, 0], sizes = [8, 256], strides = [1, 1]} : vector<8x384xf32> to vector<8x256xf32>
      %73 = arith.addf %71, %72 : vector<8x256xf32>
      %74 = arith.negf %73 : vector<8x256xf32>
      %75 = math.exp %74 : vector<8x256xf32>
      %cst_65 = arith.constant 1.000000e+00 : f32
      %76 = vector.broadcast %cst_65 : f32 to vector<8x256xf32>
      %77 = arith.addf %76, %75 : vector<8x256xf32>
      %78 = arith.divf %76, %77 : vector<8x256xf32>
      %79 = vector.extract_strided_slice %78 {offsets = [0, 0], sizes = [8, 128], strides = [1, 1]} : vector<8x256xf32> to vector<8x128xf32>
      %80 = vector.extract_strided_slice %78 {offsets = [0, 128], sizes = [8, 128], strides = [1, 1]} : vector<8x256xf32> to vector<8x128xf32>
      %81 = vector.extract_strided_slice %68 {offsets = [0, 256], sizes = [8, 128], strides = [1, 1]} : vector<8x384xf32> to vector<8x128xf32>
      %82 = vector.extract_strided_slice %70 {offsets = [0, 256], sizes = [8, 128], strides = [1, 1]} : vector<8x384xf32> to vector<8x128xf32>
      %83 = arith.addf %82, %16 : vector<8x128xf32>
      %84 = arith.mulf %79, %83 : vector<8x128xf32>
      %85 = arith.addf %81, %84 : vector<8x128xf32>
      %86 = math.tanh %85 : vector<8x128xf32>
      %cst_66 = arith.constant 1.000000e+00 : f32
      %87 = vector.broadcast %cst_66 : f32 to vector<8x128xf32>
      %88 = arith.subf %87, %80 : vector<8x128xf32>
      %89 = arith.subf %86, %65 : vector<8x128xf32>
      %90 = arith.mulf %88, %89 : vector<8x128xf32>
      %91 = arith.addf %65, %90 : vector<8x128xf32>
      %92 = arith.truncf %91 : vector<8x128xf32> to vector<8x128xbf16>
      %93 = arith.addi %56, %c0_i32_61 : i32
      %94 = arith.index_cast %93 : i32 to index
      %c0_67 = arith.constant 0 : index
      %c0_68 = arith.constant 0 : index
      %95 = vector.load %arg9[%94, %c0_67, %c0_68] : memref<8x8x128xbf16, #tpu.memory_space<vmem>>, vector<1x8x128xbf16>
      %96 = vector.shape_cast %95 : vector<1x8x128xbf16> to vector<8x128xbf16>
      %97 = vector.shape_cast %92 : vector<8x128xbf16> to vector<1x8x128xbf16>
      tpu.vector_store %arg9[%94, %c0_67, %c0_68], %97 {strides = array<i32>} : memref<8x8x128xbf16, #tpu.memory_space<vmem>>, vector<1x8x128xbf16>,
      %c1_i32_69 = arith.constant 1 : i32
      %98 = arith.index_cast %c1_i32_69 : i32 to index
      %c0_70 = arith.constant 0 : index
      %c0_71 = arith.constant 0 : index
      %99 = vector.load %arg10[%98, %c0_70, %c0_71] : memref<8x8x384xf32, #tpu.memory_space<vmem>>, vector<1x8x384xf32>
      %100 = vector.shape_cast %99 : vector<1x8x384xf32> to vector<8x384xf32>
      %101 = arith.truncf %91 : vector<8x128xf32> to vector<8x128xbf16>
      %cst_72 = arith.constant dense<0.000000e+00> : vector<8x384xf32>
      %102 = tpu.matmul %101, %10, %cst_72 {dimension_numbers = #tpu.dot_dimension_numbers<[1], [0], [0], [1], [0, 0, 1, 1], [], []>} : vector<8x128xbf16>, vector<128x384xbf16>, vector<8x384xf32> -> vector<8x384xf32>
      %103 = vector.extract_strided_slice %100 {offsets = [0, 0], sizes = [8, 256], strides = [1, 1]} : vector<8x384xf32> to vector<8x256xf32>
      %104 = vector.extract_strided_slice %102 {offsets = [0, 0], sizes = [8, 256], strides = [1, 1]} : vector<8x384xf32> to vector<8x256xf32>
      %105 = arith.addf %103, %104 : vector<8x256xf32>
      %106 = arith.negf %105 : vector<8x256xf32>
      %107 = math.exp %106 : vector<8x256xf32>
      %cst_73 = arith.constant 1.000000e+00 : f32
      %108 = vector.broadcast %cst_73 : f32 to vector<8x256xf32>
      %109 = arith.addf %108, %107 : vector<8x256xf32>
      %110 = arith.divf %108, %109 : vector<8x256xf32>
      %111 = vector.extract_strided_slice %110 {offsets = [0, 0], sizes = [8, 128], strides = [1, 1]} : vector<8x256xf32> to vector<8x128xf32>
      %112 = vector.extract_strided_slice %110 {offsets = [0, 128], sizes = [8, 128], strides = [1, 1]} : vector<8x256xf32> to vector<8x128xf32>
      %113 = vector.extract_strided_slice %100 {offsets = [0, 256], sizes = [8, 128], strides = [1, 1]} : vector<8x384xf32> to vector<8x128xf32>
      %114 = vector.extract_strided_slice %102 {offsets = [0, 256], sizes = [8, 128], strides = [1, 1]} : vector<8x384xf32> to vector<8x128xf32>
      %115 = arith.addf %114, %16 : vector<8x128xf32>
      %116 = arith.mulf %111, %115 : vector<8x128xf32>
      %117 = arith.addf %113, %116 : vector<8x128xf32>
      %118 = math.tanh %117 : vector<8x128xf32>
      %cst_74 = arith.constant 1.000000e+00 : f32
      %119 = vector.broadcast %cst_74 : f32 to vector<8x128xf32>
      %120 = arith.subf %119, %112 : vector<8x128xf32>
      %121 = arith.subf %118, %91 : vector<8x128xf32>
      %122 = arith.mulf %120, %121 : vector<8x128xf32>
      %123 = arith.addf %91, %122 : vector<8x128xf32>
      %124 = arith.truncf %123 : vector<8x128xf32> to vector<8x128xbf16>
      %125 = arith.addi %56, %c1_i32_69 : i32
      %126 = arith.index_cast %125 : i32 to index
      %c0_75 = arith.constant 0 : index
      %c0_76 = arith.constant 0 : index
      %127 = vector.load %arg9[%126, %c0_75, %c0_76] : memref<8x8x128xbf16, #tpu.memory_space<vmem>>, vector<1x8x128xbf16>
      %128 = vector.shape_cast %127 : vector<1x8x128xbf16> to vector<8x128xbf16>
      %129 = vector.shape_cast %124 : vector<8x128xbf16> to vector<1x8x128xbf16>
      tpu.vector_store %arg9[%126, %c0_75, %c0_76], %129 {strides = array<i32>} : memref<8x8x128xbf16, #tpu.memory_space<vmem>>, vector<1x8x128xbf16>,
      %c2_i32 = arith.constant 2 : i32
      %130 = arith.index_cast %c2_i32 : i32 to index
      %c0_77 = arith.constant 0 : index
      %c0_78 = arith.constant 0 : index
      %131 = vector.load %arg10[%130, %c0_77, %c0_78] : memref<8x8x384xf32, #tpu.memory_space<vmem>>, vector<1x8x384xf32>
      %132 = vector.shape_cast %131 : vector<1x8x384xf32> to vector<8x384xf32>
      %133 = arith.truncf %123 : vector<8x128xf32> to vector<8x128xbf16>
      %cst_79 = arith.constant dense<0.000000e+00> : vector<8x384xf32>
      %134 = tpu.matmul %133, %10, %cst_79 {dimension_numbers = #tpu.dot_dimension_numbers<[1], [0], [0], [1], [0, 0, 1, 1], [], []>} : vector<8x128xbf16>, vector<128x384xbf16>, vector<8x384xf32> -> vector<8x384xf32>
      %135 = vector.extract_strided_slice %132 {offsets = [0, 0], sizes = [8, 256], strides = [1, 1]} : vector<8x384xf32> to vector<8x256xf32>
      %136 = vector.extract_strided_slice %134 {offsets = [0, 0], sizes = [8, 256], strides = [1, 1]} : vector<8x384xf32> to vector<8x256xf32>
      %137 = arith.addf %135, %136 : vector<8x256xf32>
      %138 = arith.negf %137 : vector<8x256xf32>
      %139 = math.exp %138 : vector<8x256xf32>
      %cst_80 = arith.constant 1.000000e+00 : f32
      %140 = vector.broadcast %cst_80 : f32 to vector<8x256xf32>
      %141 = arith.addf %140, %139 : vector<8x256xf32>
      %142 = arith.divf %140, %141 : vector<8x256xf32>
      %143 = vector.extract_strided_slice %142 {offsets = [0, 0], sizes = [8, 128], strides = [1, 1]} : vector<8x256xf32> to vector<8x128xf32>
      %144 = vector.extract_strided_slice %142 {offsets = [0, 128], sizes = [8, 128], strides = [1, 1]} : vector<8x256xf32> to vector<8x128xf32>
      %145 = vector.extract_strided_slice %132 {offsets = [0, 256], sizes = [8, 128], strides = [1, 1]} : vector<8x384xf32> to vector<8x128xf32>
      %146 = vector.extract_strided_slice %134 {offsets = [0, 256], sizes = [8, 128], strides = [1, 1]} : vector<8x384xf32> to vector<8x128xf32>
      %147 = arith.addf %146, %16 : vector<8x128xf32>
      %148 = arith.mulf %143, %147 : vector<8x128xf32>
      %149 = arith.addf %145, %148 : vector<8x128xf32>
      %150 = math.tanh %149 : vector<8x128xf32>
      %cst_81 = arith.constant 1.000000e+00 : f32
      %151 = vector.broadcast %cst_81 : f32 to vector<8x128xf32>
      %152 = arith.subf %151, %144 : vector<8x128xf32>
      %153 = arith.subf %150, %123 : vector<8x128xf32>
      %154 = arith.mulf %152, %153 : vector<8x128xf32>
      %155 = arith.addf %123, %154 : vector<8x128xf32>
      %156 = arith.truncf %155 : vector<8x128xf32> to vector<8x128xbf16>
      %157 = arith.addi %56, %c2_i32 : i32
      %158 = arith.index_cast %157 : i32 to index
      %c0_82 = arith.constant 0 : index
      %c0_83 = arith.constant 0 : index
      %159 = vector.load %arg9[%158, %c0_82, %c0_83] : memref<8x8x128xbf16, #tpu.memory_space<vmem>>, vector<1x8x128xbf16>
      %160 = vector.shape_cast %159 : vector<1x8x128xbf16> to vector<8x128xbf16>
      %161 = vector.shape_cast %156 : vector<8x128xbf16> to vector<1x8x128xbf16>
      tpu.vector_store %arg9[%158, %c0_82, %c0_83], %161 {strides = array<i32>} : memref<8x8x128xbf16, #tpu.memory_space<vmem>>, vector<1x8x128xbf16>,
      %c3_i32 = arith.constant 3 : i32
      %162 = arith.index_cast %c3_i32 : i32 to index
      %c0_84 = arith.constant 0 : index
      %c0_85 = arith.constant 0 : index
      %163 = vector.load %arg10[%162, %c0_84, %c0_85] : memref<8x8x384xf32, #tpu.memory_space<vmem>>, vector<1x8x384xf32>
      %164 = vector.shape_cast %163 : vector<1x8x384xf32> to vector<8x384xf32>
      %165 = arith.truncf %155 : vector<8x128xf32> to vector<8x128xbf16>
      %cst_86 = arith.constant dense<0.000000e+00> : vector<8x384xf32>
      %166 = tpu.matmul %165, %10, %cst_86 {dimension_numbers = #tpu.dot_dimension_numbers<[1], [0], [0], [1], [0, 0, 1, 1], [], []>} : vector<8x128xbf16>, vector<128x384xbf16>, vector<8x384xf32> -> vector<8x384xf32>
      %167 = vector.extract_strided_slice %164 {offsets = [0, 0], sizes = [8, 256], strides = [1, 1]} : vector<8x384xf32> to vector<8x256xf32>
      %168 = vector.extract_strided_slice %166 {offsets = [0, 0], sizes = [8, 256], strides = [1, 1]} : vector<8x384xf32> to vector<8x256xf32>
      %169 = arith.addf %167, %168 : vector<8x256xf32>
      %170 = arith.negf %169 : vector<8x256xf32>
      %171 = math.exp %170 : vector<8x256xf32>
      %cst_87 = arith.constant 1.000000e+00 : f32
      %172 = vector.broadcast %cst_87 : f32 to vector<8x256xf32>
      %173 = arith.addf %172, %171 : vector<8x256xf32>
      %174 = arith.divf %172, %173 : vector<8x256xf32>
      %175 = vector.extract_strided_slice %174 {offsets = [0, 0], sizes = [8, 128], strides = [1, 1]} : vector<8x256xf32> to vector<8x128xf32>
      %176 = vector.extract_strided_slice %174 {offsets = [0, 128], sizes = [8, 128], strides = [1, 1]} : vector<8x256xf32> to vector<8x128xf32>
      %177 = vector.extract_strided_slice %164 {offsets = [0, 256], sizes = [8, 128], strides = [1, 1]} : vector<8x384xf32> to vector<8x128xf32>
      %178 = vector.extract_strided_slice %166 {offsets = [0, 256], sizes = [8, 128], strides = [1, 1]} : vector<8x384xf32> to vector<8x128xf32>
      %179 = arith.addf %178, %16 : vector<8x128xf32>
      %180 = arith.mulf %175, %179 : vector<8x128xf32>
      %181 = arith.addf %177, %180 : vector<8x128xf32>
      %182 = math.tanh %181 : vector<8x128xf32>
      %cst_88 = arith.constant 1.000000e+00 : f32
      %183 = vector.broadcast %cst_88 : f32 to vector<8x128xf32>
      %184 = arith.subf %183, %176 : vector<8x128xf32>
      %185 = arith.subf %182, %155 : vector<8x128xf32>
      %186 = arith.mulf %184, %185 : vector<8x128xf32>
      %187 = arith.addf %155, %186 : vector<8x128xf32>
      %188 = arith.truncf %187 : vector<8x128xf32> to vector<8x128xbf16>
      %189 = arith.addi %56, %c3_i32 : i32
      %190 = arith.index_cast %189 : i32 to index
      %c0_89 = arith.constant 0 : index
      %c0_90 = arith.constant 0 : index
      %191 = vector.load %arg9[%190, %c0_89, %c0_90] : memref<8x8x128xbf16, #tpu.memory_space<vmem>>, vector<1x8x128xbf16>
      %192 = vector.shape_cast %191 : vector<1x8x128xbf16> to vector<8x128xbf16>
      %193 = vector.shape_cast %188 : vector<8x128xbf16> to vector<1x8x128xbf16>
      tpu.vector_store %arg9[%190, %c0_89, %c0_90], %193 {strides = array<i32>} : memref<8x8x128xbf16, #tpu.memory_space<vmem>>, vector<1x8x128xbf16>,
      %c4_i32 = arith.constant 4 : i32
      %194 = arith.index_cast %c4_i32 : i32 to index
      %c0_91 = arith.constant 0 : index
      %c0_92 = arith.constant 0 : index
      %195 = vector.load %arg10[%194, %c0_91, %c0_92] : memref<8x8x384xf32, #tpu.memory_space<vmem>>, vector<1x8x384xf32>
      %196 = vector.shape_cast %195 : vector<1x8x384xf32> to vector<8x384xf32>
      %197 = arith.truncf %187 : vector<8x128xf32> to vector<8x128xbf16>
      %cst_93 = arith.constant dense<0.000000e+00> : vector<8x384xf32>
      %198 = tpu.matmul %197, %10, %cst_93 {dimension_numbers = #tpu.dot_dimension_numbers<[1], [0], [0], [1], [0, 0, 1, 1], [], []>} : vector<8x128xbf16>, vector<128x384xbf16>, vector<8x384xf32> -> vector<8x384xf32>
      %199 = vector.extract_strided_slice %196 {offsets = [0, 0], sizes = [8, 256], strides = [1, 1]} : vector<8x384xf32> to vector<8x256xf32>
      %200 = vector.extract_strided_slice %198 {offsets = [0, 0], sizes = [8, 256], strides = [1, 1]} : vector<8x384xf32> to vector<8x256xf32>
      %201 = arith.addf %199, %200 : vector<8x256xf32>
      %202 = arith.negf %201 : vector<8x256xf32>
      %203 = math.exp %202 : vector<8x256xf32>
      %cst_94 = arith.constant 1.000000e+00 : f32
      %204 = vector.broadcast %cst_94 : f32 to vector<8x256xf32>
      %205 = arith.addf %204, %203 : vector<8x256xf32>
      %206 = arith.divf %204, %205 : vector<8x256xf32>
      %207 = vector.extract_strided_slice %206 {offsets = [0, 0], sizes = [8, 128], strides = [1, 1]} : vector<8x256xf32> to vector<8x128xf32>
      %208 = vector.extract_strided_slice %206 {offsets = [0, 128], sizes = [8, 128], strides = [1, 1]} : vector<8x256xf32> to vector<8x128xf32>
      %209 = vector.extract_strided_slice %196 {offsets = [0, 256], sizes = [8, 128], strides = [1, 1]} : vector<8x384xf32> to vector<8x128xf32>
      %210 = vector.extract_strided_slice %198 {offsets = [0, 256], sizes = [8, 128], strides = [1, 1]} : vector<8x384xf32> to vector<8x128xf32>
      %211 = arith.addf %210, %16 : vector<8x128xf32>
      %212 = arith.mulf %207, %211 : vector<8x128xf32>
      %213 = arith.addf %209, %212 : vector<8x128xf32>
      %214 = math.tanh %213 : vector<8x128xf32>
      %cst_95 = arith.constant 1.000000e+00 : f32
      %215 = vector.broadcast %cst_95 : f32 to vector<8x128xf32>
      %216 = arith.subf %215, %208 : vector<8x128xf32>
      %217 = arith.subf %214, %187 : vector<8x128xf32>
      %218 = arith.mulf %216, %217 : vector<8x128xf32>
      %219 = arith.addf %187, %218 : vector<8x128xf32>
      %220 = arith.truncf %219 : vector<8x128xf32> to vector<8x128xbf16>
      %221 = arith.addi %56, %c4_i32 : i32
      %222 = arith.index_cast %221 : i32 to index
      %c0_96 = arith.constant 0 : index
      %c0_97 = arith.constant 0 : index
      %223 = vector.load %arg9[%222, %c0_96, %c0_97] : memref<8x8x128xbf16, #tpu.memory_space<vmem>>, vector<1x8x128xbf16>
      %224 = vector.shape_cast %223 : vector<1x8x128xbf16> to vector<8x128xbf16>
      %225 = vector.shape_cast %220 : vector<8x128xbf16> to vector<1x8x128xbf16>
      tpu.vector_store %arg9[%222, %c0_96, %c0_97], %225 {strides = array<i32>} : memref<8x8x128xbf16, #tpu.memory_space<vmem>>, vector<1x8x128xbf16>,
      %c5_i32 = arith.constant 5 : i32
      %226 = arith.index_cast %c5_i32 : i32 to index
      %c0_98 = arith.constant 0 : index
      %c0_99 = arith.constant 0 : index
      %227 = vector.load %arg10[%226, %c0_98, %c0_99] : memref<8x8x384xf32, #tpu.memory_space<vmem>>, vector<1x8x384xf32>
      %228 = vector.shape_cast %227 : vector<1x8x384xf32> to vector<8x384xf32>
      %229 = arith.truncf %219 : vector<8x128xf32> to vector<8x128xbf16>
      %cst_100 = arith.constant dense<0.000000e+00> : vector<8x384xf32>
      %230 = tpu.matmul %229, %10, %cst_100 {dimension_numbers = #tpu.dot_dimension_numbers<[1], [0], [0], [1], [0, 0, 1, 1], [], []>} : vector<8x128xbf16>, vector<128x384xbf16>, vector<8x384xf32> -> vector<8x384xf32>
      %231 = vector.extract_strided_slice %228 {offsets = [0, 0], sizes = [8, 256], strides = [1, 1]} : vector<8x384xf32> to vector<8x256xf32>
      %232 = vector.extract_strided_slice %230 {offsets = [0, 0], sizes = [8, 256], strides = [1, 1]} : vector<8x384xf32> to vector<8x256xf32>
      %233 = arith.addf %231, %232 : vector<8x256xf32>
      %234 = arith.negf %233 : vector<8x256xf32>
      %235 = math.exp %234 : vector<8x256xf32>
      %cst_101 = arith.constant 1.000000e+00 : f32
      %236 = vector.broadcast %cst_101 : f32 to vector<8x256xf32>
      %237 = arith.addf %236, %235 : vector<8x256xf32>
      %238 = arith.divf %236, %237 : vector<8x256xf32>
      %239 = vector.extract_strided_slice %238 {offsets = [0, 0], sizes = [8, 128], strides = [1, 1]} : vector<8x256xf32> to vector<8x128xf32>
      %240 = vector.extract_strided_slice %238 {offsets = [0, 128], sizes = [8, 128], strides = [1, 1]} : vector<8x256xf32> to vector<8x128xf32>
      %241 = vector.extract_strided_slice %228 {offsets = [0, 256], sizes = [8, 128], strides = [1, 1]} : vector<8x384xf32> to vector<8x128xf32>
      %242 = vector.extract_strided_slice %230 {offsets = [0, 256], sizes = [8, 128], strides = [1, 1]} : vector<8x384xf32> to vector<8x128xf32>
      %243 = arith.addf %242, %16 : vector<8x128xf32>
      %244 = arith.mulf %239, %243 : vector<8x128xf32>
      %245 = arith.addf %241, %244 : vector<8x128xf32>
      %246 = math.tanh %245 : vector<8x128xf32>
      %cst_102 = arith.constant 1.000000e+00 : f32
      %247 = vector.broadcast %cst_102 : f32 to vector<8x128xf32>
      %248 = arith.subf %247, %240 : vector<8x128xf32>
      %249 = arith.subf %246, %219 : vector<8x128xf32>
      %250 = arith.mulf %248, %249 : vector<8x128xf32>
      %251 = arith.addf %219, %250 : vector<8x128xf32>
      %252 = arith.truncf %251 : vector<8x128xf32> to vector<8x128xbf16>
      %253 = arith.addi %56, %c5_i32 : i32
      %254 = arith.index_cast %253 : i32 to index
      %c0_103 = arith.constant 0 : index
      %c0_104 = arith.constant 0 : index
      %255 = vector.load %arg9[%254, %c0_103, %c0_104] : memref<8x8x128xbf16, #tpu.memory_space<vmem>>, vector<1x8x128xbf16>
      %256 = vector.shape_cast %255 : vector<1x8x128xbf16> to vector<8x128xbf16>
      %257 = vector.shape_cast %252 : vector<8x128xbf16> to vector<1x8x128xbf16>
      tpu.vector_store %arg9[%254, %c0_103, %c0_104], %257 {strides = array<i32>} : memref<8x8x128xbf16, #tpu.memory_space<vmem>>, vector<1x8x128xbf16>,
      %c6_i32 = arith.constant 6 : i32
      %258 = arith.index_cast %c6_i32 : i32 to index
      %c0_105 = arith.constant 0 : index
      %c0_106 = arith.constant 0 : index
      %259 = vector.load %arg10[%258, %c0_105, %c0_106] : memref<8x8x384xf32, #tpu.memory_space<vmem>>, vector<1x8x384xf32>
      %260 = vector.shape_cast %259 : vector<1x8x384xf32> to vector<8x384xf32>
      %261 = arith.truncf %251 : vector<8x128xf32> to vector<8x128xbf16>
      %cst_107 = arith.constant dense<0.000000e+00> : vector<8x384xf32>
      %262 = tpu.matmul %261, %10, %cst_107 {dimension_numbers = #tpu.dot_dimension_numbers<[1], [0], [0], [1], [0, 0, 1, 1], [], []>} : vector<8x128xbf16>, vector<128x384xbf16>, vector<8x384xf32> -> vector<8x384xf32>
      %263 = vector.extract_strided_slice %260 {offsets = [0, 0], sizes = [8, 256], strides = [1, 1]} : vector<8x384xf32> to vector<8x256xf32>
      %264 = vector.extract_strided_slice %262 {offsets = [0, 0], sizes = [8, 256], strides = [1, 1]} : vector<8x384xf32> to vector<8x256xf32>
      %265 = arith.addf %263, %264 : vector<8x256xf32>
      %266 = arith.negf %265 : vector<8x256xf32>
      %267 = math.exp %266 : vector<8x256xf32>
      %cst_108 = arith.constant 1.000000e+00 : f32
      %268 = vector.broadcast %cst_108 : f32 to vector<8x256xf32>
      %269 = arith.addf %268, %267 : vector<8x256xf32>
      %270 = arith.divf %268, %269 : vector<8x256xf32>
      %271 = vector.extract_strided_slice %270 {offsets = [0, 0], sizes = [8, 128], strides = [1, 1]} : vector<8x256xf32> to vector<8x128xf32>
      %272 = vector.extract_strided_slice %270 {offsets = [0, 128], sizes = [8, 128], strides = [1, 1]} : vector<8x256xf32> to vector<8x128xf32>
      %273 = vector.extract_strided_slice %260 {offsets = [0, 256], sizes = [8, 128], strides = [1, 1]} : vector<8x384xf32> to vector<8x128xf32>
      %274 = vector.extract_strided_slice %262 {offsets = [0, 256], sizes = [8, 128], strides = [1, 1]} : vector<8x384xf32> to vector<8x128xf32>
      %275 = arith.addf %274, %16 : vector<8x128xf32>
      %276 = arith.mulf %271, %275 : vector<8x128xf32>
      %277 = arith.addf %273, %276 : vector<8x128xf32>
      %278 = math.tanh %277 : vector<8x128xf32>
      %cst_109 = arith.constant 1.000000e+00 : f32
      %279 = vector.broadcast %cst_109 : f32 to vector<8x128xf32>
      %280 = arith.subf %279, %272 : vector<8x128xf32>
      %281 = arith.subf %278, %251 : vector<8x128xf32>
      %282 = arith.mulf %280, %281 : vector<8x128xf32>
      %283 = arith.addf %251, %282 : vector<8x128xf32>
      %284 = arith.truncf %283 : vector<8x128xf32> to vector<8x128xbf16>
      %285 = arith.addi %56, %c6_i32 : i32
      %286 = arith.index_cast %285 : i32 to index
      %c0_110 = arith.constant 0 : index
      %c0_111 = arith.constant 0 : index
      %287 = vector.load %arg9[%286, %c0_110, %c0_111] : memref<8x8x128xbf16, #tpu.memory_space<vmem>>, vector<1x8x128xbf16>
      %288 = vector.shape_cast %287 : vector<1x8x128xbf16> to vector<8x128xbf16>
      %289 = vector.shape_cast %284 : vector<8x128xbf16> to vector<1x8x128xbf16>
      tpu.vector_store %arg9[%286, %c0_110, %c0_111], %289 {strides = array<i32>} : memref<8x8x128xbf16, #tpu.memory_space<vmem>>, vector<1x8x128xbf16>,
      %c7_i32_112 = arith.constant 7 : i32
      %290 = arith.index_cast %c7_i32_112 : i32 to index
      %c0_113 = arith.constant 0 : index
      %c0_114 = arith.constant 0 : index
      %291 = vector.load %arg10[%290, %c0_113, %c0_114] : memref<8x8x384xf32, #tpu.memory_space<vmem>>, vector<1x8x384xf32>
      %292 = vector.shape_cast %291 : vector<1x8x384xf32> to vector<8x384xf32>
      %293 = arith.truncf %283 : vector<8x128xf32> to vector<8x128xbf16>
      %cst_115 = arith.constant dense<0.000000e+00> : vector<8x384xf32>
      %294 = tpu.matmul %293, %10, %cst_115 {dimension_numbers = #tpu.dot_dimension_numbers<[1], [0], [0], [1], [0, 0, 1, 1], [], []>} : vector<8x128xbf16>, vector<128x384xbf16>, vector<8x384xf32> -> vector<8x384xf32>
      %295 = vector.extract_strided_slice %292 {offsets = [0, 0], sizes = [8, 256], strides = [1, 1]} : vector<8x384xf32> to vector<8x256xf32>
      %296 = vector.extract_strided_slice %294 {offsets = [0, 0], sizes = [8, 256], strides = [1, 1]} : vector<8x384xf32> to vector<8x256xf32>
      %297 = arith.addf %295, %296 : vector<8x256xf32>
      %298 = arith.negf %297 : vector<8x256xf32>
      %299 = math.exp %298 : vector<8x256xf32>
      %cst_116 = arith.constant 1.000000e+00 : f32
      %300 = vector.broadcast %cst_116 : f32 to vector<8x256xf32>
      %301 = arith.addf %300, %299 : vector<8x256xf32>
      %302 = arith.divf %300, %301 : vector<8x256xf32>
      %303 = vector.extract_strided_slice %302 {offsets = [0, 0], sizes = [8, 128], strides = [1, 1]} : vector<8x256xf32> to vector<8x128xf32>
      %304 = vector.extract_strided_slice %302 {offsets = [0, 128], sizes = [8, 128], strides = [1, 1]} : vector<8x256xf32> to vector<8x128xf32>
      %305 = vector.extract_strided_slice %292 {offsets = [0, 256], sizes = [8, 128], strides = [1, 1]} : vector<8x384xf32> to vector<8x128xf32>
      %306 = vector.extract_strided_slice %294 {offsets = [0, 256], sizes = [8, 128], strides = [1, 1]} : vector<8x384xf32> to vector<8x128xf32>
      %307 = arith.addf %306, %16 : vector<8x128xf32>
      %308 = arith.mulf %303, %307 : vector<8x128xf32>
      %309 = arith.addf %305, %308 : vector<8x128xf32>
      %310 = math.tanh %309 : vector<8x128xf32>
      %cst_117 = arith.constant 1.000000e+00 : f32
      %311 = vector.broadcast %cst_117 : f32 to vector<8x128xf32>
      %312 = arith.subf %311, %304 : vector<8x128xf32>
      %313 = arith.subf %310, %283 : vector<8x128xf32>
      %314 = arith.mulf %312, %313 : vector<8x128xf32>
      %315 = arith.addf %283, %314 : vector<8x128xf32>
      %316 = arith.truncf %315 : vector<8x128xf32> to vector<8x128xbf16>
      %317 = arith.addi %56, %c7_i32_112 : i32
      %318 = arith.index_cast %317 : i32 to index
      %c0_118 = arith.constant 0 : index
      %c0_119 = arith.constant 0 : index
      %319 = vector.load %arg9[%318, %c0_118, %c0_119] : memref<8x8x128xbf16, #tpu.memory_space<vmem>>, vector<1x8x128xbf16>
      %320 = vector.shape_cast %319 : vector<1x8x128xbf16> to vector<8x128xbf16>
      %321 = vector.shape_cast %316 : vector<8x128xbf16> to vector<1x8x128xbf16>
      tpu.vector_store %arg9[%318, %c0_118, %c0_119], %321 {strides = array<i32>} : memref<8x8x128xbf16, #tpu.memory_space<vmem>>, vector<1x8x128xbf16>,
      %c8_i32_120 = arith.constant 8 : i32
      %c0_121 = arith.constant 0 : index
      %c0_122 = arith.constant 0 : index
      %322 = vector.load %arg11[%c0_121, %c0_122] : memref<8x128xf32, #tpu.memory_space<vmem>>, vector<8x128xf32>
      tpu.vector_store %arg11[%c0_121, %c0_122], %315 {strides = array<i32>} : memref<8x128xf32, #tpu.memory_space<vmem>>, vector<8x128xf32>,
    }
    %c1 = arith.constant 1 : index
    %c0_24 = arith.constant 0 : index
    %c0_25 = arith.constant 0 : index
    %25 = vector.load %arg4[%c1, %c0_24, %c0_25] : memref<2x128x384xbf16, #tpu.memory_space<vmem>>, vector<1x128x384xbf16>
    %26 = vector.shape_cast %25 : vector<1x128x384xbf16> to vector<128x384xbf16>
    %c1_26 = arith.constant 1 : index
    %c0_27 = arith.constant 0 : index
    %c0_28 = arith.constant 0 : index
    %27 = vector.load %arg5[%c1_26, %c0_27, %c0_28] : memref<2x128x384xbf16, #tpu.memory_space<vmem>>, vector<1x128x384xbf16>
    %28 = vector.shape_cast %27 : vector<1x128x384xbf16> to vector<128x384xbf16>
    %c1_29 = arith.constant 1 : index
    %c0_30 = arith.constant 0 : index
    %c0_31 = arith.constant 0 : index
    %29 = vector.load %arg6[%c1_29, %c0_30, %c0_31] : memref<2x1x384xf32, #tpu.memory_space<vmem>>, vector<1x1x384xf32>
    %30 = vector.shape_cast %29 : vector<1x1x384xf32> to vector<1x384xf32>
    %c1_32 = arith.constant 1 : index
    %c0_33 = arith.constant 0 : index
    %c0_34 = arith.constant 0 : index
    %31 = vector.load %arg7[%c1_32, %c0_33, %c0_34] : memref<2x1x128xf32, #tpu.memory_space<vmem>>, vector<1x1x128xf32>
    %32 = vector.shape_cast %31 : vector<1x1x128xf32> to vector<1x128xf32>
    %33 = vector.shape_cast %32 : vector<1x128xf32> to vector<1x128xf32>
    %34 = vector.broadcast %33 : vector<1x128xf32> to vector<8x128xf32>
    %cst_35 = arith.constant 0.000000e+00 : f32
    %35 = vector.broadcast %cst_35 : f32 to vector<8x128xf32>
    %c0_36 = arith.constant 0 : index
    %c0_37 = arith.constant 0 : index
    %36 = vector.load %arg11[%c0_36, %c0_37] : memref<8x128xf32, #tpu.memory_space<vmem>>, vector<8x128xf32>
    tpu.vector_store %arg11[%c0_36, %c0_37], %35 {strides = array<i32>} : memref<8x128xf32, #tpu.memory_space<vmem>>, vector<8x128xf32>,
    %c0_i32_38 = arith.constant 0 : i32
    %37 = arith.subi %3, %c0_i32_38 : i32
    %c1_i32_39 = arith.constant 1 : i32
    %c1_i32_40 = arith.constant 1 : i32
    %38 = arith.subi %c1_i32_39, %c1_i32_40 : i32
    %39 = arith.addi %37, %38 : i32
    %c1_i32_41 = arith.constant 1 : i32
    %40 = arith.divsi %39, %c1_i32_41 : i32
    %c1_i32_42 = arith.constant 1 : i32
    %c0_i32_43 = arith.constant 0 : i32
    %c0_i32_44 = arith.constant 0 : i32
    %41 = arith.subi %40, %c0_i32_44 : i32
    %42 = arith.addi %c0_i32_44, %41 : i32
    %c1_i32_45 = arith.constant 1 : i32
    scf.for %arg13 = %c0_i32_44 to %42 step %c1_i32_45  : i32 {
      %53 = arith.muli %arg13, %c1_i32_42 : i32
      %54 = arith.addi %c0_i32_43, %53 : i32
      %c8_i32_52 = arith.constant 8 : i32
      %55 = arith.muli %54, %c8_i32_52 : i32
      %56 = tpu.assume_multiple %55, 8 : i32
      %57 = arith.index_cast %56 : i32 to index
      %c0_53 = arith.constant 0 : index
      %c0_54 = arith.constant 0 : index
      %58 = vector.load %arg9[%57, %c0_53, %c0_54] : memref<8x8x128xbf16, #tpu.memory_space<vmem>>, vector<8x8x128xbf16>
      %59 = vector.shape_cast %58 : vector<8x8x128xbf16> to vector<64x128xbf16>
      %cst_55 = arith.constant dense<0.000000e+00> : vector<64x384xf32>
      %60 = tpu.matmul %59, %26, %cst_55 {dimension_numbers = #tpu.dot_dimension_numbers<[1], [0], [0], [1], [0, 0, 1, 1], [], []>} : vector<64x128xbf16>, vector<128x384xbf16>, vector<64x384xf32> -> vector<64x384xf32>
      %61 = vector.broadcast %30 : vector<1x384xf32> to vector<64x384xf32>
      %62 = arith.addf %60, %61 : vector<64x384xf32>
      %63 = vector.shape_cast %62 : vector<64x384xf32> to vector<8x8x384xf32>
      %c0_56 = arith.constant 0 : index
      %c0_57 = arith.constant 0 : index
      %c0_58 = arith.constant 0 : index
      %64 = vector.load %arg10[%c0_56, %c0_57, %c0_58] : memref<8x8x384xf32, #tpu.memory_space<vmem>>, vector<8x8x384xf32>
      tpu.vector_store %arg10[%c0_56, %c0_57, %c0_58], %63 {strides = array<i32>} : memref<8x8x384xf32, #tpu.memory_space<vmem>>, vector<8x8x384xf32>,
      %c0_59 = arith.constant 0 : index
      %c0_60 = arith.constant 0 : index
      %65 = vector.load %arg11[%c0_59, %c0_60] : memref<8x128xf32, #tpu.memory_space<vmem>>, vector<8x128xf32>
      %c0_61 = arith.constant 0 : index
      %c0_62 = arith.constant 0 : index
      %66 = vector.load %arg12[%c0_61, %c0_62] : memref<8x128xf32, #tpu.memory_space<vmem>>, vector<8x128xf32>
      %c0_i32_63 = arith.constant 0 : i32
      %67 = arith.index_cast %c0_i32_63 : i32 to index
      %c0_64 = arith.constant 0 : index
      %c0_65 = arith.constant 0 : index
      %68 = vector.load %arg10[%67, %c0_64, %c0_65] : memref<8x8x384xf32, #tpu.memory_space<vmem>>, vector<1x8x384xf32>
      %69 = vector.shape_cast %68 : vector<1x8x384xf32> to vector<8x384xf32>
      %70 = arith.truncf %65 : vector<8x128xf32> to vector<8x128xbf16>
      %cst_66 = arith.constant dense<0.000000e+00> : vector<8x384xf32>
      %71 = tpu.matmul %70, %28, %cst_66 {dimension_numbers = #tpu.dot_dimension_numbers<[1], [0], [0], [1], [0, 0, 1, 1], [], []>} : vector<8x128xbf16>, vector<128x384xbf16>, vector<8x384xf32> -> vector<8x384xf32>
      %72 = vector.extract_strided_slice %69 {offsets = [0, 0], sizes = [8, 256], strides = [1, 1]} : vector<8x384xf32> to vector<8x256xf32>
      %73 = vector.extract_strided_slice %71 {offsets = [0, 0], sizes = [8, 256], strides = [1, 1]} : vector<8x384xf32> to vector<8x256xf32>
      %74 = arith.addf %72, %73 : vector<8x256xf32>
      %75 = arith.negf %74 : vector<8x256xf32>
      %76 = math.exp %75 : vector<8x256xf32>
      %cst_67 = arith.constant 1.000000e+00 : f32
      %77 = vector.broadcast %cst_67 : f32 to vector<8x256xf32>
      %78 = arith.addf %77, %76 : vector<8x256xf32>
      %79 = arith.divf %77, %78 : vector<8x256xf32>
      %80 = vector.extract_strided_slice %79 {offsets = [0, 0], sizes = [8, 128], strides = [1, 1]} : vector<8x256xf32> to vector<8x128xf32>
      %81 = vector.extract_strided_slice %79 {offsets = [0, 128], sizes = [8, 128], strides = [1, 1]} : vector<8x256xf32> to vector<8x128xf32>
      %82 = vector.extract_strided_slice %69 {offsets = [0, 256], sizes = [8, 128], strides = [1, 1]} : vector<8x384xf32> to vector<8x128xf32>
      %83 = vector.extract_strided_slice %71 {offsets = [0, 256], sizes = [8, 128], strides = [1, 1]} : vector<8x384xf32> to vector<8x128xf32>
      %84 = arith.addf %83, %34 : vector<8x128xf32>
      %85 = arith.mulf %80, %84 : vector<8x128xf32>
      %86 = arith.addf %82, %85 : vector<8x128xf32>
      %87 = math.tanh %86 : vector<8x128xf32>
      %cst_68 = arith.constant 1.000000e+00 : f32
      %88 = vector.broadcast %cst_68 : f32 to vector<8x128xf32>
      %89 = arith.subf %88, %81 : vector<8x128xf32>
      %90 = arith.subf %87, %65 : vector<8x128xf32>
      %91 = arith.mulf %89, %90 : vector<8x128xf32>
      %92 = arith.addf %65, %91 : vector<8x128xf32>
      %93 = arith.addi %56, %c0_i32_63 : i32
      %94 = vector.broadcast %93 : i32 to vector<8x1xi32>
      %95 = arith.cmpi eq, %4, %94 : vector<8x1xi32>
      %96 = vector.shape_cast %95 : vector<8x1xi1> to vector<8x1xi1>
      %97 = vector.broadcast %96 : vector<8x1xi1> to vector<8x128xi1>
      %98 = arith.select %97, %92, %66 : vector<8x128xi1>, vector<8x128xf32>
      %c1_i32_69 = arith.constant 1 : i32
      %99 = arith.index_cast %c1_i32_69 : i32 to index
      %c0_70 = arith.constant 0 : index
      %c0_71 = arith.constant 0 : index
      %100 = vector.load %arg10[%99, %c0_70, %c0_71] : memref<8x8x384xf32, #tpu.memory_space<vmem>>, vector<1x8x384xf32>
      %101 = vector.shape_cast %100 : vector<1x8x384xf32> to vector<8x384xf32>
      %102 = arith.truncf %92 : vector<8x128xf32> to vector<8x128xbf16>
      %cst_72 = arith.constant dense<0.000000e+00> : vector<8x384xf32>
      %103 = tpu.matmul %102, %28, %cst_72 {dimension_numbers = #tpu.dot_dimension_numbers<[1], [0], [0], [1], [0, 0, 1, 1], [], []>} : vector<8x128xbf16>, vector<128x384xbf16>, vector<8x384xf32> -> vector<8x384xf32>
      %104 = vector.extract_strided_slice %101 {offsets = [0, 0], sizes = [8, 256], strides = [1, 1]} : vector<8x384xf32> to vector<8x256xf32>
      %105 = vector.extract_strided_slice %103 {offsets = [0, 0], sizes = [8, 256], strides = [1, 1]} : vector<8x384xf32> to vector<8x256xf32>
      %106 = arith.addf %104, %105 : vector<8x256xf32>
      %107 = arith.negf %106 : vector<8x256xf32>
      %108 = math.exp %107 : vector<8x256xf32>
      %cst_73 = arith.constant 1.000000e+00 : f32
      %109 = vector.broadcast %cst_73 : f32 to vector<8x256xf32>
      %110 = arith.addf %109, %108 : vector<8x256xf32>
      %111 = arith.divf %109, %110 : vector<8x256xf32>
      %112 = vector.extract_strided_slice %111 {offsets = [0, 0], sizes = [8, 128], strides = [1, 1]} : vector<8x256xf32> to vector<8x128xf32>
      %113 = vector.extract_strided_slice %111 {offsets = [0, 128], sizes = [8, 128], strides = [1, 1]} : vector<8x256xf32> to vector<8x128xf32>
      %114 = vector.extract_strided_slice %101 {offsets = [0, 256], sizes = [8, 128], strides = [1, 1]} : vector<8x384xf32> to vector<8x128xf32>
      %115 = vector.extract_strided_slice %103 {offsets = [0, 256], sizes = [8, 128], strides = [1, 1]} : vector<8x384xf32> to vector<8x128xf32>
      %116 = arith.addf %115, %34 : vector<8x128xf32>
      %117 = arith.mulf %112, %116 : vector<8x128xf32>
      %118 = arith.addf %114, %117 : vector<8x128xf32>
      %119 = math.tanh %118 : vector<8x128xf32>
      %cst_74 = arith.constant 1.000000e+00 : f32
      %120 = vector.broadcast %cst_74 : f32 to vector<8x128xf32>
      %121 = arith.subf %120, %113 : vector<8x128xf32>
      %122 = arith.subf %119, %92 : vector<8x128xf32>
      %123 = arith.mulf %121, %122 : vector<8x128xf32>
      %124 = arith.addf %92, %123 : vector<8x128xf32>
      %125 = arith.addi %56, %c1_i32_69 : i32
      %126 = vector.broadcast %125 : i32 to vector<8x1xi32>
      %127 = arith.cmpi eq, %4, %126 : vector<8x1xi32>
      %128 = vector.shape_cast %127 : vector<8x1xi1> to vector<8x1xi1>
      %129 = vector.broadcast %128 : vector<8x1xi1> to vector<8x128xi1>
      %130 = arith.select %129, %124, %98 : vector<8x128xi1>, vector<8x128xf32>
      %c2_i32 = arith.constant 2 : i32
      %131 = arith.index_cast %c2_i32 : i32 to index
      %c0_75 = arith.constant 0 : index
      %c0_76 = arith.constant 0 : index
      %132 = vector.load %arg10[%131, %c0_75, %c0_76] : memref<8x8x384xf32, #tpu.memory_space<vmem>>, vector<1x8x384xf32>
      %133 = vector.shape_cast %132 : vector<1x8x384xf32> to vector<8x384xf32>
      %134 = arith.truncf %124 : vector<8x128xf32> to vector<8x128xbf16>
      %cst_77 = arith.constant dense<0.000000e+00> : vector<8x384xf32>
      %135 = tpu.matmul %134, %28, %cst_77 {dimension_numbers = #tpu.dot_dimension_numbers<[1], [0], [0], [1], [0, 0, 1, 1], [], []>} : vector<8x128xbf16>, vector<128x384xbf16>, vector<8x384xf32> -> vector<8x384xf32>
      %136 = vector.extract_strided_slice %133 {offsets = [0, 0], sizes = [8, 256], strides = [1, 1]} : vector<8x384xf32> to vector<8x256xf32>
      %137 = vector.extract_strided_slice %135 {offsets = [0, 0], sizes = [8, 256], strides = [1, 1]} : vector<8x384xf32> to vector<8x256xf32>
      %138 = arith.addf %136, %137 : vector<8x256xf32>
      %139 = arith.negf %138 : vector<8x256xf32>
      %140 = math.exp %139 : vector<8x256xf32>
      %cst_78 = arith.constant 1.000000e+00 : f32
      %141 = vector.broadcast %cst_78 : f32 to vector<8x256xf32>
      %142 = arith.addf %141, %140 : vector<8x256xf32>
      %143 = arith.divf %141, %142 : vector<8x256xf32>
      %144 = vector.extract_strided_slice %143 {offsets = [0, 0], sizes = [8, 128], strides = [1, 1]} : vector<8x256xf32> to vector<8x128xf32>
      %145 = vector.extract_strided_slice %143 {offsets = [0, 128], sizes = [8, 128], strides = [1, 1]} : vector<8x256xf32> to vector<8x128xf32>
      %146 = vector.extract_strided_slice %133 {offsets = [0, 256], sizes = [8, 128], strides = [1, 1]} : vector<8x384xf32> to vector<8x128xf32>
      %147 = vector.extract_strided_slice %135 {offsets = [0, 256], sizes = [8, 128], strides = [1, 1]} : vector<8x384xf32> to vector<8x128xf32>
      %148 = arith.addf %147, %34 : vector<8x128xf32>
      %149 = arith.mulf %144, %148 : vector<8x128xf32>
      %150 = arith.addf %146, %149 : vector<8x128xf32>
      %151 = math.tanh %150 : vector<8x128xf32>
      %cst_79 = arith.constant 1.000000e+00 : f32
      %152 = vector.broadcast %cst_79 : f32 to vector<8x128xf32>
      %153 = arith.subf %152, %145 : vector<8x128xf32>
      %154 = arith.subf %151, %124 : vector<8x128xf32>
      %155 = arith.mulf %153, %154 : vector<8x128xf32>
      %156 = arith.addf %124, %155 : vector<8x128xf32>
      %157 = arith.addi %56, %c2_i32 : i32
      %158 = vector.broadcast %157 : i32 to vector<8x1xi32>
      %159 = arith.cmpi eq, %4, %158 : vector<8x1xi32>
      %160 = vector.shape_cast %159 : vector<8x1xi1> to vector<8x1xi1>
      %161 = vector.broadcast %160 : vector<8x1xi1> to vector<8x128xi1>
      %162 = arith.select %161, %156, %130 : vector<8x128xi1>, vector<8x128xf32>
      %c3_i32 = arith.constant 3 : i32
      %163 = arith.index_cast %c3_i32 : i32 to index
      %c0_80 = arith.constant 0 : index
      %c0_81 = arith.constant 0 : index
      %164 = vector.load %arg10[%163, %c0_80, %c0_81] : memref<8x8x384xf32, #tpu.memory_space<vmem>>, vector<1x8x384xf32>
      %165 = vector.shape_cast %164 : vector<1x8x384xf32> to vector<8x384xf32>
      %166 = arith.truncf %156 : vector<8x128xf32> to vector<8x128xbf16>
      %cst_82 = arith.constant dense<0.000000e+00> : vector<8x384xf32>
      %167 = tpu.matmul %166, %28, %cst_82 {dimension_numbers = #tpu.dot_dimension_numbers<[1], [0], [0], [1], [0, 0, 1, 1], [], []>} : vector<8x128xbf16>, vector<128x384xbf16>, vector<8x384xf32> -> vector<8x384xf32>
      %168 = vector.extract_strided_slice %165 {offsets = [0, 0], sizes = [8, 256], strides = [1, 1]} : vector<8x384xf32> to vector<8x256xf32>
      %169 = vector.extract_strided_slice %167 {offsets = [0, 0], sizes = [8, 256], strides = [1, 1]} : vector<8x384xf32> to vector<8x256xf32>
      %170 = arith.addf %168, %169 : vector<8x256xf32>
      %171 = arith.negf %170 : vector<8x256xf32>
      %172 = math.exp %171 : vector<8x256xf32>
      %cst_83 = arith.constant 1.000000e+00 : f32
      %173 = vector.broadcast %cst_83 : f32 to vector<8x256xf32>
      %174 = arith.addf %173, %172 : vector<8x256xf32>
      %175 = arith.divf %173, %174 : vector<8x256xf32>
      %176 = vector.extract_strided_slice %175 {offsets = [0, 0], sizes = [8, 128], strides = [1, 1]} : vector<8x256xf32> to vector<8x128xf32>
      %177 = vector.extract_strided_slice %175 {offsets = [0, 128], sizes = [8, 128], strides = [1, 1]} : vector<8x256xf32> to vector<8x128xf32>
      %178 = vector.extract_strided_slice %165 {offsets = [0, 256], sizes = [8, 128], strides = [1, 1]} : vector<8x384xf32> to vector<8x128xf32>
      %179 = vector.extract_strided_slice %167 {offsets = [0, 256], sizes = [8, 128], strides = [1, 1]} : vector<8x384xf32> to vector<8x128xf32>
      %180 = arith.addf %179, %34 : vector<8x128xf32>
      %181 = arith.mulf %176, %180 : vector<8x128xf32>
      %182 = arith.addf %178, %181 : vector<8x128xf32>
      %183 = math.tanh %182 : vector<8x128xf32>
      %cst_84 = arith.constant 1.000000e+00 : f32
      %184 = vector.broadcast %cst_84 : f32 to vector<8x128xf32>
      %185 = arith.subf %184, %177 : vector<8x128xf32>
      %186 = arith.subf %183, %156 : vector<8x128xf32>
      %187 = arith.mulf %185, %186 : vector<8x128xf32>
      %188 = arith.addf %156, %187 : vector<8x128xf32>
      %189 = arith.addi %56, %c3_i32 : i32
      %190 = vector.broadcast %189 : i32 to vector<8x1xi32>
      %191 = arith.cmpi eq, %4, %190 : vector<8x1xi32>
      %192 = vector.shape_cast %191 : vector<8x1xi1> to vector<8x1xi1>
      %193 = vector.broadcast %192 : vector<8x1xi1> to vector<8x128xi1>
      %194 = arith.select %193, %188, %162 : vector<8x128xi1>, vector<8x128xf32>
      %c4_i32 = arith.constant 4 : i32
      %195 = arith.index_cast %c4_i32 : i32 to index
      %c0_85 = arith.constant 0 : index
      %c0_86 = arith.constant 0 : index
      %196 = vector.load %arg10[%195, %c0_85, %c0_86] : memref<8x8x384xf32, #tpu.memory_space<vmem>>, vector<1x8x384xf32>
      %197 = vector.shape_cast %196 : vector<1x8x384xf32> to vector<8x384xf32>
      %198 = arith.truncf %188 : vector<8x128xf32> to vector<8x128xbf16>
      %cst_87 = arith.constant dense<0.000000e+00> : vector<8x384xf32>
      %199 = tpu.matmul %198, %28, %cst_87 {dimension_numbers = #tpu.dot_dimension_numbers<[1], [0], [0], [1], [0, 0, 1, 1], [], []>} : vector<8x128xbf16>, vector<128x384xbf16>, vector<8x384xf32> -> vector<8x384xf32>
      %200 = vector.extract_strided_slice %197 {offsets = [0, 0], sizes = [8, 256], strides = [1, 1]} : vector<8x384xf32> to vector<8x256xf32>
      %201 = vector.extract_strided_slice %199 {offsets = [0, 0], sizes = [8, 256], strides = [1, 1]} : vector<8x384xf32> to vector<8x256xf32>
      %202 = arith.addf %200, %201 : vector<8x256xf32>
      %203 = arith.negf %202 : vector<8x256xf32>
      %204 = math.exp %203 : vector<8x256xf32>
      %cst_88 = arith.constant 1.000000e+00 : f32
      %205 = vector.broadcast %cst_88 : f32 to vector<8x256xf32>
      %206 = arith.addf %205, %204 : vector<8x256xf32>
      %207 = arith.divf %205, %206 : vector<8x256xf32>
      %208 = vector.extract_strided_slice %207 {offsets = [0, 0], sizes = [8, 128], strides = [1, 1]} : vector<8x256xf32> to vector<8x128xf32>
      %209 = vector.extract_strided_slice %207 {offsets = [0, 128], sizes = [8, 128], strides = [1, 1]} : vector<8x256xf32> to vector<8x128xf32>
      %210 = vector.extract_strided_slice %197 {offsets = [0, 256], sizes = [8, 128], strides = [1, 1]} : vector<8x384xf32> to vector<8x128xf32>
      %211 = vector.extract_strided_slice %199 {offsets = [0, 256], sizes = [8, 128], strides = [1, 1]} : vector<8x384xf32> to vector<8x128xf32>
      %212 = arith.addf %211, %34 : vector<8x128xf32>
      %213 = arith.mulf %208, %212 : vector<8x128xf32>
      %214 = arith.addf %210, %213 : vector<8x128xf32>
      %215 = math.tanh %214 : vector<8x128xf32>
      %cst_89 = arith.constant 1.000000e+00 : f32
      %216 = vector.broadcast %cst_89 : f32 to vector<8x128xf32>
      %217 = arith.subf %216, %209 : vector<8x128xf32>
      %218 = arith.subf %215, %188 : vector<8x128xf32>
      %219 = arith.mulf %217, %218 : vector<8x128xf32>
      %220 = arith.addf %188, %219 : vector<8x128xf32>
      %221 = arith.addi %56, %c4_i32 : i32
      %222 = vector.broadcast %221 : i32 to vector<8x1xi32>
      %223 = arith.cmpi eq, %4, %222 : vector<8x1xi32>
      %224 = vector.shape_cast %223 : vector<8x1xi1> to vector<8x1xi1>
      %225 = vector.broadcast %224 : vector<8x1xi1> to vector<8x128xi1>
      %226 = arith.select %225, %220, %194 : vector<8x128xi1>, vector<8x128xf32>
      %c5_i32 = arith.constant 5 : i32
      %227 = arith.index_cast %c5_i32 : i32 to index
      %c0_90 = arith.constant 0 : index
      %c0_91 = arith.constant 0 : index
      %228 = vector.load %arg10[%227, %c0_90, %c0_91] : memref<8x8x384xf32, #tpu.memory_space<vmem>>, vector<1x8x384xf32>
      %229 = vector.shape_cast %228 : vector<1x8x384xf32> to vector<8x384xf32>
      %230 = arith.truncf %220 : vector<8x128xf32> to vector<8x128xbf16>
      %cst_92 = arith.constant dense<0.000000e+00> : vector<8x384xf32>
      %231 = tpu.matmul %230, %28, %cst_92 {dimension_numbers = #tpu.dot_dimension_numbers<[1], [0], [0], [1], [0, 0, 1, 1], [], []>} : vector<8x128xbf16>, vector<128x384xbf16>, vector<8x384xf32> -> vector<8x384xf32>
      %232 = vector.extract_strided_slice %229 {offsets = [0, 0], sizes = [8, 256], strides = [1, 1]} : vector<8x384xf32> to vector<8x256xf32>
      %233 = vector.extract_strided_slice %231 {offsets = [0, 0], sizes = [8, 256], strides = [1, 1]} : vector<8x384xf32> to vector<8x256xf32>
      %234 = arith.addf %232, %233 : vector<8x256xf32>
      %235 = arith.negf %234 : vector<8x256xf32>
      %236 = math.exp %235 : vector<8x256xf32>
      %cst_93 = arith.constant 1.000000e+00 : f32
      %237 = vector.broadcast %cst_93 : f32 to vector<8x256xf32>
      %238 = arith.addf %237, %236 : vector<8x256xf32>
      %239 = arith.divf %237, %238 : vector<8x256xf32>
      %240 = vector.extract_strided_slice %239 {offsets = [0, 0], sizes = [8, 128], strides = [1, 1]} : vector<8x256xf32> to vector<8x128xf32>
      %241 = vector.extract_strided_slice %239 {offsets = [0, 128], sizes = [8, 128], strides = [1, 1]} : vector<8x256xf32> to vector<8x128xf32>
      %242 = vector.extract_strided_slice %229 {offsets = [0, 256], sizes = [8, 128], strides = [1, 1]} : vector<8x384xf32> to vector<8x128xf32>
      %243 = vector.extract_strided_slice %231 {offsets = [0, 256], sizes = [8, 128], strides = [1, 1]} : vector<8x384xf32> to vector<8x128xf32>
      %244 = arith.addf %243, %34 : vector<8x128xf32>
      %245 = arith.mulf %240, %244 : vector<8x128xf32>
      %246 = arith.addf %242, %245 : vector<8x128xf32>
      %247 = math.tanh %246 : vector<8x128xf32>
      %cst_94 = arith.constant 1.000000e+00 : f32
      %248 = vector.broadcast %cst_94 : f32 to vector<8x128xf32>
      %249 = arith.subf %248, %241 : vector<8x128xf32>
      %250 = arith.subf %247, %220 : vector<8x128xf32>
      %251 = arith.mulf %249, %250 : vector<8x128xf32>
      %252 = arith.addf %220, %251 : vector<8x128xf32>
      %253 = arith.addi %56, %c5_i32 : i32
      %254 = vector.broadcast %253 : i32 to vector<8x1xi32>
      %255 = arith.cmpi eq, %4, %254 : vector<8x1xi32>
      %256 = vector.shape_cast %255 : vector<8x1xi1> to vector<8x1xi1>
      %257 = vector.broadcast %256 : vector<8x1xi1> to vector<8x128xi1>
      %258 = arith.select %257, %252, %226 : vector<8x128xi1>, vector<8x128xf32>
      %c6_i32 = arith.constant 6 : i32
      %259 = arith.index_cast %c6_i32 : i32 to index
      %c0_95 = arith.constant 0 : index
      %c0_96 = arith.constant 0 : index
      %260 = vector.load %arg10[%259, %c0_95, %c0_96] : memref<8x8x384xf32, #tpu.memory_space<vmem>>, vector<1x8x384xf32>
      %261 = vector.shape_cast %260 : vector<1x8x384xf32> to vector<8x384xf32>
      %262 = arith.truncf %252 : vector<8x128xf32> to vector<8x128xbf16>
      %cst_97 = arith.constant dense<0.000000e+00> : vector<8x384xf32>
      %263 = tpu.matmul %262, %28, %cst_97 {dimension_numbers = #tpu.dot_dimension_numbers<[1], [0], [0], [1], [0, 0, 1, 1], [], []>} : vector<8x128xbf16>, vector<128x384xbf16>, vector<8x384xf32> -> vector<8x384xf32>
      %264 = vector.extract_strided_slice %261 {offsets = [0, 0], sizes = [8, 256], strides = [1, 1]} : vector<8x384xf32> to vector<8x256xf32>
      %265 = vector.extract_strided_slice %263 {offsets = [0, 0], sizes = [8, 256], strides = [1, 1]} : vector<8x384xf32> to vector<8x256xf32>
      %266 = arith.addf %264, %265 : vector<8x256xf32>
      %267 = arith.negf %266 : vector<8x256xf32>
      %268 = math.exp %267 : vector<8x256xf32>
      %cst_98 = arith.constant 1.000000e+00 : f32
      %269 = vector.broadcast %cst_98 : f32 to vector<8x256xf32>
      %270 = arith.addf %269, %268 : vector<8x256xf32>
      %271 = arith.divf %269, %270 : vector<8x256xf32>
      %272 = vector.extract_strided_slice %271 {offsets = [0, 0], sizes = [8, 128], strides = [1, 1]} : vector<8x256xf32> to vector<8x128xf32>
      %273 = vector.extract_strided_slice %271 {offsets = [0, 128], sizes = [8, 128], strides = [1, 1]} : vector<8x256xf32> to vector<8x128xf32>
      %274 = vector.extract_strided_slice %261 {offsets = [0, 256], sizes = [8, 128], strides = [1, 1]} : vector<8x384xf32> to vector<8x128xf32>
      %275 = vector.extract_strided_slice %263 {offsets = [0, 256], sizes = [8, 128], strides = [1, 1]} : vector<8x384xf32> to vector<8x128xf32>
      %276 = arith.addf %275, %34 : vector<8x128xf32>
      %277 = arith.mulf %272, %276 : vector<8x128xf32>
      %278 = arith.addf %274, %277 : vector<8x128xf32>
      %279 = math.tanh %278 : vector<8x128xf32>
      %cst_99 = arith.constant 1.000000e+00 : f32
      %280 = vector.broadcast %cst_99 : f32 to vector<8x128xf32>
      %281 = arith.subf %280, %273 : vector<8x128xf32>
      %282 = arith.subf %279, %252 : vector<8x128xf32>
      %283 = arith.mulf %281, %282 : vector<8x128xf32>
      %284 = arith.addf %252, %283 : vector<8x128xf32>
      %285 = arith.addi %56, %c6_i32 : i32
      %286 = vector.broadcast %285 : i32 to vector<8x1xi32>
      %287 = arith.cmpi eq, %4, %286 : vector<8x1xi32>
      %288 = vector.shape_cast %287 : vector<8x1xi1> to vector<8x1xi1>
      %289 = vector.broadcast %288 : vector<8x1xi1> to vector<8x128xi1>
      %290 = arith.select %289, %284, %258 : vector<8x128xi1>, vector<8x128xf32>
      %c7_i32_100 = arith.constant 7 : i32
      %291 = arith.index_cast %c7_i32_100 : i32 to index
      %c0_101 = arith.constant 0 : index
      %c0_102 = arith.constant 0 : index
      %292 = vector.load %arg10[%291, %c0_101, %c0_102] : memref<8x8x384xf32, #tpu.memory_space<vmem>>, vector<1x8x384xf32>
      %293 = vector.shape_cast %292 : vector<1x8x384xf32> to vector<8x384xf32>
      %294 = arith.truncf %284 : vector<8x128xf32> to vector<8x128xbf16>
      %cst_103 = arith.constant dense<0.000000e+00> : vector<8x384xf32>
      %295 = tpu.matmul %294, %28, %cst_103 {dimension_numbers = #tpu.dot_dimension_numbers<[1], [0], [0], [1], [0, 0, 1, 1], [], []>} : vector<8x128xbf16>, vector<128x384xbf16>, vector<8x384xf32> -> vector<8x384xf32>
      %296 = vector.extract_strided_slice %293 {offsets = [0, 0], sizes = [8, 256], strides = [1, 1]} : vector<8x384xf32> to vector<8x256xf32>
      %297 = vector.extract_strided_slice %295 {offsets = [0, 0], sizes = [8, 256], strides = [1, 1]} : vector<8x384xf32> to vector<8x256xf32>
      %298 = arith.addf %296, %297 : vector<8x256xf32>
      %299 = arith.negf %298 : vector<8x256xf32>
      %300 = math.exp %299 : vector<8x256xf32>
      %cst_104 = arith.constant 1.000000e+00 : f32
      %301 = vector.broadcast %cst_104 : f32 to vector<8x256xf32>
      %302 = arith.addf %301, %300 : vector<8x256xf32>
      %303 = arith.divf %301, %302 : vector<8x256xf32>
      %304 = vector.extract_strided_slice %303 {offsets = [0, 0], sizes = [8, 128], strides = [1, 1]} : vector<8x256xf32> to vector<8x128xf32>
      %305 = vector.extract_strided_slice %303 {offsets = [0, 128], sizes = [8, 128], strides = [1, 1]} : vector<8x256xf32> to vector<8x128xf32>
      %306 = vector.extract_strided_slice %293 {offsets = [0, 256], sizes = [8, 128], strides = [1, 1]} : vector<8x384xf32> to vector<8x128xf32>
      %307 = vector.extract_strided_slice %295 {offsets = [0, 256], sizes = [8, 128], strides = [1, 1]} : vector<8x384xf32> to vector<8x128xf32>
      %308 = arith.addf %307, %34 : vector<8x128xf32>
      %309 = arith.mulf %304, %308 : vector<8x128xf32>
      %310 = arith.addf %306, %309 : vector<8x128xf32>
      %311 = math.tanh %310 : vector<8x128xf32>
      %cst_105 = arith.constant 1.000000e+00 : f32
      %312 = vector.broadcast %cst_105 : f32 to vector<8x128xf32>
      %313 = arith.subf %312, %305 : vector<8x128xf32>
      %314 = arith.subf %311, %284 : vector<8x128xf32>
      %315 = arith.mulf %313, %314 : vector<8x128xf32>
      %316 = arith.addf %284, %315 : vector<8x128xf32>
      %317 = arith.addi %56, %c7_i32_100 : i32
      %318 = vector.broadcast %317 : i32 to vector<8x1xi32>
      %319 = arith.cmpi eq, %4, %318 : vector<8x1xi32>
      %320 = vector.shape_cast %319 : vector<8x1xi1> to vector<8x1xi1>
      %321 = vector.broadcast %320 : vector<8x1xi1> to vector<8x128xi1>
      %322 = arith.select %321, %316, %290 : vector<8x128xi1>, vector<8x128xf32>
      %c8_i32_106 = arith.constant 8 : i32
      %c0_107 = arith.constant 0 : index
      %c0_108 = arith.constant 0 : index
      %323 = vector.load %arg11[%c0_107, %c0_108] : memref<8x128xf32, #tpu.memory_space<vmem>>, vector<8x128xf32>
      tpu.vector_store %arg11[%c0_107, %c0_108], %316 {strides = array<i32>} : memref<8x128xf32, #tpu.memory_space<vmem>>, vector<8x128xf32>,
      %c0_109 = arith.constant 0 : index
      %c0_110 = arith.constant 0 : index
      %324 = vector.load %arg12[%c0_109, %c0_110] : memref<8x128xf32, #tpu.memory_space<vmem>>, vector<8x128xf32>
      tpu.vector_store %arg12[%c0_109, %c0_110], %322 {strides = array<i32>} : memref<8x128xf32, #tpu.memory_space<vmem>>, vector<8x128xf32>,
    }
    %c0_46 = arith.constant 0 : index
    %c0_47 = arith.constant 0 : index
    %43 = vector.load %arg12[%c0_46, %c0_47] : memref<8x128xf32, #tpu.memory_space<vmem>>, vector<8x128xf32>
    %44 = arith.mulf %43, %43 : vector<8x128xf32>
    %cst_48 = arith.constant dense<0.000000e+00> : vector<8xf32>
    %45 = vector.multi_reduction <add>, %44, %cst_48 [1] : vector<8x128xf32> to vector<8xf32>
    %46 = vector.shape_cast %45 : vector<8xf32> to vector<8x1xf32>
    %47 = math.sqrt %46 : vector<8x1xf32>
    %cst_49 = arith.constant 9.99999996E-13 : f32
    %48 = vector.broadcast %cst_49 : f32 to vector<8x1xf32>
    %49 = arith.maximumf %47, %48 : vector<8x1xf32>
    %50 = vector.broadcast %49 : vector<8x1xf32> to vector<8x128xf32>
    %51 = arith.divf %43, %50 : vector<8x128xf32>
    %c0_50 = arith.constant 0 : index
    %c0_51 = arith.constant 0 : index
    %52 = vector.load %arg8[%c0_50, %c0_51] : memref<8x128xf32, #tpu.memory_space<vmem>>, vector<8x128xf32>
    tpu.vector_store %arg8[%c0_50, %c0_51], %51 {strides = array<i32>} : memref<8x128xf32, #tpu.memory_space<vmem>>, vector<8x128xf32>,
    return
  }
  func.func @transform_0(%arg0: i32, %arg1: memref<1xi32, #tpu.memory_space<smem>>) -> (i32, i32) {
    %c0_i32 = arith.constant 0 : i32
    %c0_i32_0 = arith.constant 0 : i32
    return %arg0, %c0_i32 : i32, i32
  }
  func.func @transform_1(%arg0: i32, %arg1: memref<1xi32, #tpu.memory_space<smem>>) -> (i32, i32, i32) {
    %c0_i32 = arith.constant 0 : i32
    %c0_i32_0 = arith.constant 0 : i32
    %c0_i32_1 = arith.constant 0 : i32
    return %c0_i32, %arg0, %c0_i32_0 : i32, i32, i32
  }
  func.func @transform_2(%arg0: i32, %arg1: memref<1xi32, #tpu.memory_space<smem>>) -> (i32, i32, i32) {
    %c0_i32 = arith.constant 0 : i32
    %c0_i32_0 = arith.constant 0 : i32
    %c0_i32_1 = arith.constant 0 : i32
    %c0_i32_2 = arith.constant 0 : i32
    return %c0_i32, %c0_i32_0, %c0_i32_1 : i32, i32, i32
  }
  func.func @transform_3(%arg0: i32, %arg1: memref<1xi32, #tpu.memory_space<smem>>) -> (i32, i32, i32) {
    %c0_i32 = arith.constant 0 : i32
    %c0_i32_0 = arith.constant 0 : i32
    %c0_i32_1 = arith.constant 0 : i32
    %c0_i32_2 = arith.constant 0 : i32
    return %c0_i32, %c0_i32_0, %c0_i32_1 : i32, i32, i32
  }
  func.func @transform_4(%arg0: i32, %arg1: memref<1xi32, #tpu.memory_space<smem>>) -> (i32, i32, i32) {
    %c0_i32 = arith.constant 0 : i32
    %c0_i32_0 = arith.constant 0 : i32
    %c0_i32_1 = arith.constant 0 : i32
    %c0_i32_2 = arith.constant 0 : i32
    return %c0_i32, %c0_i32_0, %c0_i32_1 : i32, i32, i32
  }
  func.func @transform_5(%arg0: i32, %arg1: memref<1xi32, #tpu.memory_space<smem>>) -> (i32, i32, i32) {
    %c0_i32 = arith.constant 0 : i32
    %c0_i32_0 = arith.constant 0 : i32
    %c0_i32_1 = arith.constant 0 : i32
    %c0_i32_2 = arith.constant 0 : i32
    return %c0_i32, %c0_i32_0, %c0_i32_1 : i32, i32, i32
  }
  func.func @transform_6(%arg0: i32, %arg1: memref<1xi32, #tpu.memory_space<smem>>) -> (i32, i32) {
    %c0_i32 = arith.constant 0 : i32
    %c0_i32_0 = arith.constant 0 : i32
    return %arg0, %c0_i32 : i32, i32
  }
}

module attributes {stable_mosaic.version = 11 : i64} {
  func.func @_encoder_text_kernel(%arg0: i32, %arg1: memref<1xi32, #tpu.memory_space<smem>>, %arg2: memref<8x1xi32, #tpu.memory_space<vmem>>, %arg3: memref<8x8x128xbf16, #tpu.memory_space<vmem>>, %arg4: memref<2x128x384xbf16, #tpu.memory_space<vmem>>, %arg5: memref<2x128x384xbf16, #tpu.memory_space<vmem>>, %arg6: memref<2x1x384xf32, #tpu.memory_space<vmem>>, %arg7: memref<2x1x128xf32, #tpu.memory_space<vmem>>, %arg8: memref<8x128xf32, #tpu.memory_space<vmem>>, %arg9: memref<8x8x128xbf16, #tpu.memory_space<vmem>>, %arg10: memref<8x8x384xf32, #tpu.memory_space<vmem>>, %arg11: memref<8x128xf32, #tpu.memory_space<vmem>>, %arg12: memref<8x128xf32, #tpu.memory_space<vmem>>) attributes {dimension_semantics = [#tpu.dimension_semantics<parallel>], iteration_bounds = array<i64: 1>, scalar_prefetch = 1 : i64, scratch_operands = 4 : i64, tpu.core_type = #tpu.core_type<tc>, window_params = [{transform_indices = @transform_0, window_bounds = array<i64: 8, 1>}, {transform_indices = @transform_1, window_bounds = array<i64: 8, 8, 128>}, {pipeline_mode = #tpu.pipeline_mode<synchronous>, transform_indices = @transform_2, window_bounds = array<i64: 2, 128, 384>}, {pipeline_mode = #tpu.pipeline_mode<synchronous>, transform_indices = @transform_3, window_bounds = array<i64: 2, 128, 384>}, {pipeline_mode = #tpu.pipeline_mode<synchronous>, transform_indices = @transform_4, window_bounds = array<i64: 2, 1, 384>}, {pipeline_mode = #tpu.pipeline_mode<synchronous>, transform_indices = @transform_5, window_bounds = array<i64: 2, 1, 128>}, {transform_indices = @transform_6, window_bounds = array<i64: 8, 128>}]} {
    %0 = arith.index_cast %arg0 : i32 to index
    %1 = memref.load %arg1[%0] : memref<1xi32, #tpu.memory_space<smem>>
    %c7_i32 = arith.constant 7 : i32
    %2 = arith.addi %1, %c7_i32 : i32
    %c8_i32 = arith.constant 8 : i32
    %3 = arith.divsi %2, %c8_i32 : i32
    %c0 = arith.constant 0 : index
    %c0_0 = arith.constant 0 : index
    %4 = vector.load %arg2[%c0, %c0_0] : memref<8x1xi32, #tpu.memory_space<vmem>>, vector<8x1xi32>
    %cst = arith.constant 0.000000e+00 : f32
    %5 = vector.broadcast %cst : f32 to vector<8x128xf32>
    %c0_1 = arith.constant 0 : index
    %c0_2 = arith.constant 0 : index
    %6 = vector.load %arg12[%c0_1, %c0_2] : memref<8x128xf32, #tpu.memory_space<vmem>>, vector<8x128xf32>
    tpu.vector_store %arg12[%c0_1, %c0_2], %5 {strides = array<i32>} : memref<8x128xf32, #tpu.memory_space<vmem>>, vector<8x128xf32>,
    %c0_3 = arith.constant 0 : index
    %c0_4 = arith.constant 0 : index
    %c0_5 = arith.constant 0 : index
    %7 = vector.load %arg4[%c0_3, %c0_4, %c0_5] : memref<2x128x384xbf16, #tpu.memory_space<vmem>>, vector<1x128x384xbf16>
    %8 = vector.shape_cast %7 : vector<1x128x384xbf16> to vector<128x384xbf16>
    %c0_6 = arith.constant 0 : index
    %c0_7 = arith.constant 0 : index
    %c0_8 = arith.constant 0 : index
    %9 = vector.load %arg5[%c0_6, %c0_7, %c0_8] : memref<2x128x384xbf16, #tpu.memory_space<vmem>>, vector<1x128x384xbf16>
    %10 = vector.shape_cast %9 : vector<1x128x384xbf16> to vector<128x384xbf16>
    %c0_9 = arith.constant 0 : index
    %c0_10 = arith.constant 0 : index
    %c0_11 = arith.constant 0 : index
    %11 = vector.load %arg6[%c0_9, %c0_10, %c0_11] : memref<2x1x384xf32, #tpu.memory_space<vmem>>, vector<1x1x384xf32>
    %12 = vector.shape_cast %11 : vector<1x1x384xf32> to vector<1x384xf32>
    %c0_12 = arith.constant 0 : index
    %c0_13 = arith.constant 0 : index
    %c0_14 = arith.constant 0 : index
    %13 = vector.load %arg7[%c0_12, %c0_13, %c0_14] : memref<2x1x128xf32, #tpu.memory_space<vmem>>, vector<1x1x128xf32>
    %14 = vector.shape_cast %13 : vector<1x1x128xf32> to vector<1x128xf32>
    %15 = vector.shape_cast %14 : vector<1x128xf32> to vector<1x128xf32>
    %16 = vector.broadcast %15 : vector<1x128xf32> to vector<8x128xf32>
    %cst_15 = arith.constant 0.000000e+00 : f32
    %17 = vector.broadcast %cst_15 : f32 to vector<8x128xf32>
    %c0_16 = arith.constant 0 : index
    %c0_17 = arith.constant 0 : index
    %18 = vector.load %arg11[%c0_16, %c0_17] : memref<8x128xf32, #tpu.memory_space<vmem>>, vector<8x128xf32>
    tpu.vector_store %arg11[%c0_16, %c0_17], %17 {strides = array<i32>} : memref<8x128xf32, #tpu.memory_space<vmem>>, vector<8x128xf32>,
    %c0_i32 = arith.constant 0 : i32
    %19 = arith.subi %3, %c0_i32 : i32
    %c1_i32 = arith.constant 1 : i32
    %c1_i32_18 = arith.constant 1 : i32
    %20 = arith.subi %c1_i32, %c1_i32_18 : i32
    %21 = arith.addi %19, %20 : i32
    %c1_i32_19 = arith.constant 1 : i32
    %22 = arith.divsi %21, %c1_i32_19 : i32
    %c1_i32_20 = arith.constant 1 : i32
    %c0_i32_21 = arith.constant 0 : i32
    %c0_i32_22 = arith.constant 0 : i32
    %23 = arith.subi %22, %c0_i32_22 : i32
    %24 = arith.addi %c0_i32_22, %23 : i32
    %c1_i32_23 = arith.constant 1 : i32
    scf.for %arg13 = %c0_i32_22 to %24 step %c1_i32_23  : i32 {
      %53 = arith.muli %arg13, %c1_i32_20 : i32
      %54 = arith.addi %c0_i32_21, %53 : i32
      %c8_i32_52 = arith.constant 8 : i32
      %55 = arith.muli %54, %c8_i32_52 : i32
      %56 = tpu.assume_multiple %55, 8 : i32
      %57 = arith.index_cast %56 : i32 to index
      %c0_53 = arith.constant 0 : index
      %c0_54 = arith.constant 0 : index
      %58 = vector.load %arg3[%57, %c0_53, %c0_54] : memref<8x8x128xbf16, #tpu.memory_space<vmem>>, vector<8x8x128xbf16>
      %59 = vector.shape_cast %58 : vector<8x8x128xbf16> to vector<64x128xbf16>
      %cst_55 = arith.constant dense<0.000000e+00> : vector<64x384xf32>
      %60 = tpu.matmul %59, %8, %cst_55 {dimension_numbers = #tpu.dot_dimension_numbers<[1], [0], [0], [1], [0, 0, 1, 1], [], []>} : vector<64x128xbf16>, vector<128x384xbf16>, vector<64x384xf32> -> vector<64x384xf32>
      %61 = vector.broadcast %12 : vector<1x384xf32> to vector<64x384xf32>
      %62 = arith.addf %60, %61 : vector<64x384xf32>
      %63 = vector.shape_cast %62 : vector<64x384xf32> to vector<8x8x384xf32>
      %c0_56 = arith.constant 0 : index
      %c0_57 = arith.constant 0 : index
      %c0_58 = arith.constant 0 : index
      %64 = vector.load %arg10[%c0_56, %c0_57, %c0_58] : memref<8x8x384xf32, #tpu.memory_space<vmem>>, vector<8x8x384xf32>
      tpu.vector_store %arg10[%c0_56, %c0_57, %c0_58], %63 {strides = array<i32>} : memref<8x8x384xf32, #tpu.memory_space<vmem>>, vector<8x8x384xf32>,
      %c0_59 = arith.constant 0 : index
      %c0_60 = arith.constant 0 : index
      %65 = vector.load %arg11[%c0_59, %c0_60] : memref<8x128xf32, #tpu.memory_space<vmem>>, vector<8x128xf32>
      %c0_i32_61 = arith.constant 0 : i32
      %66 = arith.index_cast %c0_i32_61 : i32 to index
      %c0_62 = arith.constant 0 : index
      %c0_63 = arith.constant 0 : index
      %67 = vector.load %arg10[%66, %c0_62, %c0_63] : memref<8x8x384xf32, #tpu.memory_space<vmem>>, vector<1x8x384xf32>
      %68 = vector.shape_cast %67 : vector<1x8x384xf32> to vector<8x384xf32>
      %69 = arith.truncf %65 : vector<8x128xf32> to vector<8x128xbf16>
      %cst_64 = arith.constant dense<0.000000e+00> : vector<8x384xf32>
      %70 = tpu.matmul %69, %10, %cst_64 {dimension_numbers = #tpu.dot_dimension_numbers<[1], [0], [0], [1], [0, 0, 1, 1], [], []>} : vector<8x128xbf16>, vector<128x384xbf16>, vector<8x384xf32> -> vector<8x384xf32>
      %71 = vector.extract_strided_slice %68 {offsets = [0, 0], sizes = [8, 256], strides = [1, 1]} : vector<8x384xf32> to vector<8x256xf32>
      %72 = vector.extract_strided_slice %70 {offsets = [0, 0], sizes = [8, 256], strides = [1, 1]} : vector<8x384xf32> to vector<8x256xf32>
      %73 = arith.addf %71, %72 : vector<8x256xf32>
      %74 = arith.negf %73 : vector<8x256xf32>
      %75 = math.exp %74 : vector<8x256xf32>
      %cst_65 = arith.constant 1.000000e+00 : f32
      %76 = vector.broadcast %cst_65 : f32 to vector<8x256xf32>
      %77 = arith.addf %76, %75 : vector<8x256xf32>
      %78 = arith.divf %76, %77 : vector<8x256xf32>
      %79 = vector.extract_strided_slice %78 {offsets = [0, 0], sizes = [8, 128], strides = [1, 1]} : vector<8x256xf32> to vector<8x128xf32>
      %80 = vector.extract_strided_slice %78 {offsets = [0, 128], sizes = [8, 128], strides = [1, 1]} : vector<8x256xf32> to vector<8x128xf32>
      %81 = vector.extract_strided_slice %68 {offsets = [0, 256], sizes = [8, 128], strides = [1, 1]} : vector<8x384xf32> to vector<8x128xf32>
      %82 = vector.extract_strided_slice %70 {offsets = [0, 256], sizes = [8, 128], strides = [1, 1]} : vector<8x384xf32> to vector<8x128xf32>
      %83 = arith.addf %82, %16 : vector<8x128xf32>
      %84 = arith.mulf %79, %83 : vector<8x128xf32>
      %85 = arith.addf %81, %84 : vector<8x128xf32>
      %86 = math.tanh %85 : vector<8x128xf32>
      %cst_66 = arith.constant 1.000000e+00 : f32
      %87 = vector.broadcast %cst_66 : f32 to vector<8x128xf32>
      %88 = arith.subf %87, %80 : vector<8x128xf32>
      %89 = arith.subf %86, %65 : vector<8x128xf32>
      %90 = arith.mulf %88, %89 : vector<8x128xf32>
      %91 = arith.addf %65, %90 : vector<8x128xf32>
      %92 = arith.truncf %91 : vector<8x128xf32> to vector<8x128xbf16>
      %93 = arith.addi %56, %c0_i32_61 : i32
      %94 = arith.index_cast %93 : i32 to index
      %c0_67 = arith.constant 0 : index
      %c0_68 = arith.constant 0 : index
      %95 = vector.load %arg9[%94, %c0_67, %c0_68] : memref<8x8x128xbf16, #tpu.memory_space<vmem>>, vector<1x8x128xbf16>
      %96 = vector.shape_cast %95 : vector<1x8x128xbf16> to vector<8x128xbf16>
      %97 = vector.shape_cast %92 : vector<8x128xbf16> to vector<1x8x128xbf16>
      tpu.vector_store %arg9[%94, %c0_67, %c0_68], %97 {strides = array<i32>} : memref<8x8x128xbf16, #tpu.memory_space<vmem>>, vector<1x8x128xbf16>,
      %c1_i32_69 = arith.constant 1 : i32
      %98 = arith.index_cast %c1_i32_69 : i32 to index
      %c0_70 = arith.constant 0 : index
      %c0_71 = arith.constant 0 : index
      %99 = vector.load %arg10[%98, %c0_70, %c0_71] : memref<8x8x384xf32, #tpu.memory_space<vmem>>, vector<1x8x384xf32>
      %100 = vector.shape_cast %99 : vector<1x8x384xf32> to vector<8x384xf32>
      %101 = arith.truncf %91 : vector<8x128xf32> to vector<8x128xbf16>
      %cst_72 = arith.constant dense<0.000000e+00> : vector<8x384xf32>
      %102 = tpu.matmul %101, %10, %cst_72 {dimension_numbers = #tpu.dot_dimension_numbers<[1], [0], [0], [1], [0, 0, 1, 1], [], []>} : vector<8x128xbf16>, vector<128x384xbf16>, vector<8x384xf32> -> vector<8x384xf32>
      %103 = vector.extract_strided_slice %100 {offsets = [0, 0], sizes = [8, 256], strides = [1, 1]} : vector<8x384xf32> to vector<8x256xf32>
      %104 = vector.extract_strided_slice %102 {offsets = [0, 0], sizes = [8, 256], strides = [1, 1]} : vector<8x384xf32> to vector<8x256xf32>
      %105 = arith.addf %103, %104 : vector<8x256xf32>
      %106 = arith.negf %105 : vector<8x256xf32>
      %107 = math.exp %106 : vector<8x256xf32>
      %cst_73 = arith.constant 1.000000e+00 : f32
      %108 = vector.broadcast %cst_73 : f32 to vector<8x256xf32>
      %109 = arith.addf %108, %107 : vector<8x256xf32>
      %110 = arith.divf %108, %109 : vector<8x256xf32>
      %111 = vector.extract_strided_slice %110 {offsets = [0, 0], sizes = [8, 128], strides = [1, 1]} : vector<8x256xf32> to vector<8x128xf32>
      %112 = vector.extract_strided_slice %110 {offsets = [0, 128], sizes = [8, 128], strides = [1, 1]} : vector<8x256xf32> to vector<8x128xf32>
      %113 = vector.extract_strided_slice %100 {offsets = [0, 256], sizes = [8, 128], strides = [1, 1]} : vector<8x384xf32> to vector<8x128xf32>
      %114 = vector.extract_strided_slice %102 {offsets = [0, 256], sizes = [8, 128], strides = [1, 1]} : vector<8x384xf32> to vector<8x128xf32>
      %115 = arith.addf %114, %16 : vector<8x128xf32>
      %116 = arith.mulf %111, %115 : vector<8x128xf32>
      %117 = arith.addf %113, %116 : vector<8x128xf32>
      %118 = math.tanh %117 : vector<8x128xf32>
      %cst_74 = arith.constant 1.000000e+00 : f32
      %119 = vector.broadcast %cst_74 : f32 to vector<8x128xf32>
      %120 = arith.subf %119, %112 : vector<8x128xf32>
      %121 = arith.subf %118, %91 : vector<8x128xf32>
      %122 = arith.mulf %120, %121 : vector<8x128xf32>
      %123 = arith.addf %91, %122 : vector<8x128xf32>
      %124 = arith.truncf %123 : vector<8x128xf32> to vector<8x128xbf16>
      %125 = arith.addi %56, %c1_i32_69 : i32
      %126 = arith.index_cast %125 : i32 to index
      %c0_75 = arith.constant 0 : index
      %c0_76 = arith.constant 0 : index
      %127 = vector.load %arg9[%126, %c0_75, %c0_76] : memref<8x8x128xbf16, #tpu.memory_space<vmem>>, vector<1x8x128xbf16>
      %128 = vector.shape_cast %127 : vector<1x8x128xbf16> to vector<8x128xbf16>
      %129 = vector.shape_cast %124 : vector<8x128xbf16> to vector<1x8x128xbf16>
      tpu.vector_store %arg9[%126, %c0_75, %c0_76], %129 {strides = array<i32>} : memref<8x8x128xbf16, #tpu.memory_space<vmem>>, vector<1x8x128xbf16>,
      %c2_i32 = arith.constant 2 : i32
      %130 = arith.index_cast %c2_i32 : i32 to index
      %c0_77 = arith.constant 0 : index
      %c0_78 = arith.constant 0 : index
      %131 = vector.load %arg10[%130, %c0_77, %c0_78] : memref<8x8x384xf32, #tpu.memory_space<vmem>>, vector<1x8x384xf32>
      %132 = vector.shape_cast %131 : vector<1x8x384xf32> to vector<8x384xf32>
      %133 = arith.truncf %123 : vector<8x128xf32> to vector<8x128xbf16>
      %cst_79 = arith.constant dense<0.000000e+00> : vector<8x384xf32>
      %134 = tpu.matmul %133, %10, %cst_79 {dimension_numbers = #tpu.dot_dimension_numbers<[1], [0], [0], [1], [0, 0, 1, 1], [], []>} : vector<8x128xbf16>, vector<128x384xbf16>, vector<8x384xf32> -> vector<8x384xf32>
      %135 = vector.extract_strided_slice %132 {offsets = [0, 0], sizes = [8, 256], strides = [1, 1]} : vector<8x384xf32> to vector<8x256xf32>
      %136 = vector.extract_strided_slice %134 {offsets = [0, 0], sizes = [8, 256], strides = [1, 1]} : vector<8x384xf32> to vector<8x256xf32>
      %137 = arith.addf %135, %136 : vector<8x256xf32>
      %138 = arith.negf %137 : vector<8x256xf32>
      %139 = math.exp %138 : vector<8x256xf32>
      %cst_80 = arith.constant 1.000000e+00 : f32
      %140 = vector.broadcast %cst_80 : f32 to vector<8x256xf32>
      %141 = arith.addf %140, %139 : vector<8x256xf32>
      %142 = arith.divf %140, %141 : vector<8x256xf32>
      %143 = vector.extract_strided_slice %142 {offsets = [0, 0], sizes = [8, 128], strides = [1, 1]} : vector<8x256xf32> to vector<8x128xf32>
      %144 = vector.extract_strided_slice %142 {offsets = [0, 128], sizes = [8, 128], strides = [1, 1]} : vector<8x256xf32> to vector<8x128xf32>
      %145 = vector.extract_strided_slice %132 {offsets = [0, 256], sizes = [8, 128], strides = [1, 1]} : vector<8x384xf32> to vector<8x128xf32>
      %146 = vector.extract_strided_slice %134 {offsets = [0, 256], sizes = [8, 128], strides = [1, 1]} : vector<8x384xf32> to vector<8x128xf32>
      %147 = arith.addf %146, %16 : vector<8x128xf32>
      %148 = arith.mulf %143, %147 : vector<8x128xf32>
      %149 = arith.addf %145, %148 : vector<8x128xf32>
      %150 = math.tanh %149 : vector<8x128xf32>
      %cst_81 = arith.constant 1.000000e+00 : f32
      %151 = vector.broadcast %cst_81 : f32 to vector<8x128xf32>
      %152 = arith.subf %151, %144 : vector<8x128xf32>
      %153 = arith.subf %150, %123 : vector<8x128xf32>
      %154 = arith.mulf %152, %153 : vector<8x128xf32>
      %155 = arith.addf %123, %154 : vector<8x128xf32>
      %156 = arith.truncf %155 : vector<8x128xf32> to vector<8x128xbf16>
      %157 = arith.addi %56, %c2_i32 : i32
      %158 = arith.index_cast %157 : i32 to index
      %c0_82 = arith.constant 0 : index
      %c0_83 = arith.constant 0 : index
      %159 = vector.load %arg9[%158, %c0_82, %c0_83] : memref<8x8x128xbf16, #tpu.memory_space<vmem>>, vector<1x8x128xbf16>
      %160 = vector.shape_cast %159 : vector<1x8x128xbf16> to vector<8x128xbf16>
      %161 = vector.shape_cast %156 : vector<8x128xbf16> to vector<1x8x128xbf16>
      tpu.vector_store %arg9[%158, %c0_82, %c0_83], %161 {strides = array<i32>} : memref<8x8x128xbf16, #tpu.memory_space<vmem>>, vector<1x8x128xbf16>,
      %c3_i32 = arith.constant 3 : i32
      %162 = arith.index_cast %c3_i32 : i32 to index
      %c0_84 = arith.constant 0 : index
      %c0_85 = arith.constant 0 : index
      %163 = vector.load %arg10[%162, %c0_84, %c0_85] : memref<8x8x384xf32, #tpu.memory_space<vmem>>, vector<1x8x384xf32>
      %164 = vector.shape_cast %163 : vector<1x8x384xf32> to vector<8x384xf32>
      %165 = arith.truncf %155 : vector<8x128xf32> to vector<8x128xbf16>
      %cst_86 = arith.constant dense<0.000000e+00> : vector<8x384xf32>
      %166 = tpu.matmul %165, %10, %cst_86 {dimension_numbers = #tpu.dot_dimension_numbers<[1], [0], [0], [1], [0, 0, 1, 1], [], []>} : vector<8x128xbf16>, vector<128x384xbf16>, vector<8x384xf32> -> vector<8x384xf32>
      %167 = vector.extract_strided_slice %164 {offsets = [0, 0], sizes = [8, 256], strides = [1, 1]} : vector<8x384xf32> to vector<8x256xf32>
      %168 = vector.extract_strided_slice %166 {offsets = [0, 0], sizes = [8, 256], strides = [1, 1]} : vector<8x384xf32> to vector<8x256xf32>
      %169 = arith.addf %167, %168 : vector<8x256xf32>
      %170 = arith.negf %169 : vector<8x256xf32>
      %171 = math.exp %170 : vector<8x256xf32>
      %cst_87 = arith.constant 1.000000e+00 : f32
      %172 = vector.broadcast %cst_87 : f32 to vector<8x256xf32>
      %173 = arith.addf %172, %171 : vector<8x256xf32>
      %174 = arith.divf %172, %173 : vector<8x256xf32>
      %175 = vector.extract_strided_slice %174 {offsets = [0, 0], sizes = [8, 128], strides = [1, 1]} : vector<8x256xf32> to vector<8x128xf32>
      %176 = vector.extract_strided_slice %174 {offsets = [0, 128], sizes = [8, 128], strides = [1, 1]} : vector<8x256xf32> to vector<8x128xf32>
      %177 = vector.extract_strided_slice %164 {offsets = [0, 256], sizes = [8, 128], strides = [1, 1]} : vector<8x384xf32> to vector<8x128xf32>
      %178 = vector.extract_strided_slice %166 {offsets = [0, 256], sizes = [8, 128], strides = [1, 1]} : vector<8x384xf32> to vector<8x128xf32>
      %179 = arith.addf %178, %16 : vector<8x128xf32>
      %180 = arith.mulf %175, %179 : vector<8x128xf32>
      %181 = arith.addf %177, %180 : vector<8x128xf32>
      %182 = math.tanh %181 : vector<8x128xf32>
      %cst_88 = arith.constant 1.000000e+00 : f32
      %183 = vector.broadcast %cst_88 : f32 to vector<8x128xf32>
      %184 = arith.subf %183, %176 : vector<8x128xf32>
      %185 = arith.subf %182, %155 : vector<8x128xf32>
      %186 = arith.mulf %184, %185 : vector<8x128xf32>
      %187 = arith.addf %155, %186 : vector<8x128xf32>
      %188 = arith.truncf %187 : vector<8x128xf32> to vector<8x128xbf16>
      %189 = arith.addi %56, %c3_i32 : i32
      %190 = arith.index_cast %189 : i32 to index
      %c0_89 = arith.constant 0 : index
      %c0_90 = arith.constant 0 : index
      %191 = vector.load %arg9[%190, %c0_89, %c0_90] : memref<8x8x128xbf16, #tpu.memory_space<vmem>>, vector<1x8x128xbf16>
      %192 = vector.shape_cast %191 : vector<1x8x128xbf16> to vector<8x128xbf16>
      %193 = vector.shape_cast %188 : vector<8x128xbf16> to vector<1x8x128xbf16>
      tpu.vector_store %arg9[%190, %c0_89, %c0_90], %193 {strides = array<i32>} : memref<8x8x128xbf16, #tpu.memory_space<vmem>>, vector<1x8x128xbf16>,
      %c4_i32 = arith.constant 4 : i32
      %194 = arith.index_cast %c4_i32 : i32 to index
      %c0_91 = arith.constant 0 : index
      %c0_92 = arith.constant 0 : index
      %195 = vector.load %arg10[%194, %c0_91, %c0_92] : memref<8x8x384xf32, #tpu.memory_space<vmem>>, vector<1x8x384xf32>
      %196 = vector.shape_cast %195 : vector<1x8x384xf32> to vector<8x384xf32>
      %197 = arith.truncf %187 : vector<8x128xf32> to vector<8x128xbf16>
      %cst_93 = arith.constant dense<0.000000e+00> : vector<8x384xf32>
      %198 = tpu.matmul %197, %10, %cst_93 {dimension_numbers = #tpu.dot_dimension_numbers<[1], [0], [0], [1], [0, 0, 1, 1], [], []>} : vector<8x128xbf16>, vector<128x384xbf16>, vector<8x384xf32> -> vector<8x384xf32>
      %199 = vector.extract_strided_slice %196 {offsets = [0, 0], sizes = [8, 256], strides = [1, 1]} : vector<8x384xf32> to vector<8x256xf32>
      %200 = vector.extract_strided_slice %198 {offsets = [0, 0], sizes = [8, 256], strides = [1, 1]} : vector<8x384xf32> to vector<8x256xf32>
      %201 = arith.addf %199, %200 : vector<8x256xf32>
      %202 = arith.negf %201 : vector<8x256xf32>
      %203 = math.exp %202 : vector<8x256xf32>
      %cst_94 = arith.constant 1.000000e+00 : f32
      %204 = vector.broadcast %cst_94 : f32 to vector<8x256xf32>
      %205 = arith.addf %204, %203 : vector<8x256xf32>
      %206 = arith.divf %204, %205 : vector<8x256xf32>
      %207 = vector.extract_strided_slice %206 {offsets = [0, 0], sizes = [8, 128], strides = [1, 1]} : vector<8x256xf32> to vector<8x128xf32>
      %208 = vector.extract_strided_slice %206 {offsets = [0, 128], sizes = [8, 128], strides = [1, 1]} : vector<8x256xf32> to vector<8x128xf32>
      %209 = vector.extract_strided_slice %196 {offsets = [0, 256], sizes = [8, 128], strides = [1, 1]} : vector<8x384xf32> to vector<8x128xf32>
      %210 = vector.extract_strided_slice %198 {offsets = [0, 256], sizes = [8, 128], strides = [1, 1]} : vector<8x384xf32> to vector<8x128xf32>
      %211 = arith.addf %210, %16 : vector<8x128xf32>
      %212 = arith.mulf %207, %211 : vector<8x128xf32>
      %213 = arith.addf %209, %212 : vector<8x128xf32>
      %214 = math.tanh %213 : vector<8x128xf32>
      %cst_95 = arith.constant 1.000000e+00 : f32
      %215 = vector.broadcast %cst_95 : f32 to vector<8x128xf32>
      %216 = arith.subf %215, %208 : vector<8x128xf32>
      %217 = arith.subf %214, %187 : vector<8x128xf32>
      %218 = arith.mulf %216, %217 : vector<8x128xf32>
      %219 = arith.addf %187, %218 : vector<8x128xf32>
      %220 = arith.truncf %219 : vector<8x128xf32> to vector<8x128xbf16>
      %221 = arith.addi %56, %c4_i32 : i32
      %222 = arith.index_cast %221 : i32 to index
      %c0_96 = arith.constant 0 : index
      %c0_97 = arith.constant 0 : index
      %223 = vector.load %arg9[%222, %c0_96, %c0_97] : memref<8x8x128xbf16, #tpu.memory_space<vmem>>, vector<1x8x128xbf16>
      %224 = vector.shape_cast %223 : vector<1x8x128xbf16> to vector<8x128xbf16>
      %225 = vector.shape_cast %220 : vector<8x128xbf16> to vector<1x8x128xbf16>
      tpu.vector_store %arg9[%222, %c0_96, %c0_97], %225 {strides = array<i32>} : memref<8x8x128xbf16, #tpu.memory_space<vmem>>, vector<1x8x128xbf16>,
      %c5_i32 = arith.constant 5 : i32
      %226 = arith.index_cast %c5_i32 : i32 to index
      %c0_98 = arith.constant 0 : index
      %c0_99 = arith.constant 0 : index
      %227 = vector.load %arg10[%226, %c0_98, %c0_99] : memref<8x8x384xf32, #tpu.memory_space<vmem>>, vector<1x8x384xf32>
      %228 = vector.shape_cast %227 : vector<1x8x384xf32> to vector<8x384xf32>
      %229 = arith.truncf %219 : vector<8x128xf32> to vector<8x128xbf16>
      %cst_100 = arith.constant dense<0.000000e+00> : vector<8x384xf32>
      %230 = tpu.matmul %229, %10, %cst_100 {dimension_numbers = #tpu.dot_dimension_numbers<[1], [0], [0], [1], [0, 0, 1, 1], [], []>} : vector<8x128xbf16>, vector<128x384xbf16>, vector<8x384xf32> -> vector<8x384xf32>
      %231 = vector.extract_strided_slice %228 {offsets = [0, 0], sizes = [8, 256], strides = [1, 1]} : vector<8x384xf32> to vector<8x256xf32>
      %232 = vector.extract_strided_slice %230 {offsets = [0, 0], sizes = [8, 256], strides = [1, 1]} : vector<8x384xf32> to vector<8x256xf32>
      %233 = arith.addf %231, %232 : vector<8x256xf32>
      %234 = arith.negf %233 : vector<8x256xf32>
      %235 = math.exp %234 : vector<8x256xf32>
      %cst_101 = arith.constant 1.000000e+00 : f32
      %236 = vector.broadcast %cst_101 : f32 to vector<8x256xf32>
      %237 = arith.addf %236, %235 : vector<8x256xf32>
      %238 = arith.divf %236, %237 : vector<8x256xf32>
      %239 = vector.extract_strided_slice %238 {offsets = [0, 0], sizes = [8, 128], strides = [1, 1]} : vector<8x256xf32> to vector<8x128xf32>
      %240 = vector.extract_strided_slice %238 {offsets = [0, 128], sizes = [8, 128], strides = [1, 1]} : vector<8x256xf32> to vector<8x128xf32>
      %241 = vector.extract_strided_slice %228 {offsets = [0, 256], sizes = [8, 128], strides = [1, 1]} : vector<8x384xf32> to vector<8x128xf32>
      %242 = vector.extract_strided_slice %230 {offsets = [0, 256], sizes = [8, 128], strides = [1, 1]} : vector<8x384xf32> to vector<8x128xf32>
      %243 = arith.addf %242, %16 : vector<8x128xf32>
      %244 = arith.mulf %239, %243 : vector<8x128xf32>
      %245 = arith.addf %241, %244 : vector<8x128xf32>
      %246 = math.tanh %245 : vector<8x128xf32>
      %cst_102 = arith.constant 1.000000e+00 : f32
      %247 = vector.broadcast %cst_102 : f32 to vector<8x128xf32>
      %248 = arith.subf %247, %240 : vector<8x128xf32>
      %249 = arith.subf %246, %219 : vector<8x128xf32>
      %250 = arith.mulf %248, %249 : vector<8x128xf32>
      %251 = arith.addf %219, %250 : vector<8x128xf32>
      %252 = arith.truncf %251 : vector<8x128xf32> to vector<8x128xbf16>
      %253 = arith.addi %56, %c5_i32 : i32
      %254 = arith.index_cast %253 : i32 to index
      %c0_103 = arith.constant 0 : index
      %c0_104 = arith.constant 0 : index
      %255 = vector.load %arg9[%254, %c0_103, %c0_104] : memref<8x8x128xbf16, #tpu.memory_space<vmem>>, vector<1x8x128xbf16>
      %256 = vector.shape_cast %255 : vector<1x8x128xbf16> to vector<8x128xbf16>
      %257 = vector.shape_cast %252 : vector<8x128xbf16> to vector<1x8x128xbf16>
      tpu.vector_store %arg9[%254, %c0_103, %c0_104], %257 {strides = array<i32>} : memref<8x8x128xbf16, #tpu.memory_space<vmem>>, vector<1x8x128xbf16>,
      %c6_i32 = arith.constant 6 : i32
      %258 = arith.index_cast %c6_i32 : i32 to index
      %c0_105 = arith.constant 0 : index
      %c0_106 = arith.constant 0 : index
      %259 = vector.load %arg10[%258, %c0_105, %c0_106] : memref<8x8x384xf32, #tpu.memory_space<vmem>>, vector<1x8x384xf32>
      %260 = vector.shape_cast %259 : vector<1x8x384xf32> to vector<8x384xf32>
      %261 = arith.truncf %251 : vector<8x128xf32> to vector<8x128xbf16>
      %cst_107 = arith.constant dense<0.000000e+00> : vector<8x384xf32>
      %262 = tpu.matmul %261, %10, %cst_107 {dimension_numbers = #tpu.dot_dimension_numbers<[1], [0], [0], [1], [0, 0, 1, 1], [], []>} : vector<8x128xbf16>, vector<128x384xbf16>, vector<8x384xf32> -> vector<8x384xf32>
      %263 = vector.extract_strided_slice %260 {offsets = [0, 0], sizes = [8, 256], strides = [1, 1]} : vector<8x384xf32> to vector<8x256xf32>
      %264 = vector.extract_strided_slice %262 {offsets = [0, 0], sizes = [8, 256], strides = [1, 1]} : vector<8x384xf32> to vector<8x256xf32>
      %265 = arith.addf %263, %264 : vector<8x256xf32>
      %266 = arith.negf %265 : vector<8x256xf32>
      %267 = math.exp %266 : vector<8x256xf32>
      %cst_108 = arith.constant 1.000000e+00 : f32
      %268 = vector.broadcast %cst_108 : f32 to vector<8x256xf32>
      %269 = arith.addf %268, %267 : vector<8x256xf32>
      %270 = arith.divf %268, %269 : vector<8x256xf32>
      %271 = vector.extract_strided_slice %270 {offsets = [0, 0], sizes = [8, 128], strides = [1, 1]} : vector<8x256xf32> to vector<8x128xf32>
      %272 = vector.extract_strided_slice %270 {offsets = [0, 128], sizes = [8, 128], strides = [1, 1]} : vector<8x256xf32> to vector<8x128xf32>
      %273 = vector.extract_strided_slice %260 {offsets = [0, 256], sizes = [8, 128], strides = [1, 1]} : vector<8x384xf32> to vector<8x128xf32>
      %274 = vector.extract_strided_slice %262 {offsets = [0, 256], sizes = [8, 128], strides = [1, 1]} : vector<8x384xf32> to vector<8x128xf32>
      %275 = arith.addf %274, %16 : vector<8x128xf32>
      %276 = arith.mulf %271, %275 : vector<8x128xf32>
      %277 = arith.addf %273, %276 : vector<8x128xf32>
      %278 = math.tanh %277 : vector<8x128xf32>
      %cst_109 = arith.constant 1.000000e+00 : f32
      %279 = vector.broadcast %cst_109 : f32 to vector<8x128xf32>
      %280 = arith.subf %279, %272 : vector<8x128xf32>
      %281 = arith.subf %278, %251 : vector<8x128xf32>
      %282 = arith.mulf %280, %281 : vector<8x128xf32>
      %283 = arith.addf %251, %282 : vector<8x128xf32>
      %284 = arith.truncf %283 : vector<8x128xf32> to vector<8x128xbf16>
      %285 = arith.addi %56, %c6_i32 : i32
      %286 = arith.index_cast %285 : i32 to index
      %c0_110 = arith.constant 0 : index
      %c0_111 = arith.constant 0 : index
      %287 = vector.load %arg9[%286, %c0_110, %c0_111] : memref<8x8x128xbf16, #tpu.memory_space<vmem>>, vector<1x8x128xbf16>
      %288 = vector.shape_cast %287 : vector<1x8x128xbf16> to vector<8x128xbf16>
      %289 = vector.shape_cast %284 : vector<8x128xbf16> to vector<1x8x128xbf16>
      tpu.vector_store %arg9[%286, %c0_110, %c0_111], %289 {strides = array<i32>} : memref<8x8x128xbf16, #tpu.memory_space<vmem>>, vector<1x8x128xbf16>,
      %c7_i32_112 = arith.constant 7 : i32
      %290 = arith.index_cast %c7_i32_112 : i32 to index
      %c0_113 = arith.constant 0 : index
      %c0_114 = arith.constant 0 : index
      %291 = vector.load %arg10[%290, %c0_113, %c0_114] : memref<8x8x384xf32, #tpu.memory_space<vmem>>, vector<1x8x384xf32>
      %292 = vector.shape_cast %291 : vector<1x8x384xf32> to vector<8x384xf32>
      %293 = arith.truncf %283 : vector<8x128xf32> to vector<8x128xbf16>
      %cst_115 = arith.constant dense<0.000000e+00> : vector<8x384xf32>
      %294 = tpu.matmul %293, %10, %cst_115 {dimension_numbers = #tpu.dot_dimension_numbers<[1], [0], [0], [1], [0, 0, 1, 1], [], []>} : vector<8x128xbf16>, vector<128x384xbf16>, vector<8x384xf32> -> vector<8x384xf32>
      %295 = vector.extract_strided_slice %292 {offsets = [0, 0], sizes = [8, 256], strides = [1, 1]} : vector<8x384xf32> to vector<8x256xf32>
      %296 = vector.extract_strided_slice %294 {offsets = [0, 0], sizes = [8, 256], strides = [1, 1]} : vector<8x384xf32> to vector<8x256xf32>
      %297 = arith.addf %295, %296 : vector<8x256xf32>
      %298 = arith.negf %297 : vector<8x256xf32>
      %299 = math.exp %298 : vector<8x256xf32>
      %cst_116 = arith.constant 1.000000e+00 : f32
      %300 = vector.broadcast %cst_116 : f32 to vector<8x256xf32>
      %301 = arith.addf %300, %299 : vector<8x256xf32>
      %302 = arith.divf %300, %301 : vector<8x256xf32>
      %303 = vector.extract_strided_slice %302 {offsets = [0, 0], sizes = [8, 128], strides = [1, 1]} : vector<8x256xf32> to vector<8x128xf32>
      %304 = vector.extract_strided_slice %302 {offsets = [0, 128], sizes = [8, 128], strides = [1, 1]} : vector<8x256xf32> to vector<8x128xf32>
      %305 = vector.extract_strided_slice %292 {offsets = [0, 256], sizes = [8, 128], strides = [1, 1]} : vector<8x384xf32> to vector<8x128xf32>
      %306 = vector.extract_strided_slice %294 {offsets = [0, 256], sizes = [8, 128], strides = [1, 1]} : vector<8x384xf32> to vector<8x128xf32>
      %307 = arith.addf %306, %16 : vector<8x128xf32>
      %308 = arith.mulf %303, %307 : vector<8x128xf32>
      %309 = arith.addf %305, %308 : vector<8x128xf32>
      %310 = math.tanh %309 : vector<8x128xf32>
      %cst_117 = arith.constant 1.000000e+00 : f32
      %311 = vector.broadcast %cst_117 : f32 to vector<8x128xf32>
      %312 = arith.subf %311, %304 : vector<8x128xf32>
      %313 = arith.subf %310, %283 : vector<8x128xf32>
      %314 = arith.mulf %312, %313 : vector<8x128xf32>
      %315 = arith.addf %283, %314 : vector<8x128xf32>
      %316 = arith.truncf %315 : vector<8x128xf32> to vector<8x128xbf16>
      %317 = arith.addi %56, %c7_i32_112 : i32
      %318 = arith.index_cast %317 : i32 to index
      %c0_118 = arith.constant 0 : index
      %c0_119 = arith.constant 0 : index
      %319 = vector.load %arg9[%318, %c0_118, %c0_119] : memref<8x8x128xbf16, #tpu.memory_space<vmem>>, vector<1x8x128xbf16>
      %320 = vector.shape_cast %319 : vector<1x8x128xbf16> to vector<8x128xbf16>
      %321 = vector.shape_cast %316 : vector<8x128xbf16> to vector<1x8x128xbf16>
      tpu.vector_store %arg9[%318, %c0_118, %c0_119], %321 {strides = array<i32>} : memref<8x8x128xbf16, #tpu.memory_space<vmem>>, vector<1x8x128xbf16>,
      %c8_i32_120 = arith.constant 8 : i32
      %c0_121 = arith.constant 0 : index
      %c0_122 = arith.constant 0 : index
      %322 = vector.load %arg11[%c0_121, %c0_122] : memref<8x128xf32, #tpu.memory_space<vmem>>, vector<8x128xf32>
      tpu.vector_store %arg11[%c0_121, %c0_122], %315 {strides = array<i32>} : memref<8x128xf32, #tpu.memory_space<vmem>>, vector<8x128xf32>,
    }
    %c1 = arith.constant 1 : index
    %c0_24 = arith.constant 0 : index
    %c0_25 = arith.constant 0 : index
    %25 = vector.load %arg4[%c1, %c0_24, %c0_25] : memref<2x128x384xbf16, #tpu.memory_space<vmem>>, vector<1x128x384xbf16>
    %26 = vector.shape_cast %25 : vector<1x128x384xbf16> to vector<128x384xbf16>
    %c1_26 = arith.constant 1 : index
    %c0_27 = arith.constant 0 : index
    %c0_28 = arith.constant 0 : index
    %27 = vector.load %arg5[%c1_26, %c0_27, %c0_28] : memref<2x128x384xbf16, #tpu.memory_space<vmem>>, vector<1x128x384xbf16>
    %28 = vector.shape_cast %27 : vector<1x128x384xbf16> to vector<128x384xbf16>
    %c1_29 = arith.constant 1 : index
    %c0_30 = arith.constant 0 : index
    %c0_31 = arith.constant 0 : index
    %29 = vector.load %arg6[%c1_29, %c0_30, %c0_31] : memref<2x1x384xf32, #tpu.memory_space<vmem>>, vector<1x1x384xf32>
    %30 = vector.shape_cast %29 : vector<1x1x384xf32> to vector<1x384xf32>
    %c1_32 = arith.constant 1 : index
    %c0_33 = arith.constant 0 : index
    %c0_34 = arith.constant 0 : index
    %31 = vector.load %arg7[%c1_32, %c0_33, %c0_34] : memref<2x1x128xf32, #tpu.memory_space<vmem>>, vector<1x1x128xf32>
    %32 = vector.shape_cast %31 : vector<1x1x128xf32> to vector<1x128xf32>
    %33 = vector.shape_cast %32 : vector<1x128xf32> to vector<1x128xf32>
    %34 = vector.broadcast %33 : vector<1x128xf32> to vector<8x128xf32>
    %cst_35 = arith.constant 0.000000e+00 : f32
    %35 = vector.broadcast %cst_35 : f32 to vector<8x128xf32>
    %c0_36 = arith.constant 0 : index
    %c0_37 = arith.constant 0 : index
    %36 = vector.load %arg11[%c0_36, %c0_37] : memref<8x128xf32, #tpu.memory_space<vmem>>, vector<8x128xf32>
    tpu.vector_store %arg11[%c0_36, %c0_37], %35 {strides = array<i32>} : memref<8x128xf32, #tpu.memory_space<vmem>>, vector<8x128xf32>,
    %c0_i32_38 = arith.constant 0 : i32
    %37 = arith.subi %3, %c0_i32_38 : i32
    %c1_i32_39 = arith.constant 1 : i32
    %c1_i32_40 = arith.constant 1 : i32
    %38 = arith.subi %c1_i32_39, %c1_i32_40 : i32
    %39 = arith.addi %37, %38 : i32
    %c1_i32_41 = arith.constant 1 : i32
    %40 = arith.divsi %39, %c1_i32_41 : i32
    %c1_i32_42 = arith.constant 1 : i32
    %c0_i32_43 = arith.constant 0 : i32
    %c0_i32_44 = arith.constant 0 : i32
    %41 = arith.subi %40, %c0_i32_44 : i32
    %42 = arith.addi %c0_i32_44, %41 : i32
    %c1_i32_45 = arith.constant 1 : i32
    scf.for %arg13 = %c0_i32_44 to %42 step %c1_i32_45  : i32 {
      %53 = arith.muli %arg13, %c1_i32_42 : i32
      %54 = arith.addi %c0_i32_43, %53 : i32
      %c8_i32_52 = arith.constant 8 : i32
      %55 = arith.muli %54, %c8_i32_52 : i32
      %56 = tpu.assume_multiple %55, 8 : i32
      %57 = arith.index_cast %56 : i32 to index
      %c0_53 = arith.constant 0 : index
      %c0_54 = arith.constant 0 : index
      %58 = vector.load %arg9[%57, %c0_53, %c0_54] : memref<8x8x128xbf16, #tpu.memory_space<vmem>>, vector<8x8x128xbf16>
      %59 = vector.shape_cast %58 : vector<8x8x128xbf16> to vector<64x128xbf16>
      %cst_55 = arith.constant dense<0.000000e+00> : vector<64x384xf32>
      %60 = tpu.matmul %59, %26, %cst_55 {dimension_numbers = #tpu.dot_dimension_numbers<[1], [0], [0], [1], [0, 0, 1, 1], [], []>} : vector<64x128xbf16>, vector<128x384xbf16>, vector<64x384xf32> -> vector<64x384xf32>
      %61 = vector.broadcast %30 : vector<1x384xf32> to vector<64x384xf32>
      %62 = arith.addf %60, %61 : vector<64x384xf32>
      %63 = vector.shape_cast %62 : vector<64x384xf32> to vector<8x8x384xf32>
      %c0_56 = arith.constant 0 : index
      %c0_57 = arith.constant 0 : index
      %c0_58 = arith.constant 0 : index
      %64 = vector.load %arg10[%c0_56, %c0_57, %c0_58] : memref<8x8x384xf32, #tpu.memory_space<vmem>>, vector<8x8x384xf32>
      tpu.vector_store %arg10[%c0_56, %c0_57, %c0_58], %63 {strides = array<i32>} : memref<8x8x384xf32, #tpu.memory_space<vmem>>, vector<8x8x384xf32>,
      %c0_59 = arith.constant 0 : index
      %c0_60 = arith.constant 0 : index
      %65 = vector.load %arg11[%c0_59, %c0_60] : memref<8x128xf32, #tpu.memory_space<vmem>>, vector<8x128xf32>
      %c0_61 = arith.constant 0 : index
      %c0_62 = arith.constant 0 : index
      %66 = vector.load %arg12[%c0_61, %c0_62] : memref<8x128xf32, #tpu.memory_space<vmem>>, vector<8x128xf32>
      %c0_i32_63 = arith.constant 0 : i32
      %67 = arith.index_cast %c0_i32_63 : i32 to index
      %c0_64 = arith.constant 0 : index
      %c0_65 = arith.constant 0 : index
      %68 = vector.load %arg10[%67, %c0_64, %c0_65] : memref<8x8x384xf32, #tpu.memory_space<vmem>>, vector<1x8x384xf32>
      %69 = vector.shape_cast %68 : vector<1x8x384xf32> to vector<8x384xf32>
      %70 = arith.truncf %65 : vector<8x128xf32> to vector<8x128xbf16>
      %cst_66 = arith.constant dense<0.000000e+00> : vector<8x384xf32>
      %71 = tpu.matmul %70, %28, %cst_66 {dimension_numbers = #tpu.dot_dimension_numbers<[1], [0], [0], [1], [0, 0, 1, 1], [], []>} : vector<8x128xbf16>, vector<128x384xbf16>, vector<8x384xf32> -> vector<8x384xf32>
      %72 = vector.extract_strided_slice %69 {offsets = [0, 0], sizes = [8, 256], strides = [1, 1]} : vector<8x384xf32> to vector<8x256xf32>
      %73 = vector.extract_strided_slice %71 {offsets = [0, 0], sizes = [8, 256], strides = [1, 1]} : vector<8x384xf32> to vector<8x256xf32>
      %74 = arith.addf %72, %73 : vector<8x256xf32>
      %75 = arith.negf %74 : vector<8x256xf32>
      %76 = math.exp %75 : vector<8x256xf32>
      %cst_67 = arith.constant 1.000000e+00 : f32
      %77 = vector.broadcast %cst_67 : f32 to vector<8x256xf32>
      %78 = arith.addf %77, %76 : vector<8x256xf32>
      %79 = arith.divf %77, %78 : vector<8x256xf32>
      %80 = vector.extract_strided_slice %79 {offsets = [0, 0], sizes = [8, 128], strides = [1, 1]} : vector<8x256xf32> to vector<8x128xf32>
      %81 = vector.extract_strided_slice %79 {offsets = [0, 128], sizes = [8, 128], strides = [1, 1]} : vector<8x256xf32> to vector<8x128xf32>
      %82 = vector.extract_strided_slice %69 {offsets = [0, 256], sizes = [8, 128], strides = [1, 1]} : vector<8x384xf32> to vector<8x128xf32>
      %83 = vector.extract_strided_slice %71 {offsets = [0, 256], sizes = [8, 128], strides = [1, 1]} : vector<8x384xf32> to vector<8x128xf32>
      %84 = arith.addf %83, %34 : vector<8x128xf32>
      %85 = arith.mulf %80, %84 : vector<8x128xf32>
      %86 = arith.addf %82, %85 : vector<8x128xf32>
      %87 = math.tanh %86 : vector<8x128xf32>
      %cst_68 = arith.constant 1.000000e+00 : f32
      %88 = vector.broadcast %cst_68 : f32 to vector<8x128xf32>
      %89 = arith.subf %88, %81 : vector<8x128xf32>
      %90 = arith.subf %87, %65 : vector<8x128xf32>
      %91 = arith.mulf %89, %90 : vector<8x128xf32>
      %92 = arith.addf %65, %91 : vector<8x128xf32>
      %93 = arith.addi %56, %c0_i32_63 : i32
      %94 = vector.broadcast %93 : i32 to vector<8x1xi32>
      %95 = arith.cmpi eq, %4, %94 : vector<8x1xi32>
      %96 = vector.shape_cast %95 : vector<8x1xi1> to vector<8x1xi1>
      %97 = vector.broadcast %96 : vector<8x1xi1> to vector<8x128xi1>
      %98 = arith.select %97, %92, %66 : vector<8x128xi1>, vector<8x128xf32>
      %c1_i32_69 = arith.constant 1 : i32
      %99 = arith.index_cast %c1_i32_69 : i32 to index
      %c0_70 = arith.constant 0 : index
      %c0_71 = arith.constant 0 : index
      %100 = vector.load %arg10[%99, %c0_70, %c0_71] : memref<8x8x384xf32, #tpu.memory_space<vmem>>, vector<1x8x384xf32>
      %101 = vector.shape_cast %100 : vector<1x8x384xf32> to vector<8x384xf32>
      %102 = arith.truncf %92 : vector<8x128xf32> to vector<8x128xbf16>
      %cst_72 = arith.constant dense<0.000000e+00> : vector<8x384xf32>
      %103 = tpu.matmul %102, %28, %cst_72 {dimension_numbers = #tpu.dot_dimension_numbers<[1], [0], [0], [1], [0, 0, 1, 1], [], []>} : vector<8x128xbf16>, vector<128x384xbf16>, vector<8x384xf32> -> vector<8x384xf32>
      %104 = vector.extract_strided_slice %101 {offsets = [0, 0], sizes = [8, 256], strides = [1, 1]} : vector<8x384xf32> to vector<8x256xf32>
      %105 = vector.extract_strided_slice %103 {offsets = [0, 0], sizes = [8, 256], strides = [1, 1]} : vector<8x384xf32> to vector<8x256xf32>
      %106 = arith.addf %104, %105 : vector<8x256xf32>
      %107 = arith.negf %106 : vector<8x256xf32>
      %108 = math.exp %107 : vector<8x256xf32>
      %cst_73 = arith.constant 1.000000e+00 : f32
      %109 = vector.broadcast %cst_73 : f32 to vector<8x256xf32>
      %110 = arith.addf %109, %108 : vector<8x256xf32>
      %111 = arith.divf %109, %110 : vector<8x256xf32>
      %112 = vector.extract_strided_slice %111 {offsets = [0, 0], sizes = [8, 128], strides = [1, 1]} : vector<8x256xf32> to vector<8x128xf32>
      %113 = vector.extract_strided_slice %111 {offsets = [0, 128], sizes = [8, 128], strides = [1, 1]} : vector<8x256xf32> to vector<8x128xf32>
      %114 = vector.extract_strided_slice %101 {offsets = [0, 256], sizes = [8, 128], strides = [1, 1]} : vector<8x384xf32> to vector<8x128xf32>
      %115 = vector.extract_strided_slice %103 {offsets = [0, 256], sizes = [8, 128], strides = [1, 1]} : vector<8x384xf32> to vector<8x128xf32>
      %116 = arith.addf %115, %34 : vector<8x128xf32>
      %117 = arith.mulf %112, %116 : vector<8x128xf32>
      %118 = arith.addf %114, %117 : vector<8x128xf32>
      %119 = math.tanh %118 : vector<8x128xf32>
      %cst_74 = arith.constant 1.000000e+00 : f32
      %120 = vector.broadcast %cst_74 : f32 to vector<8x128xf32>
      %121 = arith.subf %120, %113 : vector<8x128xf32>
      %122 = arith.subf %119, %92 : vector<8x128xf32>
      %123 = arith.mulf %121, %122 : vector<8x128xf32>
      %124 = arith.addf %92, %123 : vector<8x128xf32>
      %125 = arith.addi %56, %c1_i32_69 : i32
      %126 = vector.broadcast %125 : i32 to vector<8x1xi32>
      %127 = arith.cmpi eq, %4, %126 : vector<8x1xi32>
      %128 = vector.shape_cast %127 : vector<8x1xi1> to vector<8x1xi1>
      %129 = vector.broadcast %128 : vector<8x1xi1> to vector<8x128xi1>
      %130 = arith.select %129, %124, %98 : vector<8x128xi1>, vector<8x128xf32>
      %c2_i32 = arith.constant 2 : i32
      %131 = arith.index_cast %c2_i32 : i32 to index
      %c0_75 = arith.constant 0 : index
      %c0_76 = arith.constant 0 : index
      %132 = vector.load %arg10[%131, %c0_75, %c0_76] : memref<8x8x384xf32, #tpu.memory_space<vmem>>, vector<1x8x384xf32>
      %133 = vector.shape_cast %132 : vector<1x8x384xf32> to vector<8x384xf32>
      %134 = arith.truncf %124 : vector<8x128xf32> to vector<8x128xbf16>
      %cst_77 = arith.constant dense<0.000000e+00> : vector<8x384xf32>
      %135 = tpu.matmul %134, %28, %cst_77 {dimension_numbers = #tpu.dot_dimension_numbers<[1], [0], [0], [1], [0, 0, 1, 1], [], []>} : vector<8x128xbf16>, vector<128x384xbf16>, vector<8x384xf32> -> vector<8x384xf32>
      %136 = vector.extract_strided_slice %133 {offsets = [0, 0], sizes = [8, 256], strides = [1, 1]} : vector<8x384xf32> to vector<8x256xf32>
      %137 = vector.extract_strided_slice %135 {offsets = [0, 0], sizes = [8, 256], strides = [1, 1]} : vector<8x384xf32> to vector<8x256xf32>
      %138 = arith.addf %136, %137 : vector<8x256xf32>
      %139 = arith.negf %138 : vector<8x256xf32>
      %140 = math.exp %139 : vector<8x256xf32>
      %cst_78 = arith.constant 1.000000e+00 : f32
      %141 = vector.broadcast %cst_78 : f32 to vector<8x256xf32>
      %142 = arith.addf %141, %140 : vector<8x256xf32>
      %143 = arith.divf %141, %142 : vector<8x256xf32>
      %144 = vector.extract_strided_slice %143 {offsets = [0, 0], sizes = [8, 128], strides = [1, 1]} : vector<8x256xf32> to vector<8x128xf32>
      %145 = vector.extract_strided_slice %143 {offsets = [0, 128], sizes = [8, 128], strides = [1, 1]} : vector<8x256xf32> to vector<8x128xf32>
      %146 = vector.extract_strided_slice %133 {offsets = [0, 256], sizes = [8, 128], strides = [1, 1]} : vector<8x384xf32> to vector<8x128xf32>
      %147 = vector.extract_strided_slice %135 {offsets = [0, 256], sizes = [8, 128], strides = [1, 1]} : vector<8x384xf32> to vector<8x128xf32>
      %148 = arith.addf %147, %34 : vector<8x128xf32>
      %149 = arith.mulf %144, %148 : vector<8x128xf32>
      %150 = arith.addf %146, %149 : vector<8x128xf32>
      %151 = math.tanh %150 : vector<8x128xf32>
      %cst_79 = arith.constant 1.000000e+00 : f32
      %152 = vector.broadcast %cst_79 : f32 to vector<8x128xf32>
      %153 = arith.subf %152, %145 : vector<8x128xf32>
      %154 = arith.subf %151, %124 : vector<8x128xf32>
      %155 = arith.mulf %153, %154 : vector<8x128xf32>
      %156 = arith.addf %124, %155 : vector<8x128xf32>
      %157 = arith.addi %56, %c2_i32 : i32
      %158 = vector.broadcast %157 : i32 to vector<8x1xi32>
      %159 = arith.cmpi eq, %4, %158 : vector<8x1xi32>
      %160 = vector.shape_cast %159 : vector<8x1xi1> to vector<8x1xi1>
      %161 = vector.broadcast %160 : vector<8x1xi1> to vector<8x128xi1>
      %162 = arith.select %161, %156, %130 : vector<8x128xi1>, vector<8x128xf32>
      %c3_i32 = arith.constant 3 : i32
      %163 = arith.index_cast %c3_i32 : i32 to index
      %c0_80 = arith.constant 0 : index
      %c0_81 = arith.constant 0 : index
      %164 = vector.load %arg10[%163, %c0_80, %c0_81] : memref<8x8x384xf32, #tpu.memory_space<vmem>>, vector<1x8x384xf32>
      %165 = vector.shape_cast %164 : vector<1x8x384xf32> to vector<8x384xf32>
      %166 = arith.truncf %156 : vector<8x128xf32> to vector<8x128xbf16>
      %cst_82 = arith.constant dense<0.000000e+00> : vector<8x384xf32>
      %167 = tpu.matmul %166, %28, %cst_82 {dimension_numbers = #tpu.dot_dimension_numbers<[1], [0], [0], [1], [0, 0, 1, 1], [], []>} : vector<8x128xbf16>, vector<128x384xbf16>, vector<8x384xf32> -> vector<8x384xf32>
      %168 = vector.extract_strided_slice %165 {offsets = [0, 0], sizes = [8, 256], strides = [1, 1]} : vector<8x384xf32> to vector<8x256xf32>
      %169 = vector.extract_strided_slice %167 {offsets = [0, 0], sizes = [8, 256], strides = [1, 1]} : vector<8x384xf32> to vector<8x256xf32>
      %170 = arith.addf %168, %169 : vector<8x256xf32>
      %171 = arith.negf %170 : vector<8x256xf32>
      %172 = math.exp %171 : vector<8x256xf32>
      %cst_83 = arith.constant 1.000000e+00 : f32
      %173 = vector.broadcast %cst_83 : f32 to vector<8x256xf32>
      %174 = arith.addf %173, %172 : vector<8x256xf32>
      %175 = arith.divf %173, %174 : vector<8x256xf32>
      %176 = vector.extract_strided_slice %175 {offsets = [0, 0], sizes = [8, 128], strides = [1, 1]} : vector<8x256xf32> to vector<8x128xf32>
      %177 = vector.extract_strided_slice %175 {offsets = [0, 128], sizes = [8, 128], strides = [1, 1]} : vector<8x256xf32> to vector<8x128xf32>
      %178 = vector.extract_strided_slice %165 {offsets = [0, 256], sizes = [8, 128], strides = [1, 1]} : vector<8x384xf32> to vector<8x128xf32>
      %179 = vector.extract_strided_slice %167 {offsets = [0, 256], sizes = [8, 128], strides = [1, 1]} : vector<8x384xf32> to vector<8x128xf32>
      %180 = arith.addf %179, %34 : vector<8x128xf32>
      %181 = arith.mulf %176, %180 : vector<8x128xf32>
      %182 = arith.addf %178, %181 : vector<8x128xf32>
      %183 = math.tanh %182 : vector<8x128xf32>
      %cst_84 = arith.constant 1.000000e+00 : f32
      %184 = vector.broadcast %cst_84 : f32 to vector<8x128xf32>
      %185 = arith.subf %184, %177 : vector<8x128xf32>
      %186 = arith.subf %183, %156 : vector<8x128xf32>
      %187 = arith.mulf %185, %186 : vector<8x128xf32>
      %188 = arith.addf %156, %187 : vector<8x128xf32>
      %189 = arith.addi %56, %c3_i32 : i32
      %190 = vector.broadcast %189 : i32 to vector<8x1xi32>
      %191 = arith.cmpi eq, %4, %190 : vector<8x1xi32>
      %192 = vector.shape_cast %191 : vector<8x1xi1> to vector<8x1xi1>
      %193 = vector.broadcast %192 : vector<8x1xi1> to vector<8x128xi1>
      %194 = arith.select %193, %188, %162 : vector<8x128xi1>, vector<8x128xf32>
      %c4_i32 = arith.constant 4 : i32
      %195 = arith.index_cast %c4_i32 : i32 to index
      %c0_85 = arith.constant 0 : index
      %c0_86 = arith.constant 0 : index
      %196 = vector.load %arg10[%195, %c0_85, %c0_86] : memref<8x8x384xf32, #tpu.memory_space<vmem>>, vector<1x8x384xf32>
      %197 = vector.shape_cast %196 : vector<1x8x384xf32> to vector<8x384xf32>
      %198 = arith.truncf %188 : vector<8x128xf32> to vector<8x128xbf16>
      %cst_87 = arith.constant dense<0.000000e+00> : vector<8x384xf32>
      %199 = tpu.matmul %198, %28, %cst_87 {dimension_numbers = #tpu.dot_dimension_numbers<[1], [0], [0], [1], [0, 0, 1, 1], [], []>} : vector<8x128xbf16>, vector<128x384xbf16>, vector<8x384xf32> -> vector<8x384xf32>
      %200 = vector.extract_strided_slice %197 {offsets = [0, 0], sizes = [8, 256], strides = [1, 1]} : vector<8x384xf32> to vector<8x256xf32>
      %201 = vector.extract_strided_slice %199 {offsets = [0, 0], sizes = [8, 256], strides = [1, 1]} : vector<8x384xf32> to vector<8x256xf32>
      %202 = arith.addf %200, %201 : vector<8x256xf32>
      %203 = arith.negf %202 : vector<8x256xf32>
      %204 = math.exp %203 : vector<8x256xf32>
      %cst_88 = arith.constant 1.000000e+00 : f32
      %205 = vector.broadcast %cst_88 : f32 to vector<8x256xf32>
      %206 = arith.addf %205, %204 : vector<8x256xf32>
      %207 = arith.divf %205, %206 : vector<8x256xf32>
      %208 = vector.extract_strided_slice %207 {offsets = [0, 0], sizes = [8, 128], strides = [1, 1]} : vector<8x256xf32> to vector<8x128xf32>
      %209 = vector.extract_strided_slice %207 {offsets = [0, 128], sizes = [8, 128], strides = [1, 1]} : vector<8x256xf32> to vector<8x128xf32>
      %210 = vector.extract_strided_slice %197 {offsets = [0, 256], sizes = [8, 128], strides = [1, 1]} : vector<8x384xf32> to vector<8x128xf32>
      %211 = vector.extract_strided_slice %199 {offsets = [0, 256], sizes = [8, 128], strides = [1, 1]} : vector<8x384xf32> to vector<8x128xf32>
      %212 = arith.addf %211, %34 : vector<8x128xf32>
      %213 = arith.mulf %208, %212 : vector<8x128xf32>
      %214 = arith.addf %210, %213 : vector<8x128xf32>
      %215 = math.tanh %214 : vector<8x128xf32>
      %cst_89 = arith.constant 1.000000e+00 : f32
      %216 = vector.broadcast %cst_89 : f32 to vector<8x128xf32>
      %217 = arith.subf %216, %209 : vector<8x128xf32>
      %218 = arith.subf %215, %188 : vector<8x128xf32>
      %219 = arith.mulf %217, %218 : vector<8x128xf32>
      %220 = arith.addf %188, %219 : vector<8x128xf32>
      %221 = arith.addi %56, %c4_i32 : i32
      %222 = vector.broadcast %221 : i32 to vector<8x1xi32>
      %223 = arith.cmpi eq, %4, %222 : vector<8x1xi32>
      %224 = vector.shape_cast %223 : vector<8x1xi1> to vector<8x1xi1>
      %225 = vector.broadcast %224 : vector<8x1xi1> to vector<8x128xi1>
      %226 = arith.select %225, %220, %194 : vector<8x128xi1>, vector<8x128xf32>
      %c5_i32 = arith.constant 5 : i32
      %227 = arith.index_cast %c5_i32 : i32 to index
      %c0_90 = arith.constant 0 : index
      %c0_91 = arith.constant 0 : index
      %228 = vector.load %arg10[%227, %c0_90, %c0_91] : memref<8x8x384xf32, #tpu.memory_space<vmem>>, vector<1x8x384xf32>
      %229 = vector.shape_cast %228 : vector<1x8x384xf32> to vector<8x384xf32>
      %230 = arith.truncf %220 : vector<8x128xf32> to vector<8x128xbf16>
      %cst_92 = arith.constant dense<0.000000e+00> : vector<8x384xf32>
      %231 = tpu.matmul %230, %28, %cst_92 {dimension_numbers = #tpu.dot_dimension_numbers<[1], [0], [0], [1], [0, 0, 1, 1], [], []>} : vector<8x128xbf16>, vector<128x384xbf16>, vector<8x384xf32> -> vector<8x384xf32>
      %232 = vector.extract_strided_slice %229 {offsets = [0, 0], sizes = [8, 256], strides = [1, 1]} : vector<8x384xf32> to vector<8x256xf32>
      %233 = vector.extract_strided_slice %231 {offsets = [0, 0], sizes = [8, 256], strides = [1, 1]} : vector<8x384xf32> to vector<8x256xf32>
      %234 = arith.addf %232, %233 : vector<8x256xf32>
      %235 = arith.negf %234 : vector<8x256xf32>
      %236 = math.exp %235 : vector<8x256xf32>
      %cst_93 = arith.constant 1.000000e+00 : f32
      %237 = vector.broadcast %cst_93 : f32 to vector<8x256xf32>
      %238 = arith.addf %237, %236 : vector<8x256xf32>
      %239 = arith.divf %237, %238 : vector<8x256xf32>
      %240 = vector.extract_strided_slice %239 {offsets = [0, 0], sizes = [8, 128], strides = [1, 1]} : vector<8x256xf32> to vector<8x128xf32>
      %241 = vector.extract_strided_slice %239 {offsets = [0, 128], sizes = [8, 128], strides = [1, 1]} : vector<8x256xf32> to vector<8x128xf32>
      %242 = vector.extract_strided_slice %229 {offsets = [0, 256], sizes = [8, 128], strides = [1, 1]} : vector<8x384xf32> to vector<8x128xf32>
      %243 = vector.extract_strided_slice %231 {offsets = [0, 256], sizes = [8, 128], strides = [1, 1]} : vector<8x384xf32> to vector<8x128xf32>
      %244 = arith.addf %243, %34 : vector<8x128xf32>
      %245 = arith.mulf %240, %244 : vector<8x128xf32>
      %246 = arith.addf %242, %245 : vector<8x128xf32>
      %247 = math.tanh %246 : vector<8x128xf32>
      %cst_94 = arith.constant 1.000000e+00 : f32
      %248 = vector.broadcast %cst_94 : f32 to vector<8x128xf32>
      %249 = arith.subf %248, %241 : vector<8x128xf32>
      %250 = arith.subf %247, %220 : vector<8x128xf32>
      %251 = arith.mulf %249, %250 : vector<8x128xf32>
      %252 = arith.addf %220, %251 : vector<8x128xf32>
      %253 = arith.addi %56, %c5_i32 : i32
      %254 = vector.broadcast %253 : i32 to vector<8x1xi32>
      %255 = arith.cmpi eq, %4, %254 : vector<8x1xi32>
      %256 = vector.shape_cast %255 : vector<8x1xi1> to vector<8x1xi1>
      %257 = vector.broadcast %256 : vector<8x1xi1> to vector<8x128xi1>
      %258 = arith.select %257, %252, %226 : vector<8x128xi1>, vector<8x128xf32>
      %c6_i32 = arith.constant 6 : i32
      %259 = arith.index_cast %c6_i32 : i32 to index
      %c0_95 = arith.constant 0 : index
      %c0_96 = arith.constant 0 : index
      %260 = vector.load %arg10[%259, %c0_95, %c0_96] : memref<8x8x384xf32, #tpu.memory_space<vmem>>, vector<1x8x384xf32>
      %261 = vector.shape_cast %260 : vector<1x8x384xf32> to vector<8x384xf32>
      %262 = arith.truncf %252 : vector<8x128xf32> to vector<8x128xbf16>
      %cst_97 = arith.constant dense<0.000000e+00> : vector<8x384xf32>
      %263 = tpu.matmul %262, %28, %cst_97 {dimension_numbers = #tpu.dot_dimension_numbers<[1], [0], [0], [1], [0, 0, 1, 1], [], []>} : vector<8x128xbf16>, vector<128x384xbf16>, vector<8x384xf32> -> vector<8x384xf32>
      %264 = vector.extract_strided_slice %261 {offsets = [0, 0], sizes = [8, 256], strides = [1, 1]} : vector<8x384xf32> to vector<8x256xf32>
      %265 = vector.extract_strided_slice %263 {offsets = [0, 0], sizes = [8, 256], strides = [1, 1]} : vector<8x384xf32> to vector<8x256xf32>
      %266 = arith.addf %264, %265 : vector<8x256xf32>
      %267 = arith.negf %266 : vector<8x256xf32>
      %268 = math.exp %267 : vector<8x256xf32>
      %cst_98 = arith.constant 1.000000e+00 : f32
      %269 = vector.broadcast %cst_98 : f32 to vector<8x256xf32>
      %270 = arith.addf %269, %268 : vector<8x256xf32>
      %271 = arith.divf %269, %270 : vector<8x256xf32>
      %272 = vector.extract_strided_slice %271 {offsets = [0, 0], sizes = [8, 128], strides = [1, 1]} : vector<8x256xf32> to vector<8x128xf32>
      %273 = vector.extract_strided_slice %271 {offsets = [0, 128], sizes = [8, 128], strides = [1, 1]} : vector<8x256xf32> to vector<8x128xf32>
      %274 = vector.extract_strided_slice %261 {offsets = [0, 256], sizes = [8, 128], strides = [1, 1]} : vector<8x384xf32> to vector<8x128xf32>
      %275 = vector.extract_strided_slice %263 {offsets = [0, 256], sizes = [8, 128], strides = [1, 1]} : vector<8x384xf32> to vector<8x128xf32>
      %276 = arith.addf %275, %34 : vector<8x128xf32>
      %277 = arith.mulf %272, %276 : vector<8x128xf32>
      %278 = arith.addf %274, %277 : vector<8x128xf32>
      %279 = math.tanh %278 : vector<8x128xf32>
      %cst_99 = arith.constant 1.000000e+00 : f32
      %280 = vector.broadcast %cst_99 : f32 to vector<8x128xf32>
      %281 = arith.subf %280, %273 : vector<8x128xf32>
      %282 = arith.subf %279, %252 : vector<8x128xf32>
      %283 = arith.mulf %281, %282 : vector<8x128xf32>
      %284 = arith.addf %252, %283 : vector<8x128xf32>
      %285 = arith.addi %56, %c6_i32 : i32
      %286 = vector.broadcast %285 : i32 to vector<8x1xi32>
      %287 = arith.cmpi eq, %4, %286 : vector<8x1xi32>
      %288 = vector.shape_cast %287 : vector<8x1xi1> to vector<8x1xi1>
      %289 = vector.broadcast %288 : vector<8x1xi1> to vector<8x128xi1>
      %290 = arith.select %289, %284, %258 : vector<8x128xi1>, vector<8x128xf32>
      %c7_i32_100 = arith.constant 7 : i32
      %291 = arith.index_cast %c7_i32_100 : i32 to index
      %c0_101 = arith.constant 0 : index
      %c0_102 = arith.constant 0 : index
      %292 = vector.load %arg10[%291, %c0_101, %c0_102] : memref<8x8x384xf32, #tpu.memory_space<vmem>>, vector<1x8x384xf32>
      %293 = vector.shape_cast %292 : vector<1x8x384xf32> to vector<8x384xf32>
      %294 = arith.truncf %284 : vector<8x128xf32> to vector<8x128xbf16>
      %cst_103 = arith.constant dense<0.000000e+00> : vector<8x384xf32>
      %295 = tpu.matmul %294, %28, %cst_103 {dimension_numbers = #tpu.dot_dimension_numbers<[1], [0], [0], [1], [0, 0, 1, 1], [], []>} : vector<8x128xbf16>, vector<128x384xbf16>, vector<8x384xf32> -> vector<8x384xf32>
      %296 = vector.extract_strided_slice %293 {offsets = [0, 0], sizes = [8, 256], strides = [1, 1]} : vector<8x384xf32> to vector<8x256xf32>
      %297 = vector.extract_strided_slice %295 {offsets = [0, 0], sizes = [8, 256], strides = [1, 1]} : vector<8x384xf32> to vector<8x256xf32>
      %298 = arith.addf %296, %297 : vector<8x256xf32>
      %299 = arith.negf %298 : vector<8x256xf32>
      %300 = math.exp %299 : vector<8x256xf32>
      %cst_104 = arith.constant 1.000000e+00 : f32
      %301 = vector.broadcast %cst_104 : f32 to vector<8x256xf32>
      %302 = arith.addf %301, %300 : vector<8x256xf32>
      %303 = arith.divf %301, %302 : vector<8x256xf32>
      %304 = vector.extract_strided_slice %303 {offsets = [0, 0], sizes = [8, 128], strides = [1, 1]} : vector<8x256xf32> to vector<8x128xf32>
      %305 = vector.extract_strided_slice %303 {offsets = [0, 128], sizes = [8, 128], strides = [1, 1]} : vector<8x256xf32> to vector<8x128xf32>
      %306 = vector.extract_strided_slice %293 {offsets = [0, 256], sizes = [8, 128], strides = [1, 1]} : vector<8x384xf32> to vector<8x128xf32>
      %307 = vector.extract_strided_slice %295 {offsets = [0, 256], sizes = [8, 128], strides = [1, 1]} : vector<8x384xf32> to vector<8x128xf32>
      %308 = arith.addf %307, %34 : vector<8x128xf32>
      %309 = arith.mulf %304, %308 : vector<8x128xf32>
      %310 = arith.addf %306, %309 : vector<8x128xf32>
      %311 = math.tanh %310 : vector<8x128xf32>
      %cst_105 = arith.constant 1.000000e+00 : f32
      %312 = vector.broadcast %cst_105 : f32 to vector<8x128xf32>
      %313 = arith.subf %312, %305 : vector<8x128xf32>
      %314 = arith.subf %311, %284 : vector<8x128xf32>
      %315 = arith.mulf %313, %314 : vector<8x128xf32>
      %316 = arith.addf %284, %315 : vector<8x128xf32>
      %317 = arith.addi %56, %c7_i32_100 : i32
      %318 = vector.broadcast %317 : i32 to vector<8x1xi32>
      %319 = arith.cmpi eq, %4, %318 : vector<8x1xi32>
      %320 = vector.shape_cast %319 : vector<8x1xi1> to vector<8x1xi1>
      %321 = vector.broadcast %320 : vector<8x1xi1> to vector<8x128xi1>
      %322 = arith.select %321, %316, %290 : vector<8x128xi1>, vector<8x128xf32>
      %c8_i32_106 = arith.constant 8 : i32
      %c0_107 = arith.constant 0 : index
      %c0_108 = arith.constant 0 : index
      %323 = vector.load %arg11[%c0_107, %c0_108] : memref<8x128xf32, #tpu.memory_space<vmem>>, vector<8x128xf32>
      tpu.vector_store %arg11[%c0_107, %c0_108], %316 {strides = array<i32>} : memref<8x128xf32, #tpu.memory_space<vmem>>, vector<8x128xf32>,
      %c0_109 = arith.constant 0 : index
      %c0_110 = arith.constant 0 : index
      %324 = vector.load %arg12[%c0_109, %c0_110] : memref<8x128xf32, #tpu.memory_space<vmem>>, vector<8x128xf32>
      tpu.vector_store %arg12[%c0_109, %c0_110], %322 {strides = array<i32>} : memref<8x128xf32, #tpu.memory_space<vmem>>, vector<8x128xf32>,
    }
    %c0_46 = arith.constant 0 : index
    %c0_47 = arith.constant 0 : index
    %43 = vector.load %arg12[%c0_46, %c0_47] : memref<8x128xf32, #tpu.memory_space<vmem>>, vector<8x128xf32>
    %44 = arith.mulf %43, %43 : vector<8x128xf32>
    %cst_48 = arith.constant dense<0.000000e+00> : vector<8xf32>
    %45 = vector.multi_reduction <add>, %44, %cst_48 [1] : vector<8x128xf32> to vector<8xf32>
    %46 = vector.shape_cast %45 : vector<8xf32> to vector<8x1xf32>
    %47 = math.sqrt %46 : vector<8x1xf32>
    %cst_49 = arith.constant 9.99999996E-13 : f32
    %48 = vector.broadcast %cst_49 : f32 to vector<8x1xf32>
    %49 = arith.maximumf %47, %48 : vector<8x1xf32>
    %50 = vector.broadcast %49 : vector<8x1xf32> to vector<8x128xf32>
    %51 = arith.divf %43, %50 : vector<8x128xf32>
    %c0_50 = arith.constant 0 : index
    %c0_51 = arith.constant 0 : index
    %52 = vector.load %arg8[%c0_50, %c0_51] : memref<8x128xf32, #tpu.memory_space<vmem>>, vector<8x128xf32>
    tpu.vector_store %arg8[%c0_50, %c0_51], %51 {strides = array<i32>} : memref<8x128xf32, #tpu.memory_space<vmem>>, vector<8x128xf32>,
    return
  }
  func.func @transform_0(%arg0: i32, %arg1: memref<1xi32, #tpu.memory_space<smem>>) -> (i32, i32) {
    %c0_i32 = arith.constant 0 : i32
    %c0_i32_0 = arith.constant 0 : i32
    return %arg0, %c0_i32 : i32, i32
  }
  func.func @transform_1(%arg0: i32, %arg1: memref<1xi32, #tpu.memory_space<smem>>) -> (i32, i32, i32) {
    %c0_i32 = arith.constant 0 : i32
    %c0_i32_0 = arith.constant 0 : i32
    %c0_i32_1 = arith.constant 0 : i32
    return %c0_i32, %arg0, %c0_i32_0 : i32, i32, i32
  }
  func.func @transform_2(%arg0: i32, %arg1: memref<1xi32, #tpu.memory_space<smem>>) -> (i32, i32, i32) {
    %c0_i32 = arith.constant 0 : i32
    %c0_i32_0 = arith.constant 0 : i32
    %c0_i32_1 = arith.constant 0 : i32
    %c0_i32_2 = arith.constant 0 : i32
    return %c0_i32, %c0_i32_0, %c0_i32_1 : i32, i32, i32
  }
  func.func @transform_3(%arg0: i32, %arg1: memref<1xi32, #tpu.memory_space<smem>>) -> (i32, i32, i32) {
    %c0_i32 = arith.constant 0 : i32
    %c0_i32_0 = arith.constant 0 : i32
    %c0_i32_1 = arith.constant 0 : i32
    %c0_i32_2 = arith.constant 0 : i32
    return %c0_i32, %c0_i32_0, %c0_i32_1 : i32, i32, i32
  }
  func.func @transform_4(%arg0: i32, %arg1: memref<1xi32, #tpu.memory_space<smem>>) -> (i32, i32, i32) {
    %c0_i32 = arith.constant 0 : i32
    %c0_i32_0 = arith.constant 0 : i32
    %c0_i32_1 = arith.constant 0 : i32
    %c0_i32_2 = arith.constant 0 : i32
    return %c0_i32, %c0_i32_0, %c0_i32_1 : i32, i32, i32
  }
  func.func @transform_5(%arg0: i32, %arg1: memref<1xi32, #tpu.memory_space<smem>>) -> (i32, i32, i32) {
    %c0_i32 = arith.constant 0 : i32
    %c0_i32_0 = arith.constant 0 : i32
    %c0_i32_1 = arith.constant 0 : i32
    %c0_i32_2 = arith.constant 0 : i32
    return %c0_i32, %c0_i32_0, %c0_i32_1 : i32, i32, i32
  }
  func.func @transform_6(%arg0: i32, %arg1: memref<1xi32, #tpu.memory_space<smem>>) -> (i32, i32) {
    %c0_i32 = arith.constant 0 : i32
    %c0_i32_0 = arith.constant 0 : i32
    return %arg0, %c0_i32 : i32, i32
  }
}

</mosaic_0001>

<bundles_post_ra>
// kernel: tpu_custom_call.1
= control target key start
LH: loop header
LB: loop body
LE: loop exit
PB: predicated region body
PF: predicated region fallthrough
CT: control target
= control target key end

     0   :  { %13 = vsyncpa [#allocation9], 0  ;;  %s5690_s0 = inlined_call_operand.<no memory space> [shape: s32[1], index: 0, kind: input, shape index: {}]   ;;  %s5691_s1 = inlined_call_operand.vmem [shape: s32[8,1], index: 1, kind: input, shape index: {}]   ;;  %s5692_s2 = inlined_call_operand.hbm [shape: bf16[8,8,128], index: 2, kind: input, shape index: {}]   ;;  %s5693_s3 = inlined_call_operand.hbm [shape: bf16[2,128,384], index: 3, kind: input, shape index: {}]   ;;  %s5694_s4 = inlined_call_operand.hbm [shape: bf16[2,128,384], index: 4, kind: input, shape index: {}]   ;;  %s5695_s5 = inlined_call_operand.vmem [shape: f32[2,1,384], index: 5, kind: input, shape index: {}]   ;;  %s5696_s6 = inlined_call_operand.vmem [shape: f32[2,1,128], index: 6, kind: input, shape index: {}]   ;;  %s5697_s7 = inlined_call_operand.hbm [shape: f32[8,128], index: 7, kind: output, shape index: {}]  }
   0x1   :  { %14 = vsyncpa [#allocation12], 0 }
   0x2   :  { %15 = vsyncpa [#allocation10], 0  ;;  %s4118_s24 = smov [#allocation11]   ;;  %s4008_s28 = scalar_lea.hbm %s5693_s3, 6144 }
   0x3   :  { %s35_s25 = sshll.u32 %s4118_s24, 4  ;;  %p4009_p0 = scmp.ne.s32.totalorder %s5693_s3, %s4008_s28  ;;  %s36_s25 = int_to_ptr.vmem [resolvable:$true] %s35_s25 }
   0x4   :  { %p4012_p1 = scmp.lt.u32.totalorder %s4008_s28, %s5693_s3 }
   0x6   :  { %p4014_p2 = pnand %p4012_p1, %p4009_p0 }
   0x8   :  { %4017 = shalt.err (!%p4014_p2)
}
   0x9   :  { %s4018_s10 = scalar_lea.vmem %s36_s25, 6144  ;;  %p4023_p4 = scmp.lt.s32.totalorder %s36_s25, %s36_s25 }
   0xa   :  { %p4019_p3 = scmp.ne.s32.totalorder %s36_s25, %s4018_s10  ;;  %p4024_p5 = scmp.lt.s32.totalorder %s4018_s10, %s4018_s10 }
   0xc   :  { %p4025_p6 = por %p4024_p5, %p4023_p4 }
   0xe   :  { %p4026_p7 = pnand %p4025_p6, %p4019_p3 }
  0x10   :  { %4029 = shalt.err (!%p4026_p7)
}
  0x11   :  { %s4119_s11 = smov 192   ;;  %s4120_s12 = smov 12  }
  0x12   :  { %41 = dma.hbm_to_vmem [thread:$0]  %s5693_s3, 6144, %s36_s25, [#allocation12], %s4119_s11, %s4119_s11, %s4120_s12  }
  0x13   :  { %s4121_s15 = smov [#allocation8]   ;;  %s4030_s19 = scalar_lea.hbm %s5692_s2, 512 }
  0x14   :  { %s23_s16 = sshll.u32 %s4121_s15, 4  ;;  %p4031_p8 = scmp.ne.s32.totalorder %s5692_s2, %s4030_s19  ;;  %s24_s16 = int_to_ptr.vmem [resolvable:$true] %s23_s16 }
  0x15   :  { %p4034_p9 = scmp.lt.u32.totalorder %s4030_s19, %s5692_s2 }
  0x17   :  { %p4036_p10 = pnand %p4034_p9, %p4031_p8 }
  0x19   :  { %4039 = shalt.err (!%p4036_p10)
}
  0x1a   :  { %s4040_s24 = scalar_lea.vmem %s24_s16, 512  ;;  %p4045_p12 = scmp.lt.s32.totalorder %s24_s16, %s24_s16 }
  0x1b   :  { %p4041_p11 = scmp.ne.s32.totalorder %s24_s16, %s4040_s24  ;;  %p4046_p13 = scmp.lt.s32.totalorder %s4040_s24, %s4040_s24 }
  0x1d   :  { %p4047_p0 = por %p4046_p13, %p4045_p12 }
  0x1f   :  { %p4048_p1 = pnand %p4047_p0, %p4041_p11 }
  0x21   :  { %4051 = shalt.err (!%p4048_p1)
}
  0x22   :  { %s4122_s3 = smov 64   ;;  %s4123_s25 = smov 4  }
  0x23   :  { %29 = dma.hbm_to_vmem [thread:$0]  %s5692_s2, 512, %s24_s16, [#allocation9], %s4122_s3, %s4122_s3, %s4123_s25  }
  0x24   :  { %s4124_s28 = smov [#allocation13]   ;;  %s4052_s9 = scalar_lea.hbm %s5694_s4, 6144 }
  0x25   :  { %s47_s29 = sshll.u32 %s4124_s28, 4  ;;  %p4053_p2 = scmp.ne.s32.totalorder %s5694_s4, %s4052_s9  ;;  %s48_s29 = int_to_ptr.vmem [resolvable:$true] %s47_s29 }
  0x26   :  { %p4056_p3 = scmp.lt.u32.totalorder %s4052_s9, %s5694_s4 }
  0x28   :  { %p4058_p4 = pnand %p4056_p3, %p4053_p2 }
  0x2a   :  { %4061 = shalt.err (!%p4058_p4)
}
  0x2b   :  { %s4062_s17 = scalar_lea.vmem %s48_s29, 6144  ;;  %p4067_p6 = scmp.lt.s32.totalorder %s48_s29, %s48_s29 }
  0x2c   :  { %p4063_p5 = scmp.ne.s32.totalorder %s48_s29, %s4062_s17  ;;  %p4068_p7 = scmp.lt.s32.totalorder %s4062_s17, %s4062_s17 }
  0x2e   :  { %p4069_p8 = por %p4068_p7, %p4067_p6 }
  0x30   :  { %p4070_p9 = pnand %p4069_p8, %p4063_p5 }
  0x32   :  { %4073 = shalt.err (!%p4070_p9)
}
  0x33   :  { %53 = dma.hbm_to_vmem [thread:$0]  %s5694_s4, 6144, %s48_s29, [#allocation12], %s4119_s11, %s4119_s11, %s4120_s12  }
  0x34   :  { %4104 = dma.done.wait [#allocation9], 512  }
  0x35   :  { %4105 = vsyncadd [#allocation9], 4294966784 }
  0x36   :  { %4106 = dma.done.wait [#allocation12], 12288  }
  0x37   :  { %4107 = vsyncadd [#allocation12], 4294955008  ;;  %s69_s20 = sadd.s32 7, %s5690_s0  ;;  %v5698_v0 = vmov 0.0   ;;  %v4225_v1 = vld [vmem:[%s5691_s1] sm:$0xff]  ;;  %v4227_v2 = vld [vmem:[#allocation11] sm:$0xff] }
  0x38   :  { %p70_p10 = scmp.lt.s32.totalorder %s69_s20, 0  ;;  %s71_s21 = ssub.s32 0, %s69_s20  ;;  %77 = vst [vmem:[#allocation5] sm:$0xff] %v5698_v0  ;;  %150 = vst [vmem:[#allocation4] sm:$0xff] %v5698_v0  ;;  %v4229_v3 = vld [vmem:[#allocation11 + $0x8] sm:$0xf] }
  0x39   :  { %s3088_s22 = smin.u32 %s71_s21, %s69_s20  ;;  %5784 = vst [vmem:[#allocation18_spill] sm:$0xff] %v4225_v1  ;;  %5785 = vst [vmem:[#allocation19_spill] sm:$0xff] %v4227_v2  ;;  %v4231_v4 = vld [vmem:[#allocation11 + $0xc] sm:$0xff]  ;;  %v4233_v5 = vld [vmem:[#allocation11 + $0x14] sm:$0xf] }
  0x3a   :  { %s73_s23 = sshrl.u32 %s3088_s22, 3  ;;  %5786 = vst [vmem:[#allocation20_spill] sm:$0xff] %v4229_v3  ;;  %5787 = vst [vmem:[#allocation21_spill] sm:$0xff] %v4231_v4  ;;  %v4235_v6 = vld [vmem:[#allocation11 + $0x18] sm:$0xff]  ;;  %v4237_v7 = vld [vmem:[#allocation11 + $0x20] sm:$0xf] }
  0x3b   :  { %s74_s24 = ssub.s32 0, %s73_s23  ;;  %5788 = vst [vmem:[#allocation22_spill] sm:$0xff] %v4233_v5  ;;  %5789 = vst [vmem:[#allocation23_spill] sm:$0xff] %v4235_v6  ;;  %v4239_v8 = vld [vmem:[#allocation11 + $0x24] sm:$0xff]  ;;  %v4241_v9 = vld [vmem:[#allocation11 + $0x2c] sm:$0xf] }
  0x3c   :  { %s6072_s24 = smov (!%p70_p10, %s74_s24), %s73_s23  ;;  %5790 = vst [vmem:[#allocation24_spill] sm:$0xff] %v4237_v7  ;;  %5791 = vst [vmem:[#allocation25_spill] sm:$0xff] %v4239_v8  ;;  %v4243_v10 = vld [vmem:[#allocation11 + $0x30] sm:$0xff]  ;;  %v4245_v11 = vld [vmem:[#allocation11 + $0x38] sm:$0xf] }
  0x3d   :  { %5792 = vst [vmem:[#allocation26_spill] sm:$0xff] %v4241_v9  ;;  %5793 = vst [vmem:[#allocation27_spill] sm:$0xff] %v4243_v10  ;;  %v4247_v12 = vld [vmem:[#allocation11 + $0x3c] sm:$0xff]  ;;  %v4249_v13 = vld [vmem:[#allocation11 + $0x44] sm:$0xf]  ;;  %p3090_p11 = scmp.le.s32.totalorder %s6072_s24, 0 }
  0x3e   :  { %5794 = vst [vmem:[#allocation28_spill] sm:$0xff] %v4245_v11  ;;  %5795 = vst [vmem:[#allocation29_spill] sm:$0xff] %v4247_v12  ;;  %v4251_v14 = vld [vmem:[#allocation11 + $0x48] sm:$0xff]  ;;  %v4253_v15 = vld [vmem:[#allocation11 + $0x50] sm:$0xf]  ;;  %s4368_s25 = smov (!%p3090_p11), 0  }
  0x3f   :  { %5796 = vst [vmem:[#allocation30_spill] sm:$0xff] %v4249_v13  ;;  %5797 = vst [vmem:[#allocation31_spill] sm:$0xff] %v4251_v14  ;;  %v4255_v16 = vld [vmem:[#allocation11 + $0x54] sm:$0xff]  ;;  %v4257_v17 = vld [vmem:[#allocation11 + $0x5c] sm:$0xf] }
  0x40   :  { %5798 = vst [vmem:[#allocation32_spill] sm:$0xff] %v4253_v15  ;;  %5799 = vst [vmem:[#allocation33_spill] sm:$0xff] %v4255_v16  ;;  %v4259_v18 = vld [vmem:[#allocation11 + $0x60] sm:$0xff]  ;;  %v4261_v19 = vld [vmem:[#allocation11 + $0x68] sm:$0xf] }
  0x41   :  { %5800 = vst [vmem:[#allocation34_spill] sm:$0xff] %v4257_v17  ;;  %5801 = vst [vmem:[#allocation35_spill] sm:$0xff] %v4259_v18  ;;  %v4263_v20 = vld [vmem:[#allocation11 + $0x6c] sm:$0xff]  ;;  %v4265_v21 = vld [vmem:[#allocation11 + $0x74] sm:$0xf] }
  0x42   :  { %5802 = vst [vmem:[#allocation36_spill] sm:$0xff] %v4261_v19  ;;  %5803 = vst [vmem:[#allocation37_spill] sm:$0xff] %v4263_v20  ;;  %v4267_v22 = vld [vmem:[#allocation11 + $0x78] sm:$0xff]  ;;  %v4269_v23 = vld [vmem:[#allocation11 + $0x80] sm:$0xf] }
  0x43   :  { %5804 = vst [vmem:[#allocation38_spill] sm:$0xff] %v4265_v21  ;;  %5805 = vst [vmem:[#allocation39_spill] sm:$0xff] %v4267_v22  ;;  %v4271_v24 = vld [vmem:[#allocation11 + $0x84] sm:$0xff]  ;;  %v4273_v25 = vld [vmem:[#allocation11 + $0x8c] sm:$0xf] }
  0x44   :  { %5806 = vst [vmem:[#allocation40_spill] sm:$0xff] %v4269_v23  ;;  %5807 = vst [vmem:[#allocation41_spill] sm:$0xff] %v4271_v24  ;;  %v4275_v26 = vld [vmem:[#allocation11 + $0x90] sm:$0xff]  ;;  %v4277_v27 = vld [vmem:[#allocation11 + $0x98] sm:$0xf] }
  0x45   :  { %5808 = vst [vmem:[#allocation42_spill] sm:$0xff] %v4273_v25  ;;  %5809 = vst [vmem:[#allocation43_spill] sm:$0xff] %v4275_v26  ;;  %v4279_v28 = vld [vmem:[#allocation11 + $0x9c] sm:$0xff]  ;;  %v4281_v29 = vld [vmem:[#allocation11 + $0xa4] sm:$0xf] }
  0x46   :  { %5810 = vst [vmem:[#allocation44_spill] sm:$0xff] %v4277_v27  ;;  %5811 = vst [vmem:[#allocation45_spill] sm:$0xff] %v4279_v28  ;;  %v4283_v30 = vld [vmem:[#allocation11 + $0xa8] sm:$0xff]  ;;  %v4285_v31 = vld [vmem:[#allocation11 + $0xb0] sm:$0xf] }
  0x47   :  { %5812 = vst [vmem:[#allocation46_spill] sm:$0xff] %v4281_v29  ;;  %5813 = vst [vmem:[#allocation47_spill] sm:$0xff] %v4283_v30  ;;  %v4287_v32 = vld [vmem:[#allocation11 + $0xb4] sm:$0xff]  ;;  %v4289_v33 = vld [vmem:[#allocation11 + $0xbc] sm:$0xf] }
  0x48   :  { %5814 = vst [vmem:[#allocation48_spill] sm:$0xff] %v4285_v31  ;;  %5815 = vst [vmem:[#allocation49_spill] sm:$0xff] %v4287_v32  ;;  %v4291_v34 = vld [vmem:[#allocation13] sm:$0xff]  ;;  %v4293_v35 = vld [vmem:[#allocation13 + $0x8] sm:$0xf] }
  0x49   :  { %5816 = vst [vmem:[#allocation50_spill] sm:$0xff] %v4289_v33  ;;  %5817 = vst [vmem:[#allocation51_spill] sm:$0xff] %v4291_v34  ;;  %v4295_v36 = vld [vmem:[#allocation13 + $0xc] sm:$0xff]  ;;  %v4297_v37 = vld [vmem:[#allocation13 + $0x14] sm:$0xf] }
  0x4a   :  { %5818 = vst [vmem:[#allocation52_spill] sm:$0xff] %v4293_v35  ;;  %5819 = vst [vmem:[#allocation53_spill] sm:$0xff] %v4295_v36  ;;  %v4299_v38 = vld [vmem:[#allocation13 + $0x18] sm:$0xff]  ;;  %v4301_v39 = vld [vmem:[#allocation13 + $0x20] sm:$0xf] }
  0x4b   :  { %5820 = vst [vmem:[#allocation54_spill] sm:$0xff] %v4297_v37  ;;  %5821 = vst [vmem:[#allocation55_spill] sm:$0xff] %v4299_v38  ;;  %v4303_v40 = vld [vmem:[#allocation13 + $0x24] sm:$0xff]  ;;  %v4305_v41 = vld [vmem:[#allocation13 + $0x2c] sm:$0xf] }
  0x4c   :  { %5822 = vst [vmem:[#allocation56_spill] sm:$0xff] %v4301_v39  ;;  %5823 = vst [vmem:[#allocation57_spill] sm:$0xff] %v4303_v40  ;;  %v4307_v42 = vld [vmem:[#allocation13 + $0x30] sm:$0xff]  ;;  %v4309_v43 = vld [vmem:[#allocation13 + $0x38] sm:$0xf] }
  0x4d   :  { %5824 = vst [vmem:[#allocation58_spill] sm:$0xff] %v4305_v41  ;;  %5825 = vst [vmem:[#allocation59_spill] sm:$0xff] %v4307_v42  ;;  %v4311_v44 = vld [vmem:[#allocation13 + $0x3c] sm:$0xff]  ;;  %v4313_v45 = vld [vmem:[#allocation13 + $0x44] sm:$0xf] }
  0x4e   :  { %5826 = vst [vmem:[#allocation60_spill] sm:$0xff] %v4309_v43  ;;  %5827 = vst [vmem:[#allocation61_spill] sm:$0xff] %v4311_v44  ;;  %v4315_v46 = vld [vmem:[#allocation13 + $0x48] sm:$0xff]  ;;  %v4317_v47 = vld [vmem:[#allocation13 + $0x50] sm:$0xf] }
  0x4f   :  { %5828 = vst [vmem:[#allocation62_spill] sm:$0xff] %v4313_v45  ;;  %5829 = vst [vmem:[#allocation63_spill] sm:$0xff] %v4315_v46  ;;  %v4319_v48 = vld [vmem:[#allocation13 + $0x54] sm:$0xff]  ;;  %v4321_v49 = vld [vmem:[#allocation13 + $0x5c] sm:$0xf] }
  0x50   :  { %5830 = vst [vmem:[#allocation64_spill] sm:$0xff] %v4317_v47  ;;  %5831 = vst [vmem:[#allocation65_spill] sm:$0xff] %v4319_v48  ;;  %v4323_v50 = vld [vmem:[#allocation13 + $0x60] sm:$0xff]  ;;  %v4325_v51 = vld [vmem:[#allocation13 + $0x68] sm:$0xf] }
  0x51   :  { %5832 = vst [vmem:[#allocation66_spill] sm:$0xff] %v4321_v49  ;;  %5833 = vst [vmem:[#allocation67_spill] sm:$0xff] %v4323_v50  ;;  %v4327_v52 = vld [vmem:[#allocation13 + $0x6c] sm:$0xff]  ;;  %v4329_v53 = vld [vmem:[#allocation13 + $0x74] sm:$0xf] }
  0x52   :  { %5834 = vst [vmem:[#allocation68_spill] sm:$0xff] %v4325_v51  ;;  %5835 = vst [vmem:[#allocation69_spill] sm:$0xff] %v4327_v52  ;;  %v4331_v54 = vld [vmem:[#allocation13 + $0x78] sm:$0xff]  ;;  %v4333_v55 = vld [vmem:[#allocation13 + $0x80] sm:$0xf] }
  0x53   :  { %5836 = vst [vmem:[#allocation70_spill] sm:$0xff] %v4329_v53  ;;  %5837 = vst [vmem:[#allocation71_spill] sm:$0xff] %v4331_v54  ;;  %v4335_v56 = vld [vmem:[#allocation13 + $0x84] sm:$0xff]  ;;  %v4337_v57 = vld [vmem:[#allocation13 + $0x8c] sm:$0xf] }
  0x54   :  { %5838 = vst [vmem:[#allocation72_spill] sm:$0xff] %v4333_v55  ;;  %5839 = vst [vmem:[#allocation73_spill] sm:$0xff] %v4335_v56  ;;  %v4339_v58 = vld [vmem:[#allocation13 + $0x90] sm:$0xff]  ;;  %v4341_v59 = vld [vmem:[#allocation13 + $0x98] sm:$0xf]  ;;  %3080 = sbr.rel (%p3090_p11) target bundleno = 2277 (0x8e5), region = 92 }
  0x55   :  { %5840 = vst [vmem:[#allocation74_spill] sm:$0xff] %v4337_v57  ;;  %5841 = vst [vmem:[#allocation75_spill] sm:$0xff] %v4339_v58  ;;  %v4343_v60 = vld [vmem:[#allocation13 + $0x9c] sm:$0xff]  ;;  %v4345_v61 = vld [vmem:[#allocation13 + $0xa4] sm:$0xf] }
  0x56   :  { %5842 = vst [vmem:[#allocation76_spill] sm:$0xff] %v4341_v59  ;;  %5843 = vst [vmem:[#allocation77_spill] sm:$0xff] %v4343_v60  ;;  %v4347_v62 = vld [vmem:[#allocation13 + $0xa8] sm:$0xff]  ;;  %v4349_v63 = vld [vmem:[#allocation13 + $0xb0] sm:$0xf] }
  0x57   :  { %5844 = vst [vmem:[#allocation78_spill] sm:$0xff] %v4345_v61  ;;  %5845 = vst [vmem:[#allocation79_spill] sm:$0xff] %v4347_v62  ;;  %v4351_v0 = vld [vmem:[#allocation13 + $0xb4] sm:$0xff]  ;;  %v4353_v1 = vld [vmem:[#allocation13 + $0xbc] sm:$0xf] }
  0x58   :  { %5846 = vst [vmem:[#allocation80_spill] sm:$0xff] %v4349_v63  ;;  %5847 = vst [vmem:[#allocation81_spill] sm:$0xff] %v4351_v0  ;;  %v4358_v55 = vld [vmem:[%s5695_s5] sm:$0x7] }
  0x59   :  { %5848 = vst [vmem:[#allocation82_spill] sm:$0xff] %v4353_v1  ;;  %5849 = vst [vmem:[#allocation83_spill] sm:$0xff] %v4358_v55  ;;  %v4363_v59 = vld [vmem:[%s5696_s6] ss:$0 sm:$0xff] }
  0x5a   :  { %5850 = vst [vmem:[#allocation84_spill] sm:$0xff] %v4363_v59 }
  0x5b LB: > { %v5853_v56 = vld [vmem:[#allocation73_spill] sm:$0xff]  ;;  %v5854_v54 = vld [vmem:[#allocation71_spill] sm:$0xff]  ;;  %s3257_s26 = sshll.u32 %s4112_s25, 5  ;;  %v5881_v5 = vld [vmem:[#allocation22_spill] sm:$0xff]  ;;  %vm4128_vm0 = vmmov 0   ;;  %s154_s25 = sadd.s32 1, %s4112_s25   ;;  %s4112_s25 = sphi %s4368_s25, %s154_s25  }
  0x5c   : > { %v5852_v58 = vld [vmem:[#allocation75_spill] sm:$0xff]  ;;  %v5855_v52 = vld [vmem:[#allocation69_spill] sm:$0xff]  ;;  %v5882_v3 = vld [vmem:[#allocation20_spill] sm:$0xff]  ;;  %s4390_s27 = scalar_lea.vmem [#allocation8], %s3257_s26  ;;  %s4666_s28 = scalar_lea.vmem [#allocation2], %s3257_s26 }
  0x5d   : > { %v5851_v60 = vld [vmem:[#allocation77_spill] sm:$0xff]  ;;  %v5856_v50 = vld [vmem:[#allocation67_spill] sm:$0xff]  ;;  %v3099_v61 = vcombine.low %v5882_v3, %v5881_v5  ;;  %v5883_v9 = vld [vmem:[#allocation26_spill] sm:$0xff]  ;;  %p153_p12 = scmp.ge.s32.totalorder %s154_s25, %s6072_s24 }
  0x5e   : > { %v5857_v48 = vld [vmem:[#allocation65_spill] sm:$0xff]  ;;  %v5858_v46 = vld [vmem:[#allocation63_spill] sm:$0xff]  ;;  %v5884_v7 = vld [vmem:[#allocation24_spill] sm:$0xff] }
  0x5f   : > { %v5859_v44 = vld [vmem:[#allocation61_spill] sm:$0xff]  ;;  %v5860_v42 = vld [vmem:[#allocation59_spill] sm:$0xff]  ;;  %v3102_v0 = vcombine.low %v5884_v7, %v5883_v9  ;;  %3435 = vmatprep.subr.bf16.mxu1 %v3099_v61  ;;  %v5885_v13 = vld [vmem:[#allocation30_spill] sm:$0xff]  ;;  %v4473_v7 = vcombine.high %v5858_v46, %v5857_v48  ;;  %v4483_v9 = vcombine.low %v5858_v46, %v5857_v48 }
  0x60   : > { %v5861_v40 = vld [vmem:[#allocation57_spill] sm:$0xff]  ;;  %v5862_v38 = vld [vmem:[#allocation55_spill] sm:$0xff]  ;;  %3436 = vmatpush3.bf16.msra.mxu1 %v3099_v61  ;;  %v5886_v11 = vld [vmem:[#allocation28_spill] sm:$0xff] }
  0x61   : > { %v5863_v36 = vld [vmem:[#allocation53_spill] sm:$0xff]  ;;  %v5864_v34 = vld [vmem:[#allocation51_spill] sm:$0xff]  ;;  %3437 = vmatprep.subr.bf16.mxu1 %v3102_v0  ;;  %v5887_v17 = vld [vmem:[#allocation34_spill] sm:$0xff] }
  0x62   : > { %v5865_v32 = vld [vmem:[#allocation49_spill] sm:$0xff]  ;;  %v5866_v30 = vld [vmem:[#allocation47_spill] sm:$0xff]  ;;  %v5888_v15 = vld [vmem:[#allocation32_spill] sm:$0xff] }
  0x63   : > { %v5867_v28 = vld [vmem:[#allocation45_spill] sm:$0xff]  ;;  %v5868_v26 = vld [vmem:[#allocation43_spill] sm:$0xff]  ;;  %v5889_v21 = vld [vmem:[#allocation38_spill] sm:$0xff] }
  0x64   : > { %v5869_v24 = vld [vmem:[#allocation41_spill] sm:$0xff]  ;;  %v5870_v22 = vld [vmem:[#allocation39_spill] sm:$0xff]  ;;  %3438 = vmatpush3.bf16.msra.mxu1 %v3102_v0  ;;  %v5890_v19 = vld [vmem:[#allocation36_spill] sm:$0xff] }
  0x65   : > { %v5871_v20 = vld [vmem:[#allocation37_spill] sm:$0xff]  ;;  %v5872_v18 = vld [vmem:[#allocation35_spill] sm:$0xff]  ;;  %v3111_v0 = vcombine.low %v5890_v19, %v5889_v21  ;;  %v5891_v25 = vld [vmem:[#allocation42_spill] sm:$0xff] }
  0x66   : > { %v5873_v16 = vld [vmem:[#allocation33_spill] sm:$0xff]  ;;  %v5874_v14 = vld [vmem:[#allocation31_spill] sm:$0xff]  ;;  %v3110_v61 = vcombine.high %v5872_v18, %v5871_v20  ;;  %v5892_v23 = vld [vmem:[#allocation40_spill] sm:$0xff] }
  0x67   : > { %v5875_v12 = vld [vmem:[#allocation29_spill] sm:$0xff]  ;;  %v5876_v10 = vld [vmem:[#allocation27_spill] sm:$0xff]  ;;  %v3107_v3 = vcombine.high %v5874_v14, %v5873_v16  ;;  %v5893_v29 = vld [vmem:[#allocation46_spill] sm:$0xff] }
  0x68   : > { %v5877_v8 = vld [vmem:[#allocation25_spill] sm:$0xff]  ;;  %v5878_v6 = vld [vmem:[#allocation23_spill] sm:$0xff]  ;;  %v3104_v62 = vcombine.high %v5876_v10, %v5875_v12  ;;  %v5894_v27 = vld [vmem:[#allocation44_spill] sm:$0xff] }
  0x69   : > { %v5879_v4 = vld [vmem:[#allocation21_spill] sm:$0xff]  ;;  %v5880_v2 = vld [vmem:[#allocation19_spill] sm:$0xff]  ;;  %v3101_v63 = vcombine.high %v5878_v6, %v5877_v8  ;;  %v3100_v1 = vcombine.low %v5878_v6, %v5877_v8  ;;  %v5895_v33 = vld [vmem:[#allocation50_spill] sm:$0xff]  ;;  %v4467_v6 = vcombine.low %v5860_v42, %v5859_v44 }
  0x6a   : > { %v3098_v55 = vcombine.high %v5880_v2, %v5879_v4  ;;  %v3097_v59 = vcombine.low %v5880_v2, %v5879_v4  ;;  %v3105_v2 = vcombine.low %v5886_v11, %v5885_v13  ;;  %v5896_v31 = vld [vmem:[#allocation48_spill] sm:$0xff]  ;;  %v5897_v37 = vld [vmem:[#allocation54_spill] sm:$0xff]  ;;  %v4455_v4 = vcombine.high %v5860_v42, %v5859_v44  ;;  %v5911_v19 = vld [vmem:[#allocation81_spill] sm:$0xff] }
  0x6b   : > { %v5898_v35 = vld [vmem:[#allocation52_spill] sm:$0xff]  ;;  %v5900_v41 = vld [vmem:[#allocation58_spill] sm:$0xff]  ;;  %v4509_v13 = vcombine.high %v5854_v54, %v5853_v56 }
  0x6c   : > { %336 = vmatprep.subr.bf16.mxu0 %v3098_v55  ;;  %v5705_v55 = vmov 0   ;;  %3439 = vmatprep.subr.bf16.mxu1 %v3105_v2  ;;  %v5901_v39 = vld [vmem:[#allocation56_spill] sm:$0xff]  ;;  %v5902_v45 = vld [vmem:[#allocation62_spill] sm:$0xff] }
  0x6d   : > { %337 = vmatpush1.bf16.msra.mxu0 %v3097_v59  ;;  %368 = vmatprep.mubr.bf16.mxu0 %v5705_v55  ;;  %v3103_v59 = vcombine.low %v5876_v10, %v5875_v12  ;;  %v3106_v55 = vcombine.low %v5874_v14, %v5873_v16  ;;  %v4462_v5 = vcombine.low %v5901_v39, %v5900_v41  ;;  %v5903_v43 = vld [vmem:[#allocation60_spill] sm:$0xff]  ;;  %v5904_v10 = vmov 0.0   ;;  %v5905_v49 = vld [vmem:[#allocation66_spill] sm:$0xff] }
  0x6e   : > { %338 = vmatprep.subr.bf16.mxu0 %v3101_v63  ;;  %v3834_v63 = vld [vmem:[%s4390_s27] sm:$0xff]   ;;  %3440 = vmatpush3.bf16.msra.mxu1 %v3105_v2  ;;  %v3114_v2 = vcombine.low %v5892_v23, %v5891_v25  ;;  %v4478_v8 = vcombine.low %v5903_v43, %v5902_v45  ;;  %v5906_v47 = vld [vmem:[#allocation64_spill] sm:$0xff]  ;;  %v4503_v12 = vcombine.low %v5856_v50, %v5855_v52  ;;  %v5907_v53 = vld [vmem:[#allocation70_spill] sm:$0xff] }
  0x6f   : > { %3451 = vmatprep.mubr.bf16.mxu1 %v3834_v63  ;;  %v4496_v11 = vcombine.low %v5906_v47, %v5905_v49  ;;  %v5908_v51 = vld [vmem:[#allocation68_spill] sm:$0xff]  ;;  %v4525_v16 = vcombine.high %v5852_v58, %v5851_v60  ;;  %v5909_v57 = vld [vmem:[#allocation74_spill] sm:$0xff]  ;;  %v4555_v25 = vld [vmem:[#allocation4] sm:$0xff] }
  0x70   : > { %v4514_v14 = vcombine.low %v5908_v51, %v5907_v53 }
  0x71   : > { %339 = vmatpush1.bf16.msra.mxu0 %v3100_v1  ;;  %v3108_v1 = vcombine.low %v5888_v15, %v5887_v17  ;;  %v4519_v15 = vcombine.low %v5854_v54, %v5853_v56 }
  0x72   : > { %340 = vmatprep.subr.bf16.mxu0 %v3104_v62  ;;  %v3109_v62 = vcombine.low %v5872_v18, %v5871_v20  ;;  %v4536_v18 = vcombine.low %v5852_v58, %v5851_v60  ;;  %v5912_v20 = vld [vmem:[#allocation79_spill] sm:$0xff] }
  0x73   : > { %3441 = vmatprep.subr.bf16.mxu1 %v3108_v1  ;;  %v4542_v21 = vcombine.high %v5912_v20, %v5911_v19 }
  0x74   : > { %3442 = vmatpush3.bf16.msra.mxu1 %v3108_v1  ;;  %v3117_v1 = vcombine.low %v5894_v27, %v5893_v29  ;;  %v5917_v27 = vld [vmem:[#allocation83_spill] sm:$0xff] }
  0x75   : > { %341 = vmatpush1.bf16.msra.mxu0 %v3103_v59  ;;  %v3113_v59 = vcombine.high %v5870_v22, %v5869_v24  ;;  %3443 = vmatprep.subr.bf16.mxu1 %v3111_v0 }
  0x76   : > { %342 = vmatprep.subr.bf16.mxu0 %v3107_v3  ;;  %v3112_v3 = vcombine.low %v5870_v22, %v5869_v24  ;;  %v5913_v22 = vld [vmem:[#allocation78_spill] sm:$0xff]  ;;  %v4552_v24 = vcombine.low %v5912_v20, %v5911_v19 }
  0x78   : > { %3444 = vmatpush3.bf16.msra.mxu1 %v3111_v0  ;;  %v3120_v0 = vcombine.low %v5896_v31, %v5895_v33 }
  0x79   : > { %343 = vmatpush1.bf16.msra.mxu0 %v3106_v55  ;;  %v3116_v55 = vcombine.high %v5868_v26, %v5867_v28  ;;  %3445 = vmatprep.subr.bf16.mxu1 %v3114_v2 }
  0x7a   : > { %344 = vmatprep.subr.bf16.mxu0 %v3110_v61  ;;  %v3115_v61 = vcombine.low %v5868_v26, %v5867_v28 }
  0x7c   : > { %3446 = vmatpush3.bf16.msra.mxu1 %v3114_v2  ;;  %v4434_v2 = vcombine.low %v5864_v34, %v5863_v36 }
  0x7d   : > { %345 = vmatpush1.bf16.msra.mxu0 %v3109_v62  ;;  %v3119_v62 = vcombine.high %v5866_v30, %v5865_v32  ;;  %3447 = vmatprep.subr.bf16.mxu1 %v3117_v1 }
  0x7e   : > { %346 = vmatprep.subr.bf16.mxu0 %v3113_v59  ;;  %v3118_v59 = vcombine.low %v5866_v30, %v5865_v32 }
  0x80   : > { %3448 = vmatpush3.bf16.msra.mxu1 %v3117_v1  ;;  %v4448_v1 = vcombine.low %v5862_v38, %v5861_v40 }
  0x81   : > { %347 = vmatpush1.bf16.msra.mxu0 %v3112_v3  ;;  %v4430_v3 = vcombine.high %v5864_v34, %v5863_v36  ;;  %3449 = vmatprep.subr.bf16.mxu1 %v3120_v0 }
  0x82   : > { %348 = vmatprep.subr.bf16.mxu0 %v3116_v55  ;;  %v4439_v55 = vcombine.high %v5862_v38, %v5861_v40 }
  0x84   : > { %3450 = vmatpush3.bf16.msra.mxu1 %v3120_v0  ;;  %v5710_v0 = vmov 0.0  }
  0x85   : > { %349 = vmatpush1.bf16.msra.mxu0 %v3115_v61  ;;  %v4443_v61 = vcombine.low %v5898_v35, %v5897_v37  ;;  %3459 = vmatprep.subr.bf16.mxu1 %v5710_v0 }
  0x86   : > { %350 = vmatprep.subr.bf16.mxu0 %v3119_v62  ;;  %v5899_v62 = vmov 0  }
  0x89   : > { %351 = vmatpush1.bf16.msra.mxu0 %v3118_v59  ;;  %v3835_v59 = vld [vmem:[%s4390_s27 + $0x8] sm:$0xff]  }
  0x8a   : > { %631 = vmatprep.subr.bf16.mxu0 %v4430_v3  ;;  %3452 = vmatmul.mubr.bf16.vlgmr.msra.gmra.mrb[0].mxu1 %v3835_v59 }
  0x8b   : > { %3460 = vmatpush3.bf16.msra.mxu1 %v4443_v61 }
  0x8c   : > { %369 = vmatmul.mubr.bf16.vlgmr.msra.gmra.mrb[0].mxu0 %v3834_v63  ;;  %v3836_v63 = vld [vmem:[%s4390_s27 + $0x10] sm:$0xff]   ;;  %3461 = vmatprep.subr.bf16.mxu1 %v5710_v0  ;;  %v3837_v0 = vld [vmem:[%s4390_s27 + $0x18] sm:$0xff]  }
  0x8d   : > { %632 = vmatpush1.bf16.msra.mxu0 %v4434_v2  ;;  %378 = vmatprep.mubr.bf16.mxu0 %v5899_v62 }
  0x8e   : > { %633 = vmatprep.subr.bf16.mxu0 %v4439_v55  ;;  %3455 = vmatprep.mubr.bf16.mxu1 %v3836_v63 }
  0x8f   : > { %3462 = vmatpush3.bf16.msra.mxu1 %v4462_v5 }
  0x90   : > { %3463 = vmatprep.subr.bf16.mxu1 %v5904_v10 }
  0x91   : > { %634 = vmatpush1.bf16.msra.mxu0 %v4448_v1 }
  0x92   : > { %635 = vmatprep.subr.bf16.mxu0 %v4455_v4  ;;  %3456 = vmatmul.mubr.bf16.gmra.mrb[4].mxu1 %v3837_v0 }
  0x93   : > { %3464 = vmatpush3.bf16.msra.mxu1 %v4478_v8  ;;  %3475 = vmatprep.mubr.msk.bf16.mxu1 %vm4128_vm0, %v5904_v10 }
  0x94   : > { %379 = vmatmul.mubr.bf16.gmra.mrb[4].mxu0 %v3835_v59  ;;  %v4490_v59 = vcombine.high %v5856_v50, %v5855_v52  ;;  %3465 = vmatprep.subr.bf16.mxu1 %v5904_v10 }
  0x95   : > { %636 = vmatpush1.bf16.msra.mxu0 %v4467_v6  ;;  %388 = vmatprep.mubr.bf16.mxu0 %v5899_v62 }
  0x96   : > { %637 = vmatprep.subr.bf16.mxu0 %v4473_v7 }
  0x97   : > { %3466 = vmatpush3.bf16.msra.mxu1 %v4496_v11 }
  0x98   : > { %3467 = vmatprep.subr.bf16.mxu1 %v5904_v10 }
  0x99   : > { %638 = vmatpush1.bf16.msra.mxu0 %v4483_v9 }
  0x9a   : > { %639 = vmatprep.subr.bf16.mxu0 %v4490_v59 }
  0x9b   : > { %3468 = vmatpush3.bf16.msra.mxu1 %v4514_v14 }
  0x9c   : > { %389 = vmatmul.mubr.bf16.gmra.mrb[8].mxu0 %v3836_v63  ;;  %v5910_v63 = vld [vmem:[#allocation72_spill] sm:$0xff]  ;;  %3469 = vmatprep.subr.bf16.mxu1 %v5904_v10 }
  0x9d   : > { %640 = vmatpush1.bf16.msra.mxu0 %v4503_v12  ;;  %398 = vmatprep.mubr.bf16.mxu0 %v5899_v62  ;;  %v4531_v17 = vcombine.low %v5910_v63, %v5909_v57  ;;  %v5914_v63 = vld [vmem:[#allocation76_spill] sm:$0xff] }
  0x9e   : > { %641 = vmatprep.subr.bf16.mxu0 %v4509_v13  ;;  %v4547_v23 = vcombine.low %v5914_v63, %v5913_v22  ;;  %v5915_v22 = vld [vmem:[#allocation82_spill] sm:$0xff]  ;;  %v5916_v63 = vld [vmem:[#allocation80_spill] sm:$0xff] }
  0x9f   : > { %3470 = vmatpush3.bf16.msra.mxu1 %v4531_v17  ;;  %v4564_v26 = vcombine.low %v5916_v63, %v5915_v22 }
  0xa0   : > { %3471 = vmatprep.subr.bf16.mxu1 %v5904_v10 }
  0xa1   : > { %642 = vmatpush1.bf16.msra.mxu0 %v4519_v15 }
  0xa2   : > { %643 = vmatprep.subr.bf16.mxu0 %v4525_v16 }
  0xa3   : > { %3472 = vmatpush3.bf16.msra.mxu1 %v4547_v23 }
  0xa4   : > { %399 = vmatmul.mubr.bf16.gmra.mrb[12].mxu0 %v3837_v0  ;;  %v502_v0 = vpack.c.bf16 %v4555_v25, %v4555_v25  ;;  %3473 = vmatprep.subr.bf16.mxu1 %v5904_v10 }
  0xa5   : > { %644 = vmatpush1.bf16.msra.mxu0 %v4536_v18  ;;  %663 = vmatprep.mubr.bf16.mxu0 %v5899_v62 }
  0xa6   : > { %645 = vmatprep.subr.bf16.mxu0 %v4542_v21 }
  0xa7   : > { %3474 = vmatpush3.bf16.msra.mxu1 %v4564_v26 }
  0xa8   : > { %3479 = vmatprep.subr.bf16.mxu1 %v5904_v10 }
  0xa9   : > { %646 = vmatpush1.bf16.msra.mxu0 %v4552_v24 }
  0xaa   : > { %742 = vmatprep.subr.bf16.mxu0 %v4430_v3  ;;  %3476 = vmatmul.mubr.bf16.vlgmr.msra.gmra.mrb[8].mxu1 %v502_v0 }
  0xab   : > { %3480 = vmatpush3.bf16.msra.mxu1 %v4443_v61  ;;  %3495 = vmatprep.mubr.msk.bf16.mxu1 %vm4128_vm0, %v5904_v10 }
  0xac   : > { %664 = vmatmul.mubr.bf16.vlgmr.msra.gmra.mrb[16].mxu0 %v502_v0  ;;  %3481 = vmatprep.subr.bf16.mxu1 %v5904_v10  ;;  %v169_v0 = vlaneseq }
  0xad   : > { %743 = vmatpush1.bf16.msra.mxu0 %v4434_v2  ;;  %774 = vmatprep.mubr.bf16.mxu0 %v5899_v62 }
  0xae   : > { %744 = vmatprep.subr.bf16.mxu0 %v4439_v55  ;;  %v170_v22 = vshrl.u32 %v169_v0, 7 }
  0xaf   : > { %3482 = vmatpush3.bf16.msra.mxu1 %v4462_v5 }
  0xb0   : > { %3483 = vmatprep.subr.bf16.mxu1 %v5904_v10  ;;  %v171_v63 = vsub.s32 0, %v170_v22  ;;  %v175_v19 = vsub.s32 1, %v170_v22  ;;  %v179_v20 = vsub.s32 2, %v170_v22 }
  0xb1   : > { %745 = vmatpush1.bf16.msra.mxu0 %v4448_v1 }
  0xb2   : > { %746 = vmatprep.subr.bf16.mxu0 %v4455_v4  ;;  %v172_v28 = vrot.slane %v5917_v27, %v171_v63  ;;  %v176_v29 = vrot.slane %v5917_v27, %v175_v19  ;;  %v180_v31 = vrot.slane %v5917_v27, %v179_v20 }
  0xb3   : > { %3484 = vmatpush3.bf16.msra.mxu1 %v4478_v8 }
  0xb4   : > { %3485 = vmatprep.subr.bf16.mxu1 %v5904_v10 }
  0xb5   : > { %747 = vmatpush1.bf16.msra.mxu0 %v4467_v6 }
  0xb6   : > { %748 = vmatprep.subr.bf16.mxu0 %v4473_v7 }
  0xb7   : > { %3486 = vmatpush3.bf16.msra.mxu1 %v4496_v11 }
  0xb8   : > { %3487 = vmatprep.subr.bf16.mxu1 %v5904_v10 }
  0xb9   : > { %749 = vmatpush1.bf16.msra.mxu0 %v4483_v9 }
  0xba   : > { %750 = vmatprep.subr.bf16.mxu0 %v4490_v59 }
  0xbb   : > { %3488 = vmatpush3.bf16.msra.mxu1 %v4514_v14 }
  0xbc   : > { %3489 = vmatprep.subr.bf16.mxu1 %v5904_v10 }
  0xbd   : > { %751 = vmatpush1.bf16.msra.mxu0 %v4503_v12 }
  0xbe   : > { %752 = vmatprep.subr.bf16.mxu0 %v4509_v13 }
  0xbf   : > { %3490 = vmatpush3.bf16.msra.mxu1 %v4531_v17 }
  0xc0   : > { %3491 = vmatprep.subr.bf16.mxu1 %v5904_v10 }
  0xc1   : > { %753 = vmatpush1.bf16.msra.mxu0 %v4519_v15 }
  0xc2   : > { %754 = vmatprep.subr.bf16.mxu0 %v4525_v16 }
  0xc3   : > { %3492 = vmatpush3.bf16.msra.mxu1 %v4547_v23 }
  0xc4   : > { %3493 = vmatprep.subr.bf16.mxu1 %v5904_v10 }
  0xc5   : > { %755 = vmatpush1.bf16.msra.mxu0 %v4536_v18 }
  0xc6   : > { %756 = vmatprep.subr.bf16.mxu0 %v4542_v21 }
  0xc7   : > { %3494 = vmatpush3.bf16.msra.mxu1 %v4564_v26 }
  0xc8   : > { %3499 = vmatprep.subr.bf16.mxu1 %v5904_v10 }
  0xc9   : > { %757 = vmatpush1.bf16.msra.mxu0 %v4552_v24 }
  0xca   : > { %854 = vmatprep.subr.bf16.mxu0 %v4430_v3 }
 0x15d   : > { %v3453_v38 = vpop.f32.mrb[0].mxu1 }
 0x15e   : > { %v4613_v0 = vadd.f32 %v3453_v38, %v180_v31  ;;  %v443_v22 = vpop.f32.mrb[1].mxu1 }
 0x15f   : > { %v370_v30 = vpop.f32.mrb[0].mxu0  ;;  %v4615_v40 = vadd.f32 %v443_v22, %v180_v31  ;;  %v3454_v63 = vpop.f32.mrb[2].mxu1 }
 0x160   : > { %v371_v32 = vadd.f32 %v370_v30, %v172_v28  ;;  %v372_v33 = vpop.f32.mrb[1].mxu0  ;;  %v4617_v19 = vadd.f32 %v3454_v63, %v180_v31  ;;  %v446_v41 = vpop.f32.mrb[3].mxu1 }
 0x161   : > { %v373_v34 = vadd.f32 %v372_v33, %v176_v29  ;;  %v374_v35 = vpop.f32.mrb[2].mxu0  ;;  %v4619_v20 = vadd.f32 %v446_v41, %v180_v31 }
 0x162   : > { %v4609_v36 = vadd.f32 %v374_v35, %v172_v28  ;;  %v376_v37 = vpop.f32.mrb[3].mxu0 }
 0x163   : > { %v4611_v39 = vadd.f32 %v376_v37, %v176_v29 }
 0x165   : > { %v3457_v43 = vpop.f32.mrb[4].mxu1 }
 0x166   : > { %v4629_v22 = vadd.f32 %v3457_v43, %v180_v31  ;;  %v459_v63 = vpop.f32.mrb[5].mxu1 }
 0x167   : > { %v380_v30 = vpop.f32.mrb[4].mxu0  ;;  %v4631_v45 = vadd.f32 %v459_v63, %v180_v31  ;;  %v3458_v41 = vpop.f32.mrb[6].mxu1 }
 0x168   : > { %v4621_v33 = vadd.f32 %v380_v30, %v172_v28  ;;  %v382_v35 = vpop.f32.mrb[5].mxu0  ;;  %5918 = vst [vmem:[#allocation85_spill] sm:$0xff] %v4629_v22  ;;  %v4633_v46 = vadd.f32 %v3458_v41, %v180_v31  ;;  %v462_v30 = vpop.f32.mrb[7].mxu1 }
 0x169   : > { %v4623_v27 = vadd.f32 %v382_v35, %v176_v29  ;;  %v384_v42 = vpop.f32.mrb[6].mxu0  ;;  %v4635_v47 = vadd.f32 %v462_v30, %v180_v31 }
 0x16a   : > { %v4625_v37 = vadd.f32 %v384_v42, %v172_v28  ;;  %v386_v38 = vpop.f32.mrb[7].mxu0  ;;  %5919 = vst [vmem:[#allocation86_spill] sm:$0xff] %v4633_v46  ;;  %497 = vst [vmem:[#allocation3 + $0xb8] sm:$0xff] %v4633_v46 }
 0x16b   : > { %v4627_v44 = vadd.f32 %v386_v38, %v176_v29 }
 0x16f   : > { %v390_v35 = vpop.f32.mrb[8].mxu0 }
 0x170   : > { %v4638_v42 = vadd.f32 %v390_v35, %v172_v28  ;;  %v392_v48 = vpop.f32.mrb[9].mxu0 }
 0x171   : > { %v4640_v49 = vadd.f32 %v392_v48, %v176_v29  ;;  %v394_v38 = vpop.f32.mrb[10].mxu0 }
 0x172   : > { %v4642_v43 = vadd.f32 %v394_v38, %v172_v28  ;;  %v396_v50 = vpop.f32.mrb[11].mxu0 }
 0x173   : > { %v4644_v63 = vadd.f32 %v396_v50, %v176_v29 }
 0x177   : > { %v400_v51 = vpop.f32.mrb[12].mxu0 }
 0x178   : > { %v4646_v41 = vadd.f32 %v400_v51, %v172_v28  ;;  %v402_v52 = vpop.f32.mrb[13].mxu0 }
 0x179   : > { %v4648_v31 = vadd.f32 %v402_v52, %v176_v29  ;;  %v404_v30 = vpop.f32.mrb[14].mxu0 }
 0x17a   : > { %v4650_v53 = vadd.f32 %v404_v30, %v172_v28  ;;  %v406_v35 = vpop.f32.mrb[15].mxu0 }
 0x17b   : > { %v4652_v54 = vadd.f32 %v406_v35, %v176_v29 }
 0x17c   : > { %5920 = vst [vmem:[#allocation87_spill] sm:$0xff] %v4650_v53  ;;  %495 = vst [vmem:[#allocation3 + $0xa8] sm:$0xff] %v4650_v53 }
 0x17d   : > { %5921 = vst [vmem:[#allocation88_spill] sm:$0xff] %v4652_v54  ;;  %496 = vst [vmem:[#allocation3 + $0xb0] sm:$0xff] %v4652_v54  ;;  %v706_v60 = vpop.f32.mrb[8].mxu1  ;;  %v5922_v54 = vld [vmem:[#allocation84_spill] sm:$0xff] }
 0x17e   : > { %v3477_v52 = vpop.f32.mrb[9].mxu1  ;;  %v726_v22 = vadd.f32 %v5922_v54, %v706_v60 }
 0x17f   : > { %v665_v48 = vpop.f32.mrb[16].mxu0  ;;  %v709_v46 = vpop.f32.mrb[10].mxu1 }
 0x180   : > { %v712_v38 = vadd.f32 %v665_v48, %v371_v32  ;;  %v667_v50 = vpop.f32.mrb[17].mxu0  ;;  %v3478_v28 = vpop.f32.mrb[11].mxu1 }
 0x181   : > { %v713_v56 = vadd.f32 %v667_v50, %v373_v34  ;;  %v669_v57 = vpop.f32.mrb[18].mxu0 }
 0x182   : > { %v3145_v51 = vmul.f32 -1.442695, %v712_v38  ;;  %v670_v58 = vpop.f32.mrb[19].mxu0 }
 0x183   : > { %v3146_v30 = vmul.f32 -1.442695, %v713_v56 }
 0x184   : > { %3838 = vpow2.f32 %v3145_v51 }
 0x185   : > { %3840 = vpow2.f32 %v3146_v30 }
 0x18e   : > { %v3839_v29 = vpop.eup %3838 }
 0x18f   : > { %v720_v35 = vadd.f32 1.0, %v3839_v29  ;;  %v3841_v53 = vpop.eup %3840 }
 0x190   : > { %v721_v32 = vadd.f32 1.0, %v3841_v53 }
 0x191   : > { %3842 = vrcp.f32 %v720_v35 }
 0x192   : > { %3844 = vrcp.f32 %v721_v32 }
 0x19b   : > { %v3843_v48 = vpop.eup %3842 }
 0x19c   : > { %v727_v34 = vmul.f32 %v3843_v48, %v726_v22  ;;  %v3845_v58 = vpop.eup %3844 }
 0x19d   : > { %v730_v46 = vsub.f32 1.0, %v3845_v58 }
 0x19e   : > { %v728_v57 = vadd.f32 %v727_v34, %v4615_v40 }
 0x1a0   : > { %3846 = vtanh.f32 %v728_v57 }
 0x1aa   : > { %v3847_v38 = vpop.eup %3846 }
 0x1ab   : > { %v731_v56 = vsub.f32 %v3847_v38, %v4555_v25 }
 0x1ad   : > { %v732_v50 = vmul.f32 %v731_v56, %v730_v46 }
 0x1af   : > { %v4660_v51 = vadd.f32 %v732_v50, %v4555_v25 }
 0x1b1   : > { %v734_v52 = vpack.c.bf16 %v4660_v51, %v4660_v51 }
 0x1b3   : > { %737 = vst [vmem:[%s4666_s28] sm:$0xf] %v734_v52  ;;  %775 = vmatmul.mubr.bf16.vlgmr.msra.gmra.mrb[20].mxu0 %v734_v52  ;;  %3496 = vmatmul.mubr.bf16.vlgmr.msra.gmra.mrb[12].mxu1 %v734_v52 }
 0x1b4   : > { %855 = vmatpush1.bf16.msra.mxu0 %v4434_v2  ;;  %3500 = vmatpush3.bf16.msra.mxu1 %v4443_v61 }
 0x1b5   : > { %856 = vmatprep.subr.bf16.mxu0 %v4439_v55  ;;  %3501 = vmatprep.subr.bf16.mxu1 %v5904_v10 }
 0x1b6   : > { %886 = vmatprep.mubr.bf16.mxu0 %v5899_v62  ;;  %3515 = vmatprep.mubr.msk.bf16.mxu1 %vm4128_vm0, %v5904_v10 }
 0x1b8   : > { %857 = vmatpush1.bf16.msra.mxu0 %v4448_v1  ;;  %3502 = vmatpush3.bf16.msra.mxu1 %v4462_v5 }
 0x1b9   : > { %858 = vmatprep.subr.bf16.mxu0 %v4455_v4  ;;  %3503 = vmatprep.subr.bf16.mxu1 %v5904_v10 }
 0x1bc   : > { %859 = vmatpush1.bf16.msra.mxu0 %v4467_v6  ;;  %3504 = vmatpush3.bf16.msra.mxu1 %v4478_v8 }
 0x1bd   : > { %860 = vmatprep.subr.bf16.mxu0 %v4473_v7  ;;  %3505 = vmatprep.subr.bf16.mxu1 %v5904_v10 }
 0x1c0   : > { %861 = vmatpush1.bf16.msra.mxu0 %v4483_v9  ;;  %3506 = vmatpush3.bf16.msra.mxu1 %v4496_v11 }
 0x1c1   : > { %862 = vmatprep.subr.bf16.mxu0 %v4490_v59  ;;  %3507 = vmatprep.subr.bf16.mxu1 %v5904_v10 }
 0x1c4   : > { %863 = vmatpush1.bf16.msra.mxu0 %v4503_v12  ;;  %3508 = vmatpush3.bf16.msra.mxu1 %v4514_v14 }
 0x1c5   : > { %864 = vmatprep.subr.bf16.mxu0 %v4509_v13  ;;  %3509 = vmatprep.subr.bf16.mxu1 %v5904_v10 }
 0x1c8   : > { %865 = vmatpush1.bf16.msra.mxu0 %v4519_v15  ;;  %3510 = vmatpush3.bf16.msra.mxu1 %v4531_v17 }
 0x1c9   : > { %866 = vmatprep.subr.bf16.mxu0 %v4525_v16  ;;  %3511 = vmatprep.subr.bf16.mxu1 %v5904_v10 }
 0x1cc   : > { %867 = vmatpush1.bf16.msra.mxu0 %v4536_v18  ;;  %3512 = vmatpush3.bf16.msra.mxu1 %v4547_v23 }
 0x1cd   : > { %868 = vmatprep.subr.bf16.mxu0 %v4542_v21  ;;  %3513 = vmatprep.subr.bf16.mxu1 %v5904_v10 }
 0x1d0   : > { %869 = vmatpush1.bf16.msra.mxu0 %v4552_v24  ;;  %3514 = vmatpush3.bf16.msra.mxu1 %v4564_v26 }
 0x1d1   : > { %966 = vmatprep.subr.bf16.mxu0 %v4430_v3  ;;  %3519 = vmatprep.subr.bf16.mxu1 %v5904_v10 }
 0x286   : > { %v776_v25 = vpop.f32.mrb[20].mxu0  ;;  %v817_v40 = vpop.f32.mrb[12].mxu1 }
 0x287   : > { %v823_v53 = vadd.f32 %v776_v25, %v4609_v36  ;;  %v778_v60 = vpop.f32.mrb[21].mxu0  ;;  %v3497_v22 = vpop.f32.mrb[13].mxu1  ;;  %v837_v46 = vadd.f32 %v5922_v54, %v817_v40 }
 0x288   : > { %v780_v28 = vpop.f32.mrb[22].mxu0  ;;  %v820_v30 = vpop.f32.mrb[14].mxu1  ;;  %v824_v48 = vadd.f32 %v778_v60, %v4611_v39 }
 0x289   : > { %v3148_v29 = vmul.f32 -1.442695, %v823_v53  ;;  %v781_v35 = vpop.f32.mrb[23].mxu0  ;;  %v3498_v32 = vpop.f32.mrb[15].mxu1 }
 0x28a   : > { %v3149_v34 = vmul.f32 -1.442695, %v824_v48 }
 0x28b   : > { %3848 = vpow2.f32 %v3148_v29 }
 0x28c   : > { %3850 = vpow2.f32 %v3149_v34 }
 0x295   : > { %v3849_v57 = vpop.eup %3848 }
 0x296   : > { %v831_v58 = vadd.f32 1.0, %v3849_v57  ;;  %v3851_v38 = vpop.eup %3850 }
 0x297   : > { %v832_v36 = vadd.f32 1.0, %v3851_v38 }
 0x298   : > { %3852 = vrcp.f32 %v831_v58 }
 0x299   : > { %3854 = vrcp.f32 %v832_v36 }
 0x2a2   : > { %v3853_v56 = vpop.eup %3852 }
 0x2a3   : > { %v838_v50 = vmul.f32 %v3853_v56, %v837_v46  ;;  %v3855_v25 = vpop.eup %3854 }
 0x2a4   : > { %v841_v22 = vsub.f32 1.0, %v3855_v25 }
 0x2a5   : > { %v839_v52 = vadd.f32 %v838_v50, %v4619_v20 }
 0x2a7   : > { %3856 = vtanh.f32 %v839_v52 }
 0x2b1   : > { %v3857_v53 = vpop.eup %3856 }
 0x2b2   : > { %v842_v39 = vsub.f32 %v3857_v53, %v4660_v51 }
 0x2b4   : > { %v843_v60 = vmul.f32 %v842_v39, %v841_v22 }
 0x2b6   : > { %v4710_v28 = vadd.f32 %v843_v60, %v4660_v51 }
 0x2b8   : > { %v845_v30 = vpack.c.bf16 %v4710_v28, %v4710_v28 }
 0x2ba   : > { %3152 = vst [vmem:[%s4666_s28 + $0x4] sm:$0xf] %v845_v30  ;;  %887 = vmatmul.mubr.bf16.vlgmr.msra.gmra.mrb[24].mxu0 %v845_v30  ;;  %3516 = vmatmul.mubr.bf16.vlgmr.msra.gmra.mrb[16].mxu1 %v845_v30 }
 0x2bb   : > { %967 = vmatpush1.bf16.msra.mxu0 %v4434_v2  ;;  %3520 = vmatpush3.bf16.msra.mxu1 %v4443_v61 }
 0x2bc   : > { %968 = vmatprep.subr.bf16.mxu0 %v4439_v55  ;;  %3521 = vmatprep.subr.bf16.mxu1 %v5904_v10 }
 0x2bd   : > { %998 = vmatprep.mubr.bf16.mxu0 %v5899_v62  ;;  %3535 = vmatprep.mubr.msk.bf16.mxu1 %vm4128_vm0, %v5904_v10 }
 0x2bf   : > { %969 = vmatpush1.bf16.msra.mxu0 %v4448_v1  ;;  %3522 = vmatpush3.bf16.msra.mxu1 %v4462_v5 }
 0x2c0   : > { %970 = vmatprep.subr.bf16.mxu0 %v4455_v4  ;;  %3523 = vmatprep.subr.bf16.mxu1 %v5904_v10 }
 0x2c3   : > { %971 = vmatpush1.bf16.msra.mxu0 %v4467_v6  ;;  %3524 = vmatpush3.bf16.msra.mxu1 %v4478_v8 }
 0x2c4   : > { %972 = vmatprep.subr.bf16.mxu0 %v4473_v7  ;;  %3525 = vmatprep.subr.bf16.mxu1 %v5904_v10 }
 0x2c7   : > { %973 = vmatpush1.bf16.msra.mxu0 %v4483_v9  ;;  %3526 = vmatpush3.bf16.msra.mxu1 %v4496_v11 }
 0x2c8   : > { %974 = vmatprep.subr.bf16.mxu0 %v4490_v59  ;;  %3527 = vmatprep.subr.bf16.mxu1 %v5904_v10 }
 0x2cb   : > { %975 = vmatpush1.bf16.msra.mxu0 %v4503_v12  ;;  %3528 = vmatpush3.bf16.msra.mxu1 %v4514_v14 }
 0x2cc   : > { %976 = vmatprep.subr.bf16.mxu0 %v4509_v13  ;;  %3529 = vmatprep.subr.bf16.mxu1 %v5904_v10 }
 0x2cf   : > { %977 = vmatpush1.bf16.msra.mxu0 %v4519_v15  ;;  %3530 = vmatpush3.bf16.msra.mxu1 %v4531_v17 }
 0x2d0   : > { %978 = vmatprep.subr.bf16.mxu0 %v4525_v16  ;;  %3531 = vmatprep.subr.bf16.mxu1 %v5904_v10 }
 0x2d3   : > { %979 = vmatpush1.bf16.msra.mxu0 %v4536_v18  ;;  %3532 = vmatpush3.bf16.msra.mxu1 %v4547_v23 }
 0x2d4   : > { %980 = vmatprep.subr.bf16.mxu0 %v4542_v21  ;;  %3533 = vmatprep.subr.bf16.mxu1 %v5904_v10 }
 0x2d7   : > { %981 = vmatpush1.bf16.msra.mxu0 %v4552_v24  ;;  %3534 = vmatpush3.bf16.msra.mxu1 %v4564_v26 }
 0x2d8   : > { %1078 = vmatprep.subr.bf16.mxu0 %v4430_v3  ;;  %3539 = vmatprep.subr.bf16.mxu1 %v5904_v10 }
 0x38d   : > { %v888_v20 = vpop.f32.mrb[24].mxu0  ;;  %v929_v51 = vpop.f32.mrb[16].mxu1 }
 0x38e   : > { %v935_v40 = vadd.f32 %v888_v20, %v4621_v33  ;;  %v890_v29 = vpop.f32.mrb[25].mxu0  ;;  %v3517_v35 = vpop.f32.mrb[17].mxu1  ;;  %v949_v52 = vadd.f32 %v5922_v54, %v929_v51 }
 0x38f   : > { %v892_v32 = vpop.f32.mrb[26].mxu0  ;;  %v932_v48 = vpop.f32.mrb[18].mxu1  ;;  %v936_v38 = vadd.f32 %v890_v29, %v4623_v27 }
 0x390   : > { %v3153_v34 = vmul.f32 -1.442695, %v935_v40  ;;  %v893_v57 = vpop.f32.mrb[27].mxu0  ;;  %v3518_v58 = vpop.f32.mrb[19].mxu1 }
 0x391   : > { %v3154_v46 = vmul.f32 -1.442695, %v936_v38 }
 0x392   : > { %3858 = vpow2.f32 %v3153_v34 }
 0x393   : > { %3860 = vpow2.f32 %v3154_v46 }
 0x39c   : > { %v3859_v36 = vpop.eup %3858 }
 0x39d   : > { %v943_v56 = vadd.f32 1.0, %v3859_v36  ;;  %v3861_v50 = vpop.eup %3860 }
 0x39e   : > { %v944_v33 = vadd.f32 1.0, %v3861_v50 }
 0x39f   : > { %3862 = vrcp.f32 %v943_v56 }
 0x3a0   : > { %3864 = vrcp.f32 %v944_v33 }
 0x3a9   : > { %v3863_v25 = vpop.eup %3862 }
 0x3aa   : > { %v950_v53 = vmul.f32 %v3863_v25, %v949_v52  ;;  %v3865_v39 = vpop.eup %3864 }
 0x3ab   : > { %v953_v30 = vsub.f32 1.0, %v3865_v39 }
 0x3ac   : > { %v951_v22 = vadd.f32 %v950_v53, %v4613_v0 }
 0x3ae   : > { %3866 = vtanh.f32 %v951_v22 }
 0x3b8   : > { %v3867_v60 = vpop.eup %3866 }
 0x3b9   : > { %v954_v27 = vsub.f32 %v3867_v60, %v4710_v28 }
 0x3bb   : > { %v955_v20 = vmul.f32 %v954_v27, %v953_v30 }
 0x3bd   : > { %v4756_v40 = vadd.f32 %v955_v20, %v4710_v28 }
 0x3bf   : > { %v957_v29 = vpack.c.bf16 %v4756_v40, %v4756_v40 }
 0x3c1   : > { %3157 = vst [vmem:[%s4666_s28 + $0x8] sm:$0xf] %v957_v29  ;;  %999 = vmatmul.mubr.bf16.vlgmr.msra.gmra.mrb[28].mxu0 %v957_v29  ;;  %3536 = vmatmul.mubr.bf16.vlgmr.msra.gmra.mrb[20].mxu1 %v957_v29 }
 0x3c2   : > { %1079 = vmatpush1.bf16.msra.mxu0 %v4434_v2  ;;  %3540 = vmatpush3.bf16.msra.mxu1 %v4443_v61 }
 0x3c3   : > { %1080 = vmatprep.subr.bf16.mxu0 %v4439_v55  ;;  %3541 = vmatprep.subr.bf16.mxu1 %v5904_v10 }
 0x3c4   : > { %1110 = vmatprep.mubr.bf16.mxu0 %v5899_v62  ;;  %3555 = vmatprep.mubr.msk.bf16.mxu1 %vm4128_vm0, %v5904_v10 }
 0x3c6   : > { %1081 = vmatpush1.bf16.msra.mxu0 %v4448_v1  ;;  %3542 = vmatpush3.bf16.msra.mxu1 %v4462_v5 }
 0x3c7   : > { %1082 = vmatprep.subr.bf16.mxu0 %v4455_v4  ;;  %3543 = vmatprep.subr.bf16.mxu1 %v5904_v10 }
 0x3ca   : > { %1083 = vmatpush1.bf16.msra.mxu0 %v4467_v6  ;;  %3544 = vmatpush3.bf16.msra.mxu1 %v4478_v8 }
 0x3cb   : > { %1084 = vmatprep.subr.bf16.mxu0 %v4473_v7  ;;  %3545 = vmatprep.subr.bf16.mxu1 %v5904_v10 }
 0x3ce   : > { %1085 = vmatpush1.bf16.msra.mxu0 %v4483_v9  ;;  %3546 = vmatpush3.bf16.msra.mxu1 %v4496_v11 }
 0x3cf   : > { %1086 = vmatprep.subr.bf16.mxu0 %v4490_v59  ;;  %3547 = vmatprep.subr.bf16.mxu1 %v5904_v10 }
 0x3d2   : > { %1087 = vmatpush1.bf16.msra.mxu0 %v4503_v12  ;;  %3548 = vmatpush3.bf16.msra.mxu1 %v4514_v14 }
 0x3d3   : > { %1088 = vmatprep.subr.bf16.mxu0 %v4509_v13  ;;  %3549 = vmatprep.subr.bf16.mxu1 %v5904_v10 }
 0x3d6   : > { %1089 = vmatpush1.bf16.msra.mxu0 %v4519_v15  ;;  %3550 = vmatpush3.bf16.msra.mxu1 %v4531_v17 }
 0x3d7   : > { %1090 = vmatprep.subr.bf16.mxu0 %v4525_v16  ;;  %3551 = vmatprep.subr.bf16.mxu1 %v5904_v10 }
 0x3da   : > { %1091 = vmatpush1.bf16.msra.mxu0 %v4536_v18  ;;  %3552 = vmatpush3.bf16.msra.mxu1 %v4547_v23 }
 0x3db   : > { %1092 = vmatprep.subr.bf16.mxu0 %v4542_v21  ;;  %3553 = vmatprep.subr.bf16.mxu1 %v5904_v10 }
 0x3de   : > { %1093 = vmatpush1.bf16.msra.mxu0 %v4552_v24  ;;  %3554 = vmatpush3.bf16.msra.mxu1 %v4564_v26 }
 0x3df   : > { %1190 = vmatprep.subr.bf16.mxu0 %v4430_v3  ;;  %3559 = vmatprep.subr.bf16.mxu1 %v5904_v10 }
 0x494   : > { %v1000_v0 = vpop.f32.mrb[28].mxu0  ;;  %v1041_v28 = vpop.f32.mrb[20].mxu1 }
 0x495   : > { %v1047_v51 = vadd.f32 %v1000_v0, %v4625_v37  ;;  %v1002_v35 = vpop.f32.mrb[29].mxu0  ;;  %v3537_v32 = vpop.f32.mrb[21].mxu1  ;;  %v1061_v33 = vadd.f32 %v5922_v54, %v1041_v28 }
 0x496   : > { %v1004_v48 = vpop.f32.mrb[30].mxu0  ;;  %v1044_v34 = vpop.f32.mrb[22].mxu1  ;;  %v1048_v46 = vadd.f32 %v1002_v35, %v4627_v44 }
 0x497   : > { %v3158_v57 = vmul.f32 -1.442695, %v1047_v51  ;;  %v1005_v58 = vpop.f32.mrb[31].mxu0  ;;  %v3538_v38 = vpop.f32.mrb[23].mxu1 }
 0x498   : > { %v3159_v36 = vmul.f32 -1.442695, %v1048_v46 }
 0x499   : > { %3868 = vpow2.f32 %v3158_v57 }
 0x49a   : > { %3870 = vpow2.f32 %v3159_v36 }
 0x4a3   : > { %v3869_v56 = vpop.eup %3868 }
 0x4a4   : > { %v1055_v50 = vadd.f32 1.0, %v3869_v56  ;;  %v3871_v52 = vpop.eup %3870 }
 0x4a5   : > { %v1056_v37 = vadd.f32 1.0, %v3871_v52 }
 0x4a6   : > { %3872 = vrcp.f32 %v1055_v50 }
 0x4a7   : > { %3874 = vrcp.f32 %v1056_v37 }
 0x4b0   : > { %v3873_v25 = vpop.eup %3872 }
 0x4b1   : > { %v1062_v53 = vmul.f32 %v3873_v25, %v1061_v33  ;;  %v3875_v39 = vpop.eup %3874 }
 0x4b2   : > { %v1065_v30 = vsub.f32 1.0, %v3875_v39 }
 0x4b3   : > { %v1063_v22 = vadd.f32 %v1062_v53, %v4617_v19 }
 0x4b5   : > { %3876 = vtanh.f32 %v1063_v22 }
 0x4bf   : > { %v3877_v60 = vpop.eup %3876 }
 0x4c0   : > { %v1066_v44 = vsub.f32 %v3877_v60, %v4756_v40 }
 0x4c2   : > { %v1067_v27 = vmul.f32 %v1066_v44, %v1065_v30 }
 0x4c4   : > { %v4802_v20 = vadd.f32 %v1067_v27, %v4756_v40 }
 0x4c6   : > { %v1069_v29 = vpack.c.bf16 %v4802_v20, %v4802_v20 }
 0x4c8   : > { %3162 = vst [vmem:[%s4666_s28 + $0xc] sm:$0xf] %v1069_v29  ;;  %1111 = vmatmul.mubr.bf16.vlgmr.msra.gmra.mrb[32].mxu0 %v1069_v29  ;;  %3556 = vmatmul.mubr.bf16.vlgmr.msra.gmra.mrb[24].mxu1 %v1069_v29 }
 0x4c9   : > { %1191 = vmatpush1.bf16.msra.mxu0 %v4434_v2  ;;  %3560 = vmatpush3.bf16.msra.mxu1 %v4443_v61 }
 0x4ca   : > { %1192 = vmatprep.subr.bf16.mxu0 %v4439_v55  ;;  %3561 = vmatprep.subr.bf16.mxu1 %v5904_v10 }
 0x4cb   : > { %1222 = vmatprep.mubr.bf16.mxu0 %v5899_v62  ;;  %3575 = vmatprep.mubr.msk.bf16.mxu1 %vm4128_vm0, %v5904_v10 }
 0x4cd   : > { %1193 = vmatpush1.bf16.msra.mxu0 %v4448_v1  ;;  %3562 = vmatpush3.bf16.msra.mxu1 %v4462_v5 }
 0x4ce   : > { %1194 = vmatprep.subr.bf16.mxu0 %v4455_v4  ;;  %3563 = vmatprep.subr.bf16.mxu1 %v5904_v10 }
 0x4d1   : > { %1195 = vmatpush1.bf16.msra.mxu0 %v4467_v6  ;;  %3564 = vmatpush3.bf16.msra.mxu1 %v4478_v8 }
 0x4d2   : > { %1196 = vmatprep.subr.bf16.mxu0 %v4473_v7  ;;  %3565 = vmatprep.subr.bf16.mxu1 %v5904_v10 }
 0x4d5   : > { %1197 = vmatpush1.bf16.msra.mxu0 %v4483_v9  ;;  %3566 = vmatpush3.bf16.msra.mxu1 %v4496_v11 }
 0x4d6   : > { %1198 = vmatprep.subr.bf16.mxu0 %v4490_v59  ;;  %3567 = vmatprep.subr.bf16.mxu1 %v5904_v10 }
 0x4d9   : > { %1199 = vmatpush1.bf16.msra.mxu0 %v4503_v12  ;;  %3568 = vmatpush3.bf16.msra.mxu1 %v4514_v14 }
 0x4da   : > { %1200 = vmatprep.subr.bf16.mxu0 %v4509_v13  ;;  %3569 = vmatprep.subr.bf16.mxu1 %v5904_v10 }
 0x4dd   : > { %1201 = vmatpush1.bf16.msra.mxu0 %v4519_v15  ;;  %3570 = vmatpush3.bf16.msra.mxu1 %v4531_v17 }
 0x4de   : > { %1202 = vmatprep.subr.bf16.mxu0 %v4525_v16  ;;  %3571 = vmatprep.subr.bf16.mxu1 %v5904_v10 }
 0x4e1   : > { %1203 = vmatpush1.bf16.msra.mxu0 %v4536_v18  ;;  %3572 = vmatpush3.bf16.msra.mxu1 %v4547_v23 }
 0x4e2   : > { %1204 = vmatprep.subr.bf16.mxu0 %v4542_v21  ;;  %3573 = vmatprep.subr.bf16.mxu1 %v5904_v10 }
 0x4e5   : > { %1205 = vmatpush1.bf16.msra.mxu0 %v4552_v24  ;;  %3574 = vmatpush3.bf16.msra.mxu1 %v4564_v26 }
 0x4e6   : > { %1302 = vmatprep.subr.bf16.mxu0 %v4430_v3  ;;  %3579 = vmatprep.subr.bf16.mxu1 %v5904_v10 }
 0x59b   : > { %v1112_v19 = vpop.f32.mrb[32].mxu0  ;;  %v1153_v40 = vpop.f32.mrb[24].mxu1 }
 0x59c   : > { %v1159_v0 = vadd.f32 %v1112_v19, %v4638_v42  ;;  %v1114_v28 = vpop.f32.mrb[33].mxu0  ;;  %v3557_v51 = vpop.f32.mrb[25].mxu1  ;;  %v1173_v50 = vadd.f32 %v5922_v54, %v1153_v40 }
 0x59d   : > { %v1116_v35 = vpop.f32.mrb[34].mxu0  ;;  %v1156_v32 = vpop.f32.mrb[26].mxu1  ;;  %v1160_v58 = vadd.f32 %v1114_v28, %v4640_v49 }
 0x59e   : > { %v3163_v48 = vmul.f32 -1.442695, %v1159_v0  ;;  %v1117_v34 = vpop.f32.mrb[35].mxu0  ;;  %v3558_v57 = vpop.f32.mrb[27].mxu1 }
 0x59f   : > { %v3164_v38 = vmul.f32 -1.442695, %v1160_v58 }
 0x5a0   : > { %3878 = vpow2.f32 %v3163_v48 }
 0x5a1   : > { %3880 = vpow2.f32 %v3164_v38 }
 0x5aa   : > { %v3879_v46 = vpop.eup %3878 }
 0x5ab   : > { %v1167_v36 = vadd.f32 1.0, %v3879_v46  ;;  %v3881_v56 = vpop.eup %3880 }
 0x5ac   : > { %v1168_v42 = vadd.f32 1.0, %v3881_v56 }
 0x5ad   : > { %3882 = vrcp.f32 %v1167_v36 }
 0x5ae   : > { %3884 = vrcp.f32 %v1168_v42 }
 0x5b7   : > { %v3883_v52 = vpop.eup %3882 }
 0x5b8   : > { %v1174_v33 = vmul.f32 %v3883_v52, %v1173_v50  ;;  %v3885_v25 = vpop.eup %3884 }
 0x5b9   : > { %v1177_v22 = vsub.f32 1.0, %v3885_v25 }
 0x5ba   : > { %v1175_v37 = vadd.f32 %v1174_v33, %v4631_v45 }
 0x5bc   : > { %3886 = vtanh.f32 %v1175_v37 }
 0x5c6   : > { %v3887_v53 = vpop.eup %3886 }
 0x5c7   : > { %v1178_v49 = vsub.f32 %v3887_v53, %v4802_v20  ;;  %v5924_v53 = vld [vmem:[#allocation87_spill] sm:$0xff] }
 0x5c9   : > { %v1179_v39 = vmul.f32 %v1178_v49, %v1177_v22 }
 0x5cb   : > { %v4848_v60 = vadd.f32 %v1179_v39, %v4802_v20 }
 0x5cd   : > { %v1181_v30 = vpack.c.bf16 %v4848_v60, %v4848_v60 }
 0x5cf   : > { %3167 = vst [vmem:[%s4666_s28 + $0x10] sm:$0xf] %v1181_v30  ;;  %1223 = vmatmul.mubr.bf16.vlgmr.msra.gmra.mrb[36].mxu0 %v1181_v30  ;;  %3576 = vmatmul.mubr.bf16.vlgmr.msra.gmra.mrb[28].mxu1 %v1181_v30 }
 0x5d0   : > { %1303 = vmatpush1.bf16.msra.mxu0 %v4434_v2  ;;  %3580 = vmatpush3.bf16.msra.mxu1 %v4443_v61 }
 0x5d1   : > { %1304 = vmatprep.subr.bf16.mxu0 %v4439_v55  ;;  %3581 = vmatprep.subr.bf16.mxu1 %v5904_v10 }
 0x5d2   : > { %1334 = vmatprep.mubr.bf16.mxu0 %v5899_v62  ;;  %3595 = vmatprep.mubr.msk.bf16.mxu1 %vm4128_vm0, %v5904_v10 }
 0x5d4   : > { %1305 = vmatpush1.bf16.msra.mxu0 %v4448_v1  ;;  %3582 = vmatpush3.bf16.msra.mxu1 %v4462_v5 }
 0x5d5   : > { %1306 = vmatprep.subr.bf16.mxu0 %v4455_v4  ;;  %3583 = vmatprep.subr.bf16.mxu1 %v5904_v10 }
 0x5d8   : > { %1307 = vmatpush1.bf16.msra.mxu0 %v4467_v6  ;;  %3584 = vmatpush3.bf16.msra.mxu1 %v4478_v8 }
 0x5d9   : > { %1308 = vmatprep.subr.bf16.mxu0 %v4473_v7  ;;  %3585 = vmatprep.subr.bf16.mxu1 %v5904_v10 }
 0x5dc   : > { %1309 = vmatpush1.bf16.msra.mxu0 %v4483_v9  ;;  %3586 = vmatpush3.bf16.msra.mxu1 %v4496_v11 }
 0x5dd   : > { %1310 = vmatprep.subr.bf16.mxu0 %v4490_v59  ;;  %3587 = vmatprep.subr.bf16.mxu1 %v5904_v10 }
 0x5e0   : > { %1311 = vmatpush1.bf16.msra.mxu0 %v4503_v12  ;;  %3588 = vmatpush3.bf16.msra.mxu1 %v4514_v14 }
 0x5e1   : > { %1312 = vmatprep.subr.bf16.mxu0 %v4509_v13  ;;  %3589 = vmatprep.subr.bf16.mxu1 %v5904_v10 }
 0x5e4   : > { %1313 = vmatpush1.bf16.msra.mxu0 %v4519_v15  ;;  %3590 = vmatpush3.bf16.msra.mxu1 %v4531_v17 }
 0x5e5   : > { %1314 = vmatprep.subr.bf16.mxu0 %v4525_v16  ;;  %3591 = vmatprep.subr.bf16.mxu1 %v5904_v10 }
 0x5e8   : > { %1315 = vmatpush1.bf16.msra.mxu0 %v4536_v18  ;;  %3592 = vmatpush3.bf16.msra.mxu1 %v4547_v23 }
 0x5e9   : > { %1316 = vmatprep.subr.bf16.mxu0 %v4542_v21  ;;  %3593 = vmatprep.subr.bf16.mxu1 %v5904_v10 }
 0x5ec   : > { %1317 = vmatpush1.bf16.msra.mxu0 %v4552_v24  ;;  %3594 = vmatpush3.bf16.msra.mxu1 %v4564_v26 }
 0x5ed   : > { %1414 = vmatprep.subr.bf16.mxu0 %v4430_v3  ;;  %3599 = vmatprep.subr.bf16.mxu1 %v5904_v10 }
 0x6a2   : > { %v1224_v45 = vpop.f32.mrb[36].mxu0  ;;  %v1265_v44 = vpop.f32.mrb[28].mxu1 }
 0x6a3   : > { %v1271_v27 = vadd.f32 %v1224_v45, %v4642_v43  ;;  %v1226_v20 = vpop.f32.mrb[37].mxu0  ;;  %v3577_v29 = vpop.f32.mrb[29].mxu1  ;;  %v1285_v57 = vadd.f32 %v5922_v54, %v1265_v44 }
 0x6a4   : > { %v1228_v19 = vpop.f32.mrb[38].mxu0  ;;  %v1268_v40 = vpop.f32.mrb[30].mxu1  ;;  %v1272_v35 = vadd.f32 %v1226_v20, %v4644_v63  ;;  %v5925_v20 = vld [vmem:[#allocation88_spill] sm:$0xff] }
 0x6a5   : > { %v3168_v0 = vmul.f32 -1.442695, %v1271_v27  ;;  %v1229_v28 = vpop.f32.mrb[39].mxu0  ;;  %v3578_v51 = vpop.f32.mrb[31].mxu1 }
 0x6a6   : > { %v3169_v32 = vmul.f32 -1.442695, %v1272_v35 }
 0x6a7   : > { %3888 = vpow2.f32 %v3168_v0 }
 0x6a8   : > { %3890 = vpow2.f32 %v3169_v32 }
 0x6b1   : > { %v3889_v48 = vpop.eup %3888 }
 0x6b2   : > { %v1279_v3 = vadd.f32 1.0, %v3889_v48  ;;  %v3891_v34 = vpop.eup %3890 }
 0x6b3   : > { %v1280_v43 = vadd.f32 1.0, %v3891_v34 }
 0x6b4   : > { %3892 = vrcp.f32 %v1279_v3  ;;  %v5926_v3 = vld [vmem:[#allocation86_spill] sm:$0xff] }
 0x6b5   : > { %3894 = vrcp.f32 %v1280_v43 }
 0x6be   : > { %v3893_v58 = vpop.eup %3892 }
 0x6bf   : > { %v1286_v38 = vmul.f32 %v3893_v58, %v1285_v57  ;;  %v3895_v36 = vpop.eup %3894 }
 0x6c0   : > { %v1289_v50 = vsub.f32 1.0, %v3895_v36 }
 0x6c1   : > { %v1287_v46 = vadd.f32 %v1286_v38, %v4635_v47  ;;  %v5923_v47 = vld [vmem:[#allocation85_spill] sm:$0xff] }
 0x6c3   : > { %3896 = vtanh.f32 %v1287_v46 }
 0x6cd   : > { %v3897_v56 = vpop.eup %3896 }
 0x6ce   : > { %v1290_v63 = vsub.f32 %v3897_v56, %v4848_v60 }
 0x6d0   : > { %v1291_v42 = vmul.f32 %v1290_v63, %v1289_v50 }
 0x6d2   : > { %v4894_v52 = vadd.f32 %v1291_v42, %v4848_v60 }
 0x6d4   : > { %v1293_v33 = vpack.c.bf16 %v4894_v52, %v4894_v52 }
 0x6d6   : > { %3172 = vst [vmem:[%s4666_s28 + $0x14] sm:$0xf] %v1293_v33  ;;  %1335 = vmatmul.mubr.bf16.vlgmr.msra.gmra.mrb[40].mxu0 %v1293_v33  ;;  %3596 = vmatmul.mubr.bf16.vlgmr.msra.gmra.mrb[32].mxu1 %v1293_v33 }
 0x6d7   : > { %1415 = vmatpush1.bf16.msra.mxu0 %v4434_v2  ;;  %3600 = vmatpush3.bf16.msra.mxu1 %v4443_v61 }
 0x6d8   : > { %1416 = vmatprep.subr.bf16.mxu0 %v4439_v55  ;;  %3601 = vmatprep.subr.bf16.mxu1 %v5904_v10 }
 0x6d9   : > { %1446 = vmatprep.mubr.bf16.mxu0 %v5899_v62  ;;  %3615 = vmatprep.mubr.msk.bf16.mxu1 %vm4128_vm0, %v5904_v10 }
 0x6db   : > { %1417 = vmatpush1.bf16.msra.mxu0 %v4448_v1  ;;  %3602 = vmatpush3.bf16.msra.mxu1 %v4462_v5 }
 0x6dc   : > { %1418 = vmatprep.subr.bf16.mxu0 %v4455_v4  ;;  %3603 = vmatprep.subr.bf16.mxu1 %v5904_v10 }
 0x6df   : > { %1419 = vmatpush1.bf16.msra.mxu0 %v4467_v6  ;;  %3604 = vmatpush3.bf16.msra.mxu1 %v4478_v8 }
 0x6e0   : > { %1420 = vmatprep.subr.bf16.mxu0 %v4473_v7  ;;  %3605 = vmatprep.subr.bf16.mxu1 %v5904_v10 }
 0x6e3   : > { %1421 = vmatpush1.bf16.msra.mxu0 %v4483_v9  ;;  %3606 = vmatpush3.bf16.msra.mxu1 %v4496_v11 }
 0x6e4   : > { %1422 = vmatprep.subr.bf16.mxu0 %v4490_v59  ;;  %3607 = vmatprep.subr.bf16.mxu1 %v5904_v10 }
 0x6e7   : > { %1423 = vmatpush1.bf16.msra.mxu0 %v4503_v12  ;;  %3608 = vmatpush3.bf16.msra.mxu1 %v4514_v14 }
 0x6e8   : > { %1424 = vmatprep.subr.bf16.mxu0 %v4509_v13  ;;  %3609 = vmatprep.subr.bf16.mxu1 %v5904_v10 }
 0x6eb   : > { %1425 = vmatpush1.bf16.msra.mxu0 %v4519_v15  ;;  %3610 = vmatpush3.bf16.msra.mxu1 %v4531_v17 }
 0x6ec   : > { %1426 = vmatprep.subr.bf16.mxu0 %v4525_v16  ;;  %3611 = vmatprep.subr.bf16.mxu1 %v5904_v10 }
 0x6ef   : > { %1427 = vmatpush1.bf16.msra.mxu0 %v4536_v18  ;;  %3612 = vmatpush3.bf16.msra.mxu1 %v4547_v23 }
 0x6f0   : > { %1428 = vmatprep.subr.bf16.mxu0 %v4542_v21  ;;  %3613 = vmatprep.subr.bf16.mxu1 %v5904_v10 }
 0x6f3   : > { %1429 = vmatpush1.bf16.msra.mxu0 %v4552_v24  ;;  %3614 = vmatpush3.bf16.msra.mxu1 %v4564_v26 }
 0x7a9   : > { %v1336_v4 = vpop.f32.mrb[40].mxu0  ;;  %v1377_v5 = vpop.f32.mrb[32].mxu1 }
 0x7aa   : > { %v1383_v6 = vadd.f32 %v1336_v4, %v4646_v41  ;;  %v1338_v7 = vpop.f32.mrb[41].mxu0  ;;  %v3597_v8 = vpop.f32.mrb[33].mxu1  ;;  %v1397_v21 = vadd.f32 %v5922_v54, %v1377_v5 }
 0x7ab   : > { %v1340_v9 = vpop.f32.mrb[42].mxu0  ;;  %v1380_v11 = vpop.f32.mrb[34].mxu1  ;;  %v1384_v15 = vadd.f32 %v1338_v7, %v4648_v31 }
 0x7ac   : > { %v3173_v12 = vmul.f32 -1.442695, %v1383_v6  ;;  %v1341_v13 = vpop.f32.mrb[43].mxu0  ;;  %v3598_v14 = vpop.f32.mrb[35].mxu1 }
 0x7ad   : > { %v3174_v16 = vmul.f32 -1.442695, %v1384_v15 }
 0x7ae   : > { %3898 = vpow2.f32 %v3173_v12 }
 0x7af   : > { %3900 = vpow2.f32 %v3174_v16 }
 0x7b8   : > { %v3899_v10 = vpop.eup %3898 }
 0x7b9   : > { %v1391_v17 = vadd.f32 1.0, %v3899_v10  ;;  %v3901_v18 = vpop.eup %3900 }
 0x7ba   : > { %v1392_v23 = vadd.f32 1.0, %v3901_v18 }
 0x7bb   : > { %3902 = vrcp.f32 %v1391_v17 }
 0x7bc   : > { %3904 = vrcp.f32 %v1392_v23 }
 0x7c5   : > { %v3903_v24 = vpop.eup %3902 }
 0x7c6   : > { %v1398_v26 = vmul.f32 %v3903_v24, %v1397_v21  ;;  %v3905_v55 = vpop.eup %3904 }
 0x7c7   : > { %v1401_v1 = vsub.f32 1.0, %v3905_v55 }
 0x7c8   : > { %v1399_v2 = vadd.f32 %v1398_v26, %v5923_v47 }
 0x7ca   : > { %3906 = vtanh.f32 %v1399_v2 }
 0x7d4   : > { %v3907_v61 = vpop.eup %3906 }
 0x7d5   : > { %v1402_v62 = vsub.f32 %v3907_v61, %v4894_v52 }
 0x7d7   : > { %v1403_v59 = vmul.f32 %v1402_v62, %v1401_v1 }
 0x7d9   : > { %v1404_v41 = vadd.f32 %v1403_v59, %v4894_v52 }
 0x7db   : > { %v1405_v31 = vpack.c.bf16 %v1404_v41, %v1404_v41 }
 0x7dd   : > { %3177 = vst [vmem:[%s4666_s28 + $0x18] sm:$0xf] %v1405_v31  ;;  %1447 = vmatmul.mubr.bf16.vlgmr.msra.gmra.mrb[44].mxu0 %v1405_v31  ;;  %3616 = vmatmul.mubr.bf16.vlgmr.msra.gmra.mrb[36].mxu1 %v1405_v31 }
 0x8b0   : > { %v1448_v37 = vpop.f32.mrb[44].mxu0  ;;  %v1489_v25 = vpop.f32.mrb[36].mxu1 }
 0x8b1   : > { %v1495_v22 = vadd.f32 %v1448_v37, %v5924_v53  ;;  %v1450_v49 = vpop.f32.mrb[45].mxu0  ;;  %v3617_v39 = vpop.f32.mrb[37].mxu1  ;;  %v1509_v51 = vadd.f32 %v5922_v54, %v1489_v25 }
 0x8b2   : > { %v1452_v60 = vpop.f32.mrb[46].mxu0  ;;  %v1492_v30 = vpop.f32.mrb[38].mxu1  ;;  %v1496_v29 = vadd.f32 %v1450_v49, %v5925_v20 }
 0x8b3   : > { %v3178_v45 = vmul.f32 -1.442695, %v1495_v22  ;;  %v1453_v44 = vpop.f32.mrb[47].mxu0  ;;  %v3618_v27 = vpop.f32.mrb[39].mxu1 }
 0x8b4   : > { %v3179_v19 = vmul.f32 -1.442695, %v1496_v29 }
 0x8b5   : > { %3908 = vpow2.f32 %v3178_v45 }
 0x8b6   : > { %3910 = vpow2.f32 %v3179_v19 }
 0x8bf   : > { %v3909_v40 = vpop.eup %3908 }
 0x8c0   : > { %v1503_v0 = vadd.f32 1.0, %v3909_v40  ;;  %v3911_v28 = vpop.eup %3910 }
 0x8c1   : > { %v1504_v35 = vadd.f32 1.0, %v3911_v28 }
 0x8c2   : > { %3912 = vrcp.f32 %v1503_v0 }
 0x8c3   : > { %3914 = vrcp.f32 %v1504_v35 }
 0x8cc   : > { %v3913_v32 = vpop.eup %3912 }
 0x8cd   : > { %v1510_v48 = vmul.f32 %v3913_v32, %v1509_v51  ;;  %v3915_v57 = vpop.eup %3914 }
 0x8ce   : > { %v1513_v58 = vsub.f32 1.0, %v3915_v57 }
 0x8cf   : > { %v1511_v34 = vadd.f32 %v1510_v48, %v5926_v3 }
 0x8d1   : > { %3916 = vtanh.f32 %v1511_v34 }
 0x8db   : > { %v3917_v43 = vpop.eup %3916 }
 0x8dc   : > { %v1514_v38 = vsub.f32 %v3917_v43, %v1404_v41 }
 0x8de   : > { %v1515_v46 = vmul.f32 %v1514_v38, %v1513_v58  ;;  %156 = sbr.rel (!%p153_p12) target bundleno = 91 (0x5b), region = 98 }
 0x8e0   : > { %v1516_v36 = vadd.f32 %v1515_v46, %v1404_v41 }
 0x8e2   : > { %v1517_v56 = vpack.c.bf16 %v1516_v36, %v1516_v36  ;;  %1522 = vst [vmem:[#allocation4] sm:$0xff] %v1516_v36 }
 0x8e4   : > { %3182 = vst [vmem:[%s4666_s28 + $0x1c] sm:$0xf] %v1517_v56 }
 0x8e5 PF:  { %v4948_v50 = vld [vmem:[#allocation11 + $0xc0] sm:$0xff]  ;;  %v4950_v63 = vld [vmem:[#allocation11 + $0xc8] sm:$0xf]  ;;  %v4952_v42 = vld [vmem:[#allocation11 + $0xcc] sm:$0xff]  ;;  %v5930_v52 = vmov 0.0   ;;  %s5089_s10 = smov (!%p3090_p11), 0  }
 0x8e6   :  { %5927 = vst [vmem:[#allocation19_spill] sm:$0xff] %v4948_v50  ;;  %5928 = vst [vmem:[#allocation20_spill] sm:$0xff] %v4950_v63  ;;  %v4955_v33 = vld [vmem:[#allocation11 + $0xd4] sm:$0xf]  ;;  %v4957_v4 = vld [vmem:[#allocation11 + $0xd8] sm:$0xff] }
 0x8e7   :  { %5929 = vst [vmem:[#allocation21_spill] sm:$0xff] %v4952_v42  ;;  %1599 = vst [vmem:[#allocation4] sm:$0xff] %v5930_v52  ;;  %v4959_v5 = vld [vmem:[#allocation11 + $0xe0] sm:$0xf]  ;;  %v4961_v6 = vld [vmem:[#allocation11 + $0xe4] sm:$0xff] }
 0x8e8   :  { %5931 = vst [vmem:[#allocation22_spill] sm:$0xff] %v4955_v33  ;;  %5932 = vst [vmem:[#allocation23_spill] sm:$0xff] %v4957_v4  ;;  %v4963_v7 = vld [vmem:[#allocation11 + $0xec] sm:$0xf]  ;;  %v4965_v8 = vld [vmem:[#allocation11 + $0xf0] sm:$0xff] }
 0x8e9   :  { %5933 = vst [vmem:[#allocation24_spill] sm:$0xff] %v4959_v5  ;;  %5934 = vst [vmem:[#allocation25_spill] sm:$0xff] %v4961_v6  ;;  %v4967_v54 = vld [vmem:[#allocation11 + $0xf8] sm:$0xf]  ;;  %v4969_v9 = vld [vmem:[#allocation11 + $0xfc] sm:$0xff] }
 0x8ea   :  { %5935 = vst [vmem:[#allocation26_spill] sm:$0xff] %v4963_v7  ;;  %5936 = vst [vmem:[#allocation27_spill] sm:$0xff] %v4965_v8  ;;  %v4971_v11 = vld [vmem:[#allocation11 + $0x104] sm:$0xf]  ;;  %v4973_v12 = vld [vmem:[#allocation11 + $0x108] sm:$0xff] }
 0x8eb   :  { %5937 = vst [vmem:[#allocation28_spill] sm:$0xff] %v4967_v54  ;;  %5938 = vst [vmem:[#allocation29_spill] sm:$0xff] %v4969_v9  ;;  %v4975_v13 = vld [vmem:[#allocation11 + $0x110] sm:$0xf]  ;;  %v4977_v14 = vld [vmem:[#allocation11 + $0x114] sm:$0xff] }
 0x8ec   :  { %5939 = vst [vmem:[#allocation30_spill] sm:$0xff] %v4971_v11  ;;  %5940 = vst [vmem:[#allocation31_spill] sm:$0xff] %v4973_v12  ;;  %v4979_v15 = vld [vmem:[#allocation11 + $0x11c] sm:$0xf]  ;;  %v4981_v16 = vld [vmem:[#allocation11 + $0x120] sm:$0xff] }
 0x8ed   :  { %5941 = vst [vmem:[#allocation32_spill] sm:$0xff] %v4975_v13  ;;  %5942 = vst [vmem:[#allocation33_spill] sm:$0xff] %v4977_v14  ;;  %v4983_v10 = vld [vmem:[#allocation11 + $0x128] sm:$0xf]  ;;  %v4985_v17 = vld [vmem:[#allocation11 + $0x12c] sm:$0xff] }
 0x8ee   :  { %5943 = vst [vmem:[#allocation34_spill] sm:$0xff] %v4979_v15  ;;  %5944 = vst [vmem:[#allocation35_spill] sm:$0xff] %v4981_v16  ;;  %v4987_v18 = vld [vmem:[#allocation11 + $0x134] sm:$0xf]  ;;  %v4989_v21 = vld [vmem:[#allocation11 + $0x138] sm:$0xff] }
 0x8ef   :  { %5945 = vst [vmem:[#allocation36_spill] sm:$0xff] %v4983_v10  ;;  %5946 = vst [vmem:[#allocation37_spill] sm:$0xff] %v4985_v17  ;;  %v4991_v23 = vld [vmem:[#allocation11 + $0x140] sm:$0xf]  ;;  %v4993_v24 = vld [vmem:[#allocation11 + $0x144] sm:$0xff] }
 0x8f0   :  { %5947 = vst [vmem:[#allocation38_spill] sm:$0xff] %v4987_v18  ;;  %5948 = vst [vmem:[#allocation39_spill] sm:$0xff] %v4989_v21  ;;  %v4995_v26 = vld [vmem:[#allocation11 + $0x14c] sm:$0xf]  ;;  %v4997_v47 = vld [vmem:[#allocation11 + $0x150] sm:$0xff] }
 0x8f1   :  { %5949 = vst [vmem:[#allocation40_spill] sm:$0xff] %v4991_v23  ;;  %5950 = vst [vmem:[#allocation41_spill] sm:$0xff] %v4993_v24  ;;  %v4999_v2 = vld [vmem:[#allocation11 + $0x158] sm:$0xf]  ;;  %v5001_v55 = vld [vmem:[#allocation11 + $0x15c] sm:$0xff] }
 0x8f2   :  { %5951 = vst [vmem:[#allocation42_spill] sm:$0xff] %v4995_v26  ;;  %5952 = vst [vmem:[#allocation43_spill] sm:$0xff] %v4997_v47  ;;  %v5003_v61 = vld [vmem:[#allocation11 + $0x164] sm:$0xf]  ;;  %v5005_v1 = vld [vmem:[#allocation11 + $0x168] sm:$0xff] }
 0x8f3   :  { %5953 = vst [vmem:[#allocation44_spill] sm:$0xff] %v4999_v2  ;;  %5954 = vst [vmem:[#allocation45_spill] sm:$0xff] %v5001_v55  ;;  %v5007_v62 = vld [vmem:[#allocation11 + $0x170] sm:$0xf]  ;;  %v5009_v59 = vld [vmem:[#allocation11 + $0x174] sm:$0xff] }
 0x8f4   :  { %5955 = vst [vmem:[#allocation46_spill] sm:$0xff] %v5003_v61  ;;  %5956 = vst [vmem:[#allocation47_spill] sm:$0xff] %v5005_v1  ;;  %v5011_v41 = vld [vmem:[#allocation11 + $0x17c] sm:$0xf]  ;;  %v5013_v31 = vld [vmem:[#allocation13 + $0xc0] sm:$0xff] }
 0x8f5   :  { %5957 = vst [vmem:[#allocation48_spill] sm:$0xff] %v5007_v62  ;;  %5958 = vst [vmem:[#allocation49_spill] sm:$0xff] %v5009_v59  ;;  %v5015_v37 = vld [vmem:[#allocation13 + $0xc8] sm:$0xf]  ;;  %v5017_v25 = vld [vmem:[#allocation13 + $0xcc] sm:$0xff] }
 0x8f6   :  { %5959 = vst [vmem:[#allocation50_spill] sm:$0xff] %v5011_v41  ;;  %5960 = vst [vmem:[#allocation51_spill] sm:$0xff] %v5013_v31  ;;  %v5019_v53 = vld [vmem:[#allocation13 + $0xd4] sm:$0xf]  ;;  %v5021_v22 = vld [vmem:[#allocation13 + $0xd8] sm:$0xff] }
 0x8f7   :  { %5961 = vst [vmem:[#allocation52_spill] sm:$0xff] %v5015_v37  ;;  %5962 = vst [vmem:[#allocation53_spill] sm:$0xff] %v5017_v25  ;;  %v5023_v49 = vld [vmem:[#allocation13 + $0xe0] sm:$0xf]  ;;  %v5025_v39 = vld [vmem:[#allocation13 + $0xe4] sm:$0xff] }
 0x8f8   :  { %5963 = vst [vmem:[#allocation54_spill] sm:$0xff] %v5019_v53  ;;  %5964 = vst [vmem:[#allocation55_spill] sm:$0xff] %v5021_v22  ;;  %v5027_v60 = vld [vmem:[#allocation13 + $0xec] sm:$0xf]  ;;  %v5029_v30 = vld [vmem:[#allocation13 + $0xf0] sm:$0xff] }
 0x8f9   :  { %5965 = vst [vmem:[#allocation56_spill] sm:$0xff] %v5023_v49  ;;  %5966 = vst [vmem:[#allocation57_spill] sm:$0xff] %v5025_v39  ;;  %v5031_v45 = vld [vmem:[#allocation13 + $0xf8] sm:$0xf]  ;;  %v5033_v44 = vld [vmem:[#allocation13 + $0xfc] sm:$0xff] }
 0x8fa   :  { %5967 = vst [vmem:[#allocation58_spill] sm:$0xff] %v5027_v60  ;;  %5968 = vst [vmem:[#allocation59_spill] sm:$0xff] %v5029_v30  ;;  %v5035_v27 = vld [vmem:[#allocation13 + $0x104] sm:$0xf]  ;;  %v5037_v20 = vld [vmem:[#allocation13 + $0x108] sm:$0xff] }
 0x8fb   :  { %5969 = vst [vmem:[#allocation60_spill] sm:$0xff] %v5031_v45  ;;  %5970 = vst [vmem:[#allocation61_spill] sm:$0xff] %v5033_v44  ;;  %v5039_v29 = vld [vmem:[#allocation13 + $0x110] sm:$0xf]  ;;  %v5041_v19 = vld [vmem:[#allocation13 + $0x114] sm:$0xff] }
 0x8fc   :  { %5971 = vst [vmem:[#allocation62_spill] sm:$0xff] %v5035_v27  ;;  %5972 = vst [vmem:[#allocation63_spill] sm:$0xff] %v5037_v20  ;;  %v5043_v40 = vld [vmem:[#allocation13 + $0x11c] sm:$0xf]  ;;  %v5045_v0 = vld [vmem:[#allocation13 + $0x120] sm:$0xff] }
 0x8fd   :  { %5973 = vst [vmem:[#allocation64_spill] sm:$0xff] %v5039_v29  ;;  %5974 = vst [vmem:[#allocation65_spill] sm:$0xff] %v5041_v19  ;;  %v5047_v28 = vld [vmem:[#allocation13 + $0x128] sm:$0xf]  ;;  %v5049_v51 = vld [vmem:[#allocation13 + $0x12c] sm:$0xff] }
 0x8fe   :  { %5975 = vst [vmem:[#allocation66_spill] sm:$0xff] %v5043_v40  ;;  %5976 = vst [vmem:[#allocation67_spill] sm:$0xff] %v5045_v0  ;;  %v5051_v35 = vld [vmem:[#allocation13 + $0x134] sm:$0xf]  ;;  %v5053_v32 = vld [vmem:[#allocation13 + $0x138] sm:$0xff] }
 0x8ff   :  { %5977 = vst [vmem:[#allocation68_spill] sm:$0xff] %v5047_v28  ;;  %5978 = vst [vmem:[#allocation69_spill] sm:$0xff] %v5049_v51  ;;  %v5055_v48 = vld [vmem:[#allocation13 + $0x140] sm:$0xf]  ;;  %v5057_v3 = vld [vmem:[#allocation13 + $0x144] sm:$0xff] }
 0x900   :  { %5979 = vst [vmem:[#allocation70_spill] sm:$0xff] %v5051_v35  ;;  %5980 = vst [vmem:[#allocation71_spill] sm:$0xff] %v5053_v32  ;;  %v5059_v34 = vld [vmem:[#allocation13 + $0x14c] sm:$0xf]  ;;  %v5061_v57 = vld [vmem:[#allocation13 + $0x150] sm:$0xff] }
 0x901   :  { %5981 = vst [vmem:[#allocation72_spill] sm:$0xff] %v5055_v48  ;;  %5982 = vst [vmem:[#allocation73_spill] sm:$0xff] %v5057_v3  ;;  %v5063_v43 = vld [vmem:[#allocation13 + $0x158] sm:$0xf]  ;;  %v5065_v58 = vld [vmem:[#allocation13 + $0x15c] sm:$0xff]  ;;  %3085 = sbr.rel (%p3090_p11) target bundleno = 4498 (0x1192), region = 103 }
 0x902   :  { %5983 = vst [vmem:[#allocation74_spill] sm:$0xff] %v5059_v34  ;;  %5984 = vst [vmem:[#allocation75_spill] sm:$0xff] %v5061_v57  ;;  %v5067_v38 = vld [vmem:[#allocation13 + $0x164] sm:$0xf]  ;;  %v5069_v46 = vld [vmem:[#allocation13 + $0x168] sm:$0xff] }
 0x903   :  { %5985 = vst [vmem:[#allocation76_spill] sm:$0xff] %v5063_v43  ;;  %5986 = vst [vmem:[#allocation77_spill] sm:$0xff] %v5065_v58  ;;  %v5071_v36 = vld [vmem:[#allocation13 + $0x170] sm:$0xf]  ;;  %v5073_v56 = vld [vmem:[#allocation13 + $0x174] sm:$0xff] }
 0x904   :  { %5987 = vst [vmem:[#allocation78_spill] sm:$0xff] %v5067_v38  ;;  %5988 = vst [vmem:[#allocation79_spill] sm:$0xff] %v5069_v46  ;;  %v5075_v52 = vld [vmem:[#allocation13 + $0x17c] sm:$0xf]  ;;  %v5080_v48 = vld [vmem:[%s5695_s5 + $0x3] sm:$0x7] }
 0x905   :  { %5989 = vst [vmem:[#allocation80_spill] sm:$0xff] %v5071_v36  ;;  %5990 = vst [vmem:[#allocation81_spill] sm:$0xff] %v5073_v56  ;;  %v5085_v43 = vld [vmem:[%s5696_s6 + $0x1] ss:$0 sm:$0xff] }
 0x906   :  { %5991 = vst [vmem:[#allocation82_spill] sm:$0xff] %v5075_v52  ;;  %5992 = vst [vmem:[#allocation83_spill] sm:$0xff] %v5080_v48 }
 0x907   :  { %5993 = vst [vmem:[#allocation84_spill] sm:$0xff] %v5085_v43 }
 0x908 LB: > { %v5994_v59 = vld [vmem:[#allocation49_spill] sm:$0xff]  ;;  %v6000_v50 = vld [vmem:[#allocation19_spill] sm:$0xff]  ;;  %s3266_s5 = sshll.u32 %s4116_s10, 5  ;;  %v6025_v33 = vld [vmem:[#allocation22_spill] sm:$0xff]  ;;  %s5120_s13 = sshll.u32 %s4116_s10, 3  ;;  %vm4131_vm2 = vmmov 0   ;;  %s4116_s10 = sphi %s5089_s10, %s1603_s10  }
 0x909   : > { %v5996_v57 = vld [vmem:[#allocation75_spill] sm:$0xff]  ;;  %v5998_v55 = vld [vmem:[#allocation45_spill] sm:$0xff]  ;;  %v6026_v63 = vld [vmem:[#allocation20_spill] sm:$0xff]  ;;  %s5109_s6 = scalar_lea.vmem [#allocation2], %s3266_s5  ;;  %s2300_s14 = sadd.s32 1, %s5120_s13 }
 0x90a   : > { %v5995_v58 = vld [vmem:[#allocation77_spill] sm:$0xff]  ;;  %v6001_v47 = vld [vmem:[#allocation43_spill] sm:$0xff]  ;;  %v3195_v38 = vcombine.low %v6026_v63, %v6025_v33  ;;  %v6027_v7 = vld [vmem:[#allocation26_spill] sm:$0xff]  ;;  %s2417_s15 = sadd.s32 2, %s5120_s13  ;;  %s2534_s17 = sadd.s32 3, %s5120_s13 }
 0x90b   : > { %v5999_v51 = vld [vmem:[#allocation69_spill] sm:$0xff]  ;;  %v6004_v32 = vld [vmem:[#allocation71_spill] sm:$0xff]  ;;  %v6028_v5 = vld [vmem:[#allocation24_spill] sm:$0xff]  ;;  %s2651_s2 = sadd.s32 4, %s5120_s13  ;;  %s2768_s16 = sadd.s32 5, %s5120_s13 }
 0x90c   : > { %v5997_v56 = vld [vmem:[#allocation81_spill] sm:$0xff]  ;;  %v6005_v31 = vld [vmem:[#allocation51_spill] sm:$0xff]  ;;  %3619 = vmatprep.subr.bf16.mxu1 %v3195_v38  ;;  %v6029_v11 = vld [vmem:[#allocation30_spill] sm:$0xff]  ;;  %s2885_s18 = sadd.s32 6, %s5120_s13  ;;  %s3002_s19 = sadd.s32 7, %s5120_s13 }
 0x90d   : > { %v6002_v44 = vld [vmem:[#allocation61_spill] sm:$0xff]  ;;  %v6006_v30 = vld [vmem:[#allocation59_spill] sm:$0xff]  ;;  %3620 = vmatpush3.bf16.msra.mxu1 %v3195_v38  ;;  %v6030_v54 = vld [vmem:[#allocation28_spill] sm:$0xff]  ;;  %s1603_s10 = sadd.s32 1, %s4116_s10  }
 0x90e   : > { %v6003_v39 = vld [vmem:[#allocation57_spill] sm:$0xff]  ;;  %v6009_v22 = vld [vmem:[#allocation55_spill] sm:$0xff]  ;;  %v6031_v15 = vld [vmem:[#allocation34_spill] sm:$0xff]  ;;  %p1602_p13 = scmp.ge.s32.totalorder %s1603_s10, %s6072_s24 }
 0x90f   : > { %v6007_v25 = vld [vmem:[#allocation53_spill] sm:$0xff]  ;;  %v6010_v21 = vld [vmem:[#allocation39_spill] sm:$0xff]  ;;  %v6032_v13 = vld [vmem:[#allocation32_spill] sm:$0xff] }
 0x910   : > { %v6008_v24 = vld [vmem:[#allocation41_spill] sm:$0xff]  ;;  %v6011_v20 = vld [vmem:[#allocation63_spill] sm:$0xff]  ;;  %v6035_v18 = vld [vmem:[#allocation38_spill] sm:$0xff] }
 0x911   : > { %v6012_v19 = vld [vmem:[#allocation65_spill] sm:$0xff]  ;;  %v6015_v16 = vld [vmem:[#allocation35_spill] sm:$0xff]  ;;  %v6036_v10 = vld [vmem:[#allocation36_spill] sm:$0xff] }
 0x912   : > { %v6013_v3 = vld [vmem:[#allocation73_spill] sm:$0xff]  ;;  %v6016_v0 = vld [vmem:[#allocation67_spill] sm:$0xff]  ;;  %v6037_v26 = vld [vmem:[#allocation42_spill] sm:$0xff] }
 0x913   : > { %v6014_v17 = vld [vmem:[#allocation37_spill] sm:$0xff]  ;;  %v6018_v12 = vld [vmem:[#allocation31_spill] sm:$0xff]  ;;  %v6038_v23 = vld [vmem:[#allocation40_spill] sm:$0xff] }
 0x914   : > { %v6017_v14 = vld [vmem:[#allocation33_spill] sm:$0xff]  ;;  %v6020_v1 = vld [vmem:[#allocation47_spill] sm:$0xff]  ;;  %v6039_v61 = vld [vmem:[#allocation46_spill] sm:$0xff] }
 0x915   : > { %v6019_v9 = vld [vmem:[#allocation29_spill] sm:$0xff]  ;;  %v6021_v8 = vld [vmem:[#allocation27_spill] sm:$0xff]  ;;  %v3202_v38 = vcombine.low %v6018_v12, %v6017_v14  ;;  %v6040_v2 = vld [vmem:[#allocation44_spill] sm:$0xff] }
 0x916   : > { %v6022_v6 = vld [vmem:[#allocation25_spill] sm:$0xff]  ;;  %v6023_v4 = vld [vmem:[#allocation23_spill] sm:$0xff]  ;;  %v3200_v46 = vcombine.high %v6021_v8, %v6019_v9  ;;  %v6041_v41 = vld [vmem:[#allocation50_spill] sm:$0xff] }
 0x917   : > { %v6024_v42 = vld [vmem:[#allocation21_spill] sm:$0xff]  ;;  %v3197_v43 = vcombine.high %v6023_v4, %v6022_v6  ;;  %v3196_v52 = vcombine.low %v6023_v4, %v6022_v6  ;;  %v3201_v4 = vcombine.low %v6030_v54, %v6029_v11  ;;  %v6033_v6 = vmov 0   ;;  %v6042_v62 = vld [vmem:[#allocation48_spill] sm:$0xff]  ;;  %v6043_v53 = vld [vmem:[#allocation54_spill] sm:$0xff] }
 0x918   : > { %v3194_v36 = vcombine.high %v6000_v50, %v6024_v42  ;;  %v3193_v48 = vcombine.low %v6000_v50, %v6024_v42  ;;  %v3198_v42 = vcombine.low %v6028_v5, %v6027_v7  ;;  %v3203_v5 = vcombine.high %v6018_v12, %v6017_v14  ;;  %3918 = vset.pattern.permute.xlu0 %v6033_v6  ;;  %v6034_v7 = vld [vmem:[#allocation18_spill] sm:$0xff]  ;;  %v6044_v37 = vld [vmem:[#allocation52_spill] sm:$0xff] }
 0x919   : > { %3919 = vset.pattern.permute.xlu1 %v6033_v6  ;;  %v6045_v60 = vld [vmem:[#allocation58_spill] sm:$0xff]  ;;  %v6046_v49 = vld [vmem:[#allocation56_spill] sm:$0xff]  ;;  %v6049_v11 = vmov 0.0   ;;  %v5236_v14 = vcombine.high %v6004_v32, %v6013_v3 }
 0x91a   : > { %1785 = vmatprep.subr.bf16.mxu0 %v3194_v36  ;;  %v5749_v36 = vmov 0   ;;  %3621 = vmatprep.subr.bf16.mxu1 %v3198_v42  ;;  %v6047_v27 = vld [vmem:[#allocation62_spill] sm:$0xff]  ;;  %v6048_v45 = vld [vmem:[#allocation60_spill] sm:$0xff] }
 0x91b   : > { %1786 = vmatpush1.bf16.msra.mxu0 %v3193_v48  ;;  %1817 = vmatprep.mubr.bf16.mxu0 %v5749_v36  ;;  %v3199_v48 = vcombine.low %v6021_v8, %v6019_v9  ;;  %v2184_v36 = vstv %s5120_s13  ;;  %v3209_v8 = vcombine.high %v6010_v21, %v6008_v24  ;;  %v5205_v9 = vcombine.low %v6048_v45, %v6047_v27  ;;  %v6050_v40 = vld [vmem:[#allocation66_spill] sm:$0xff]  ;;  %v6051_v29 = vld [vmem:[#allocation64_spill] sm:$0xff] }
 0x91c   : > { %1787 = vmatprep.subr.bf16.mxu0 %v3197_v43  ;;  %v3920_v43 = vld [vmem:[%s5109_s6] sm:$0xff]   ;;  %3622 = vmatpush3.bf16.msra.mxu1 %v3198_v42  ;;  %vm2185_vm1 = vcmp.eq.s32.totalorder %v6034_v7, %v2184_v36  ;;  %v3210_v36 = vcombine.low %v6038_v23, %v6037_v26  ;;  %v5223_v12 = vcombine.low %v6051_v29, %v6050_v40  ;;  %v6052_v35 = vld [vmem:[#allocation70_spill] sm:$0xff]  ;;  %v6053_v28 = vld [vmem:[#allocation68_spill] sm:$0xff] }
 0x91d   : > { %3635 = vmatprep.mubr.bf16.mxu1 %v3920_v43  ;;  %3623 = vmatprep.subr.bf16.mxu1 %v3201_v4  ;;  %v2186_v42 = vsel %vm2185_vm1, 1, %v6033_v6  ;;  %v6054_v34 = vld [vmem:[#allocation74_spill] sm:$0xff]  ;;  %v5282_v23 = vld [vmem:[#allocation4] sm:$0xff] }
 0x91e   : > { %2188 = vperm.xlu0 %3918, %v2186_v42   ;;  %v3215_v42 = vcombine.high %v6020_v1, %v5994_v59 }
 0x91f   : > { %1788 = vmatpush1.bf16.msra.mxu0 %v3196_v52  ;;  %v3204_v52 = vcombine.low %v6032_v13, %v6031_v15  ;;  %v5230_v13 = vcombine.low %v6016_v0, %v5999_v51  ;;  %v5241_v15 = vcombine.low %v6053_v28, %v6052_v35  ;;  %v6061_v28 = vld [vmem:[#allocation83_spill] sm:$0xff] }
 0x920   : > { %1789 = vmatprep.subr.bf16.mxu0 %v3200_v46  ;;  %v3206_v46 = vcombine.high %v6015_v16, %v6014_v17  ;;  %3624 = vmatpush3.bf16.msra.mxu1 %v3201_v4  ;;  %v3208_v4 = vcombine.low %v6010_v21, %v6008_v24 }
 0x921   : > { %3625 = vmatprep.subr.bf16.mxu1 %v3204_v52 }
 0x923   : > { %1790 = vmatpush1.bf16.msra.mxu0 %v3199_v48  ;;  %v3205_v48 = vcombine.low %v6015_v16, %v6014_v17  ;;  %v5252_v16 = vcombine.high %v5996_v57, %v5995_v58 }
 0x924   : > { %1791 = vmatprep.subr.bf16.mxu0 %v3203_v5  ;;  %v3207_v5 = vcombine.low %v6036_v10, %v6035_v18  ;;  %3626 = vmatpush3.bf16.msra.mxu1 %v3204_v52  ;;  %v3213_v52 = vcombine.low %v6040_v2, %v6039_v61  ;;  %v5200_v2 = vcombine.high %v6011_v20, %v6012_v19  ;;  %v6056_v18 = vld [vmem:[#allocation79_spill] sm:$0xff] }
 0x925   : > { %v5210_v10 = vcombine.low %v6011_v20, %v6012_v19  ;;  %v5269_v19 = vcombine.high %v6056_v18, %v5997_v56  ;;  %v6057_v20 = vld [vmem:[#allocation78_spill] sm:$0xff] }
 0x926   : > { %3627 = vmatprep.subr.bf16.mxu1 %v3207_v5 }
 0x927   : > { %1792 = vmatpush1.bf16.msra.mxu0 %v3202_v38  ;;  %v3212_v38 = vcombine.high %v6001_v47, %v5998_v55 }
 0x928   : > { %1793 = vmatprep.subr.bf16.mxu0 %v3206_v46  ;;  %3628 = vmatpush3.bf16.msra.mxu1 %v3207_v5  ;;  %v3211_v46 = vcombine.low %v6001_v47, %v5998_v55  ;;  %v5157_v5 = vcombine.high %v6005_v31, %v6007_v25 }
 0x929   : > { %3629 = vmatprep.subr.bf16.mxu1 %v3210_v36 }
 0x92b   : > { %1794 = vmatpush1.bf16.msra.mxu0 %v3205_v48  ;;  %v3216_v48 = vcombine.low %v6042_v62, %v6041_v41 }
 0x92c   : > { %1795 = vmatprep.subr.bf16.mxu0 %v3209_v8  ;;  %3630 = vmatpush3.bf16.msra.mxu1 %v3210_v36  ;;  %v3214_v8 = vcombine.low %v6020_v1, %v5994_v59  ;;  %v5166_v36 = vcombine.high %v6009_v22, %v6003_v39  ;;  %v5194_v1 = vcombine.low %v6006_v30, %v6002_v44 }
 0x92d   : > { %3631 = vmatprep.subr.bf16.mxu1 %v3213_v52 }
 0x92f   : > { %1796 = vmatpush1.bf16.msra.mxu0 %v3208_v4  ;;  %v5161_v4 = vcombine.low %v6005_v31, %v6007_v25 }
 0x930   : > { %1797 = vmatprep.subr.bf16.mxu0 %v3212_v38  ;;  %3632 = vmatpush3.bf16.msra.mxu1 %v3213_v52  ;;  %v5170_v38 = vcombine.low %v6044_v37, %v6043_v53  ;;  %v3921_v52 = vld [vmem:[%s5109_s6 + $0x8] sm:$0xff]  }
 0x931   : > { %3633 = vmatprep.subr.bf16.mxu1 %v3216_v48 }
 0x933   : > { %1798 = vmatpush1.bf16.msra.mxu0 %v3211_v46  ;;  %v5175_v46 = vcombine.low %v6009_v22, %v6003_v39  ;;  %v5279_v22 = vcombine.low %v6056_v18, %v5997_v56 }
 0x934   : > { %1799 = vmatprep.subr.bf16.mxu0 %v3215_v42  ;;  %3634 = vmatpush3.bf16.msra.mxu1 %v3216_v48  ;;  %v5182_v42 = vcombine.high %v6006_v30, %v6002_v44  ;;  %v5189_v48 = vcombine.low %v6046_v49, %v6045_v60 }
 0x937   : > { %1800 = vmatpush1.bf16.msra.mxu0 %v3214_v8  ;;  %v5755_v8 = vmov 0.0   ;;  %3636 = vmatmul.mubr.bf16.vlgmr.msra.gmra.mrb[0].mxu1 %v3921_v52 }
 0x938   : > { %2081 = vmatprep.subr.bf16.mxu0 %v5157_v5  ;;  %3643 = vmatprep.subr.bf16.mxu1 %v5755_v8 }
 0x939   : > { %3644 = vmatpush3.bf16.msra.mxu1 %v5170_v38 }
 0x93a   : > { %1818 = vmatmul.mubr.bf16.vlgmr.msra.gmra.mrb[0].mxu0 %v3920_v43  ;;  %v3922_v43 = vld [vmem:[%s5109_s6 + $0x10] sm:$0xff]   ;;  %3645 = vmatprep.subr.bf16.mxu1 %v5755_v8  ;;  %v3923_v8 = vld [vmem:[%s5109_s6 + $0x18] sm:$0xff]  }
 0x93b   : > { %2082 = vmatpush1.bf16.msra.mxu0 %v5161_v4  ;;  %1827 = vmatprep.mubr.bf16.mxu0 %v6033_v6 }
 0x93c   : > { %2083 = vmatprep.subr.bf16.mxu0 %v5166_v36  ;;  %3639 = vmatprep.mubr.bf16.mxu1 %v3922_v43 }
 0x93d   : > { %3646 = vmatpush3.bf16.msra.mxu1 %v5189_v48 }
 0x93e   : > { %3647 = vmatprep.subr.bf16.mxu1 %v6049_v11 }
 0x93f   : > { %2084 = vmatpush1.bf16.msra.mxu0 %v5175_v46  ;;  %3640 = vmatmul.mubr.bf16.gmra.mrb[4].mxu1 %v3923_v8 }
 0x940   : > { %2085 = vmatprep.subr.bf16.mxu0 %v5182_v42  ;;  %3659 = vmatprep.mubr.msk.bf16.mxu1 %vm4131_vm2, %v6049_v11 }
 0x941   : > { %3648 = vmatpush3.bf16.msra.mxu1 %v5205_v9 }
 0x942   : > { %1828 = vmatmul.mubr.bf16.gmra.mrb[4].mxu0 %v3921_v52  ;;  %v5217_v52 = vcombine.high %v6016_v0, %v5999_v51  ;;  %3649 = vmatprep.subr.bf16.mxu1 %v6049_v11  ;;  %v5246_v0 = vcombine.low %v6004_v32, %v6013_v3  ;;  %v5263_v3 = vcombine.low %v5996_v57, %v5995_v58 }
 0x943   : > { %2086 = vmatpush1.bf16.msra.mxu0 %v5194_v1  ;;  %1837 = vmatprep.mubr.bf16.mxu0 %v6033_v6 }
 0x944   : > { %2087 = vmatprep.subr.bf16.mxu0 %v5200_v2 }
 0x945   : > { %3650 = vmatpush3.bf16.msra.mxu1 %v5223_v12 }
 0x946   : > { %3651 = vmatprep.subr.bf16.mxu1 %v6049_v11 }
 0x947   : > { %2088 = vmatpush1.bf16.msra.mxu0 %v5210_v10 }
 0x948   : > { %2089 = vmatprep.subr.bf16.mxu0 %v5217_v52 }
 0x949   : > { %3652 = vmatpush3.bf16.msra.mxu1 %v5241_v15 }
 0x94a   : > { %1838 = vmatmul.mubr.bf16.gmra.mrb[8].mxu0 %v3922_v43  ;;  %v6055_v43 = vld [vmem:[#allocation72_spill] sm:$0xff]  ;;  %3653 = vmatprep.subr.bf16.mxu1 %v6049_v11 }
 0x94b   : > { %2090 = vmatpush1.bf16.msra.mxu0 %v5230_v13  ;;  %1847 = vmatprep.mubr.bf16.mxu0 %v6033_v6  ;;  %v5258_v17 = vcombine.low %v6055_v43, %v6054_v34  ;;  %v6058_v43 = vld [vmem:[#allocation76_spill] sm:$0xff] }
 0x94c   : > { %2091 = vmatprep.subr.bf16.mxu0 %v5236_v14  ;;  %v5274_v21 = vcombine.low %v6058_v43, %v6057_v20  ;;  %v6059_v20 = vld [vmem:[#allocation82_spill] sm:$0xff]  ;;  %v6060_v43 = vld [vmem:[#allocation80_spill] sm:$0xff] }
 0x94d   : > { %3654 = vmatpush3.bf16.msra.mxu1 %v5258_v17  ;;  %v5291_v24 = vcombine.low %v6060_v43, %v6059_v20  ;;  %v1618_v43 = vlaneseq }
 0x94e   : > { %3655 = vmatprep.subr.bf16.mxu1 %v6049_v11 }
 0x94f   : > { %2092 = vmatpush1.bf16.msra.mxu0 %v5246_v0  ;;  %v1619_v18 = vshrl.u32 %v1618_v43, 7 }
 0x950   : > { %2093 = vmatprep.subr.bf16.mxu0 %v5252_v16 }
 0x951   : > { %3656 = vmatpush3.bf16.msra.mxu1 %v5274_v21  ;;  %v1620_v25 = vsub.s32 0, %v1619_v18  ;;  %v1624_v26 = vsub.s32 1, %v1619_v18  ;;  %v1628_v27 = vsub.s32 2, %v1619_v18 }
 0x952   : > { %1848 = vmatmul.mubr.bf16.gmra.mrb[12].mxu0 %v3923_v8  ;;  %v1952_v8 = vpack.c.bf16 %v5282_v23, %v5282_v23  ;;  %3657 = vmatprep.subr.bf16.mxu1 %v6049_v11 }
 0x953   : > { %2094 = vmatpush1.bf16.msra.mxu0 %v5263_v3  ;;  %2113 = vmatprep.mubr.bf16.mxu0 %v6033_v6  ;;  %v1621_v29 = vrot.slane %v6061_v28, %v1620_v25  ;;  %v1625_v30 = vrot.slane %v6061_v28, %v1624_v26  ;;  %v1629_v32 = vrot.slane %v6061_v28, %v1628_v27 }
 0x954   : > { %2095 = vmatprep.subr.bf16.mxu0 %v5269_v19 }
 0x955   : > { %3658 = vmatpush3.bf16.msra.mxu1 %v5291_v24 }
 0x956   : > { %3663 = vmatprep.subr.bf16.mxu1 %v6049_v11 }
 0x957   : > { %2096 = vmatpush1.bf16.msra.mxu0 %v5279_v22 }
 0x958   : > { %2197 = vmatprep.subr.bf16.mxu0 %v5157_v5  ;;  %3660 = vmatmul.mubr.bf16.vlgmr.msra.gmra.mrb[8].mxu1 %v1952_v8 }
 0x959   : > { %3664 = vmatpush3.bf16.msra.mxu1 %v5170_v38  ;;  %3679 = vmatprep.mubr.msk.bf16.mxu1 %vm4131_vm2, %v6049_v11 }
 0x95a   : > { %2114 = vmatmul.mubr.bf16.vlgmr.msra.gmra.mrb[16].mxu0 %v1952_v8  ;;  %3665 = vmatprep.subr.bf16.mxu1 %v6049_v11  ;;  %v2301_v8 = vstv %s2300_s14 }
 0x95b   : > { %2198 = vmatpush1.bf16.msra.mxu0 %v5161_v4  ;;  %2229 = vmatprep.mubr.bf16.mxu0 %v6033_v6  ;;  %vm2302_vm3 = vcmp.eq.s32.totalorder %v6034_v7, %v2301_v8 }
 0x95c   : > { %2199 = vmatprep.subr.bf16.mxu0 %v5166_v36  ;;  %v2303_v20 = vsel %vm2302_vm3, 1, %v6033_v6 }
 0x95d   : > { %3666 = vmatpush3.bf16.msra.mxu1 %v5189_v48  ;;  %2305 = vperm.xlu0 %3918, %v2303_v20  }
 0x95e   : > { %3667 = vmatprep.subr.bf16.mxu1 %v6049_v11 }
 0x95f   : > { %2200 = vmatpush1.bf16.msra.mxu0 %v5175_v46 }
 0x960   : > { %2201 = vmatprep.subr.bf16.mxu0 %v5182_v42 }
 0x961   : > { %3668 = vmatpush3.bf16.msra.mxu1 %v5205_v9 }
 0x962   : > { %3669 = vmatprep.subr.bf16.mxu1 %v6049_v11 }
 0x963   : > { %2202 = vmatpush1.bf16.msra.mxu0 %v5194_v1 }
 0x964   : > { %2203 = vmatprep.subr.bf16.mxu0 %v5200_v2 }
 0x965   : > { %3670 = vmatpush3.bf16.msra.mxu1 %v5223_v12 }
 0x966   : > { %3671 = vmatprep.subr.bf16.mxu1 %v6049_v11 }
 0x967   : > { %2204 = vmatpush1.bf16.msra.mxu0 %v5210_v10 }
 0x968   : > { %2205 = vmatprep.subr.bf16.mxu0 %v5217_v52 }
 0x969   : > { %3672 = vmatpush3.bf16.msra.mxu1 %v5241_v15 }
 0x96a   : > { %3673 = vmatprep.subr.bf16.mxu1 %v6049_v11 }
 0x96b   : > { %2206 = vmatpush1.bf16.msra.mxu0 %v5230_v13 }
 0x96c   : > { %2207 = vmatprep.subr.bf16.mxu0 %v5236_v14 }
 0x96d   : > { %3674 = vmatpush3.bf16.msra.mxu1 %v5258_v17 }
 0x96e   : > { %3675 = vmatprep.subr.bf16.mxu1 %v6049_v11 }
 0x96f   : > { %2208 = vmatpush1.bf16.msra.mxu0 %v5246_v0 }
 0x970   : > { %2209 = vmatprep.subr.bf16.mxu0 %v5252_v16 }
 0x971   : > { %3676 = vmatpush3.bf16.msra.mxu1 %v5274_v21 }
 0x972   : > { %3677 = vmatprep.subr.bf16.mxu1 %v6049_v11 }
 0x973   : > { %2210 = vmatpush1.bf16.msra.mxu0 %v5263_v3 }
 0x974   : > { %2211 = vmatprep.subr.bf16.mxu0 %v5269_v19 }
 0x975   : > { %3678 = vmatpush3.bf16.msra.mxu1 %v5291_v24 }
 0x976   : > { %3683 = vmatprep.subr.bf16.mxu1 %v6049_v11 }
 0x977   : > { %2212 = vmatpush1.bf16.msra.mxu0 %v5279_v22 }
 0x978   : > { %2314 = vmatprep.subr.bf16.mxu0 %v5157_v5 }
 0xa0a   : > { %v3637_v20 = vpop.f32.mrb[0].mxu1 }
 0xa0b   : > { %v5343_v43 = vadd.f32 %v3637_v20, %v1629_v32  ;;  %v1892_v18 = vpop.f32.mrb[1].mxu1 }
 0xa0c   : > { %v5345_v41 = vadd.f32 %v1892_v18, %v1629_v32  ;;  %v3638_v25 = vpop.f32.mrb[2].mxu1 }
 0xa0d   : > { %v1819_v31 = vpop.f32.mrb[0].mxu0  ;;  %v5347_v26 = vadd.f32 %v3638_v25, %v1629_v32  ;;  %v1895_v44 = vpop.f32.mrb[3].mxu1 }
 0xa0e   : > { %v1820_v33 = vadd.f32 %v1819_v31, %v1621_v29  ;;  %v1821_v34 = vpop.f32.mrb[1].mxu0  ;;  %v5349_v27 = vadd.f32 %v1895_v44, %v1629_v32 }
 0xa0f   : > { %v1822_v35 = vadd.f32 %v1821_v34, %v1625_v30  ;;  %v1823_v37 = vpop.f32.mrb[2].mxu0 }
 0xa10   : > { %v5339_v8 = vadd.f32 %v1823_v37, %v1621_v29  ;;  %v1825_v39 = vpop.f32.mrb[3].mxu0 }
 0xa11   : > { %v5341_v40 = vadd.f32 %v1825_v39, %v1625_v30 }
 0xa12   : > { %v3641_v47 = vpop.f32.mrb[4].mxu1 }
 0xa13   : > { %v5359_v18 = vadd.f32 %v3641_v47, %v1629_v32  ;;  %v1908_v25 = vpop.f32.mrb[5].mxu1 }
 0xa14   : > { %v5361_v50 = vadd.f32 %v1908_v25, %v1629_v32  ;;  %v3642_v44 = vpop.f32.mrb[6].mxu1 }
 0xa15   : > { %v1829_v31 = vpop.f32.mrb[4].mxu0  ;;  %6062 = vst [vmem:[#allocation89_spill] sm:$0xff] %v5359_v18  ;;  %v1920_v51 = vadd.f32 %v3642_v44, %v1629_v32  ;;  %v1911_v53 = vpop.f32.mrb[7].mxu1 }
 0xa16   : > { %v5351_v34 = vadd.f32 %v1829_v31, %v1621_v29  ;;  %v1831_v37 = vpop.f32.mrb[5].mxu0  ;;  %v5363_v31 = vadd.f32 %v1911_v53, %v1629_v32 }
 0xa17   : > { %v5353_v28 = vadd.f32 %v1831_v37, %v1625_v30  ;;  %v1833_v45 = vpop.f32.mrb[6].mxu0  ;;  %1946 = vst [vmem:[#allocation3 + $0xb8] sm:$0xff] %v1920_v51 }
 0xa18   : > { %v5355_v39 = vadd.f32 %v1833_v45, %v1621_v29  ;;  %v1835_v20 = vpop.f32.mrb[7].mxu0  ;;  %6063 = vst [vmem:[#allocation90_spill] sm:$0xff] %v5363_v31 }
 0xa19   : > { %v5357_v49 = vadd.f32 %v1835_v20, %v1625_v30 }
 0xa1d   : > { %v1839_v54 = vpop.f32.mrb[8].mxu0 }
 0xa1e   : > { %v5365_v37 = vadd.f32 %v1839_v54, %v1621_v29  ;;  %v1841_v45 = vpop.f32.mrb[9].mxu0 }
 0xa1f   : > { %v5367_v55 = vadd.f32 %v1841_v45, %v1625_v30  ;;  %v1843_v56 = vpop.f32.mrb[10].mxu0 }
 0xa20   : > { %v5369_v20 = vadd.f32 %v1843_v56, %v1621_v29  ;;  %v1845_v47 = vpop.f32.mrb[11].mxu0 }
 0xa21   : > { %v5371_v57 = vadd.f32 %v1845_v47, %v1625_v30 }
 0xa25   : > { %v1849_v25 = vpop.f32.mrb[12].mxu0 }
 0xa26   : > { %v5373_v58 = vadd.f32 %v1849_v25, %v1621_v29  ;;  %v1851_v44 = vpop.f32.mrb[13].mxu0 }
 0xa27   : > { %v5375_v59 = vadd.f32 %v1851_v44, %v1625_v30  ;;  %v1853_v53 = vpop.f32.mrb[14].mxu0 }
 0xa28   : > { %6064 = vst [vmem:[#allocation91_spill] sm:$0xff] %v5373_v58  ;;  %v1854_v32 = vadd.f32 %v1853_v53, %v1621_v29  ;;  %v1855_v51 = vpop.f32.mrb[15].mxu0  ;;  %v6066_v53 = vld [vmem:[#allocation84_spill] sm:$0xff] }
 0xa29   : > { %6065 = vst [vmem:[#allocation92_spill] sm:$0xff] %v5375_v59  ;;  %v1856_v54 = vadd.f32 %v1855_v51, %v1625_v30 }
 0xa2a   : > { %1944 = vst [vmem:[#allocation3 + $0xa8] sm:$0xff] %v1854_v32 }
 0xa2b   : > { %1945 = vst [vmem:[#allocation3 + $0xb0] sm:$0xff] %v1856_v54  ;;  %v2156_v18 = vpop.f32.mrb[8].mxu1 }
 0xa2c   : > { %v3661_v31 = vpop.f32.mrb[9].mxu1  ;;  %v2176_v32 = vadd.f32 %v6066_v53, %v2156_v18 }
 0xa2d   : > { %v2115_v45 = vpop.f32.mrb[16].mxu0  ;;  %v2159_v25 = vpop.f32.mrb[10].mxu1 }
 0xa2e   : > { %v2162_v60 = vadd.f32 %v2115_v45, %v1820_v33  ;;  %v2117_v61 = vpop.f32.mrb[17].mxu0  ;;  %v3662_v58 = vpop.f32.mrb[11].mxu1 }
 0xa2f   : > { %v2163_v56 = vadd.f32 %v2117_v61, %v1822_v35  ;;  %v2119_v62 = vpop.f32.mrb[18].mxu0 }
 0xa30   : > { %v3241_v63 = vmul.f32 -1.442695, %v2162_v60  ;;  %v2120_v47 = vpop.f32.mrb[19].mxu0 }
 0xa31   : > { %v3242_v44 = vmul.f32 -1.442695, %v2163_v56 }
 0xa32   : > { %3924 = vpow2.f32 %v3241_v63 }
 0xa33   : > { %3926 = vpow2.f32 %v3242_v44 }
 0xa3c   : > { %v3925_v59 = vpop.eup %3924 }
 0xa3d   : > { %v2170_v29 = vadd.f32 1.0, %v3925_v59  ;;  %v3927_v30 = vpop.eup %3926 }
 0xa3e   : > { %v2171_v51 = vadd.f32 1.0, %v3927_v30 }
 0xa3f   : > { %3928 = vrcp.f32 %v2170_v29 }
 0xa40   : > { %3930 = vrcp.f32 %v2171_v51 }
 0xa49   : > { %v3929_v33 = vpop.eup %3928 }
 0xa4a   : > { %v2177_v54 = vmul.f32 %v3929_v33, %v2176_v32  ;;  %v3931_v62 = vpop.eup %3930 }
 0xa4b   : > { %v2180_v63 = vsub.f32 1.0, %v3931_v62 }
 0xa4c   : > { %v2178_v61 = vadd.f32 %v2177_v54, %v5345_v41 }
 0xa4e   : > { %3932 = vtanh.f32 %v2178_v61 }
 0xa58   : > { %v3933_v60 = vpop.eup %3932 }
 0xa59   : > { %v2181_v35 = vsub.f32 %v3933_v60, %v5282_v23 }
 0xa5b   : > { %v2182_v58 = vmul.f32 %v2181_v35, %v2180_v63 }
 0xa5d   : > { %v5381_v31 = vadd.f32 %v2182_v58, %v5282_v23  ;;  %v2418_v23 = vstv %s2417_s15 }
 0xa5e   : > { %vm2419_vm4 = vcmp.eq.s32.totalorder %v6034_v7, %v2418_v23 }
 0xa5f   : > { %v2196_v59 = vpack.c.bf16 %v5381_v31, %v5381_v31  ;;  %v2420_v41 = vsel %vm2419_vm4, 1, %v6033_v6 }
 0xa60   : > { %2422 = vperm.xlu1 %3919, %v2420_v41  }
 0xa61   : > { %2230 = vmatmul.mubr.bf16.vlgmr.msra.gmra.mrb[20].mxu0 %v2196_v59  ;;  %3680 = vmatmul.mubr.bf16.vlgmr.msra.gmra.mrb[12].mxu1 %v2196_v59 }
 0xa62   : > { %2315 = vmatpush1.bf16.msra.mxu0 %v5161_v4  ;;  %3684 = vmatpush3.bf16.msra.mxu1 %v5170_v38 }
 0xa63   : > { %2316 = vmatprep.subr.bf16.mxu0 %v5166_v36  ;;  %3685 = vmatprep.subr.bf16.mxu1 %v6049_v11 }
 0xa64   : > { %2346 = vmatprep.mubr.bf16.mxu0 %v6033_v6  ;;  %3699 = vmatprep.mubr.msk.bf16.mxu1 %vm4131_vm2, %v6049_v11 }
 0xa66   : > { %2317 = vmatpush1.bf16.msra.mxu0 %v5175_v46  ;;  %3686 = vmatpush3.bf16.msra.mxu1 %v5189_v48 }
 0xa67   : > { %2318 = vmatprep.subr.bf16.mxu0 %v5182_v42  ;;  %3687 = vmatprep.subr.bf16.mxu1 %v6049_v11 }
 0xa6a   : > { %2319 = vmatpush1.bf16.msra.mxu0 %v5194_v1  ;;  %3688 = vmatpush3.bf16.msra.mxu1 %v5205_v9 }
 0xa6b   : > { %2320 = vmatprep.subr.bf16.mxu0 %v5200_v2  ;;  %3689 = vmatprep.subr.bf16.mxu1 %v6049_v11 }
 0xa6e   : > { %2321 = vmatpush1.bf16.msra.mxu0 %v5210_v10  ;;  %3690 = vmatpush3.bf16.msra.mxu1 %v5223_v12 }
 0xa6f   : > { %2322 = vmatprep.subr.bf16.mxu0 %v5217_v52  ;;  %3691 = vmatprep.subr.bf16.mxu1 %v6049_v11 }
 0xa72   : > { %2323 = vmatpush1.bf16.msra.mxu0 %v5230_v13  ;;  %3692 = vmatpush3.bf16.msra.mxu1 %v5241_v15 }
 0xa73   : > { %2324 = vmatprep.subr.bf16.mxu0 %v5236_v14  ;;  %3693 = vmatprep.subr.bf16.mxu1 %v6049_v11 }
 0xa76   : > { %2325 = vmatpush1.bf16.msra.mxu0 %v5246_v0  ;;  %3694 = vmatpush3.bf16.msra.mxu1 %v5258_v17 }
 0xa77   : > { %2326 = vmatprep.subr.bf16.mxu0 %v5252_v16  ;;  %3695 = vmatprep.subr.bf16.mxu1 %v6049_v11 }
 0xa7a   : > { %2327 = vmatpush1.bf16.msra.mxu0 %v5263_v3  ;;  %3696 = vmatpush3.bf16.msra.mxu1 %v5274_v21 }
 0xa7b   : > { %2328 = vmatprep.subr.bf16.mxu0 %v5269_v19  ;;  %3697 = vmatprep.subr.bf16.mxu1 %v6049_v11 }
 0xa7e   : > { %2329 = vmatpush1.bf16.msra.mxu0 %v5279_v22  ;;  %3698 = vmatpush3.bf16.msra.mxu1 %v5291_v24 }
 0xa7f   : > { %2431 = vmatprep.subr.bf16.mxu0 %v5157_v5  ;;  %3703 = vmatprep.subr.bf16.mxu1 %v6049_v11 }
 0xb34   : > { %v2231_v18 = vpop.f32.mrb[20].mxu0  ;;  %v2272_v45 = vpop.f32.mrb[12].mxu1 }
 0xb35   : > { %v2278_v56 = vadd.f32 %v2231_v18, %v5339_v8  ;;  %v2233_v47 = vpop.f32.mrb[21].mxu0  ;;  %v3681_v25 = vpop.f32.mrb[13].mxu1  ;;  %v2292_v63 = vadd.f32 %v6066_v53, %v2272_v45 }
 0xb36   : > { %v2235_v44 = vpop.f32.mrb[22].mxu0  ;;  %v2275_v29 = vpop.f32.mrb[14].mxu1  ;;  %v2279_v33 = vadd.f32 %v2233_v47, %v5341_v40 }
 0xb37   : > { %v3243_v30 = vmul.f32 -1.442695, %v2278_v56  ;;  %v2236_v32 = vpop.f32.mrb[23].mxu0  ;;  %v3682_v51 = vpop.f32.mrb[15].mxu1 }
 0xb38   : > { %v3244_v54 = vmul.f32 -1.442695, %v2279_v33 }
 0xb39   : > { %3934 = vpow2.f32 %v3243_v30 }
 0xb3a   : > { %3936 = vpow2.f32 %v3244_v54 }
 0xb43   : > { %v3935_v61 = vpop.eup %3934 }
 0xb44   : > { %v2286_v62 = vadd.f32 1.0, %v3935_v61  ;;  %v3937_v60 = vpop.eup %3936 }
 0xb45   : > { %v2287_v35 = vadd.f32 1.0, %v3937_v60 }
 0xb46   : > { %3938 = vrcp.f32 %v2286_v62 }
 0xb47   : > { %3940 = vrcp.f32 %v2287_v35 }
 0xb50   : > { %v3939_v8 = vpop.eup %3938 }
 0xb51   : > { %v2293_v58 = vmul.f32 %v3939_v8, %v2292_v63  ;;  %v3941_v23 = vpop.eup %3940 }
 0xb52   : > { %v2296_v18 = vsub.f32 1.0, %v3941_v23 }
 0xb53   : > { %v2294_v59 = vadd.f32 %v2293_v58, %v5349_v27  ;;  %v2535_v27 = vstv %s2534_s17 }
 0xb54   : > { %vm2536_vm5 = vcmp.eq.s32.totalorder %v6034_v7, %v2535_v27 }
 0xb55   : > { %3942 = vtanh.f32 %v2294_v59  ;;  %v2537_v45 = vsel %vm2536_vm5, 1, %v6033_v6 }
 0xb56   : > { %2539 = vperm.xlu1 %3919, %v2537_v45  }
 0xb5f   : > { %v3943_v41 = vpop.eup %3942 }
 0xb60   : > { %v2297_v40 = vsub.f32 %v3943_v41, %v5381_v31 }
 0xb62   : > { %v2298_v56 = vmul.f32 %v2297_v40, %v2296_v18 }
 0xb64   : > { %v5429_v47 = vadd.f32 %v2298_v56, %v5381_v31 }
 0xb66   : > { %v2313_v25 = vpack.c.bf16 %v5429_v47, %v5429_v47 }
 0xb68   : > { %2347 = vmatmul.mubr.bf16.vlgmr.msra.gmra.mrb[24].mxu0 %v2313_v25  ;;  %3700 = vmatmul.mubr.bf16.vlgmr.msra.gmra.mrb[16].mxu1 %v2313_v25 }
 0xb69   : > { %2432 = vmatpush1.bf16.msra.mxu0 %v5161_v4  ;;  %3704 = vmatpush3.bf16.msra.mxu1 %v5170_v38 }
 0xb6a   : > { %2433 = vmatprep.subr.bf16.mxu0 %v5166_v36  ;;  %3705 = vmatprep.subr.bf16.mxu1 %v6049_v11 }
 0xb6b   : > { %2463 = vmatprep.mubr.bf16.mxu0 %v6033_v6  ;;  %3719 = vmatprep.mubr.msk.bf16.mxu1 %vm4131_vm2, %v6049_v11 }
 0xb6d   : > { %2434 = vmatpush1.bf16.msra.mxu0 %v5175_v46  ;;  %3706 = vmatpush3.bf16.msra.mxu1 %v5189_v48 }
 0xb6e   : > { %2435 = vmatprep.subr.bf16.mxu0 %v5182_v42  ;;  %3707 = vmatprep.subr.bf16.mxu1 %v6049_v11 }
 0xb71   : > { %2436 = vmatpush1.bf16.msra.mxu0 %v5194_v1  ;;  %3708 = vmatpush3.bf16.msra.mxu1 %v5205_v9 }
 0xb72   : > { %2437 = vmatprep.subr.bf16.mxu0 %v5200_v2  ;;  %3709 = vmatprep.subr.bf16.mxu1 %v6049_v11 }
 0xb75   : > { %2438 = vmatpush1.bf16.msra.mxu0 %v5210_v10  ;;  %3710 = vmatpush3.bf16.msra.mxu1 %v5223_v12 }
 0xb76   : > { %2439 = vmatprep.subr.bf16.mxu0 %v5217_v52  ;;  %3711 = vmatprep.subr.bf16.mxu1 %v6049_v11 }
 0xb79   : > { %2440 = vmatpush1.bf16.msra.mxu0 %v5230_v13  ;;  %3712 = vmatpush3.bf16.msra.mxu1 %v5241_v15 }
 0xb7a   : > { %2441 = vmatprep.subr.bf16.mxu0 %v5236_v14  ;;  %3713 = vmatprep.subr.bf16.mxu1 %v6049_v11 }
 0xb7d   : > { %2442 = vmatpush1.bf16.msra.mxu0 %v5246_v0  ;;  %3714 = vmatpush3.bf16.msra.mxu1 %v5258_v17 }
 0xb7e   : > { %2443 = vmatprep.subr.bf16.mxu0 %v5252_v16  ;;  %3715 = vmatprep.subr.bf16.mxu1 %v6049_v11 }
 0xb81   : > { %2444 = vmatpush1.bf16.msra.mxu0 %v5263_v3  ;;  %3716 = vmatpush3.bf16.msra.mxu1 %v5274_v21 }
 0xb82   : > { %2445 = vmatprep.subr.bf16.mxu0 %v5269_v19  ;;  %3717 = vmatprep.subr.bf16.mxu1 %v6049_v11 }
 0xb85   : > { %2446 = vmatpush1.bf16.msra.mxu0 %v5279_v22  ;;  %3718 = vmatpush3.bf16.msra.mxu1 %v5291_v24 }
 0xb86   : > { %2548 = vmatprep.subr.bf16.mxu0 %v5157_v5  ;;  %3723 = vmatprep.subr.bf16.mxu1 %v6049_v11 }
 0xc3b   : > { %v2348_v44 = vpop.f32.mrb[24].mxu0  ;;  %v2389_v29 = vpop.f32.mrb[16].mxu1 }
 0xc3c   : > { %v2395_v30 = vadd.f32 %v2348_v44, %v5351_v34  ;;  %v2350_v32 = vpop.f32.mrb[25].mxu0  ;;  %v3701_v51 = vpop.f32.mrb[17].mxu1  ;;  %v2409_v23 = vadd.f32 %v6066_v53, %v2389_v29 }
 0xc3d   : > { %v2352_v33 = vpop.f32.mrb[26].mxu0  ;;  %v2392_v54 = vpop.f32.mrb[18].mxu1  ;;  %v2396_v63 = vadd.f32 %v2350_v32, %v5353_v28 }
 0xc3e   : > { %v3245_v61 = vmul.f32 -1.442695, %v2395_v30  ;;  %v2353_v62 = vpop.f32.mrb[27].mxu0  ;;  %v3702_v60 = vpop.f32.mrb[19].mxu1 }
 0xc3f   : > { %v3246_v35 = vmul.f32 -1.442695, %v2396_v63 }
 0xc40   : > { %3944 = vpow2.f32 %v3245_v61 }
 0xc41   : > { %3946 = vpow2.f32 %v3246_v35 }
 0xc4a   : > { %v3945_v8 = vpop.eup %3944 }
 0xc4b   : > { %v2403_v58 = vadd.f32 1.0, %v3945_v8  ;;  %v3947_v59 = vpop.eup %3946 }
 0xc4c   : > { %v2404_v41 = vadd.f32 1.0, %v3947_v59 }
 0xc4d   : > { %3948 = vrcp.f32 %v2403_v58 }
 0xc4e   : > { %3950 = vrcp.f32 %v2404_v41 }
 0xc57   : > { %v3949_v34 = vpop.eup %3948 }
 0xc58   : > { %v2410_v18 = vmul.f32 %v3949_v34, %v2409_v23  ;;  %v3951_v56 = vpop.eup %3950 }
 0xc59   : > { %v2413_v27 = vsub.f32 1.0, %v3951_v56 }
 0xc5a   : > { %v2411_v40 = vadd.f32 %v2410_v18, %v5343_v43  ;;  %v2652_v43 = vstv %s2651_s2 }
 0xc5b   : > { %vm2653_vm6 = vcmp.eq.s32.totalorder %v6034_v7, %v2652_v43 }
 0xc5c   : > { %3952 = vtanh.f32 %v2411_v40  ;;  %v2654_v29 = vsel %vm2653_vm6, 1, %v6033_v6 }
 0xc5d   : > { %2656 = vperm.xlu0 %3918, %v2654_v29  }
 0xc66   : > { %v3953_v25 = vpop.eup %3952 }
 0xc67   : > { %v2414_v28 = vsub.f32 %v3953_v25, %v5429_v47 }
 0xc69   : > { %v2415_v45 = vmul.f32 %v2414_v28, %v2413_v27 }
 0xc6b   : > { %v5477_v44 = vadd.f32 %v2415_v45, %v5429_v47 }
 0xc6d   : > { %v2430_v30 = vpack.c.bf16 %v5477_v44, %v5477_v44 }
 0xc6f   : > { %2464 = vmatmul.mubr.bf16.vlgmr.msra.gmra.mrb[28].mxu0 %v2430_v30  ;;  %3720 = vmatmul.mubr.bf16.vlgmr.msra.gmra.mrb[20].mxu1 %v2430_v30 }
 0xc70   : > { %2549 = vmatpush1.bf16.msra.mxu0 %v5161_v4  ;;  %3724 = vmatpush3.bf16.msra.mxu1 %v5170_v38 }
 0xc71   : > { %2550 = vmatprep.subr.bf16.mxu0 %v5166_v36  ;;  %3725 = vmatprep.subr.bf16.mxu1 %v6049_v11 }
 0xc72   : > { %2580 = vmatprep.mubr.bf16.mxu0 %v6033_v6  ;;  %3739 = vmatprep.mubr.msk.bf16.mxu1 %vm4131_vm2, %v6049_v11 }
 0xc74   : > { %2551 = vmatpush1.bf16.msra.mxu0 %v5175_v46  ;;  %3726 = vmatpush3.bf16.msra.mxu1 %v5189_v48 }
 0xc75   : > { %2552 = vmatprep.subr.bf16.mxu0 %v5182_v42  ;;  %3727 = vmatprep.subr.bf16.mxu1 %v6049_v11 }
 0xc78   : > { %2553 = vmatpush1.bf16.msra.mxu0 %v5194_v1  ;;  %3728 = vmatpush3.bf16.msra.mxu1 %v5205_v9 }
 0xc79   : > { %2554 = vmatprep.subr.bf16.mxu0 %v5200_v2  ;;  %3729 = vmatprep.subr.bf16.mxu1 %v6049_v11 }
 0xc7c   : > { %2555 = vmatpush1.bf16.msra.mxu0 %v5210_v10  ;;  %3730 = vmatpush3.bf16.msra.mxu1 %v5223_v12 }
 0xc7d   : > { %2556 = vmatprep.subr.bf16.mxu0 %v5217_v52  ;;  %3731 = vmatprep.subr.bf16.mxu1 %v6049_v11 }
 0xc80   : > { %2557 = vmatpush1.bf16.msra.mxu0 %v5230_v13  ;;  %3732 = vmatpush3.bf16.msra.mxu1 %v5241_v15 }
 0xc81   : > { %2558 = vmatprep.subr.bf16.mxu0 %v5236_v14  ;;  %3733 = vmatprep.subr.bf16.mxu1 %v6049_v11 }
 0xc84   : > { %2559 = vmatpush1.bf16.msra.mxu0 %v5246_v0  ;;  %3734 = vmatpush3.bf16.msra.mxu1 %v5258_v17 }
 0xc85   : > { %2560 = vmatprep.subr.bf16.mxu0 %v5252_v16  ;;  %3735 = vmatprep.subr.bf16.mxu1 %v6049_v11 }
 0xc88   : > { %2561 = vmatpush1.bf16.msra.mxu0 %v5263_v3  ;;  %3736 = vmatpush3.bf16.msra.mxu1 %v5274_v21 }
 0xc89   : > { %2562 = vmatprep.subr.bf16.mxu0 %v5269_v19  ;;  %3737 = vmatprep.subr.bf16.mxu1 %v6049_v11 }
 0xc8c   : > { %2563 = vmatpush1.bf16.msra.mxu0 %v5279_v22  ;;  %3738 = vmatpush3.bf16.msra.mxu1 %v5291_v24 }
 0xc8d   : > { %2665 = vmatprep.subr.bf16.mxu0 %v5157_v5  ;;  %3743 = vmatprep.subr.bf16.mxu1 %v6049_v11 }
 0xd42   : > { %v2465_v32 = vpop.f32.mrb[28].mxu0  ;;  %v2506_v51 = vpop.f32.mrb[20].mxu1 }
 0xd43   : > { %v2512_v33 = vadd.f32 %v2465_v32, %v5355_v39  ;;  %v2467_v54 = vpop.f32.mrb[29].mxu0  ;;  %v3721_v61 = vpop.f32.mrb[21].mxu1  ;;  %v2526_v18 = vadd.f32 %v6066_v53, %v2506_v51 }
 0xd44   : > { %v2469_v62 = vpop.f32.mrb[30].mxu0  ;;  %v2509_v60 = vpop.f32.mrb[22].mxu1  ;;  %v2513_v58 = vadd.f32 %v2467_v54, %v5357_v49 }
 0xd45   : > { %v3247_v63 = vmul.f32 -1.442695, %v2512_v33  ;;  %v2470_v35 = vpop.f32.mrb[31].mxu0  ;;  %v3722_v8 = vpop.f32.mrb[23].mxu1 }
 0xd46   : > { %v3248_v59 = vmul.f32 -1.442695, %v2513_v58 }
 0xd47   : > { %3954 = vpow2.f32 %v3247_v63 }
 0xd48   : > { %3956 = vpow2.f32 %v3248_v59 }
 0xd51   : > { %v3955_v23 = vpop.eup %3954 }
 0xd52   : > { %v2520_v41 = vadd.f32 1.0, %v3955_v23  ;;  %v3957_v34 = vpop.eup %3956 }
 0xd53   : > { %v2521_v40 = vadd.f32 1.0, %v3957_v34 }
 0xd54   : > { %3958 = vrcp.f32 %v2520_v41 }
 0xd55   : > { %3960 = vrcp.f32 %v2521_v40 }
 0xd5e   : > { %v3959_v39 = vpop.eup %3958 }
 0xd5f   : > { %v2527_v56 = vmul.f32 %v3959_v39, %v2526_v18  ;;  %v3961_v27 = vpop.eup %3960 }
 0xd60   : > { %v2530_v45 = vsub.f32 1.0, %v3961_v27 }
 0xd61   : > { %v2528_v25 = vadd.f32 %v2527_v56, %v5347_v26  ;;  %v2769_v26 = vstv %s2768_s16 }
 0xd62   : > { %vm2770_vm7 = vcmp.eq.s32.totalorder %v6034_v7, %v2769_v26 }
 0xd63   : > { %3962 = vtanh.f32 %v2528_v25  ;;  %v2771_v32 = vsel %vm2770_vm7, 1, %v6033_v6 }
 0xd64   : > { %2773 = vperm.xlu1 %3919, %v2771_v32  }
 0xd6d   : > { %v3963_v28 = vpop.eup %3962 }
 0xd6e   : > { %v2531_v49 = vsub.f32 %v3963_v28, %v5477_v44 }
 0xd70   : > { %v2532_v30 = vmul.f32 %v2531_v49, %v2530_v45 }
 0xd72   : > { %v5525_v43 = vadd.f32 %v2532_v30, %v5477_v44 }
 0xd74   : > { %v2547_v29 = vpack.c.bf16 %v5525_v43, %v5525_v43 }
 0xd76   : > { %2581 = vmatmul.mubr.bf16.vlgmr.msra.gmra.mrb[32].mxu0 %v2547_v29  ;;  %3740 = vmatmul.mubr.bf16.vlgmr.msra.gmra.mrb[24].mxu1 %v2547_v29 }
 0xd77   : > { %2666 = vmatpush1.bf16.msra.mxu0 %v5161_v4  ;;  %3744 = vmatpush3.bf16.msra.mxu1 %v5170_v38 }
 0xd78   : > { %2667 = vmatprep.subr.bf16.mxu0 %v5166_v36  ;;  %3745 = vmatprep.subr.bf16.mxu1 %v6049_v11 }
 0xd79   : > { %2697 = vmatprep.mubr.bf16.mxu0 %v6033_v6  ;;  %3759 = vmatprep.mubr.msk.bf16.mxu1 %vm4131_vm2, %v6049_v11 }
 0xd7b   : > { %2668 = vmatpush1.bf16.msra.mxu0 %v5175_v46  ;;  %3746 = vmatpush3.bf16.msra.mxu1 %v5189_v48 }
 0xd7c   : > { %2669 = vmatprep.subr.bf16.mxu0 %v5182_v42  ;;  %3747 = vmatprep.subr.bf16.mxu1 %v6049_v11 }
 0xd7f   : > { %2670 = vmatpush1.bf16.msra.mxu0 %v5194_v1  ;;  %3748 = vmatpush3.bf16.msra.mxu1 %v5205_v9 }
 0xd80   : > { %2671 = vmatprep.subr.bf16.mxu0 %v5200_v2  ;;  %3749 = vmatprep.subr.bf16.mxu1 %v6049_v11 }
 0xd83   : > { %2672 = vmatpush1.bf16.msra.mxu0 %v5210_v10  ;;  %3750 = vmatpush3.bf16.msra.mxu1 %v5223_v12 }
 0xd84   : > { %2673 = vmatprep.subr.bf16.mxu0 %v5217_v52  ;;  %3751 = vmatprep.subr.bf16.mxu1 %v6049_v11 }
 0xd87   : > { %2674 = vmatpush1.bf16.msra.mxu0 %v5230_v13  ;;  %3752 = vmatpush3.bf16.msra.mxu1 %v5241_v15 }
 0xd88   : > { %2675 = vmatprep.subr.bf16.mxu0 %v5236_v14  ;;  %3753 = vmatprep.subr.bf16.mxu1 %v6049_v11 }
 0xd8b   : > { %2676 = vmatpush1.bf16.msra.mxu0 %v5246_v0  ;;  %3754 = vmatpush3.bf16.msra.mxu1 %v5258_v17 }
 0xd8c   : > { %2677 = vmatprep.subr.bf16.mxu0 %v5252_v16  ;;  %3755 = vmatprep.subr.bf16.mxu1 %v6049_v11 }
 0xd8f   : > { %2678 = vmatpush1.bf16.msra.mxu0 %v5263_v3  ;;  %3756 = vmatpush3.bf16.msra.mxu1 %v5274_v21 }
 0xd90   : > { %2679 = vmatprep.subr.bf16.mxu0 %v5269_v19  ;;  %3757 = vmatprep.subr.bf16.mxu1 %v6049_v11 }
 0xd93   : > { %2680 = vmatpush1.bf16.msra.mxu0 %v5279_v22  ;;  %3758 = vmatpush3.bf16.msra.mxu1 %v5291_v24 }
 0xd94   : > { %2782 = vmatprep.subr.bf16.mxu0 %v5157_v5  ;;  %3763 = vmatprep.subr.bf16.mxu1 %v6049_v11 }
 0xe49   : > { %v2582_v51 = vpop.f32.mrb[32].mxu0  ;;  %v2623_v33 = vpop.f32.mrb[24].mxu1 }
 0xe4a   : > { %v2629_v54 = vadd.f32 %v2582_v51, %v5365_v37  ;;  %v2584_v61 = vpop.f32.mrb[33].mxu0  ;;  %v3741_v62 = vpop.f32.mrb[25].mxu1  ;;  %v2643_v40 = vadd.f32 %v6066_v53, %v2623_v33 }
 0xe4b   : > { %v2586_v60 = vpop.f32.mrb[34].mxu0  ;;  %v2626_v63 = vpop.f32.mrb[26].mxu1  ;;  %v2630_v59 = vadd.f32 %v2584_v61, %v5367_v55 }
 0xe4c   : > { %v3249_v35 = vmul.f32 -1.442695, %v2629_v54  ;;  %v2587_v8 = vpop.f32.mrb[35].mxu0  ;;  %v3742_v58 = vpop.f32.mrb[27].mxu1 }
 0xe4d   : > { %v3250_v23 = vmul.f32 -1.442695, %v2630_v59 }
 0xe4e   : > { %3964 = vpow2.f32 %v3249_v35 }
 0xe4f   : > { %3966 = vpow2.f32 %v3250_v23 }
 0xe58   : > { %v3965_v41 = vpop.eup %3964 }
 0xe59   : > { %v2637_v34 = vadd.f32 1.0, %v3965_v41  ;;  %v3967_v18 = vpop.eup %3966 }
 0xe5a   : > { %v2638_v39 = vadd.f32 1.0, %v3967_v18 }
 0xe5b   : > { %3968 = vrcp.f32 %v2637_v34 }
 0xe5c   : > { %3970 = vrcp.f32 %v2638_v39  ;;  %v6067_v39 = vld [vmem:[#allocation90_spill] sm:$0xff] }
 0xe65   : > { %v3969_v37 = vpop.eup %3968 }
 0xe66   : > { %v2644_v56 = vmul.f32 %v3969_v37, %v2643_v40  ;;  %v3971_v27 = vpop.eup %3970 }
 0xe67   : > { %v2647_v45 = vsub.f32 1.0, %v3971_v27 }
 0xe68   : > { %v2645_v25 = vadd.f32 %v2644_v56, %v5361_v50  ;;  %v2886_v50 = vstv %s2885_s18 }
 0xe69   : > { %vm2887_vm8 = vcmp.eq.s32.totalorder %v6034_v7, %v2886_v50 }
 0xe6a   : > { %3972 = vtanh.f32 %v2645_v25  ;;  %v2888_v26 = vsel %vm2887_vm8, 1, %v6033_v6 }
 0xe6b   : > { %2890 = vperm.xlu0 %3918, %v2888_v26  }
 0xe74   : > { %v3973_v28 = vpop.eup %3972 }
 0xe75   : > { %v2648_v55 = vsub.f32 %v3973_v28, %v5525_v43 }
 0xe77   : > { %v2649_v49 = vmul.f32 %v2648_v55, %v2647_v45 }
 0xe79   : > { %v5573_v30 = vadd.f32 %v2649_v49, %v5525_v43 }
 0xe7b   : > { %v2664_v29 = vpack.c.bf16 %v5573_v30, %v5573_v30 }
 0xe7d   : > { %2698 = vmatmul.mubr.bf16.vlgmr.msra.gmra.mrb[36].mxu0 %v2664_v29  ;;  %3760 = vmatmul.mubr.bf16.vlgmr.msra.gmra.mrb[28].mxu1 %v2664_v29 }
 0xe7e   : > { %2783 = vmatpush1.bf16.msra.mxu0 %v5161_v4  ;;  %3764 = vmatpush3.bf16.msra.mxu1 %v5170_v38 }
 0xe7f   : > { %2784 = vmatprep.subr.bf16.mxu0 %v5166_v36  ;;  %3765 = vmatprep.subr.bf16.mxu1 %v6049_v11 }
 0xe80   : > { %2814 = vmatprep.mubr.bf16.mxu0 %v6033_v6  ;;  %3779 = vmatprep.mubr.msk.bf16.mxu1 %vm4131_vm2, %v6049_v11 }
 0xe82   : > { %2785 = vmatpush1.bf16.msra.mxu0 %v5175_v46  ;;  %3766 = vmatpush3.bf16.msra.mxu1 %v5189_v48 }
 0xe83   : > { %2786 = vmatprep.subr.bf16.mxu0 %v5182_v42  ;;  %3767 = vmatprep.subr.bf16.mxu1 %v6049_v11 }
 0xe86   : > { %2787 = vmatpush1.bf16.msra.mxu0 %v5194_v1  ;;  %3768 = vmatpush3.bf16.msra.mxu1 %v5205_v9 }
 0xe87   : > { %2788 = vmatprep.subr.bf16.mxu0 %v5200_v2  ;;  %3769 = vmatprep.subr.bf16.mxu1 %v6049_v11 }
 0xe8a   : > { %2789 = vmatpush1.bf16.msra.mxu0 %v5210_v10  ;;  %3770 = vmatpush3.bf16.msra.mxu1 %v5223_v12 }
 0xe8b   : > { %2790 = vmatprep.subr.bf16.mxu0 %v5217_v52  ;;  %3771 = vmatprep.subr.bf16.mxu1 %v6049_v11 }
 0xe8e   : > { %2791 = vmatpush1.bf16.msra.mxu0 %v5230_v13  ;;  %3772 = vmatpush3.bf16.msra.mxu1 %v5241_v15 }
 0xe8f   : > { %2792 = vmatprep.subr.bf16.mxu0 %v5236_v14  ;;  %3773 = vmatprep.subr.bf16.mxu1 %v6049_v11 }
 0xe92   : > { %2793 = vmatpush1.bf16.msra.mxu0 %v5246_v0  ;;  %3774 = vmatpush3.bf16.msra.mxu1 %v5258_v17 }
 0xe93   : > { %2794 = vmatprep.subr.bf16.mxu0 %v5252_v16  ;;  %3775 = vmatprep.subr.bf16.mxu1 %v6049_v11 }
 0xe96   : > { %2795 = vmatpush1.bf16.msra.mxu0 %v5263_v3  ;;  %3776 = vmatpush3.bf16.msra.mxu1 %v5274_v21 }
 0xe97   : > { %2796 = vmatprep.subr.bf16.mxu0 %v5269_v19  ;;  %3777 = vmatprep.subr.bf16.mxu1 %v6049_v11 }
 0xe9a   : > { %2797 = vmatpush1.bf16.msra.mxu0 %v5279_v22  ;;  %3778 = vmatpush3.bf16.msra.mxu1 %v5291_v24 }
 0xe9b   : > { %2899 = vmatprep.subr.bf16.mxu0 %v5157_v5  ;;  %3783 = vmatprep.subr.bf16.mxu1 %v6049_v11 }
 0xf50   : > { %v2699_v32 = vpop.f32.mrb[36].mxu0  ;;  %v2740_v51 = vpop.f32.mrb[28].mxu1 }
 0xf51   : > { %v2746_v33 = vadd.f32 %v2699_v32, %v5369_v20  ;;  %v2701_v54 = vpop.f32.mrb[37].mxu0  ;;  %v3761_v61 = vpop.f32.mrb[29].mxu1  ;;  %v2760_v34 = vadd.f32 %v6066_v53, %v2740_v51 }
 0xf52   : > { %v2703_v62 = vpop.f32.mrb[38].mxu0  ;;  %v2743_v60 = vpop.f32.mrb[30].mxu1  ;;  %v2747_v8 = vadd.f32 %v2701_v54, %v5371_v57  ;;  %v2895_v54 = vld [vmem:[#allocation3 + $0xa8] sm:$0xff] }
 0xf53   : > { %v3251_v63 = vmul.f32 -1.442695, %v2746_v33  ;;  %v2704_v35 = vpop.f32.mrb[39].mxu0  ;;  %v3762_v5 = vpop.f32.mrb[31].mxu1 }
 0xf54   : > { %v3252_v58 = vmul.f32 -1.442695, %v2747_v8 }
 0xf55   : > { %3974 = vpow2.f32 %v3251_v63 }
 0xf56   : > { %3976 = vpow2.f32 %v3252_v58 }
 0xf5f   : > { %v3975_v59 = vpop.eup %3974 }
 0xf60   : > { %v2754_v23 = vadd.f32 1.0, %v3975_v59  ;;  %v3977_v41 = vpop.eup %3976 }
 0xf61   : > { %v2755_v18 = vadd.f32 1.0, %v3977_v41  ;;  %v2896_v41 = vld [vmem:[#allocation3 + $0xb0] sm:$0xff] }
 0xf62   : > { %3978 = vrcp.f32 %v2754_v23 }
 0xf63   : > { %3980 = vrcp.f32 %v2755_v18 }
 0xf6c   : > { %v3979_v20 = vpop.eup %3978 }
 0xf6d   : > { %v2761_v40 = vmul.f32 %v3979_v20, %v2760_v34  ;;  %v3981_v56 = vpop.eup %3980 }
 0xf6e   : > { %v2764_v27 = vsub.f32 1.0, %v3981_v56 }
 0xf6f   : > { %v2762_v37 = vadd.f32 %v2761_v40, %v6067_v39 }
 0xf71   : > { %3982 = vtanh.f32 %v2762_v37 }
 0xf7b   : > { %v3983_v25 = vpop.eup %3982 }
 0xf7c   : > { %v2765_v57 = vsub.f32 %v3983_v25, %v5573_v30 }
 0xf7e   : > { %v2766_v28 = vmul.f32 %v2765_v57, %v2764_v27  ;;  %v2897_v57 = vld [vmem:[#allocation3 + $0xb8] sm:$0xff] }
 0xf80   : > { %v5621_v45 = vadd.f32 %v2766_v28, %v5573_v30  ;;  %v2189_v28 = vpop.permute.xlu0 %2188 }
 0xf81   : > { %vm2190_vm10 = vcmp.eq.s32.totalorder %v2189_v28, 1 }
 0xf82   : > { %v2781_v55 = vpack.c.bf16 %v5621_v45, %v5621_v45 }
 0xf84   : > { %2815 = vmatmul.mubr.bf16.vlgmr.msra.gmra.mrb[40].mxu0 %v2781_v55  ;;  %3780 = vmatmul.mubr.bf16.vlgmr.msra.gmra.mrb[32].mxu1 %v2781_v55 }
 0xf85   : > { %2900 = vmatpush1.bf16.msra.mxu0 %v5161_v4  ;;  %3784 = vmatpush3.bf16.msra.mxu1 %v5170_v38 }
 0xf86   : > { %2901 = vmatprep.subr.bf16.mxu0 %v5166_v36  ;;  %3785 = vmatprep.subr.bf16.mxu1 %v6049_v11 }
 0xf87   : > { %2931 = vmatprep.mubr.bf16.mxu0 %v6033_v6  ;;  %3799 = vmatprep.mubr.msk.bf16.mxu1 %vm4131_vm2, %v6049_v11 }
 0xf89   : > { %2902 = vmatpush1.bf16.msra.mxu0 %v5175_v46  ;;  %3786 = vmatpush3.bf16.msra.mxu1 %v5189_v48  ;;  %v6070_v48 = vld [vmem:[#allocation89_spill] sm:$0xff] }
 0xf8a   : > { %2903 = vmatprep.subr.bf16.mxu0 %v5182_v42  ;;  %3787 = vmatprep.subr.bf16.mxu1 %v6049_v11 }
 0xf8d   : > { %2904 = vmatpush1.bf16.msra.mxu0 %v5194_v1  ;;  %3788 = vmatpush3.bf16.msra.mxu1 %v5205_v9  ;;  %v3003_v9 = vstv %s3002_s19 }
 0xf8e   : > { %2905 = vmatprep.subr.bf16.mxu0 %v5200_v2  ;;  %3789 = vmatprep.subr.bf16.mxu1 %v6049_v11  ;;  %vm3004_vm9 = vcmp.eq.s32.totalorder %v6034_v7, %v3003_v9  ;;  %v2423_v9 = vpop.permute.xlu1 %2422 }
 0xf8f   : > { %vm2424_vm12 = vcmp.eq.s32.totalorder %v2423_v9, 1 }
 0xf91   : > { %2906 = vmatpush1.bf16.msra.mxu0 %v5210_v10  ;;  %3790 = vmatpush3.bf16.msra.mxu1 %v5223_v12  ;;  %v3005_v12 = vsel %vm3004_vm9, 1, %v6033_v6 }
 0xf92   : > { %2907 = vmatprep.subr.bf16.mxu0 %v5217_v52  ;;  %3791 = vmatprep.subr.bf16.mxu1 %v6049_v11 }
 0xf93   : > { %3007 = vperm.xlu1 %3919, %v3005_v12   ;;  %v2306_v12 = vpop.permute.xlu0 %2305 }
 0xf94   : > { %vm2307_vm11 = vcmp.eq.s32.totalorder %v2306_v12, 1 }
 0xf95   : > { %2908 = vmatpush1.bf16.msra.mxu0 %v5230_v13  ;;  %3792 = vmatpush3.bf16.msra.mxu1 %v5241_v15  ;;  %v6068_v15 = vld [vmem:[#allocation91_spill] sm:$0xff] }
 0xf96   : > { %2909 = vmatprep.subr.bf16.mxu0 %v5236_v14  ;;  %3793 = vmatprep.subr.bf16.mxu1 %v6049_v11 }
 0xf99   : > { %2910 = vmatpush1.bf16.msra.mxu0 %v5246_v0  ;;  %3794 = vmatpush3.bf16.msra.mxu1 %v5258_v17 }
 0xf9a   : > { %2911 = vmatprep.subr.bf16.mxu0 %v5252_v16  ;;  %3795 = vmatprep.subr.bf16.mxu1 %v6049_v11 }
 0xf9d   : > { %2912 = vmatpush1.bf16.msra.mxu0 %v5263_v3  ;;  %3796 = vmatpush3.bf16.msra.mxu1 %v5274_v21 }
 0xf9e   : > { %2913 = vmatprep.subr.bf16.mxu0 %v5269_v19  ;;  %3797 = vmatprep.subr.bf16.mxu1 %v6049_v11 }
 0xfa1   : > { %2914 = vmatpush1.bf16.msra.mxu0 %v5279_v22  ;;  %3798 = vmatpush3.bf16.msra.mxu1 %v5291_v24  ;;  %v6069_v24 = vld [vmem:[#allocation92_spill] sm:$0xff] }
0x1057   : > { %v2816_v13 = vpop.f32.mrb[40].mxu0  ;;  %v2857_v14 = vpop.f32.mrb[32].mxu1 }
0x1058   : > { %v2863_v16 = vadd.f32 %v2816_v13, %v6068_v15  ;;  %v2818_v10 = vpop.f32.mrb[41].mxu0  ;;  %v3781_v17 = vpop.f32.mrb[33].mxu1  ;;  %v2877_v36 = vadd.f32 %v6066_v53, %v2857_v14  ;;  %v1948_v15 = vld [vmem:[#allocation5] sm:$0xff] }
0x1059   : > { %v2820_v21 = vpop.f32.mrb[42].mxu0  ;;  %v2860_v2 = vpop.f32.mrb[34].mxu1  ;;  %v2864_v19 = vadd.f32 %v2818_v10, %v6069_v24 }
0x105a   : > { %v3253_v11 = vmul.f32 -1.442695, %v2863_v16  ;;  %v2821_v1 = vpop.f32.mrb[43].mxu0  ;;  %v3782_v22 = vpop.f32.mrb[35].mxu1  ;;  %v2191_v21 = vsel %vm2190_vm10, %v5381_v31, %v1948_v15 }
0x105b   : > { %v3254_v0 = vmul.f32 -1.442695, %v2864_v19  ;;  %v2540_v13 = vpop.permute.xlu1 %2539  ;;  %v2657_v14 = vpop.permute.xlu0 %2656 }
0x105c   : > { %3984 = vpow2.f32 %v3253_v11  ;;  %vm2541_vm13 = vcmp.eq.s32.totalorder %v2540_v13, 1  ;;  %v2308_v11 = vsel %vm2307_vm11, %v5429_v47, %v2191_v21  ;;  %vm2658_vm14 = vcmp.eq.s32.totalorder %v2657_v14, 1 }
0x105d   : > { %3986 = vpow2.f32 %v3254_v0  ;;  %v2425_v24 = vsel %vm2424_vm12, %v5477_v44, %v2308_v11 }
0x105e   : > { %v2542_v19 = vsel %vm2541_vm13, %v5525_v43, %v2425_v24 }
0x105f   : > { %v2774_v10 = vpop.permute.xlu1 %2773  ;;  %v2891_v2 = vpop.permute.xlu0 %2890 }
0x1060   : > { %vm2775_vm15 = vcmp.eq.s32.totalorder %v2774_v10, 1  ;;  %vm2892_vm0 = vcmp.eq.s32.totalorder %v2891_v2, 1 }
0x1066   : > { %v3985_v3 = vpop.eup %3984 }
0x1067   : > { %v2871_v4 = vadd.f32 1.0, %v3985_v3  ;;  %v3987_v6 = vpop.eup %3986  ;;  %v3008_v3 = vpop.permute.xlu1 %3007 }
0x1068   : > { %v2872_v38 = vadd.f32 1.0, %v3987_v6  ;;  %vm3009_vm1 = vcmp.eq.s32.totalorder %v3008_v3, 1 }
0x1069   : > { %3988 = vrcp.f32 %v2871_v4  ;;  %v2659_v4 = vsel %vm2658_vm14, %v5573_v30, %v2542_v19 }
0x106a   : > { %3990 = vrcp.f32 %v2872_v38  ;;  %v2776_v6 = vsel %vm2775_vm15, %v5621_v45, %v2659_v4 }
0x1073   : > { %v3989_v46 = vpop.eup %3988 }
0x1074   : > { %v2878_v42 = vmul.f32 %v3989_v46, %v2877_v36  ;;  %v3991_v49 = vpop.eup %3990 }
0x1075   : > { %v2881_v50 = vsub.f32 1.0, %v3991_v49 }
0x1076   : > { %v2879_v52 = vadd.f32 %v2878_v42, %v6070_v48 }
0x1078   : > { %3992 = vtanh.f32 %v2879_v52 }
0x1082   : > { %v3993_v29 = vpop.eup %3992 }
0x1083   : > { %v2882_v26 = vsub.f32 %v3993_v29, %v5621_v45 }
0x1085   : > { %v2883_v32 = vmul.f32 %v2882_v26, %v2881_v50 }
0x1087   : > { %v2884_v51 = vadd.f32 %v2883_v32, %v5621_v45 }
0x1089   : > { %v2898_v33 = vpack.c.bf16 %v2884_v51, %v2884_v51  ;;  %v2893_v36 = vsel %vm2892_vm0, %v2884_v51, %v2776_v6 }
0x108b   : > { %2932 = vmatmul.mubr.bf16.vlgmr.msra.gmra.mrb[44].mxu0 %v2898_v33  ;;  %3800 = vmatmul.mubr.bf16.vlgmr.msra.gmra.mrb[36].mxu1 %v2898_v33 }
0x115e   : > { %v2933_v61 = vpop.f32.mrb[44].mxu0  ;;  %v2974_v62 = vpop.f32.mrb[36].mxu1 }
0x115f   : > { %v2980_v60 = vadd.f32 %v2933_v61, %v2895_v54  ;;  %v2935_v63 = vpop.f32.mrb[45].mxu0  ;;  %v3801_v35 = vpop.f32.mrb[37].mxu1  ;;  %v2994_v37 = vadd.f32 %v6066_v53, %v2974_v62 }
0x1160   : > { %v2937_v5 = vpop.f32.mrb[46].mxu0  ;;  %v2977_v8 = vpop.f32.mrb[38].mxu1  ;;  %v2981_v34 = vadd.f32 %v2935_v63, %v2896_v41 }
0x1161   : > { %v3255_v58 = vmul.f32 -1.442695, %v2980_v60  ;;  %v2938_v59 = vpop.f32.mrb[47].mxu0  ;;  %v3802_v23 = vpop.f32.mrb[39].mxu1 }
0x1162   : > { %v3256_v18 = vmul.f32 -1.442695, %v2981_v34 }
0x1163   : > { %3994 = vpow2.f32 %v3255_v58 }
0x1164   : > { %3996 = vpow2.f32 %v3256_v18 }
0x116d   : > { %v3995_v20 = vpop.eup %3994 }
0x116e   : > { %v2988_v40 = vadd.f32 1.0, %v3995_v20  ;;  %v3997_v39 = vpop.eup %3996 }
0x116f   : > { %v2989_v56 = vadd.f32 1.0, %v3997_v39 }
0x1170   : > { %3998 = vrcp.f32 %v2988_v40 }
0x1171   : > { %4000 = vrcp.f32 %v2989_v56 }
0x117a   : > { %v3999_v25 = vpop.eup %3998 }
0x117b   : > { %v2995_v27 = vmul.f32 %v3999_v25, %v2994_v37  ;;  %v4001_v16 = vpop.eup %4000 }
0x117c   : > { %v2998_v1 = vsub.f32 1.0, %v4001_v16 }
0x117d   : > { %v2996_v55 = vadd.f32 %v2995_v27, %v2897_v57 }
0x117f   : > { %4002 = vtanh.f32 %v2996_v55 }
0x1189   : > { %v4003_v17 = vpop.eup %4002 }
0x118a   : > { %v2999_v22 = vsub.f32 %v4003_v17, %v2884_v51 }
0x118b   :  { %1605 = sbr.rel (!%p1602_p13) target bundleno = 2312 (0x908), region = 109 }
0x118c   : > { %v3000_v0 = vmul.f32 %v2999_v22, %v2998_v1 }
0x118e   : > { %v3001_v31 = vadd.f32 %v3000_v0, %v2884_v51 }
0x1190   : > { %3011 = vst [vmem:[#allocation4] sm:$0xff] %v3001_v31  ;;  %v3010_v47 = vsel %vm3009_vm1, %v3001_v31, %v2893_v36 }
0x1191   : > { %3012 = vst [vmem:[#allocation5] sm:$0xff] %v3010_v47 }
0x1192 PF:  { %s4132_s20 = smov [#allocation14]  }
0x1193   :  { %s3034_s21 = sshll.u32 %s4132_s20, 4  ;;  %s3035_s21 = int_to_ptr.vmem [resolvable:$true] %s3034_s21 }
0x1194   :  { %s4074_s22 = scalar_lea.vmem %s3035_s21, 128  ;;  %p4079_p1 = scmp.lt.s32.totalorder %s3035_s21, %s3035_s21 }
0x1195   :  { %p4075_p0 = scmp.ne.s32.totalorder %s3035_s21, %s4074_s22  ;;  %p4080_p2 = scmp.lt.s32.totalorder %s4074_s22, %s4074_s22 }
0x1197   :  { %p4081_p3 = por %p4080_p2, %p4079_p1 }
0x1198   :  { %v3013_v44 = vld [vmem:[#allocation5] sm:$0xff] }
0x1199   :  { %v3014_v43 = vmul.f32 %v3013_v44, %v3013_v44  ;;  %p4082_p4 = pnand %p4081_p3, %p4075_p0 }
0x119b   :  { %3015 = vadd.xlane.f32.xlu0 %v3014_v43 }
0x1228   :  { %v3016_v30 = vpop.xlane.xlu0 %3015 }
0x1229   :  { %4004 = vrsqrt.f32 %v3016_v30  ;;  %vm3019_vm2 = vcmp.eq.f32.partialorder %v3016_v30, inf  ;;  %v3022_v46 = vand.u32 2147483648, %v3016_v30  ;;  %vm3021_vm3 = vcmp.eq.f32.partialorder %v3016_v30, 0.0 }
0x1233   :  { %v4005_v45 = vpop.eup %4004 }
0x1234   :  { %v3018_v38 = vmul.f32 %v4005_v45, %v3016_v30 }
0x1236   :  { %v3020_v42 = vsel %vm3019_vm2, %v3016_v30, %v3018_v38 }
0x1237   :  { %v3023_v48 = vsel %vm3021_vm3, %v3022_v46, %v3020_v42 }
0x1238   :  { %v3024_v52 = vmax.f32 %v3023_v48, 1e-12 }
0x123a   :  { %4006 = vrcp.f32 %v3024_v52 }
0x1244   :  { %v4007_v49 = vpop.eup %4006 }
0x1245   :  { %v3026_v29 = vmul.f32 %v4007_v49, %v3013_v44 }
0x1247   :  { %3027 = vst [vmem:[#allocation14] sm:$0xff] %v3026_v29 }
0x1248   :  { %4085 = shalt.err (!%p4082_p4)
}
0x1249   :  { %s4086_s4 = scalar_lea.hbm %s5697_s7, 128 }
0x124a   :  { %p4087_p5 = scmp.ne.s32.totalorder %s5697_s7, %s4086_s4  ;;  %p4090_p6 = scmp.lt.u32.totalorder %s4086_s4, %s5697_s7 }
0x124c   :  { %p4092_p7 = pnand %p4090_p6, %p4087_p5 }
0x124e   :  { %4095 = shalt.err (!%p4092_p7)
}
0x124f   :  { %3037 = dma.vmem_to_hbm [thread:$0]  %s3035_s21, 128, %s5697_s7, [#allocation10]  }
0x1250   :  { %4108 = dma.done.wait [#allocation10], 128  }
0x1251   :  { %4109 = vsyncadd [#allocation10], 4294967168 }
0x1252   :  { %3041 = vsyncpa [#allocation9], 1 }
0x1253   :  { %3042 = vsyncpa [#allocation12], 1 }
0x1254   :  { %3043 = vsyncpa [#allocation10], 1 }

// kernel: tpu_custom_call.1
= control target key start
LH: loop header
LB: loop body
LE: loop exit
PB: predicated region body
PF: predicated region fallthrough
CT: control target
= control target key end

     0   :  { %13 = vsyncpa [#allocation9], 0  ;;  %s5690_s0 = inlined_call_operand.<no memory space> [shape: s32[1], index: 0, kind: input, shape index: {}]   ;;  %s5691_s1 = inlined_call_operand.vmem [shape: s32[8,1], index: 1, kind: input, shape index: {}]   ;;  %s5692_s2 = inlined_call_operand.hbm [shape: bf16[8,8,128], index: 2, kind: input, shape index: {}]   ;;  %s5693_s3 = inlined_call_operand.hbm [shape: bf16[2,128,384], index: 3, kind: input, shape index: {}]   ;;  %s5694_s4 = inlined_call_operand.hbm [shape: bf16[2,128,384], index: 4, kind: input, shape index: {}]   ;;  %s5695_s5 = inlined_call_operand.vmem [shape: f32[2,1,384], index: 5, kind: input, shape index: {}]   ;;  %s5696_s6 = inlined_call_operand.vmem [shape: f32[2,1,128], index: 6, kind: input, shape index: {}]   ;;  %s5697_s7 = inlined_call_operand.hbm [shape: f32[8,128], index: 7, kind: output, shape index: {}]  }
   0x1   :  { %14 = vsyncpa [#allocation12], 0 }
   0x2   :  { %15 = vsyncpa [#allocation10], 0  ;;  %s4118_s24 = smov [#allocation11]   ;;  %s4008_s28 = scalar_lea.hbm %s5693_s3, 6144 }
   0x3   :  { %s35_s25 = sshll.u32 %s4118_s24, 4  ;;  %p4009_p0 = scmp.ne.s32.totalorder %s5693_s3, %s4008_s28  ;;  %s36_s25 = int_to_ptr.vmem [resolvable:$true] %s35_s25 }
   0x4   :  { %p4012_p1 = scmp.lt.u32.totalorder %s4008_s28, %s5693_s3 }
   0x6   :  { %p4014_p2 = pnand %p4012_p1, %p4009_p0 }
   0x8   :  { %4017 = shalt.err (!%p4014_p2)
}
   0x9   :  { %s4018_s10 = scalar_lea.vmem %s36_s25, 6144  ;;  %p4023_p4 = scmp.lt.s32.totalorder %s36_s25, %s36_s25 }
   0xa   :  { %p4019_p3 = scmp.ne.s32.totalorder %s36_s25, %s4018_s10  ;;  %p4024_p5 = scmp.lt.s32.totalorder %s4018_s10, %s4018_s10 }
   0xc   :  { %p4025_p6 = por %p4024_p5, %p4023_p4 }
   0xe   :  { %p4026_p7 = pnand %p4025_p6, %p4019_p3 }
  0x10   :  { %4029 = shalt.err (!%p4026_p7)
}
  0x11   :  { %s4119_s11 = smov 192   ;;  %s4120_s12 = smov 12  }
  0x12   :  { %41 = dma.hbm_to_vmem [thread:$0]  %s5693_s3, 6144, %s36_s25, [#allocation12], %s4119_s11, %s4119_s11, %s4120_s12  }
  0x13   :  { %s4121_s15 = smov [#allocation8]   ;;  %s4030_s19 = scalar_lea.hbm %s5692_s2, 512 }
  0x14   :  { %s23_s16 = sshll.u32 %s4121_s15, 4  ;;  %p4031_p8 = scmp.ne.s32.totalorder %s5692_s2, %s4030_s19  ;;  %s24_s16 = int_to_ptr.vmem [resolvable:$true] %s23_s16 }
  0x15   :  { %p4034_p9 = scmp.lt.u32.totalorder %s4030_s19, %s5692_s2 }
  0x17   :  { %p4036_p10 = pnand %p4034_p9, %p4031_p8 }
  0x19   :  { %4039 = shalt.err (!%p4036_p10)
}
  0x1a   :  { %s4040_s24 = scalar_lea.vmem %s24_s16, 512  ;;  %p4045_p12 = scmp.lt.s32.totalorder %s24_s16, %s24_s16 }
  0x1b   :  { %p4041_p11 = scmp.ne.s32.totalorder %s24_s16, %s4040_s24  ;;  %p4046_p13 = scmp.lt.s32.totalorder %s4040_s24, %s4040_s24 }
  0x1d   :  { %p4047_p0 = por %p4046_p13, %p4045_p12 }
  0x1f   :  { %p4048_p1 = pnand %p4047_p0, %p4041_p11 }
  0x21   :  { %4051 = shalt.err (!%p4048_p1)
}
  0x22   :  { %s4122_s3 = smov 64   ;;  %s4123_s25 = smov 4  }
  0x23   :  { %29 = dma.hbm_to_vmem [thread:$0]  %s5692_s2, 512, %s24_s16, [#allocation9], %s4122_s3, %s4122_s3, %s4123_s25  }
  0x24   :  { %s4124_s28 = smov [#allocation13]   ;;  %s4052_s9 = scalar_lea.hbm %s5694_s4, 6144 }
  0x25   :  { %s47_s29 = sshll.u32 %s4124_s28, 4  ;;  %p4053_p2 = scmp.ne.s32.totalorder %s5694_s4, %s4052_s9  ;;  %s48_s29 = int_to_ptr.vmem [resolvable:$true] %s47_s29 }
  0x26   :  { %p4056_p3 = scmp.lt.u32.totalorder %s4052_s9, %s5694_s4 }
  0x28   :  { %p4058_p4 = pnand %p4056_p3, %p4053_p2 }
  0x2a   :  { %4061 = shalt.err (!%p4058_p4)
}
  0x2b   :  { %s4062_s17 = scalar_lea.vmem %s48_s29, 6144  ;;  %p4067_p6 = scmp.lt.s32.totalorder %s48_s29, %s48_s29 }
  0x2c   :  { %p4063_p5 = scmp.ne.s32.totalorder %s48_s29, %s4062_s17  ;;  %p4068_p7 = scmp.lt.s32.totalorder %s4062_s17, %s4062_s17 }
  0x2e   :  { %p4069_p8 = por %p4068_p7, %p4067_p6 }
  0x30   :  { %p4070_p9 = pnand %p4069_p8, %p4063_p5 }
  0x32   :  { %4073 = shalt.err (!%p4070_p9)
}
  0x33   :  { %53 = dma.hbm_to_vmem [thread:$0]  %s5694_s4, 6144, %s48_s29, [#allocation12], %s4119_s11, %s4119_s11, %s4120_s12  }
  0x34   :  { %4104 = dma.done.wait [#allocation9], 512  }
  0x35   :  { %4105 = vsyncadd [#allocation9], 4294966784 }
  0x36   :  { %4106 = dma.done.wait [#allocation12], 12288  }
  0x37   :  { %4107 = vsyncadd [#allocation12], 4294955008  ;;  %s69_s20 = sadd.s32 7, %s5690_s0  ;;  %v5698_v0 = vmov 0.0   ;;  %v4225_v1 = vld [vmem:[%s5691_s1] sm:$0xff]  ;;  %v4227_v2 = vld [vmem:[#allocation11] sm:$0xff] }
  0x38   :  { %p70_p10 = scmp.lt.s32.totalorder %s69_s20, 0  ;;  %s71_s21 = ssub.s32 0, %s69_s20  ;;  %77 = vst [vmem:[#allocation5] sm:$0xff] %v5698_v0  ;;  %150 = vst [vmem:[#allocation4] sm:$0xff] %v5698_v0  ;;  %v4229_v3 = vld [vmem:[#allocation11 + $0x8] sm:$0xf] }
  0x39   :  { %s3088_s22 = smin.u32 %s71_s21, %s69_s20  ;;  %5784 = vst [vmem:[#allocation18_spill] sm:$0xff] %v4225_v1  ;;  %5785 = vst [vmem:[#allocation19_spill] sm:$0xff] %v4227_v2  ;;  %v4231_v4 = vld [vmem:[#allocation11 + $0xc] sm:$0xff]  ;;  %v4233_v5 = vld [vmem:[#allocation11 + $0x14] sm:$0xf] }
  0x3a   :  { %s73_s23 = sshrl.u32 %s3088_s22, 3  ;;  %5786 = vst [vmem:[#allocation20_spill] sm:$0xff] %v4229_v3  ;;  %5787 = vst [vmem:[#allocation21_spill] sm:$0xff] %v4231_v4  ;;  %v4235_v6 = vld [vmem:[#allocation11 + $0x18] sm:$0xff]  ;;  %v4237_v7 = vld [vmem:[#allocation11 + $0x20] sm:$0xf] }
  0x3b   :  { %s74_s24 = ssub.s32 0, %s73_s23  ;;  %5788 = vst [vmem:[#allocation22_spill] sm:$0xff] %v4233_v5  ;;  %5789 = vst [vmem:[#allocation23_spill] sm:$0xff] %v4235_v6  ;;  %v4239_v8 = vld [vmem:[#allocation11 + $0x24] sm:$0xff]  ;;  %v4241_v9 = vld [vmem:[#allocation11 + $0x2c] sm:$0xf] }
  0x3c   :  { %s6072_s24 = smov (!%p70_p10, %s74_s24), %s73_s23  ;;  %5790 = vst [vmem:[#allocation24_spill] sm:$0xff] %v4237_v7  ;;  %5791 = vst [vmem:[#allocation25_spill] sm:$0xff] %v4239_v8  ;;  %v4243_v10 = vld [vmem:[#allocation11 + $0x30] sm:$0xff]  ;;  %v4245_v11 = vld [vmem:[#allocation11 + $0x38] sm:$0xf] }
  0x3d   :  { %5792 = vst [vmem:[#allocation26_spill] sm:$0xff] %v4241_v9  ;;  %5793 = vst [vmem:[#allocation27_spill] sm:$0xff] %v4243_v10  ;;  %v4247_v12 = vld [vmem:[#allocation11 + $0x3c] sm:$0xff]  ;;  %v4249_v13 = vld [vmem:[#allocation11 + $0x44] sm:$0xf]  ;;  %p3090_p11 = scmp.le.s32.totalorder %s6072_s24, 0 }
  0x3e   :  { %5794 = vst [vmem:[#allocation28_spill] sm:$0xff] %v4245_v11  ;;  %5795 = vst [vmem:[#allocation29_spill] sm:$0xff] %v4247_v12  ;;  %v4251_v14 = vld [vmem:[#allocation11 + $0x48] sm:$0xff]  ;;  %v4253_v15 = vld [vmem:[#allocation11 + $0x50] sm:$0xf]  ;;  %s4368_s25 = smov (!%p3090_p11), 0  }
  0x3f   :  { %5796 = vst [vmem:[#allocation30_spill] sm:$0xff] %v4249_v13  ;;  %5797 = vst [vmem:[#allocation31_spill] sm:$0xff] %v4251_v14  ;;  %v4255_v16 = vld [vmem:[#allocation11 + $0x54] sm:$0xff]  ;;  %v4257_v17 = vld [vmem:[#allocation11 + $0x5c] sm:$0xf] }
  0x40   :  { %5798 = vst [vmem:[#allocation32_spill] sm:$0xff] %v4253_v15  ;;  %5799 = vst [vmem:[#allocation33_spill] sm:$0xff] %v4255_v16  ;;  %v4259_v18 = vld [vmem:[#allocation11 + $0x60] sm:$0xff]  ;;  %v4261_v19 = vld [vmem:[#allocation11 + $0x68] sm:$0xf] }
  0x41   :  { %5800 = vst [vmem:[#allocation34_spill] sm:$0xff] %v4257_v17  ;;  %5801 = vst [vmem:[#allocation35_spill] sm:$0xff] %v4259_v18  ;;  %v4263_v20 = vld [vmem:[#allocation11 + $0x6c] sm:$0xff]  ;;  %v4265_v21 = vld [vmem:[#allocation11 + $0x74] sm:$0xf] }
  0x42   :  { %5802 = vst [vmem:[#allocation36_spill] sm:$0xff] %v4261_v19  ;;  %5803 = vst [vmem:[#allocation37_spill] sm:$0xff] %v4263_v20  ;;  %v4267_v22 = vld [vmem:[#allocation11 + $0x78] sm:$0xff]  ;;  %v4269_v23 = vld [vmem:[#allocation11 + $0x80] sm:$0xf] }
  0x43   :  { %5804 = vst [vmem:[#allocation38_spill] sm:$0xff] %v4265_v21  ;;  %5805 = vst [vmem:[#allocation39_spill] sm:$0xff] %v4267_v22  ;;  %v4271_v24 = vld [vmem:[#allocation11 + $0x84] sm:$0xff]  ;;  %v4273_v25 = vld [vmem:[#allocation11 + $0x8c] sm:$0xf] }
  0x44   :  { %5806 = vst [vmem:[#allocation40_spill] sm:$0xff] %v4269_v23  ;;  %5807 = vst [vmem:[#allocation41_spill] sm:$0xff] %v4271_v24  ;;  %v4275_v26 = vld [vmem:[#allocation11 + $0x90] sm:$0xff]  ;;  %v4277_v27 = vld [vmem:[#allocation11 + $0x98] sm:$0xf] }
  0x45   :  { %5808 = vst [vmem:[#allocation42_spill] sm:$0xff] %v4273_v25  ;;  %5809 = vst [vmem:[#allocation43_spill] sm:$0xff] %v4275_v26  ;;  %v4279_v28 = vld [vmem:[#allocation11 + $0x9c] sm:$0xff]  ;;  %v4281_v29 = vld [vmem:[#allocation11 + $0xa4] sm:$0xf] }
  0x46   :  { %5810 = vst [vmem:[#allocation44_spill] sm:$0xff] %v4277_v27  ;;  %5811 = vst [vmem:[#allocation45_spill] sm:$0xff] %v4279_v28  ;;  %v4283_v30 = vld [vmem:[#allocation11 + $0xa8] sm:$0xff]  ;;  %v4285_v31 = vld [vmem:[#allocation11 + $0xb0] sm:$0xf] }
  0x47   :  { %5812 = vst [vmem:[#allocation46_spill] sm:$0xff] %v4281_v29  ;;  %5813 = vst [vmem:[#allocation47_spill] sm:$0xff] %v4283_v30  ;;  %v4287_v32 = vld [vmem:[#allocation11 + $0xb4] sm:$0xff]  ;;  %v4289_v33 = vld [vmem:[#allocation11 + $0xbc] sm:$0xf] }
  0x48   :  { %5814 = vst [vmem:[#allocation48_spill] sm:$0xff] %v4285_v31  ;;  %5815 = vst [vmem:[#allocation49_spill] sm:$0xff] %v4287_v32  ;;  %v4291_v34 = vld [vmem:[#allocation13] sm:$0xff]  ;;  %v4293_v35 = vld [vmem:[#allocation13 + $0x8] sm:$0xf] }
  0x49   :  { %5816 = vst [vmem:[#allocation50_spill] sm:$0xff] %v4289_v33  ;;  %5817 = vst [vmem:[#allocation51_spill] sm:$0xff] %v4291_v34  ;;  %v4295_v36 = vld [vmem:[#allocation13 + $0xc] sm:$0xff]  ;;  %v4297_v37 = vld [vmem:[#allocation13 + $0x14] sm:$0xf] }
  0x4a   :  { %5818 = vst [vmem:[#allocation52_spill] sm:$0xff] %v4293_v35  ;;  %5819 = vst [vmem:[#allocation53_spill] sm:$0xff] %v4295_v36  ;;  %v4299_v38 = vld [vmem:[#allocation13 + $0x18] sm:$0xff]  ;;  %v4301_v39 = vld [vmem:[#allocation13 + $0x20] sm:$0xf] }
  0x4b   :  { %5820 = vst [vmem:[#allocation54_spill] sm:$0xff] %v4297_v37  ;;  %5821 = vst [vmem:[#allocation55_spill] sm:$0xff] %v4299_v38  ;;  %v4303_v40 = vld [vmem:[#allocation13 + $0x24] sm:$0xff]  ;;  %v4305_v41 = vld [vmem:[#allocation13 + $0x2c] sm:$0xf] }
  0x4c   :  { %5822 = vst [vmem:[#allocation56_spill] sm:$0xff] %v4301_v39  ;;  %5823 = vst [vmem:[#allocation57_spill] sm:$0xff] %v4303_v40  ;;  %v4307_v42 = vld [vmem:[#allocation13 + $0x30] sm:$0xff]  ;;  %v4309_v43 = vld [vmem:[#allocation13 + $0x38] sm:$0xf] }
  0x4d   :  { %5824 = vst [vmem:[#allocation58_spill] sm:$0xff] %v4305_v41  ;;  %5825 = vst [vmem:[#allocation59_spill] sm:$0xff] %v4307_v42  ;;  %v4311_v44 = vld [vmem:[#allocation13 + $0x3c] sm:$0xff]  ;;  %v4313_v45 = vld [vmem:[#allocation13 + $0x44] sm:$0xf] }
  0x4e   :  { %5826 = vst [vmem:[#allocation60_spill] sm:$0xff] %v4309_v43  ;;  %5827 = vst [vmem:[#allocation61_spill] sm:$0xff] %v4311_v44  ;;  %v4315_v46 = vld [vmem:[#allocation13 + $0x48] sm:$0xff]  ;;  %v4317_v47 = vld [vmem:[#allocation13 + $0x50] sm:$0xf] }
  0x4f   :  { %5828 = vst [vmem:[#allocation62_spill] sm:$0xff] %v4313_v45  ;;  %5829 = vst [vmem:[#allocation63_spill] sm:$0xff] %v4315_v46  ;;  %v4319_v48 = vld [vmem:[#allocation13 + $0x54] sm:$0xff]  ;;  %v4321_v49 = vld [vmem:[#allocation13 + $0x5c] sm:$0xf] }
  0x50   :  { %5830 = vst [vmem:[#allocation64_spill] sm:$0xff] %v4317_v47  ;;  %5831 = vst [vmem:[#allocation65_spill] sm:$0xff] %v4319_v48  ;;  %v4323_v50 = vld [vmem:[#allocation13 + $0x60] sm:$0xff]  ;;  %v4325_v51 = vld [vmem:[#allocation13 + $0x68] sm:$0xf] }
  0x51   :  { %5832 = vst [vmem:[#allocation66_spill] sm:$0xff] %v4321_v49  ;;  %5833 = vst [vmem:[#allocation67_spill] sm:$0xff] %v4323_v50  ;;  %v4327_v52 = vld [vmem:[#allocation13 + $0x6c] sm:$0xff]  ;;  %v4329_v53 = vld [vmem:[#allocation13 + $0x74] sm:$0xf] }
  0x52   :  { %5834 = vst [vmem:[#allocation68_spill] sm:$0xff] %v4325_v51  ;;  %5835 = vst [vmem:[#allocation69_spill] sm:$0xff] %v4327_v52  ;;  %v4331_v54 = vld [vmem:[#allocation13 + $0x78] sm:$0xff]  ;;  %v4333_v55 = vld [vmem:[#allocation13 + $0x80] sm:$0xf] }
  0x53   :  { %5836 = vst [vmem:[#allocation70_spill] sm:$0xff] %v4329_v53  ;;  %5837 = vst [vmem:[#allocation71_spill] sm:$0xff] %v4331_v54  ;;  %v4335_v56 = vld [vmem:[#allocation13 + $0x84] sm:$0xff]  ;;  %v4337_v57 = vld [vmem:[#allocation13 + $0x8c] sm:$0xf] }
  0x54   :  { %5838 = vst [vmem:[#allocation72_spill] sm:$0xff] %v4333_v55  ;;  %5839 = vst [vmem:[#allocation73_spill] sm:$0xff] %v4335_v56  ;;  %v4339_v58 = vld [vmem:[#allocation13 + $0x90] sm:$0xff]  ;;  %v4341_v59 = vld [vmem:[#allocation13 + $0x98] sm:$0xf]  ;;  %3080 = sbr.rel (%p3090_p11) target bundleno = 2277 (0x8e5), region = 92 }
  0x55   :  { %5840 = vst [vmem:[#allocation74_spill] sm:$0xff] %v4337_v57  ;;  %5841 = vst [vmem:[#allocation75_spill] sm:$0xff] %v4339_v58  ;;  %v4343_v60 = vld [vmem:[#allocation13 + $0x9c] sm:$0xff]  ;;  %v4345_v61 = vld [vmem:[#allocation13 + $0xa4] sm:$0xf] }
  0x56   :  { %5842 = vst [vmem:[#allocation76_spill] sm:$0xff] %v4341_v59  ;;  %5843 = vst [vmem:[#allocation77_spill] sm:$0xff] %v4343_v60  ;;  %v4347_v62 = vld [vmem:[#allocation13 + $0xa8] sm:$0xff]  ;;  %v4349_v63 = vld [vmem:[#allocation13 + $0xb0] sm:$0xf] }
  0x57   :  { %5844 = vst [vmem:[#allocation78_spill] sm:$0xff] %v4345_v61  ;;  %5845 = vst [vmem:[#allocation79_spill] sm:$0xff] %v4347_v62  ;;  %v4351_v0 = vld [vmem:[#allocation13 + $0xb4] sm:$0xff]  ;;  %v4353_v1 = vld [vmem:[#allocation13 + $0xbc] sm:$0xf] }
  0x58   :  { %5846 = vst [vmem:[#allocation80_spill] sm:$0xff] %v4349_v63  ;;  %5847 = vst [vmem:[#allocation81_spill] sm:$0xff] %v4351_v0  ;;  %v4358_v55 = vld [vmem:[%s5695_s5] sm:$0x7] }
  0x59   :  { %5848 = vst [vmem:[#allocation82_spill] sm:$0xff] %v4353_v1  ;;  %5849 = vst [vmem:[#allocation83_spill] sm:$0xff] %v4358_v55  ;;  %v4363_v59 = vld [vmem:[%s5696_s6] ss:$0 sm:$0xff] }
  0x5a   :  { %5850 = vst [vmem:[#allocation84_spill] sm:$0xff] %v4363_v59 }
  0x5b LB: > { %v5853_v56 = vld [vmem:[#allocation73_spill] sm:$0xff]  ;;  %v5854_v54 = vld [vmem:[#allocation71_spill] sm:$0xff]  ;;  %s3257_s26 = sshll.u32 %s4112_s25, 5  ;;  %v5881_v5 = vld [vmem:[#allocation22_spill] sm:$0xff]  ;;  %vm4128_vm0 = vmmov 0   ;;  %s154_s25 = sadd.s32 1, %s4112_s25   ;;  %s4112_s25 = sphi %s4368_s25, %s154_s25  }
  0x5c   : > { %v5852_v58 = vld [vmem:[#allocation75_spill] sm:$0xff]  ;;  %v5855_v52 = vld [vmem:[#allocation69_spill] sm:$0xff]  ;;  %v5882_v3 = vld [vmem:[#allocation20_spill] sm:$0xff]  ;;  %s4390_s27 = scalar_lea.vmem [#allocation8], %s3257_s26  ;;  %s4666_s28 = scalar_lea.vmem [#allocation2], %s3257_s26 }
  0x5d   : > { %v5851_v60 = vld [vmem:[#allocation77_spill] sm:$0xff]  ;;  %v5856_v50 = vld [vmem:[#allocation67_spill] sm:$0xff]  ;;  %v3099_v61 = vcombine.low %v5882_v3, %v5881_v5  ;;  %v5883_v9 = vld [vmem:[#allocation26_spill] sm:$0xff]  ;;  %p153_p12 = scmp.ge.s32.totalorder %s154_s25, %s6072_s24 }
  0x5e   : > { %v5857_v48 = vld [vmem:[#allocation65_spill] sm:$0xff]  ;;  %v5858_v46 = vld [vmem:[#allocation63_spill] sm:$0xff]  ;;  %v5884_v7 = vld [vmem:[#allocation24_spill] sm:$0xff] }
  0x5f   : > { %v5859_v44 = vld [vmem:[#allocation61_spill] sm:$0xff]  ;;  %v5860_v42 = vld [vmem:[#allocation59_spill] sm:$0xff]  ;;  %v3102_v0 = vcombine.low %v5884_v7, %v5883_v9  ;;  %3435 = vmatprep.subr.bf16.mxu1 %v3099_v61  ;;  %v5885_v13 = vld [vmem:[#allocation30_spill] sm:$0xff]  ;;  %v4473_v7 = vcombine.high %v5858_v46, %v5857_v48  ;;  %v4483_v9 = vcombine.low %v5858_v46, %v5857_v48 }
  0x60   : > { %v5861_v40 = vld [vmem:[#allocation57_spill] sm:$0xff]  ;;  %v5862_v38 = vld [vmem:[#allocation55_spill] sm:$0xff]  ;;  %3436 = vmatpush3.bf16.msra.mxu1 %v3099_v61  ;;  %v5886_v11 = vld [vmem:[#allocation28_spill] sm:$0xff] }
  0x61   : > { %v5863_v36 = vld [vmem:[#allocation53_spill] sm:$0xff]  ;;  %v5864_v34 = vld [vmem:[#allocation51_spill] sm:$0xff]  ;;  %3437 = vmatprep.subr.bf16.mxu1 %v3102_v0  ;;  %v5887_v17 = vld [vmem:[#allocation34_spill] sm:$0xff] }
  0x62   : > { %v5865_v32 = vld [vmem:[#allocation49_spill] sm:$0xff]  ;;  %v5866_v30 = vld [vmem:[#allocation47_spill] sm:$0xff]  ;;  %v5888_v15 = vld [vmem:[#allocation32_spill] sm:$0xff] }
  0x63   : > { %v5867_v28 = vld [vmem:[#allocation45_spill] sm:$0xff]  ;;  %v5868_v26 = vld [vmem:[#allocation43_spill] sm:$0xff]  ;;  %v5889_v21 = vld [vmem:[#allocation38_spill] sm:$0xff] }
  0x64   : > { %v5869_v24 = vld [vmem:[#allocation41_spill] sm:$0xff]  ;;  %v5870_v22 = vld [vmem:[#allocation39_spill] sm:$0xff]  ;;  %3438 = vmatpush3.bf16.msra.mxu1 %v3102_v0  ;;  %v5890_v19 = vld [vmem:[#allocation36_spill] sm:$0xff] }
  0x65   : > { %v5871_v20 = vld [vmem:[#allocation37_spill] sm:$0xff]  ;;  %v5872_v18 = vld [vmem:[#allocation35_spill] sm:$0xff]  ;;  %v3111_v0 = vcombine.low %v5890_v19, %v5889_v21  ;;  %v5891_v25 = vld [vmem:[#allocation42_spill] sm:$0xff] }
  0x66   : > { %v5873_v16 = vld [vmem:[#allocation33_spill] sm:$0xff]  ;;  %v5874_v14 = vld [vmem:[#allocation31_spill] sm:$0xff]  ;;  %v3110_v61 = vcombine.high %v5872_v18, %v5871_v20  ;;  %v5892_v23 = vld [vmem:[#allocation40_spill] sm:$0xff] }
  0x67   : > { %v5875_v12 = vld [vmem:[#allocation29_spill] sm:$0xff]  ;;  %v5876_v10 = vld [vmem:[#allocation27_spill] sm:$0xff]  ;;  %v3107_v3 = vcombine.high %v5874_v14, %v5873_v16  ;;  %v5893_v29 = vld [vmem:[#allocation46_spill] sm:$0xff] }
  0x68   : > { %v5877_v8 = vld [vmem:[#allocation25_spill] sm:$0xff]  ;;  %v5878_v6 = vld [vmem:[#allocation23_spill] sm:$0xff]  ;;  %v3104_v62 = vcombine.high %v5876_v10, %v5875_v12  ;;  %v5894_v27 = vld [vmem:[#allocation44_spill] sm:$0xff] }
  0x69   : > { %v5879_v4 = vld [vmem:[#allocation21_spill] sm:$0xff]  ;;  %v5880_v2 = vld [vmem:[#allocation19_spill] sm:$0xff]  ;;  %v3101_v63 = vcombine.high %v5878_v6, %v5877_v8  ;;  %v3100_v1 = vcombine.low %v5878_v6, %v5877_v8  ;;  %v5895_v33 = vld [vmem:[#allocation50_spill] sm:$0xff]  ;;  %v4467_v6 = vcombine.low %v5860_v42, %v5859_v44 }
  0x6a   : > { %v3098_v55 = vcombine.high %v5880_v2, %v5879_v4  ;;  %v3097_v59 = vcombine.low %v5880_v2, %v5879_v4  ;;  %v3105_v2 = vcombine.low %v5886_v11, %v5885_v13  ;;  %v5896_v31 = vld [vmem:[#allocation48_spill] sm:$0xff]  ;;  %v5897_v37 = vld [vmem:[#allocation54_spill] sm:$0xff]  ;;  %v4455_v4 = vcombine.high %v5860_v42, %v5859_v44  ;;  %v5911_v19 = vld [vmem:[#allocation81_spill] sm:$0xff] }
  0x6b   : > { %v5898_v35 = vld [vmem:[#allocation52_spill] sm:$0xff]  ;;  %v5900_v41 = vld [vmem:[#allocation58_spill] sm:$0xff]  ;;  %v4509_v13 = vcombine.high %v5854_v54, %v5853_v56 }
  0x6c   : > { %336 = vmatprep.subr.bf16.mxu0 %v3098_v55  ;;  %v5705_v55 = vmov 0   ;;  %3439 = vmatprep.subr.bf16.mxu1 %v3105_v2  ;;  %v5901_v39 = vld [vmem:[#allocation56_spill] sm:$0xff]  ;;  %v5902_v45 = vld [vmem:[#allocation62_spill] sm:$0xff] }
  0x6d   : > { %337 = vmatpush1.bf16.msra.mxu0 %v3097_v59  ;;  %368 = vmatprep.mubr.bf16.mxu0 %v5705_v55  ;;  %v3103_v59 = vcombine.low %v5876_v10, %v5875_v12  ;;  %v3106_v55 = vcombine.low %v5874_v14, %v5873_v16  ;;  %v4462_v5 = vcombine.low %v5901_v39, %v5900_v41  ;;  %v5903_v43 = vld [vmem:[#allocation60_spill] sm:$0xff]  ;;  %v5904_v10 = vmov 0.0   ;;  %v5905_v49 = vld [vmem:[#allocation66_spill] sm:$0xff] }
  0x6e   : > { %338 = vmatprep.subr.bf16.mxu0 %v3101_v63  ;;  %v3834_v63 = vld [vmem:[%s4390_s27] sm:$0xff]   ;;  %3440 = vmatpush3.bf16.msra.mxu1 %v3105_v2  ;;  %v3114_v2 = vcombine.low %v5892_v23, %v5891_v25  ;;  %v4478_v8 = vcombine.low %v5903_v43, %v5902_v45  ;;  %v5906_v47 = vld [vmem:[#allocation64_spill] sm:$0xff]  ;;  %v4503_v12 = vcombine.low %v5856_v50, %v5855_v52  ;;  %v5907_v53 = vld [vmem:[#allocation70_spill] sm:$0xff] }
  0x6f   : > { %3451 = vmatprep.mubr.bf16.mxu1 %v3834_v63  ;;  %v4496_v11 = vcombine.low %v5906_v47, %v5905_v49  ;;  %v5908_v51 = vld [vmem:[#allocation68_spill] sm:$0xff]  ;;  %v4525_v16 = vcombine.high %v5852_v58, %v5851_v60  ;;  %v5909_v57 = vld [vmem:[#allocation74_spill] sm:$0xff]  ;;  %v4555_v25 = vld [vmem:[#allocation4] sm:$0xff] }
  0x70   : > { %v4514_v14 = vcombine.low %v5908_v51, %v5907_v53 }
  0x71   : > { %339 = vmatpush1.bf16.msra.mxu0 %v3100_v1  ;;  %v3108_v1 = vcombine.low %v5888_v15, %v5887_v17  ;;  %v4519_v15 = vcombine.low %v5854_v54, %v5853_v56 }
  0x72   : > { %340 = vmatprep.subr.bf16.mxu0 %v3104_v62  ;;  %v3109_v62 = vcombine.low %v5872_v18, %v5871_v20  ;;  %v4536_v18 = vcombine.low %v5852_v58, %v5851_v60  ;;  %v5912_v20 = vld [vmem:[#allocation79_spill] sm:$0xff] }
  0x73   : > { %3441 = vmatprep.subr.bf16.mxu1 %v3108_v1  ;;  %v4542_v21 = vcombine.high %v5912_v20, %v5911_v19 }
  0x74   : > { %3442 = vmatpush3.bf16.msra.mxu1 %v3108_v1  ;;  %v3117_v1 = vcombine.low %v5894_v27, %v5893_v29  ;;  %v5917_v27 = vld [vmem:[#allocation83_spill] sm:$0xff] }
  0x75   : > { %341 = vmatpush1.bf16.msra.mxu0 %v3103_v59  ;;  %v3113_v59 = vcombine.high %v5870_v22, %v5869_v24  ;;  %3443 = vmatprep.subr.bf16.mxu1 %v3111_v0 }
  0x76   : > { %342 = vmatprep.subr.bf16.mxu0 %v3107_v3  ;;  %v3112_v3 = vcombine.low %v5870_v22, %v5869_v24  ;;  %v5913_v22 = vld [vmem:[#allocation78_spill] sm:$0xff]  ;;  %v4552_v24 = vcombine.low %v5912_v20, %v5911_v19 }
  0x78   : > { %3444 = vmatpush3.bf16.msra.mxu1 %v3111_v0  ;;  %v3120_v0 = vcombine.low %v5896_v31, %v5895_v33 }
  0x79   : > { %343 = vmatpush1.bf16.msra.mxu0 %v3106_v55  ;;  %v3116_v55 = vcombine.high %v5868_v26, %v5867_v28  ;;  %3445 = vmatprep.subr.bf16.mxu1 %v3114_v2 }
  0x7a   : > { %344 = vmatprep.subr.bf16.mxu0 %v3110_v61  ;;  %v3115_v61 = vcombine.low %v5868_v26, %v5867_v28 }
  0x7c   : > { %3446 = vmatpush3.bf16.msra.mxu1 %v3114_v2  ;;  %v4434_v2 = vcombine.low %v5864_v34, %v5863_v36 }
  0x7d   : > { %345 = vmatpush1.bf16.msra.mxu0 %v3109_v62  ;;  %v3119_v62 = vcombine.high %v5866_v30, %v5865_v32  ;;  %3447 = vmatprep.subr.bf16.mxu1 %v3117_v1 }
  0x7e   : > { %346 = vmatprep.subr.bf16.mxu0 %v3113_v59  ;;  %v3118_v59 = vcombine.low %v5866_v30, %v5865_v32 }
  0x80   : > { %3448 = vmatpush3.bf16.msra.mxu1 %v3117_v1  ;;  %v4448_v1 = vcombine.low %v5862_v38, %v5861_v40 }
  0x81   : > { %347 = vmatpush1.bf16.msra.mxu0 %v3112_v3  ;;  %v4430_v3 = vcombine.high %v5864_v34, %v5863_v36  ;;  %3449 = vmatprep.subr.bf16.mxu1 %v3120_v0 }
  0x82   : > { %348 = vmatprep.subr.bf16.mxu0 %v3116_v55  ;;  %v4439_v55 = vcombine.high %v5862_v38, %v5861_v40 }
  0x84   : > { %3450 = vmatpush3.bf16.msra.mxu1 %v3120_v0  ;;  %v5710_v0 = vmov 0.0  }
  0x85   : > { %349 = vmatpush1.bf16.msra.mxu0 %v3115_v61  ;;  %v4443_v61 = vcombine.low %v5898_v35, %v5897_v37  ;;  %3459 = vmatprep.subr.bf16.mxu1 %v5710_v0 }
  0x86   : > { %350 = vmatprep.subr.bf16.mxu0 %v3119_v62  ;;  %v5899_v62 = vmov 0  }
  0x89   : > { %351 = vmatpush1.bf16.msra.mxu0 %v3118_v59  ;;  %v3835_v59 = vld [vmem:[%s4390_s27 + $0x8] sm:$0xff]  }
  0x8a   : > { %631 = vmatprep.subr.bf16.mxu0 %v4430_v3  ;;  %3452 = vmatmul.mubr.bf16.vlgmr.msra.gmra.mrb[0].mxu1 %v3835_v59 }
  0x8b   : > { %3460 = vmatpush3.bf16.msra.mxu1 %v4443_v61 }
  0x8c   : > { %369 = vmatmul.mubr.bf16.vlgmr.msra.gmra.mrb[0].mxu0 %v3834_v63  ;;  %v3836_v63 = vld [vmem:[%s4390_s27 + $0x10] sm:$0xff]   ;;  %3461 = vmatprep.subr.bf16.mxu1 %v5710_v0  ;;  %v3837_v0 = vld [vmem:[%s4390_s27 + $0x18] sm:$0xff]  }
  0x8d   : > { %632 = vmatpush1.bf16.msra.mxu0 %v4434_v2  ;;  %378 = vmatprep.mubr.bf16.mxu0 %v5899_v62 }
  0x8e   : > { %633 = vmatprep.subr.bf16.mxu0 %v4439_v55  ;;  %3455 = vmatprep.mubr.bf16.mxu1 %v3836_v63 }
  0x8f   : > { %3462 = vmatpush3.bf16.msra.mxu1 %v4462_v5 }
  0x90   : > { %3463 = vmatprep.subr.bf16.mxu1 %v5904_v10 }
  0x91   : > { %634 = vmatpush1.bf16.msra.mxu0 %v4448_v1 }
  0x92   : > { %635 = vmatprep.subr.bf16.mxu0 %v4455_v4  ;;  %3456 = vmatmul.mubr.bf16.gmra.mrb[4].mxu1 %v3837_v0 }
  0x93   : > { %3464 = vmatpush3.bf16.msra.mxu1 %v4478_v8  ;;  %3475 = vmatprep.mubr.msk.bf16.mxu1 %vm4128_vm0, %v5904_v10 }
  0x94   : > { %379 = vmatmul.mubr.bf16.gmra.mrb[4].mxu0 %v3835_v59  ;;  %v4490_v59 = vcombine.high %v5856_v50, %v5855_v52  ;;  %3465 = vmatprep.subr.bf16.mxu1 %v5904_v10 }
  0x95   : > { %636 = vmatpush1.bf16.msra.mxu0 %v4467_v6  ;;  %388 = vmatprep.mubr.bf16.mxu0 %v5899_v62 }
  0x96   : > { %637 = vmatprep.subr.bf16.mxu0 %v4473_v7 }
  0x97   : > { %3466 = vmatpush3.bf16.msra.mxu1 %v4496_v11 }
  0x98   : > { %3467 = vmatprep.subr.bf16.mxu1 %v5904_v10 }
  0x99   : > { %638 = vmatpush1.bf16.msra.mxu0 %v4483_v9 }
  0x9a   : > { %639 = vmatprep.subr.bf16.mxu0 %v4490_v59 }
  0x9b   : > { %3468 = vmatpush3.bf16.msra.mxu1 %v4514_v14 }
  0x9c   : > { %389 = vmatmul.mubr.bf16.gmra.mrb[8].mxu0 %v3836_v63  ;;  %v5910_v63 = vld [vmem:[#allocation72_spill] sm:$0xff]  ;;  %3469 = vmatprep.subr.bf16.mxu1 %v5904_v10 }
  0x9d   : > { %640 = vmatpush1.bf16.msra.mxu0 %v4503_v12  ;;  %398 = vmatprep.mubr.bf16.mxu0 %v5899_v62  ;;  %v4531_v17 = vcombine.low %v5910_v63, %v5909_v57  ;;  %v5914_v63 = vld [vmem:[#allocation76_spill] sm:$0xff] }
  0x9e   : > { %641 = vmatprep.subr.bf16.mxu0 %v4509_v13  ;;  %v4547_v23 = vcombine.low %v5914_v63, %v5913_v22  ;;  %v5915_v22 = vld [vmem:[#allocation82_spill] sm:$0xff]  ;;  %v5916_v63 = vld [vmem:[#allocation80_spill] sm:$0xff] }
  0x9f   : > { %3470 = vmatpush3.bf16.msra.mxu1 %v4531_v17  ;;  %v4564_v26 = vcombine.low %v5916_v63, %v5915_v22 }
  0xa0   : > { %3471 = vmatprep.subr.bf16.mxu1 %v5904_v10 }
  0xa1   : > { %642 = vmatpush1.bf16.msra.mxu0 %v4519_v15 }
  0xa2   : > { %643 = vmatprep.subr.bf16.mxu0 %v4525_v16 }
  0xa3   : > { %3472 = vmatpush3.bf16.msra.mxu1 %v4547_v23 }
  0xa4   : > { %399 = vmatmul.mubr.bf16.gmra.mrb[12].mxu0 %v3837_v0  ;;  %v502_v0 = vpack.c.bf16 %v4555_v25, %v4555_v25  ;;  %3473 = vmatprep.subr.bf16.mxu1 %v5904_v10 }
  0xa5   : > { %644 = vmatpush1.bf16.msra.mxu0 %v4536_v18  ;;  %663 = vmatprep.mubr.bf16.mxu0 %v5899_v62 }
  0xa6   : > { %645 = vmatprep.subr.bf16.mxu0 %v4542_v21 }
  0xa7   : > { %3474 = vmatpush3.bf16.msra.mxu1 %v4564_v26 }
  0xa8   : > { %3479 = vmatprep.subr.bf16.mxu1 %v5904_v10 }
  0xa9   : > { %646 = vmatpush1.bf16.msra.mxu0 %v4552_v24 }
  0xaa   : > { %742 = vmatprep.subr.bf16.mxu0 %v4430_v3  ;;  %3476 = vmatmul.mubr.bf16.vlgmr.msra.gmra.mrb[8].mxu1 %v502_v0 }
  0xab   : > { %3480 = vmatpush3.bf16.msra.mxu1 %v4443_v61  ;;  %3495 = vmatprep.mubr.msk.bf16.mxu1 %vm4128_vm0, %v5904_v10 }
  0xac   : > { %664 = vmatmul.mubr.bf16.vlgmr.msra.gmra.mrb[16].mxu0 %v502_v0  ;;  %3481 = vmatprep.subr.bf16.mxu1 %v5904_v10  ;;  %v169_v0 = vlaneseq }
  0xad   : > { %743 = vmatpush1.bf16.msra.mxu0 %v4434_v2  ;;  %774 = vmatprep.mubr.bf16.mxu0 %v5899_v62 }
  0xae   : > { %744 = vmatprep.subr.bf16.mxu0 %v4439_v55  ;;  %v170_v22 = vshrl.u32 %v169_v0, 7 }
  0xaf   : > { %3482 = vmatpush3.bf16.msra.mxu1 %v4462_v5 }
  0xb0   : > { %3483 = vmatprep.subr.bf16.mxu1 %v5904_v10  ;;  %v171_v63 = vsub.s32 0, %v170_v22  ;;  %v175_v19 = vsub.s32 1, %v170_v22  ;;  %v179_v20 = vsub.s32 2, %v170_v22 }
  0xb1   : > { %745 = vmatpush1.bf16.msra.mxu0 %v4448_v1 }
  0xb2   : > { %746 = vmatprep.subr.bf16.mxu0 %v4455_v4  ;;  %v172_v28 = vrot.slane %v5917_v27, %v171_v63  ;;  %v176_v29 = vrot.slane %v5917_v27, %v175_v19  ;;  %v180_v31 = vrot.slane %v5917_v27, %v179_v20 }
  0xb3   : > { %3484 = vmatpush3.bf16.msra.mxu1 %v4478_v8 }
  0xb4   : > { %3485 = vmatprep.subr.bf16.mxu1 %v5904_v10 }
  0xb5   : > { %747 = vmatpush1.bf16.msra.mxu0 %v4467_v6 }
  0xb6   : > { %748 = vmatprep.subr.bf16.mxu0 %v4473_v7 }
  0xb7   : > { %3486 = vmatpush3.bf16.msra.mxu1 %v4496_v11 }
  0xb8   : > { %3487 = vmatprep.subr.bf16.mxu1 %v5904_v10 }
  0xb9   : > { %749 = vmatpush1.bf16.msra.mxu0 %v4483_v9 }
  0xba   : > { %750 = vmatprep.subr.bf16.mxu0 %v4490_v59 }
  0xbb   : > { %3488 = vmatpush3.bf16.msra.mxu1 %v4514_v14 }
  0xbc   : > { %3489 = vmatprep.subr.bf16.mxu1 %v5904_v10 }
  0xbd   : > { %751 = vmatpush1.bf16.msra.mxu0 %v4503_v12 }
  0xbe   : > { %752 = vmatprep.subr.bf16.mxu0 %v4509_v13 }
  0xbf   : > { %3490 = vmatpush3.bf16.msra.mxu1 %v4531_v17 }
  0xc0   : > { %3491 = vmatprep.subr.bf16.mxu1 %v5904_v10 }
  0xc1   : > { %753 = vmatpush1.bf16.msra.mxu0 %v4519_v15 }
  0xc2   : > { %754 = vmatprep.subr.bf16.mxu0 %v4525_v16 }
  0xc3   : > { %3492 = vmatpush3.bf16.msra.mxu1 %v4547_v23 }
  0xc4   : > { %3493 = vmatprep.subr.bf16.mxu1 %v5904_v10 }
  0xc5   : > { %755 = vmatpush1.bf16.msra.mxu0 %v4536_v18 }
  0xc6   : > { %756 = vmatprep.subr.bf16.mxu0 %v4542_v21 }
  0xc7   : > { %3494 = vmatpush3.bf16.msra.mxu1 %v4564_v26 }
  0xc8   : > { %3499 = vmatprep.subr.bf16.mxu1 %v5904_v10 }
  0xc9   : > { %757 = vmatpush1.bf16.msra.mxu0 %v4552_v24 }
  0xca   : > { %854 = vmatprep.subr.bf16.mxu0 %v4430_v3 }
 0x15d   : > { %v3453_v38 = vpop.f32.mrb[0].mxu1 }
 0x15e   : > { %v4613_v0 = vadd.f32 %v3453_v38, %v180_v31  ;;  %v443_v22 = vpop.f32.mrb[1].mxu1 }
 0x15f   : > { %v370_v30 = vpop.f32.mrb[0].mxu0  ;;  %v4615_v40 = vadd.f32 %v443_v22, %v180_v31  ;;  %v3454_v63 = vpop.f32.mrb[2].mxu1 }
 0x160   : > { %v371_v32 = vadd.f32 %v370_v30, %v172_v28  ;;  %v372_v33 = vpop.f32.mrb[1].mxu0  ;;  %v4617_v19 = vadd.f32 %v3454_v63, %v180_v31  ;;  %v446_v41 = vpop.f32.mrb[3].mxu1 }
 0x161   : > { %v373_v34 = vadd.f32 %v372_v33, %v176_v29  ;;  %v374_v35 = vpop.f32.mrb[2].mxu0  ;;  %v4619_v20 = vadd.f32 %v446_v41, %v180_v31 }
 0x162   : > { %v4609_v36 = vadd.f32 %v374_v35, %v172_v28  ;;  %v376_v37 = vpop.f32.mrb[3].mxu0 }
 0x163   : > { %v4611_v39 = vadd.f32 %v376_v37, %v176_v29 }
 0x165   : > { %v3457_v43 = vpop.f32.mrb[4].mxu1 }
 0x166   : > { %v4629_v22 = vadd.f32 %v3457_v43, %v180_v31  ;;  %v459_v63 = vpop.f32.mrb[5].mxu1 }
 0x167   : > { %v380_v30 = vpop.f32.mrb[4].mxu0  ;;  %v4631_v45 = vadd.f32 %v459_v63, %v180_v31  ;;  %v3458_v41 = vpop.f32.mrb[6].mxu1 }
 0x168   : > { %v4621_v33 = vadd.f32 %v380_v30, %v172_v28  ;;  %v382_v35 = vpop.f32.mrb[5].mxu0  ;;  %5918 = vst [vmem:[#allocation85_spill] sm:$0xff] %v4629_v22  ;;  %v4633_v46 = vadd.f32 %v3458_v41, %v180_v31  ;;  %v462_v30 = vpop.f32.mrb[7].mxu1 }
 0x169   : > { %v4623_v27 = vadd.f32 %v382_v35, %v176_v29  ;;  %v384_v42 = vpop.f32.mrb[6].mxu0  ;;  %v4635_v47 = vadd.f32 %v462_v30, %v180_v31 }
 0x16a   : > { %v4625_v37 = vadd.f32 %v384_v42, %v172_v28  ;;  %v386_v38 = vpop.f32.mrb[7].mxu0  ;;  %5919 = vst [vmem:[#allocation86_spill] sm:$0xff] %v4633_v46  ;;  %497 = vst [vmem:[#allocation3 + $0xb8] sm:$0xff] %v4633_v46 }
 0x16b   : > { %v4627_v44 = vadd.f32 %v386_v38, %v176_v29 }
 0x16f   : > { %v390_v35 = vpop.f32.mrb[8].mxu0 }
 0x170   : > { %v4638_v42 = vadd.f32 %v390_v35, %v172_v28  ;;  %v392_v48 = vpop.f32.mrb[9].mxu0 }
 0x171   : > { %v4640_v49 = vadd.f32 %v392_v48, %v176_v29  ;;  %v394_v38 = vpop.f32.mrb[10].mxu0 }
 0x172   : > { %v4642_v43 = vadd.f32 %v394_v38, %v172_v28  ;;  %v396_v50 = vpop.f32.mrb[11].mxu0 }
 0x173   : > { %v4644_v63 = vadd.f32 %v396_v50, %v176_v29 }
 0x177   : > { %v400_v51 = vpop.f32.mrb[12].mxu0 }
 0x178   : > { %v4646_v41 = vadd.f32 %v400_v51, %v172_v28  ;;  %v402_v52 = vpop.f32.mrb[13].mxu0 }
 0x179   : > { %v4648_v31 = vadd.f32 %v402_v52, %v176_v29  ;;  %v404_v30 = vpop.f32.mrb[14].mxu0 }
 0x17a   : > { %v4650_v53 = vadd.f32 %v404_v30, %v172_v28  ;;  %v406_v35 = vpop.f32.mrb[15].mxu0 }
 0x17b   : > { %v4652_v54 = vadd.f32 %v406_v35, %v176_v29 }
 0x17c   : > { %5920 = vst [vmem:[#allocation87_spill] sm:$0xff] %v4650_v53  ;;  %495 = vst [vmem:[#allocation3 + $0xa8] sm:$0xff] %v4650_v53 }
 0x17d   : > { %5921 = vst [vmem:[#allocation88_spill] sm:$0xff] %v4652_v54  ;;  %496 = vst [vmem:[#allocation3 + $0xb0] sm:$0xff] %v4652_v54  ;;  %v706_v60 = vpop.f32.mrb[8].mxu1  ;;  %v5922_v54 = vld [vmem:[#allocation84_spill] sm:$0xff] }
 0x17e   : > { %v3477_v52 = vpop.f32.mrb[9].mxu1  ;;  %v726_v22 = vadd.f32 %v5922_v54, %v706_v60 }
 0x17f   : > { %v665_v48 = vpop.f32.mrb[16].mxu0  ;;  %v709_v46 = vpop.f32.mrb[10].mxu1 }
 0x180   : > { %v712_v38 = vadd.f32 %v665_v48, %v371_v32  ;;  %v667_v50 = vpop.f32.mrb[17].mxu0  ;;  %v3478_v28 = vpop.f32.mrb[11].mxu1 }
 0x181   : > { %v713_v56 = vadd.f32 %v667_v50, %v373_v34  ;;  %v669_v57 = vpop.f32.mrb[18].mxu0 }
 0x182   : > { %v3145_v51 = vmul.f32 -1.442695, %v712_v38  ;;  %v670_v58 = vpop.f32.mrb[19].mxu0 }
 0x183   : > { %v3146_v30 = vmul.f32 -1.442695, %v713_v56 }
 0x184   : > { %3838 = vpow2.f32 %v3145_v51 }
 0x185   : > { %3840 = vpow2.f32 %v3146_v30 }
 0x18e   : > { %v3839_v29 = vpop.eup %3838 }
 0x18f   : > { %v720_v35 = vadd.f32 1.0, %v3839_v29  ;;  %v3841_v53 = vpop.eup %3840 }
 0x190   : > { %v721_v32 = vadd.f32 1.0, %v3841_v53 }
 0x191   : > { %3842 = vrcp.f32 %v720_v35 }
 0x192   : > { %3844 = vrcp.f32 %v721_v32 }
 0x19b   : > { %v3843_v48 = vpop.eup %3842 }
 0x19c   : > { %v727_v34 = vmul.f32 %v3843_v48, %v726_v22  ;;  %v3845_v58 = vpop.eup %3844 }
 0x19d   : > { %v730_v46 = vsub.f32 1.0, %v3845_v58 }
 0x19e   : > { %v728_v57 = vadd.f32 %v727_v34, %v4615_v40 }
 0x1a0   : > { %3846 = vtanh.f32 %v728_v57 }
 0x1aa   : > { %v3847_v38 = vpop.eup %3846 }
 0x1ab   : > { %v731_v56 = vsub.f32 %v3847_v38, %v4555_v25 }
 0x1ad   : > { %v732_v50 = vmul.f32 %v731_v56, %v730_v46 }
 0x1af   : > { %v4660_v51 = vadd.f32 %v732_v50, %v4555_v25 }
 0x1b1   : > { %v734_v52 = vpack.c.bf16 %v4660_v51, %v4660_v51 }
 0x1b3   : > { %737 = vst [vmem:[%s4666_s28] sm:$0xf] %v734_v52  ;;  %775 = vmatmul.mubr.bf16.vlgmr.msra.gmra.mrb[20].mxu0 %v734_v52  ;;  %3496 = vmatmul.mubr.bf16.vlgmr.msra.gmra.mrb[12].mxu1 %v734_v52 }
 0x1b4   : > { %855 = vmatpush1.bf16.msra.mxu0 %v4434_v2  ;;  %3500 = vmatpush3.bf16.msra.mxu1 %v4443_v61 }
 0x1b5   : > { %856 = vmatprep.subr.bf16.mxu0 %v4439_v55  ;;  %3501 = vmatprep.subr.bf16.mxu1 %v5904_v10 }
 0x1b6   : > { %886 = vmatprep.mubr.bf16.mxu0 %v5899_v62  ;;  %3515 = vmatprep.mubr.msk.bf16.mxu1 %vm4128_vm0, %v5904_v10 }
 0x1b8   : > { %857 = vmatpush1.bf16.msra.mxu0 %v4448_v1  ;;  %3502 = vmatpush3.bf16.msra.mxu1 %v4462_v5 }
 0x1b9   : > { %858 = vmatprep.subr.bf16.mxu0 %v4455_v4  ;;  %3503 = vmatprep.subr.bf16.mxu1 %v5904_v10 }
 0x1bc   : > { %859 = vmatpush1.bf16.msra.mxu0 %v4467_v6  ;;  %3504 = vmatpush3.bf16.msra.mxu1 %v4478_v8 }
 0x1bd   : > { %860 = vmatprep.subr.bf16.mxu0 %v4473_v7  ;;  %3505 = vmatprep.subr.bf16.mxu1 %v5904_v10 }
 0x1c0   : > { %861 = vmatpush1.bf16.msra.mxu0 %v4483_v9  ;;  %3506 = vmatpush3.bf16.msra.mxu1 %v4496_v11 }
 0x1c1   : > { %862 = vmatprep.subr.bf16.mxu0 %v4490_v59  ;;  %3507 = vmatprep.subr.bf16.mxu1 %v5904_v10 }
 0x1c4   : > { %863 = vmatpush1.bf16.msra.mxu0 %v4503_v12  ;;  %3508 = vmatpush3.bf16.msra.mxu1 %v4514_v14 }
 0x1c5   : > { %864 = vmatprep.subr.bf16.mxu0 %v4509_v13  ;;  %3509 = vmatprep.subr.bf16.mxu1 %v5904_v10 }
 0x1c8   : > { %865 = vmatpush1.bf16.msra.mxu0 %v4519_v15  ;;  %3510 = vmatpush3.bf16.msra.mxu1 %v4531_v17 }
 0x1c9   : > { %866 = vmatprep.subr.bf16.mxu0 %v4525_v16  ;;  %3511 = vmatprep.subr.bf16.mxu1 %v5904_v10 }
 0x1cc   : > { %867 = vmatpush1.bf16.msra.mxu0 %v4536_v18  ;;  %3512 = vmatpush3.bf16.msra.mxu1 %v4547_v23 }
 0x1cd   : > { %868 = vmatprep.subr.bf16.mxu0 %v4542_v21  ;;  %3513 = vmatprep.subr.bf16.mxu1 %v5904_v10 }
 0x1d0   : > { %869 = vmatpush1.bf16.msra.mxu0 %v4552_v24  ;;  %3514 = vmatpush3.bf16.msra.mxu1 %v4564_v26 }
 0x1d1   : > { %966 = vmatprep.subr.bf16.mxu0 %v4430_v3  ;;  %3519 = vmatprep.subr.bf16.mxu1 %v5904_v10 }
 0x286   : > { %v776_v25 = vpop.f32.mrb[20].mxu0  ;;  %v817_v40 = vpop.f32.mrb[12].mxu1 }
 0x287   : > { %v823_v53 = vadd.f32 %v776_v25, %v4609_v36  ;;  %v778_v60 = vpop.f32.mrb[21].mxu0  ;;  %v3497_v22 = vpop.f32.mrb[13].mxu1  ;;  %v837_v46 = vadd.f32 %v5922_v54, %v817_v40 }
 0x288   : > { %v780_v28 = vpop.f32.mrb[22].mxu0  ;;  %v820_v30 = vpop.f32.mrb[14].mxu1  ;;  %v824_v48 = vadd.f32 %v778_v60, %v4611_v39 }
 0x289   : > { %v3148_v29 = vmul.f32 -1.442695, %v823_v53  ;;  %v781_v35 = vpop.f32.mrb[23].mxu0  ;;  %v3498_v32 = vpop.f32.mrb[15].mxu1 }
 0x28a   : > { %v3149_v34 = vmul.f32 -1.442695, %v824_v48 }
 0x28b   : > { %3848 = vpow2.f32 %v3148_v29 }
 0x28c   : > { %3850 = vpow2.f32 %v3149_v34 }
 0x295   : > { %v3849_v57 = vpop.eup %3848 }
 0x296   : > { %v831_v58 = vadd.f32 1.0, %v3849_v57  ;;  %v3851_v38 = vpop.eup %3850 }
 0x297   : > { %v832_v36 = vadd.f32 1.0, %v3851_v38 }
 0x298   : > { %3852 = vrcp.f32 %v831_v58 }
 0x299   : > { %3854 = vrcp.f32 %v832_v36 }
 0x2a2   : > { %v3853_v56 = vpop.eup %3852 }
 0x2a3   : > { %v838_v50 = vmul.f32 %v3853_v56, %v837_v46  ;;  %v3855_v25 = vpop.eup %3854 }
 0x2a4   : > { %v841_v22 = vsub.f32 1.0, %v3855_v25 }
 0x2a5   : > { %v839_v52 = vadd.f32 %v838_v50, %v4619_v20 }
 0x2a7   : > { %3856 = vtanh.f32 %v839_v52 }
 0x2b1   : > { %v3857_v53 = vpop.eup %3856 }
 0x2b2   : > { %v842_v39 = vsub.f32 %v3857_v53, %v4660_v51 }
 0x2b4   : > { %v843_v60 = vmul.f32 %v842_v39, %v841_v22 }
 0x2b6   : > { %v4710_v28 = vadd.f32 %v843_v60, %v4660_v51 }
 0x2b8   : > { %v845_v30 = vpack.c.bf16 %v4710_v28, %v4710_v28 }
 0x2ba   : > { %3152 = vst [vmem:[%s4666_s28 + $0x4] sm:$0xf] %v845_v30  ;;  %887 = vmatmul.mubr.bf16.vlgmr.msra.gmra.mrb[24].mxu0 %v845_v30  ;;  %3516 = vmatmul.mubr.bf16.vlgmr.msra.gmra.mrb[16].mxu1 %v845_v30 }
 0x2bb   : > { %967 = vmatpush1.bf16.msra.mxu0 %v4434_v2  ;;  %3520 = vmatpush3.bf16.msra.mxu1 %v4443_v61 }
 0x2bc   : > { %968 = vmatprep.subr.bf16.mxu0 %v4439_v55  ;;  %3521 = vmatprep.subr.bf16.mxu1 %v5904_v10 }
 0x2bd   : > { %998 = vmatprep.mubr.bf16.mxu0 %v5899_v62  ;;  %3535 = vmatprep.mubr.msk.bf16.mxu1 %vm4128_vm0, %v5904_v10 }
 0x2bf   : > { %969 = vmatpush1.bf16.msra.mxu0 %v4448_v1  ;;  %3522 = vmatpush3.bf16.msra.mxu1 %v4462_v5 }
 0x2c0   : > { %970 = vmatprep.subr.bf16.mxu0 %v4455_v4  ;;  %3523 = vmatprep.subr.bf16.mxu1 %v5904_v10 }
 0x2c3   : > { %971 = vmatpush1.bf16.msra.mxu0 %v4467_v6  ;;  %3524 = vmatpush3.bf16.msra.mxu1 %v4478_v8 }
 0x2c4   : > { %972 = vmatprep.subr.bf16.mxu0 %v4473_v7  ;;  %3525 = vmatprep.subr.bf16.mxu1 %v5904_v10 }
 0x2c7   : > { %973 = vmatpush1.bf16.msra.mxu0 %v4483_v9  ;;  %3526 = vmatpush3.bf16.msra.mxu1 %v4496_v11 }
 0x2c8   : > { %974 = vmatprep.subr.bf16.mxu0 %v4490_v59  ;;  %3527 = vmatprep.subr.bf16.mxu1 %v5904_v10 }
 0x2cb   : > { %975 = vmatpush1.bf16.msra.mxu0 %v4503_v12  ;;  %3528 = vmatpush3.bf16.msra.mxu1 %v4514_v14 }
 0x2cc   : > { %976 = vmatprep.subr.bf16.mxu0 %v4509_v13  ;;  %3529 = vmatprep.subr.bf16.mxu1 %v5904_v10 }
 0x2cf   : > { %977 = vmatpush1.bf16.msra.mxu0 %v4519_v15  ;;  %3530 = vmatpush3.bf16.msra.mxu1 %v4531_v17 }
 0x2d0   : > { %978 = vmatprep.subr.bf16.mxu0 %v4525_v16  ;;  %3531 = vmatprep.subr.bf16.mxu1 %v5904_v10 }
 0x2d3   : > { %979 = vmatpush1.bf16.msra.mxu0 %v4536_v18  ;;  %3532 = vmatpush3.bf16.msra.mxu1 %v4547_v23 }
 0x2d4   : > { %980 = vmatprep.subr.bf16.mxu0 %v4542_v21  ;;  %3533 = vmatprep.subr.bf16.mxu1 %v5904_v10 }
 0x2d7   : > { %981 = vmatpush1.bf16.msra.mxu0 %v4552_v24  ;;  %3534 = vmatpush3.bf16.msra.mxu1 %v4564_v26 }
 0x2d8   : > { %1078 = vmatprep.subr.bf16.mxu0 %v4430_v3  ;;  %3539 = vmatprep.subr.bf16.mxu1 %v5904_v10 }
 0x38d   : > { %v888_v20 = vpop.f32.mrb[24].mxu0  ;;  %v929_v51 = vpop.f32.mrb[16].mxu1 }
 0x38e   : > { %v935_v40 = vadd.f32 %v888_v20, %v4621_v33  ;;  %v890_v29 = vpop.f32.mrb[25].mxu0  ;;  %v3517_v35 = vpop.f32.mrb[17].mxu1  ;;  %v949_v52 = vadd.f32 %v5922_v54, %v929_v51 }
 0x38f   : > { %v892_v32 = vpop.f32.mrb[26].mxu0  ;;  %v932_v48 = vpop.f32.mrb[18].mxu1  ;;  %v936_v38 = vadd.f32 %v890_v29, %v4623_v27 }
 0x390   : > { %v3153_v34 = vmul.f32 -1.442695, %v935_v40  ;;  %v893_v57 = vpop.f32.mrb[27].mxu0  ;;  %v3518_v58 = vpop.f32.mrb[19].mxu1 }
 0x391   : > { %v3154_v46 = vmul.f32 -1.442695, %v936_v38 }
 0x392   : > { %3858 = vpow2.f32 %v3153_v34 }
 0x393   : > { %3860 = vpow2.f32 %v3154_v46 }
 0x39c   : > { %v3859_v36 = vpop.eup %3858 }
 0x39d   : > { %v943_v56 = vadd.f32 1.0, %v3859_v36  ;;  %v3861_v50 = vpop.eup %3860 }
 0x39e   : > { %v944_v33 = vadd.f32 1.0, %v3861_v50 }
 0x39f   : > { %3862 = vrcp.f32 %v943_v56 }
 0x3a0   : > { %3864 = vrcp.f32 %v944_v33 }
 0x3a9   : > { %v3863_v25 = vpop.eup %3862 }
 0x3aa   : > { %v950_v53 = vmul.f32 %v3863_v25, %v949_v52  ;;  %v3865_v39 = vpop.eup %3864 }
 0x3ab   : > { %v953_v30 = vsub.f32 1.0, %v3865_v39 }
 0x3ac   : > { %v951_v22 = vadd.f32 %v950_v53, %v4613_v0 }
 0x3ae   : > { %3866 = vtanh.f32 %v951_v22 }
 0x3b8   : > { %v3867_v60 = vpop.eup %3866 }
 0x3b9   : > { %v954_v27 = vsub.f32 %v3867_v60, %v4710_v28 }
 0x3bb   : > { %v955_v20 = vmul.f32 %v954_v27, %v953_v30 }
 0x3bd   : > { %v4756_v40 = vadd.f32 %v955_v20, %v4710_v28 }
 0x3bf   : > { %v957_v29 = vpack.c.bf16 %v4756_v40, %v4756_v40 }
 0x3c1   : > { %3157 = vst [vmem:[%s4666_s28 + $0x8] sm:$0xf] %v957_v29  ;;  %999 = vmatmul.mubr.bf16.vlgmr.msra.gmra.mrb[28].mxu0 %v957_v29  ;;  %3536 = vmatmul.mubr.bf16.vlgmr.msra.gmra.mrb[20].mxu1 %v957_v29 }
 0x3c2   : > { %1079 = vmatpush1.bf16.msra.mxu0 %v4434_v2  ;;  %3540 = vmatpush3.bf16.msra.mxu1 %v4443_v61 }
 0x3c3   : > { %1080 = vmatprep.subr.bf16.mxu0 %v4439_v55  ;;  %3541 = vmatprep.subr.bf16.mxu1 %v5904_v10 }
 0x3c4   : > { %1110 = vmatprep.mubr.bf16.mxu0 %v5899_v62  ;;  %3555 = vmatprep.mubr.msk.bf16.mxu1 %vm4128_vm0, %v5904_v10 }
 0x3c6   : > { %1081 = vmatpush1.bf16.msra.mxu0 %v4448_v1  ;;  %3542 = vmatpush3.bf16.msra.mxu1 %v4462_v5 }
 0x3c7   : > { %1082 = vmatprep.subr.bf16.mxu0 %v4455_v4  ;;  %3543 = vmatprep.subr.bf16.mxu1 %v5904_v10 }
 0x3ca   : > { %1083 = vmatpush1.bf16.msra.mxu0 %v4467_v6  ;;  %3544 = vmatpush3.bf16.msra.mxu1 %v4478_v8 }
 0x3cb   : > { %1084 = vmatprep.subr.bf16.mxu0 %v4473_v7  ;;  %3545 = vmatprep.subr.bf16.mxu1 %v5904_v10 }
 0x3ce   : > { %1085 = vmatpush1.bf16.msra.mxu0 %v4483_v9  ;;  %3546 = vmatpush3.bf16.msra.mxu1 %v4496_v11 }
 0x3cf   : > { %1086 = vmatprep.subr.bf16.mxu0 %v4490_v59  ;;  %3547 = vmatprep.subr.bf16.mxu1 %v5904_v10 }
 0x3d2   : > { %1087 = vmatpush1.bf16.msra.mxu0 %v4503_v12  ;;  %3548 = vmatpush3.bf16.msra.mxu1 %v4514_v14 }
 0x3d3   : > { %1088 = vmatprep.subr.bf16.mxu0 %v4509_v13  ;;  %3549 = vmatprep.subr.bf16.mxu1 %v5904_v10 }
 0x3d6   : > { %1089 = vmatpush1.bf16.msra.mxu0 %v4519_v15  ;;  %3550 = vmatpush3.bf16.msra.mxu1 %v4531_v17 }
 0x3d7   : > { %1090 = vmatprep.subr.bf16.mxu0 %v4525_v16  ;;  %3551 = vmatprep.subr.bf16.mxu1 %v5904_v10 }
 0x3da   : > { %1091 = vmatpush1.bf16.msra.mxu0 %v4536_v18  ;;  %3552 = vmatpush3.bf16.msra.mxu1 %v4547_v23 }
 0x3db   : > { %1092 = vmatprep.subr.bf16.mxu0 %v4542_v21  ;;  %3553 = vmatprep.subr.bf16.mxu1 %v5904_v10 }
 0x3de   : > { %1093 = vmatpush1.bf16.msra.mxu0 %v4552_v24  ;;  %3554 = vmatpush3.bf16.msra.mxu1 %v4564_v26 }
 0x3df   : > { %1190 = vmatprep.subr.bf16.mxu0 %v4430_v3  ;;  %3559 = vmatprep.subr.bf16.mxu1 %v5904_v10 }
 0x494   : > { %v1000_v0 = vpop.f32.mrb[28].mxu0  ;;  %v1041_v28 = vpop.f32.mrb[20].mxu1 }
 0x495   : > { %v1047_v51 = vadd.f32 %v1000_v0, %v4625_v37  ;;  %v1002_v35 = vpop.f32.mrb[29].mxu0  ;;  %v3537_v32 = vpop.f32.mrb[21].mxu1  ;;  %v1061_v33 = vadd.f32 %v5922_v54, %v1041_v28 }
 0x496   : > { %v1004_v48 = vpop.f32.mrb[30].mxu0  ;;  %v1044_v34 = vpop.f32.mrb[22].mxu1  ;;  %v1048_v46 = vadd.f32 %v1002_v35, %v4627_v44 }
 0x497   : > { %v3158_v57 = vmul.f32 -1.442695, %v1047_v51  ;;  %v1005_v58 = vpop.f32.mrb[31].mxu0  ;;  %v3538_v38 = vpop.f32.mrb[23].mxu1 }
 0x498   : > { %v3159_v36 = vmul.f32 -1.442695, %v1048_v46 }
 0x499   : > { %3868 = vpow2.f32 %v3158_v57 }
 0x49a   : > { %3870 = vpow2.f32 %v3159_v36 }
 0x4a3   : > { %v3869_v56 = vpop.eup %3868 }
 0x4a4   : > { %v1055_v50 = vadd.f32 1.0, %v3869_v56  ;;  %v3871_v52 = vpop.eup %3870 }
 0x4a5   : > { %v1056_v37 = vadd.f32 1.0, %v3871_v52 }
 0x4a6   : > { %3872 = vrcp.f32 %v1055_v50 }
 0x4a7   : > { %3874 = vrcp.f32 %v1056_v37 }
 0x4b0   : > { %v3873_v25 = vpop.eup %3872 }
 0x4b1   : > { %v1062_v53 = vmul.f32 %v3873_v25, %v1061_v33  ;;  %v3875_v39 = vpop.eup %3874 }
 0x4b2   : > { %v1065_v30 = vsub.f32 1.0, %v3875_v39 }
 0x4b3   : > { %v1063_v22 = vadd.f32 %v1062_v53, %v4617_v19 }
 0x4b5   : > { %3876 = vtanh.f32 %v1063_v22 }
 0x4bf   : > { %v3877_v60 = vpop.eup %3876 }
 0x4c0   : > { %v1066_v44 = vsub.f32 %v3877_v60, %v4756_v40 }
 0x4c2   : > { %v1067_v27 = vmul.f32 %v1066_v44, %v1065_v30 }
 0x4c4   : > { %v4802_v20 = vadd.f32 %v1067_v27, %v4756_v40 }
 0x4c6   : > { %v1069_v29 = vpack.c.bf16 %v4802_v20, %v4802_v20 }
 0x4c8   : > { %3162 = vst [vmem:[%s4666_s28 + $0xc] sm:$0xf] %v1069_v29  ;;  %1111 = vmatmul.mubr.bf16.vlgmr.msra.gmra.mrb[32].mxu0 %v1069_v29  ;;  %3556 = vmatmul.mubr.bf16.vlgmr.msra.gmra.mrb[24].mxu1 %v1069_v29 }
 0x4c9   : > { %1191 = vmatpush1.bf16.msra.mxu0 %v4434_v2  ;;  %3560 = vmatpush3.bf16.msra.mxu1 %v4443_v61 }
 0x4ca   : > { %1192 = vmatprep.subr.bf16.mxu0 %v4439_v55  ;;  %3561 = vmatprep.subr.bf16.mxu1 %v5904_v10 }
 0x4cb   : > { %1222 = vmatprep.mubr.bf16.mxu0 %v5899_v62  ;;  %3575 = vmatprep.mubr.msk.bf16.mxu1 %vm4128_vm0, %v5904_v10 }
 0x4cd   : > { %1193 = vmatpush1.bf16.msra.mxu0 %v4448_v1  ;;  %3562 = vmatpush3.bf16.msra.mxu1 %v4462_v5 }
 0x4ce   : > { %1194 = vmatprep.subr.bf16.mxu0 %v4455_v4  ;;  %3563 = vmatprep.subr.bf16.mxu1 %v5904_v10 }
 0x4d1   : > { %1195 = vmatpush1.bf16.msra.mxu0 %v4467_v6  ;;  %3564 = vmatpush3.bf16.msra.mxu1 %v4478_v8 }
 0x4d2   : > { %1196 = vmatprep.subr.bf16.mxu0 %v4473_v7  ;;  %3565 = vmatprep.subr.bf16.mxu1 %v5904_v10 }
 0x4d5   : > { %1197 = vmatpush1.bf16.msra.mxu0 %v4483_v9  ;;  %3566 = vmatpush3.bf16.msra.mxu1 %v4496_v11 }
 0x4d6   : > { %1198 = vmatprep.subr.bf16.mxu0 %v4490_v59  ;;  %3567 = vmatprep.subr.bf16.mxu1 %v5904_v10 }
 0x4d9   : > { %1199 = vmatpush1.bf16.msra.mxu0 %v4503_v12  ;;  %3568 = vmatpush3.bf16.msra.mxu1 %v4514_v14 }
 0x4da   : > { %1200 = vmatprep.subr.bf16.mxu0 %v4509_v13  ;;  %3569 = vmatprep.subr.bf16.mxu1 %v5904_v10 }
 0x4dd   : > { %1201 = vmatpush1.bf16.msra.mxu0 %v4519_v15  ;;  %3570 = vmatpush3.bf16.msra.mxu1 %v4531_v17 }
 0x4de   : > { %1202 = vmatprep.subr.bf16.mxu0 %v4525_v16  ;;  %3571 = vmatprep.subr.bf16.mxu1 %v5904_v10 }
 0x4e1   : > { %1203 = vmatpush1.bf16.msra.mxu0 %v4536_v18  ;;  %3572 = vmatpush3.bf16.msra.mxu1 %v4547_v23 }
 0x4e2   : > { %1204 = vmatprep.subr.bf16.mxu0 %v4542_v21  ;;  %3573 = vmatprep.subr.bf16.mxu1 %v5904_v10 }
 0x4e5   : > { %1205 = vmatpush1.bf16.msra.mxu0 %v4552_v24  ;;  %3574 = vmatpush3.bf16.msra.mxu1 %v4564_v26 }
 0x4e6   : > { %1302 = vmatprep.subr.bf16.mxu0 %v4430_v3  ;;  %3579 = vmatprep.subr.bf16.mxu1 %v5904_v10 }
 0x59b   : > { %v1112_v19 = vpop.f32.mrb[32].mxu0  ;;  %v1153_v40 = vpop.f32.mrb[24].mxu1 }
 0x59c   : > { %v1159_v0 = vadd.f32 %v1112_v19, %v4638_v42  ;;  %v1114_v28 = vpop.f32.mrb[33].mxu0  ;;  %v3557_v51 = vpop.f32.mrb[25].mxu1  ;;  %v1173_v50 = vadd.f32 %v5922_v54, %v1153_v40 }
 0x59d   : > { %v1116_v35 = vpop.f32.mrb[34].mxu0  ;;  %v1156_v32 = vpop.f32.mrb[26].mxu1  ;;  %v1160_v58 = vadd.f32 %v1114_v28, %v4640_v49 }
 0x59e   : > { %v3163_v48 = vmul.f32 -1.442695, %v1159_v0  ;;  %v1117_v34 = vpop.f32.mrb[35].mxu0  ;;  %v3558_v57 = vpop.f32.mrb[27].mxu1 }
 0x59f   : > { %v3164_v38 = vmul.f32 -1.442695, %v1160_v58 }
 0x5a0   : > { %3878 = vpow2.f32 %v3163_v48 }
 0x5a1   : > { %3880 = vpow2.f32 %v3164_v38 }
 0x5aa   : > { %v3879_v46 = vpop.eup %3878 }
 0x5ab   : > { %v1167_v36 = vadd.f32 1.0, %v3879_v46  ;;  %v3881_v56 = vpop.eup %3880 }
 0x5ac   : > { %v1168_v42 = vadd.f32 1.0, %v3881_v56 }
 0x5ad   : > { %3882 = vrcp.f32 %v1167_v36 }
 0x5ae   : > { %3884 = vrcp.f32 %v1168_v42 }
 0x5b7   : > { %v3883_v52 = vpop.eup %3882 }
 0x5b8   : > { %v1174_v33 = vmul.f32 %v3883_v52, %v1173_v50  ;;  %v3885_v25 = vpop.eup %3884 }
 0x5b9   : > { %v1177_v22 = vsub.f32 1.0, %v3885_v25 }
 0x5ba   : > { %v1175_v37 = vadd.f32 %v1174_v33, %v4631_v45 }
 0x5bc   : > { %3886 = vtanh.f32 %v1175_v37 }
 0x5c6   : > { %v3887_v53 = vpop.eup %3886 }
 0x5c7   : > { %v1178_v49 = vsub.f32 %v3887_v53, %v4802_v20  ;;  %v5924_v53 = vld [vmem:[#allocation87_spill] sm:$0xff] }
 0x5c9   : > { %v1179_v39 = vmul.f32 %v1178_v49, %v1177_v22 }
 0x5cb   : > { %v4848_v60 = vadd.f32 %v1179_v39, %v4802_v20 }
 0x5cd   : > { %v1181_v30 = vpack.c.bf16 %v4848_v60, %v4848_v60 }
 0x5cf   : > { %3167 = vst [vmem:[%s4666_s28 + $0x10] sm:$0xf] %v1181_v30  ;;  %1223 = vmatmul.mubr.bf16.vlgmr.msra.gmra.mrb[36].mxu0 %v1181_v30  ;;  %3576 = vmatmul.mubr.bf16.vlgmr.msra.gmra.mrb[28].mxu1 %v1181_v30 }
 0x5d0   : > { %1303 = vmatpush1.bf16.msra.mxu0 %v4434_v2  ;;  %3580 = vmatpush3.bf16.msra.mxu1 %v4443_v61 }
 0x5d1   : > { %1304 = vmatprep.subr.bf16.mxu0 %v4439_v55  ;;  %3581 = vmatprep.subr.bf16.mxu1 %v5904_v10 }
 0x5d2   : > { %1334 = vmatprep.mubr.bf16.mxu0 %v5899_v62  ;;  %3595 = vmatprep.mubr.msk.bf16.mxu1 %vm4128_vm0, %v5904_v10 }
 0x5d4   : > { %1305 = vmatpush1.bf16.msra.mxu0 %v4448_v1  ;;  %3582 = vmatpush3.bf16.msra.mxu1 %v4462_v5 }
 0x5d5   : > { %1306 = vmatprep.subr.bf16.mxu0 %v4455_v4  ;;  %3583 = vmatprep.subr.bf16.mxu1 %v5904_v10 }
 0x5d8   : > { %1307 = vmatpush1.bf16.msra.mxu0 %v4467_v6  ;;  %3584 = vmatpush3.bf16.msra.mxu1 %v4478_v8 }
 0x5d9   : > { %1308 = vmatprep.subr.bf16.mxu0 %v4473_v7  ;;  %3585 = vmatprep.subr.bf16.mxu1 %v5904_v10 }
 0x5dc   : > { %1309 = vmatpush1.bf16.msra.mxu0 %v4483_v9  ;;  %3586 = vmatpush3.bf16.msra.mxu1 %v4496_v11 }
 0x5dd   : > { %1310 = vmatprep.subr.bf16.mxu0 %v4490_v59  ;;  %3587 = vmatprep.subr.bf16.mxu1 %v5904_v10 }
 0x5e0   : > { %1311 = vmatpush1.bf16.msra.mxu0 %v4503_v12  ;;  %3588 = vmatpush3.bf16.msra.mxu1 %v4514_v14 }
 0x5e1   : > { %1312 = vmatprep.subr.bf16.mxu0 %v4509_v13  ;;  %3589 = vmatprep.subr.bf16.mxu1 %v5904_v10 }
 0x5e4   : > { %1313 = vmatpush1.bf16.msra.mxu0 %v4519_v15  ;;  %3590 = vmatpush3.bf16.msra.mxu1 %v4531_v17 }
 0x5e5   : > { %1314 = vmatprep.subr.bf16.mxu0 %v4525_v16  ;;  %3591 = vmatprep.subr.bf16.mxu1 %v5904_v10 }
 0x5e8   : > { %1315 = vmatpush1.bf16.msra.mxu0 %v4536_v18  ;;  %3592 = vmatpush3.bf16.msra.mxu1 %v4547_v23 }
 0x5e9   : > { %1316 = vmatprep.subr.bf16.mxu0 %v4542_v21  ;;  %3593 = vmatprep.subr.bf16.mxu1 %v5904_v10 }
 0x5ec   : > { %1317 = vmatpush1.bf16.msra.mxu0 %v4552_v24  ;;  %3594 = vmatpush3.bf16.msra.mxu1 %v4564_v26 }
 0x5ed   : > { %1414 = vmatprep.subr.bf16.mxu0 %v4430_v3  ;;  %3599 = vmatprep.subr.bf16.mxu1 %v5904_v10 }
 0x6a2   : > { %v1224_v45 = vpop.f32.mrb[36].mxu0  ;;  %v1265_v44 = vpop.f32.mrb[28].mxu1 }
 0x6a3   : > { %v1271_v27 = vadd.f32 %v1224_v45, %v4642_v43  ;;  %v1226_v20 = vpop.f32.mrb[37].mxu0  ;;  %v3577_v29 = vpop.f32.mrb[29].mxu1  ;;  %v1285_v57 = vadd.f32 %v5922_v54, %v1265_v44 }
 0x6a4   : > { %v1228_v19 = vpop.f32.mrb[38].mxu0  ;;  %v1268_v40 = vpop.f32.mrb[30].mxu1  ;;  %v1272_v35 = vadd.f32 %v1226_v20, %v4644_v63  ;;  %v5925_v20 = vld [vmem:[#allocation88_spill] sm:$0xff] }
 0x6a5   : > { %v3168_v0 = vmul.f32 -1.442695, %v1271_v27  ;;  %v1229_v28 = vpop.f32.mrb[39].mxu0  ;;  %v3578_v51 = vpop.f32.mrb[31].mxu1 }
 0x6a6   : > { %v3169_v32 = vmul.f32 -1.442695, %v1272_v35 }
 0x6a7   : > { %3888 = vpow2.f32 %v3168_v0 }
 0x6a8   : > { %3890 = vpow2.f32 %v3169_v32 }
 0x6b1   : > { %v3889_v48 = vpop.eup %3888 }
 0x6b2   : > { %v1279_v3 = vadd.f32 1.0, %v3889_v48  ;;  %v3891_v34 = vpop.eup %3890 }
 0x6b3   : > { %v1280_v43 = vadd.f32 1.0, %v3891_v34 }
 0x6b4   : > { %3892 = vrcp.f32 %v1279_v3  ;;  %v5926_v3 = vld [vmem:[#allocation86_spill] sm:$0xff] }
 0x6b5   : > { %3894 = vrcp.f32 %v1280_v43 }
 0x6be   : > { %v3893_v58 = vpop.eup %3892 }
 0x6bf   : > { %v1286_v38 = vmul.f32 %v3893_v58, %v1285_v57  ;;  %v3895_v36 = vpop.eup %3894 }
 0x6c0   : > { %v1289_v50 = vsub.f32 1.0, %v3895_v36 }
 0x6c1   : > { %v1287_v46 = vadd.f32 %v1286_v38, %v4635_v47  ;;  %v5923_v47 = vld [vmem:[#allocation85_spill] sm:$0xff] }
 0x6c3   : > { %3896 = vtanh.f32 %v1287_v46 }
 0x6cd   : > { %v3897_v56 = vpop.eup %3896 }
 0x6ce   : > { %v1290_v63 = vsub.f32 %v3897_v56, %v4848_v60 }
 0x6d0   : > { %v1291_v42 = vmul.f32 %v1290_v63, %v1289_v50 }
 0x6d2   : > { %v4894_v52 = vadd.f32 %v1291_v42, %v4848_v60 }
 0x6d4   : > { %v1293_v33 = vpack.c.bf16 %v4894_v52, %v4894_v52 }
 0x6d6   : > { %3172 = vst [vmem:[%s4666_s28 + $0x14] sm:$0xf] %v1293_v33  ;;  %1335 = vmatmul.mubr.bf16.vlgmr.msra.gmra.mrb[40].mxu0 %v1293_v33  ;;  %3596 = vmatmul.mubr.bf16.vlgmr.msra.gmra.mrb[32].mxu1 %v1293_v33 }
 0x6d7   : > { %1415 = vmatpush1.bf16.msra.mxu0 %v4434_v2  ;;  %3600 = vmatpush3.bf16.msra.mxu1 %v4443_v61 }
 0x6d8   : > { %1416 = vmatprep.subr.bf16.mxu0 %v4439_v55  ;;  %3601 = vmatprep.subr.bf16.mxu1 %v5904_v10 }
 0x6d9   : > { %1446 = vmatprep.mubr.bf16.mxu0 %v5899_v62  ;;  %3615 = vmatprep.mubr.msk.bf16.mxu1 %vm4128_vm0, %v5904_v10 }
 0x6db   : > { %1417 = vmatpush1.bf16.msra.mxu0 %v4448_v1  ;;  %3602 = vmatpush3.bf16.msra.mxu1 %v4462_v5 }
 0x6dc   : > { %1418 = vmatprep.subr.bf16.mxu0 %v4455_v4  ;;  %3603 = vmatprep.subr.bf16.mxu1 %v5904_v10 }
 0x6df   : > { %1419 = vmatpush1.bf16.msra.mxu0 %v4467_v6  ;;  %3604 = vmatpush3.bf16.msra.mxu1 %v4478_v8 }
 0x6e0   : > { %1420 = vmatprep.subr.bf16.mxu0 %v4473_v7  ;;  %3605 = vmatprep.subr.bf16.mxu1 %v5904_v10 }
 0x6e3   : > { %1421 = vmatpush1.bf16.msra.mxu0 %v4483_v9  ;;  %3606 = vmatpush3.bf16.msra.mxu1 %v4496_v11 }
 0x6e4   : > { %1422 = vmatprep.subr.bf16.mxu0 %v4490_v59  ;;  %3607 = vmatprep.subr.bf16.mxu1 %v5904_v10 }
 0x6e7   : > { %1423 = vmatpush1.bf16.msra.mxu0 %v4503_v12  ;;  %3608 = vmatpush3.bf16.msra.mxu1 %v4514_v14 }
 0x6e8   : > { %1424 = vmatprep.subr.bf16.mxu0 %v4509_v13  ;;  %3609 = vmatprep.subr.bf16.mxu1 %v5904_v10 }
 0x6eb   : > { %1425 = vmatpush1.bf16.msra.mxu0 %v4519_v15  ;;  %3610 = vmatpush3.bf16.msra.mxu1 %v4531_v17 }
 0x6ec   : > { %1426 = vmatprep.subr.bf16.mxu0 %v4525_v16  ;;  %3611 = vmatprep.subr.bf16.mxu1 %v5904_v10 }
 0x6ef   : > { %1427 = vmatpush1.bf16.msra.mxu0 %v4536_v18  ;;  %3612 = vmatpush3.bf16.msra.mxu1 %v4547_v23 }
 0x6f0   : > { %1428 = vmatprep.subr.bf16.mxu0 %v4542_v21  ;;  %3613 = vmatprep.subr.bf16.mxu1 %v5904_v10 }
 0x6f3   : > { %1429 = vmatpush1.bf16.msra.mxu0 %v4552_v24  ;;  %3614 = vmatpush3.bf16.msra.mxu1 %v4564_v26 }
 0x7a9   : > { %v1336_v4 = vpop.f32.mrb[40].mxu0  ;;  %v1377_v5 = vpop.f32.mrb[32].mxu1 }
 0x7aa   : > { %v1383_v6 = vadd.f32 %v1336_v4, %v4646_v41  ;;  %v1338_v7 = vpop.f32.mrb[41].mxu0  ;;  %v3597_v8 = vpop.f32.mrb[33].mxu1  ;;  %v1397_v21 = vadd.f32 %v5922_v54, %v1377_v5 }
 0x7ab   : > { %v1340_v9 = vpop.f32.mrb[42].mxu0  ;;  %v1380_v11 = vpop.f32.mrb[34].mxu1  ;;  %v1384_v15 = vadd.f32 %v1338_v7, %v4648_v31 }
 0x7ac   : > { %v3173_v12 = vmul.f32 -1.442695, %v1383_v6  ;;  %v1341_v13 = vpop.f32.mrb[43].mxu0  ;;  %v3598_v14 = vpop.f32.mrb[35].mxu1 }
 0x7ad   : > { %v3174_v16 = vmul.f32 -1.442695, %v1384_v15 }
 0x7ae   : > { %3898 = vpow2.f32 %v3173_v12 }
 0x7af   : > { %3900 = vpow2.f32 %v3174_v16 }
 0x7b8   : > { %v3899_v10 = vpop.eup %3898 }
 0x7b9   : > { %v1391_v17 = vadd.f32 1.0, %v3899_v10  ;;  %v3901_v18 = vpop.eup %3900 }
 0x7ba   : > { %v1392_v23 = vadd.f32 1.0, %v3901_v18 }
 0x7bb   : > { %3902 = vrcp.f32 %v1391_v17 }
 0x7bc   : > { %3904 = vrcp.f32 %v1392_v23 }
 0x7c5   : > { %v3903_v24 = vpop.eup %3902 }
 0x7c6   : > { %v1398_v26 = vmul.f32 %v3903_v24, %v1397_v21  ;;  %v3905_v55 = vpop.eup %3904 }
 0x7c7   : > { %v1401_v1 = vsub.f32 1.0, %v3905_v55 }
 0x7c8   : > { %v1399_v2 = vadd.f32 %v1398_v26, %v5923_v47 }
 0x7ca   : > { %3906 = vtanh.f32 %v1399_v2 }
 0x7d4   : > { %v3907_v61 = vpop.eup %3906 }
 0x7d5   : > { %v1402_v62 = vsub.f32 %v3907_v61, %v4894_v52 }
 0x7d7   : > { %v1403_v59 = vmul.f32 %v1402_v62, %v1401_v1 }
 0x7d9   : > { %v1404_v41 = vadd.f32 %v1403_v59, %v4894_v52 }
 0x7db   : > { %v1405_v31 = vpack.c.bf16 %v1404_v41, %v1404_v41 }
 0x7dd   : > { %3177 = vst [vmem:[%s4666_s28 + $0x18] sm:$0xf] %v1405_v31  ;;  %1447 = vmatmul.mubr.bf16.vlgmr.msra.gmra.mrb[44].mxu0 %v1405_v31  ;;  %3616 = vmatmul.mubr.bf16.vlgmr.msra.gmra.mrb[36].mxu1 %v1405_v31 }
 0x8b0   : > { %v1448_v37 = vpop.f32.mrb[44].mxu0  ;;  %v1489_v25 = vpop.f32.mrb[36].mxu1 }
 0x8b1   : > { %v1495_v22 = vadd.f32 %v1448_v37, %v5924_v53  ;;  %v1450_v49 = vpop.f32.mrb[45].mxu0  ;;  %v3617_v39 = vpop.f32.mrb[37].mxu1  ;;  %v1509_v51 = vadd.f32 %v5922_v54, %v1489_v25 }
 0x8b2   : > { %v1452_v60 = vpop.f32.mrb[46].mxu0  ;;  %v1492_v30 = vpop.f32.mrb[38].mxu1  ;;  %v1496_v29 = vadd.f32 %v1450_v49, %v5925_v20 }
 0x8b3   : > { %v3178_v45 = vmul.f32 -1.442695, %v1495_v22  ;;  %v1453_v44 = vpop.f32.mrb[47].mxu0  ;;  %v3618_v27 = vpop.f32.mrb[39].mxu1 }
 0x8b4   : > { %v3179_v19 = vmul.f32 -1.442695, %v1496_v29 }
 0x8b5   : > { %3908 = vpow2.f32 %v3178_v45 }
 0x8b6   : > { %3910 = vpow2.f32 %v3179_v19 }
 0x8bf   : > { %v3909_v40 = vpop.eup %3908 }
 0x8c0   : > { %v1503_v0 = vadd.f32 1.0, %v3909_v40  ;;  %v3911_v28 = vpop.eup %3910 }
 0x8c1   : > { %v1504_v35 = vadd.f32 1.0, %v3911_v28 }
 0x8c2   : > { %3912 = vrcp.f32 %v1503_v0 }
 0x8c3   : > { %3914 = vrcp.f32 %v1504_v35 }
 0x8cc   : > { %v3913_v32 = vpop.eup %3912 }
 0x8cd   : > { %v1510_v48 = vmul.f32 %v3913_v32, %v1509_v51  ;;  %v3915_v57 = vpop.eup %3914 }
 0x8ce   : > { %v1513_v58 = vsub.f32 1.0, %v3915_v57 }
 0x8cf   : > { %v1511_v34 = vadd.f32 %v1510_v48, %v5926_v3 }
 0x8d1   : > { %3916 = vtanh.f32 %v1511_v34 }
 0x8db   : > { %v3917_v43 = vpop.eup %3916 }
 0x8dc   : > { %v1514_v38 = vsub.f32 %v3917_v43, %v1404_v41 }
 0x8de   : > { %v1515_v46 = vmul.f32 %v1514_v38, %v1513_v58  ;;  %156 = sbr.rel (!%p153_p12) target bundleno = 91 (0x5b), region = 98 }
 0x8e0   : > { %v1516_v36 = vadd.f32 %v1515_v46, %v1404_v41 }
 0x8e2   : > { %v1517_v56 = vpack.c.bf16 %v1516_v36, %v1516_v36  ;;  %1522 = vst [vmem:[#allocation4] sm:$0xff] %v1516_v36 }
 0x8e4   : > { %3182 = vst [vmem:[%s4666_s28 + $0x1c] sm:$0xf] %v1517_v56 }
 0x8e5 PF:  { %v4948_v50 = vld [vmem:[#allocation11 + $0xc0] sm:$0xff]  ;;  %v4950_v63 = vld [vmem:[#allocation11 + $0xc8] sm:$0xf]  ;;  %v4952_v42 = vld [vmem:[#allocation11 + $0xcc] sm:$0xff]  ;;  %v5930_v52 = vmov 0.0   ;;  %s5089_s10 = smov (!%p3090_p11), 0  }
 0x8e6   :  { %5927 = vst [vmem:[#allocation19_spill] sm:$0xff] %v4948_v50  ;;  %5928 = vst [vmem:[#allocation20_spill] sm:$0xff] %v4950_v63  ;;  %v4955_v33 = vld [vmem:[#allocation11 + $0xd4] sm:$0xf]  ;;  %v4957_v4 = vld [vmem:[#allocation11 + $0xd8] sm:$0xff] }
 0x8e7   :  { %5929 = vst [vmem:[#allocation21_spill] sm:$0xff] %v4952_v42  ;;  %1599 = vst [vmem:[#allocation4] sm:$0xff] %v5930_v52  ;;  %v4959_v5 = vld [vmem:[#allocation11 + $0xe0] sm:$0xf]  ;;  %v4961_v6 = vld [vmem:[#allocation11 + $0xe4] sm:$0xff] }
 0x8e8   :  { %5931 = vst [vmem:[#allocation22_spill] sm:$0xff] %v4955_v33  ;;  %5932 = vst [vmem:[#allocation23_spill] sm:$0xff] %v4957_v4  ;;  %v4963_v7 = vld [vmem:[#allocation11 + $0xec] sm:$0xf]  ;;  %v4965_v8 = vld [vmem:[#allocation11 + $0xf0] sm:$0xff] }
 0x8e9   :  { %5933 = vst [vmem:[#allocation24_spill] sm:$0xff] %v4959_v5  ;;  %5934 = vst [vmem:[#allocation25_spill] sm:$0xff] %v4961_v6  ;;  %v4967_v54 = vld [vmem:[#allocation11 + $0xf8] sm:$0xf]  ;;  %v4969_v9 = vld [vmem:[#allocation11 + $0xfc] sm:$0xff] }
 0x8ea   :  { %5935 = vst [vmem:[#allocation26_spill] sm:$0xff] %v4963_v7  ;;  %5936 = vst [vmem:[#allocation27_spill] sm:$0xff] %v4965_v8  ;;  %v4971_v11 = vld [vmem:[#allocation11 + $0x104] sm:$0xf]  ;;  %v4973_v12 = vld [vmem:[#allocation11 + $0x108] sm:$0xff] }
 0x8eb   :  { %5937 = vst [vmem:[#allocation28_spill] sm:$0xff] %v4967_v54  ;;  %5938 = vst [vmem:[#allocation29_spill] sm:$0xff] %v4969_v9  ;;  %v4975_v13 = vld [vmem:[#allocation11 + $0x110] sm:$0xf]  ;;  %v4977_v14 = vld [vmem:[#allocation11 + $0x114] sm:$0xff] }
 0x8ec   :  { %5939 = vst [vmem:[#allocation30_spill] sm:$0xff] %v4971_v11  ;;  %5940 = vst [vmem:[#allocation31_spill] sm:$0xff] %v4973_v12  ;;  %v4979_v15 = vld [vmem:[#allocation11 + $0x11c] sm:$0xf]  ;;  %v4981_v16 = vld [vmem:[#allocation11 + $0x120] sm:$0xff] }
 0x8ed   :  { %5941 = vst [vmem:[#allocation32_spill] sm:$0xff] %v4975_v13  ;;  %5942 = vst [vmem:[#allocation33_spill] sm:$0xff] %v4977_v14  ;;  %v4983_v10 = vld [vmem:[#allocation11 + $0x128] sm:$0xf]  ;;  %v4985_v17 = vld [vmem:[#allocation11 + $0x12c] sm:$0xff] }
 0x8ee   :  { %5943 = vst [vmem:[#allocation34_spill] sm:$0xff] %v4979_v15  ;;  %5944 = vst [vmem:[#allocation35_spill] sm:$0xff] %v4981_v16  ;;  %v4987_v18 = vld [vmem:[#allocation11 + $0x134] sm:$0xf]  ;;  %v4989_v21 = vld [vmem:[#allocation11 + $0x138] sm:$0xff] }
 0x8ef   :  { %5945 = vst [vmem:[#allocation36_spill] sm:$0xff] %v4983_v10  ;;  %5946 = vst [vmem:[#allocation37_spill] sm:$0xff] %v4985_v17  ;;  %v4991_v23 = vld [vmem:[#allocation11 + $0x140] sm:$0xf]  ;;  %v4993_v24 = vld [vmem:[#allocation11 + $0x144] sm:$0xff] }
 0x8f0   :  { %5947 = vst [vmem:[#allocation38_spill] sm:$0xff] %v4987_v18  ;;  %5948 = vst [vmem:[#allocation39_spill] sm:$0xff] %v4989_v21  ;;  %v4995_v26 = vld [vmem:[#allocation11 + $0x14c] sm:$0xf]  ;;  %v4997_v47 = vld [vmem:[#allocation11 + $0x150] sm:$0xff] }
 0x8f1   :  { %5949 = vst [vmem:[#allocation40_spill] sm:$0xff] %v4991_v23  ;;  %5950 = vst [vmem:[#allocation41_spill] sm:$0xff] %v4993_v24  ;;  %v4999_v2 = vld [vmem:[#allocation11 + $0x158] sm:$0xf]  ;;  %v5001_v55 = vld [vmem:[#allocation11 + $0x15c] sm:$0xff] }
 0x8f2   :  { %5951 = vst [vmem:[#allocation42_spill] sm:$0xff] %v4995_v26  ;;  %5952 = vst [vmem:[#allocation43_spill] sm:$0xff] %v4997_v47  ;;  %v5003_v61 = vld [vmem:[#allocation11 + $0x164] sm:$0xf]  ;;  %v5005_v1 = vld [vmem:[#allocation11 + $0x168] sm:$0xff] }
 0x8f3   :  { %5953 = vst [vmem:[#allocation44_spill] sm:$0xff] %v4999_v2  ;;  %5954 = vst [vmem:[#allocation45_spill] sm:$0xff] %v5001_v55  ;;  %v5007_v62 = vld [vmem:[#allocation11 + $0x170] sm:$0xf]  ;;  %v5009_v59 = vld [vmem:[#allocation11 + $0x174] sm:$0xff] }
 0x8f4   :  { %5955 = vst [vmem:[#allocation46_spill] sm:$0xff] %v5003_v61  ;;  %5956 = vst [vmem:[#allocation47_spill] sm:$0xff] %v5005_v1  ;;  %v5011_v41 = vld [vmem:[#allocation11 + $0x17c] sm:$0xf]  ;;  %v5013_v31 = vld [vmem:[#allocation13 + $0xc0] sm:$0xff] }
 0x8f5   :  { %5957 = vst [vmem:[#allocation48_spill] sm:$0xff] %v5007_v62  ;;  %5958 = vst [vmem:[#allocation49_spill] sm:$0xff] %v5009_v59  ;;  %v5015_v37 = vld [vmem:[#allocation13 + $0xc8] sm:$0xf]  ;;  %v5017_v25 = vld [vmem:[#allocation13 + $0xcc] sm:$0xff] }
 0x8f6   :  { %5959 = vst [vmem:[#allocation50_spill] sm:$0xff] %v5011_v41  ;;  %5960 = vst [vmem:[#allocation51_spill] sm:$0xff] %v5013_v31  ;;  %v5019_v53 = vld [vmem:[#allocation13 + $0xd4] sm:$0xf]  ;;  %v5021_v22 = vld [vmem:[#allocation13 + $0xd8] sm:$0xff] }
 0x8f7   :  { %5961 = vst [vmem:[#allocation52_spill] sm:$0xff] %v5015_v37  ;;  %5962 = vst [vmem:[#allocation53_spill] sm:$0xff] %v5017_v25  ;;  %v5023_v49 = vld [vmem:[#allocation13 + $0xe0] sm:$0xf]  ;;  %v5025_v39 = vld [vmem:[#allocation13 + $0xe4] sm:$0xff] }
 0x8f8   :  { %5963 = vst [vmem:[#allocation54_spill] sm:$0xff] %v5019_v53  ;;  %5964 = vst [vmem:[#allocation55_spill] sm:$0xff] %v5021_v22  ;;  %v5027_v60 = vld [vmem:[#allocation13 + $0xec] sm:$0xf]  ;;  %v5029_v30 = vld [vmem:[#allocation13 + $0xf0] sm:$0xff] }
 0x8f9   :  { %5965 = vst [vmem:[#allocation56_spill] sm:$0xff] %v5023_v49  ;;  %5966 = vst [vmem:[#allocation57_spill] sm:$0xff] %v5025_v39  ;;  %v5031_v45 = vld [vmem:[#allocation13 + $0xf8] sm:$0xf]  ;;  %v5033_v44 = vld [vmem:[#allocation13 + $0xfc] sm:$0xff] }
 0x8fa   :  { %5967 = vst [vmem:[#allocation58_spill] sm:$0xff] %v5027_v60  ;;  %5968 = vst [vmem:[#allocation59_spill] sm:$0xff] %v5029_v30  ;;  %v5035_v27 = vld [vmem:[#allocation13 + $0x104] sm:$0xf]  ;;  %v5037_v20 = vld [vmem:[#allocation13 + $0x108] sm:$0xff] }
 0x8fb   :  { %5969 = vst [vmem:[#allocation60_spill] sm:$0xff] %v5031_v45  ;;  %5970 = vst [vmem:[#allocation61_spill] sm:$0xff] %v5033_v44  ;;  %v5039_v29 = vld [vmem:[#allocation13 + $0x110] sm:$0xf]  ;;  %v5041_v19 = vld [vmem:[#allocation13 + $0x114] sm:$0xff] }
 0x8fc   :  { %5971 = vst [vmem:[#allocation62_spill] sm:$0xff] %v5035_v27  ;;  %5972 = vst [vmem:[#allocation63_spill] sm:$0xff] %v5037_v20  ;;  %v5043_v40 = vld [vmem:[#allocation13 + $0x11c] sm:$0xf]  ;;  %v5045_v0 = vld [vmem:[#allocation13 + $0x120] sm:$0xff] }
 0x8fd   :  { %5973 = vst [vmem:[#allocation64_spill] sm:$0xff] %v5039_v29  ;;  %5974 = vst [vmem:[#allocation65_spill] sm:$0xff] %v5041_v19  ;;  %v5047_v28 = vld [vmem:[#allocation13 + $0x128] sm:$0xf]  ;;  %v5049_v51 = vld [vmem:[#allocation13 + $0x12c] sm:$0xff] }
 0x8fe   :  { %5975 = vst [vmem:[#allocation66_spill] sm:$0xff] %v5043_v40  ;;  %5976 = vst [vmem:[#allocation67_spill] sm:$0xff] %v5045_v0  ;;  %v5051_v35 = vld [vmem:[#allocation13 + $0x134] sm:$0xf]  ;;  %v5053_v32 = vld [vmem:[#allocation13 + $0x138] sm:$0xff] }
 0x8ff   :  { %5977 = vst [vmem:[#allocation68_spill] sm:$0xff] %v5047_v28  ;;  %5978 = vst [vmem:[#allocation69_spill] sm:$0xff] %v5049_v51  ;;  %v5055_v48 = vld [vmem:[#allocation13 + $0x140] sm:$0xf]  ;;  %v5057_v3 = vld [vmem:[#allocation13 + $0x144] sm:$0xff] }
 0x900   :  { %5979 = vst [vmem:[#allocation70_spill] sm:$0xff] %v5051_v35  ;;  %5980 = vst [vmem:[#allocation71_spill] sm:$0xff] %v5053_v32  ;;  %v5059_v34 = vld [vmem:[#allocation13 + $0x14c] sm:$0xf]  ;;  %v5061_v57 = vld [vmem:[#allocation13 + $0x150] sm:$0xff] }
 0x901   :  { %5981 = vst [vmem:[#allocation72_spill] sm:$0xff] %v5055_v48  ;;  %5982 = vst [vmem:[#allocation73_spill] sm:$0xff] %v5057_v3  ;;  %v5063_v43 = vld [vmem:[#allocation13 + $0x158] sm:$0xf]  ;;  %v5065_v58 = vld [vmem:[#allocation13 + $0x15c] sm:$0xff]  ;;  %3085 = sbr.rel (%p3090_p11) target bundleno = 4498 (0x1192), region = 103 }
 0x902   :  { %5983 = vst [vmem:[#allocation74_spill] sm:$0xff] %v5059_v34  ;;  %5984 = vst [vmem:[#allocation75_spill] sm:$0xff] %v5061_v57  ;;  %v5067_v38 = vld [vmem:[#allocation13 + $0x164] sm:$0xf]  ;;  %v5069_v46 = vld [vmem:[#allocation13 + $0x168] sm:$0xff] }
 0x903   :  { %5985 = vst [vmem:[#allocation76_spill] sm:$0xff] %v5063_v43  ;;  %5986 = vst [vmem:[#allocation77_spill] sm:$0xff] %v5065_v58  ;;  %v5071_v36 = vld [vmem:[#allocation13 + $0x170] sm:$0xf]  ;;  %v5073_v56 = vld [vmem:[#allocation13 + $0x174] sm:$0xff] }
 0x904   :  { %5987 = vst [vmem:[#allocation78_spill] sm:$0xff] %v5067_v38  ;;  %5988 = vst [vmem:[#allocation79_spill] sm:$0xff] %v5069_v46  ;;  %v5075_v52 = vld [vmem:[#allocation13 + $0x17c] sm:$0xf]  ;;  %v5080_v48 = vld [vmem:[%s5695_s5 + $0x3] sm:$0x7] }
 0x905   :  { %5989 = vst [vmem:[#allocation80_spill] sm:$0xff] %v5071_v36  ;;  %5990 = vst [vmem:[#allocation81_spill] sm:$0xff] %v5073_v56  ;;  %v5085_v43 = vld [vmem:[%s5696_s6 + $0x1] ss:$0 sm:$0xff] }
 0x906   :  { %5991 = vst [vmem:[#allocation82_spill] sm:$0xff] %v5075_v52  ;;  %5992 = vst [vmem:[#allocation83_spill] sm:$0xff] %v5080_v48 }
 0x907   :  { %5993 = vst [vmem:[#allocation84_spill] sm:$0xff] %v5085_v43 }
 0x908 LB: > { %v5994_v59 = vld [vmem:[#allocation49_spill] sm:$0xff]  ;;  %v6000_v50 = vld [vmem:[#allocation19_spill] sm:$0xff]  ;;  %s3266_s5 = sshll.u32 %s4116_s10, 5  ;;  %v6025_v33 = vld [vmem:[#allocation22_spill] sm:$0xff]  ;;  %s5120_s13 = sshll.u32 %s4116_s10, 3  ;;  %vm4131_vm2 = vmmov 0   ;;  %s4116_s10 = sphi %s5089_s10, %s1603_s10  }
 0x909   : > { %v5996_v57 = vld [vmem:[#allocation75_spill] sm:$0xff]  ;;  %v5998_v55 = vld [vmem:[#allocation45_spill] sm:$0xff]  ;;  %v6026_v63 = vld [vmem:[#allocation20_spill] sm:$0xff]  ;;  %s5109_s6 = scalar_lea.vmem [#allocation2], %s3266_s5  ;;  %s2300_s14 = sadd.s32 1, %s5120_s13 }
 0x90a   : > { %v5995_v58 = vld [vmem:[#allocation77_spill] sm:$0xff]  ;;  %v6001_v47 = vld [vmem:[#allocation43_spill] sm:$0xff]  ;;  %v3195_v38 = vcombine.low %v6026_v63, %v6025_v33  ;;  %v6027_v7 = vld [vmem:[#allocation26_spill] sm:$0xff]  ;;  %s2417_s15 = sadd.s32 2, %s5120_s13  ;;  %s2534_s17 = sadd.s32 3, %s5120_s13 }
 0x90b   : > { %v5999_v51 = vld [vmem:[#allocation69_spill] sm:$0xff]  ;;  %v6004_v32 = vld [vmem:[#allocation71_spill] sm:$0xff]  ;;  %v6028_v5 = vld [vmem:[#allocation24_spill] sm:$0xff]  ;;  %s2651_s2 = sadd.s32 4, %s5120_s13  ;;  %s2768_s16 = sadd.s32 5, %s5120_s13 }
 0x90c   : > { %v5997_v56 = vld [vmem:[#allocation81_spill] sm:$0xff]  ;;  %v6005_v31 = vld [vmem:[#allocation51_spill] sm:$0xff]  ;;  %3619 = vmatprep.subr.bf16.mxu1 %v3195_v38  ;;  %v6029_v11 = vld [vmem:[#allocation30_spill] sm:$0xff]  ;;  %s2885_s18 = sadd.s32 6, %s5120_s13  ;;  %s3002_s19 = sadd.s32 7, %s5120_s13 }
 0x90d   : > { %v6002_v44 = vld [vmem:[#allocation61_spill] sm:$0xff]  ;;  %v6006_v30 = vld [vmem:[#allocation59_spill] sm:$0xff]  ;;  %3620 = vmatpush3.bf16.msra.mxu1 %v3195_v38  ;;  %v6030_v54 = vld [vmem:[#allocation28_spill] sm:$0xff]  ;;  %s1603_s10 = sadd.s32 1, %s4116_s10  }
 0x90e   : > { %v6003_v39 = vld [vmem:[#allocation57_spill] sm:$0xff]  ;;  %v6009_v22 = vld [vmem:[#allocation55_spill] sm:$0xff]  ;;  %v6031_v15 = vld [vmem:[#allocation34_spill] sm:$0xff]  ;;  %p1602_p13 = scmp.ge.s32.totalorder %s1603_s10, %s6072_s24 }
 0x90f   : > { %v6007_v25 = vld [vmem:[#allocation53_spill] sm:$0xff]  ;;  %v6010_v21 = vld [vmem:[#allocation39_spill] sm:$0xff]  ;;  %v6032_v13 = vld [vmem:[#allocation32_spill] sm:$0xff] }
 0x910   : > { %v6008_v24 = vld [vmem:[#allocation41_spill] sm:$0xff]  ;;  %v6011_v20 = vld [vmem:[#allocation63_spill] sm:$0xff]  ;;  %v6035_v18 = vld [vmem:[#allocation38_spill] sm:$0xff] }
 0x911   : > { %v6012_v19 = vld [vmem:[#allocation65_spill] sm:$0xff]  ;;  %v6015_v16 = vld [vmem:[#allocation35_spill] sm:$0xff]  ;;  %v6036_v10 = vld [vmem:[#allocation36_spill] sm:$0xff] }
 0x912   : > { %v6013_v3 = vld [vmem:[#allocation73_spill] sm:$0xff]  ;;  %v6016_v0 = vld [vmem:[#allocation67_spill] sm:$0xff]  ;;  %v6037_v26 = vld [vmem:[#allocation42_spill] sm:$0xff] }
 0x913   : > { %v6014_v17 = vld [vmem:[#allocation37_spill] sm:$0xff]  ;;  %v6018_v12 = vld [vmem:[#allocation31_spill] sm:$0xff]  ;;  %v6038_v23 = vld [vmem:[#allocation40_spill] sm:$0xff] }
 0x914   : > { %v6017_v14 = vld [vmem:[#allocation33_spill] sm:$0xff]  ;;  %v6020_v1 = vld [vmem:[#allocation47_spill] sm:$0xff]  ;;  %v6039_v61 = vld [vmem:[#allocation46_spill] sm:$0xff] }
 0x915   : > { %v6019_v9 = vld [vmem:[#allocation29_spill] sm:$0xff]  ;;  %v6021_v8 = vld [vmem:[#allocation27_spill] sm:$0xff]  ;;  %v3202_v38 = vcombine.low %v6018_v12, %v6017_v14  ;;  %v6040_v2 = vld [vmem:[#allocation44_spill] sm:$0xff] }
 0x916   : > { %v6022_v6 = vld [vmem:[#allocation25_spill] sm:$0xff]  ;;  %v6023_v4 = vld [vmem:[#allocation23_spill] sm:$0xff]  ;;  %v3200_v46 = vcombine.high %v6021_v8, %v6019_v9  ;;  %v6041_v41 = vld [vmem:[#allocation50_spill] sm:$0xff] }
 0x917   : > { %v6024_v42 = vld [vmem:[#allocation21_spill] sm:$0xff]  ;;  %v3197_v43 = vcombine.high %v6023_v4, %v6022_v6  ;;  %v3196_v52 = vcombine.low %v6023_v4, %v6022_v6  ;;  %v3201_v4 = vcombine.low %v6030_v54, %v6029_v11  ;;  %v6033_v6 = vmov 0   ;;  %v6042_v62 = vld [vmem:[#allocation48_spill] sm:$0xff]  ;;  %v6043_v53 = vld [vmem:[#allocation54_spill] sm:$0xff] }
 0x918   : > { %v3194_v36 = vcombine.high %v6000_v50, %v6024_v42  ;;  %v3193_v48 = vcombine.low %v6000_v50, %v6024_v42  ;;  %v3198_v42 = vcombine.low %v6028_v5, %v6027_v7  ;;  %v3203_v5 = vcombine.high %v6018_v12, %v6017_v14  ;;  %3918 = vset.pattern.permute.xlu0 %v6033_v6  ;;  %v6034_v7 = vld [vmem:[#allocation18_spill] sm:$0xff]  ;;  %v6044_v37 = vld [vmem:[#allocation52_spill] sm:$0xff] }
 0x919   : > { %3919 = vset.pattern.permute.xlu1 %v6033_v6  ;;  %v6045_v60 = vld [vmem:[#allocation58_spill] sm:$0xff]  ;;  %v6046_v49 = vld [vmem:[#allocation56_spill] sm:$0xff]  ;;  %v6049_v11 = vmov 0.0   ;;  %v5236_v14 = vcombine.high %v6004_v32, %v6013_v3 }
 0x91a   : > { %1785 = vmatprep.subr.bf16.mxu0 %v3194_v36  ;;  %v5749_v36 = vmov 0   ;;  %3621 = vmatprep.subr.bf16.mxu1 %v3198_v42  ;;  %v6047_v27 = vld [vmem:[#allocation62_spill] sm:$0xff]  ;;  %v6048_v45 = vld [vmem:[#allocation60_spill] sm:$0xff] }
 0x91b   : > { %1786 = vmatpush1.bf16.msra.mxu0 %v3193_v48  ;;  %1817 = vmatprep.mubr.bf16.mxu0 %v5749_v36  ;;  %v3199_v48 = vcombine.low %v6021_v8, %v6019_v9  ;;  %v2184_v36 = vstv %s5120_s13  ;;  %v3209_v8 = vcombine.high %v6010_v21, %v6008_v24  ;;  %v5205_v9 = vcombine.low %v6048_v45, %v6047_v27  ;;  %v6050_v40 = vld [vmem:[#allocation66_spill] sm:$0xff]  ;;  %v6051_v29 = vld [vmem:[#allocation64_spill] sm:$0xff] }
 0x91c   : > { %1787 = vmatprep.subr.bf16.mxu0 %v3197_v43  ;;  %v3920_v43 = vld [vmem:[%s5109_s6] sm:$0xff]   ;;  %3622 = vmatpush3.bf16.msra.mxu1 %v3198_v42  ;;  %vm2185_vm1 = vcmp.eq.s32.totalorder %v6034_v7, %v2184_v36  ;;  %v3210_v36 = vcombine.low %v6038_v23, %v6037_v26  ;;  %v5223_v12 = vcombine.low %v6051_v29, %v6050_v40  ;;  %v6052_v35 = vld [vmem:[#allocation70_spill] sm:$0xff]  ;;  %v6053_v28 = vld [vmem:[#allocation68_spill] sm:$0xff] }
 0x91d   : > { %3635 = vmatprep.mubr.bf16.mxu1 %v3920_v43  ;;  %3623 = vmatprep.subr.bf16.mxu1 %v3201_v4  ;;  %v2186_v42 = vsel %vm2185_vm1, 1, %v6033_v6  ;;  %v6054_v34 = vld [vmem:[#allocation74_spill] sm:$0xff]  ;;  %v5282_v23 = vld [vmem:[#allocation4] sm:$0xff] }
 0x91e   : > { %2188 = vperm.xlu0 %3918, %v2186_v42   ;;  %v3215_v42 = vcombine.high %v6020_v1, %v5994_v59 }
 0x91f   : > { %1788 = vmatpush1.bf16.msra.mxu0 %v3196_v52  ;;  %v3204_v52 = vcombine.low %v6032_v13, %v6031_v15  ;;  %v5230_v13 = vcombine.low %v6016_v0, %v5999_v51  ;;  %v5241_v15 = vcombine.low %v6053_v28, %v6052_v35  ;;  %v6061_v28 = vld [vmem:[#allocation83_spill] sm:$0xff] }
 0x920   : > { %1789 = vmatprep.subr.bf16.mxu0 %v3200_v46  ;;  %v3206_v46 = vcombine.high %v6015_v16, %v6014_v17  ;;  %3624 = vmatpush3.bf16.msra.mxu1 %v3201_v4  ;;  %v3208_v4 = vcombine.low %v6010_v21, %v6008_v24 }
 0x921   : > { %3625 = vmatprep.subr.bf16.mxu1 %v3204_v52 }
 0x923   : > { %1790 = vmatpush1.bf16.msra.mxu0 %v3199_v48  ;;  %v3205_v48 = vcombine.low %v6015_v16, %v6014_v17  ;;  %v5252_v16 = vcombine.high %v5996_v57, %v5995_v58 }
 0x924   : > { %1791 = vmatprep.subr.bf16.mxu0 %v3203_v5  ;;  %v3207_v5 = vcombine.low %v6036_v10, %v6035_v18  ;;  %3626 = vmatpush3.bf16.msra.mxu1 %v3204_v52  ;;  %v3213_v52 = vcombine.low %v6040_v2, %v6039_v61  ;;  %v5200_v2 = vcombine.high %v6011_v20, %v6012_v19  ;;  %v6056_v18 = vld [vmem:[#allocation79_spill] sm:$0xff] }
 0x925   : > { %v5210_v10 = vcombine.low %v6011_v20, %v6012_v19  ;;  %v5269_v19 = vcombine.high %v6056_v18, %v5997_v56  ;;  %v6057_v20 = vld [vmem:[#allocation78_spill] sm:$0xff] }
 0x926   : > { %3627 = vmatprep.subr.bf16.mxu1 %v3207_v5 }
 0x927   : > { %1792 = vmatpush1.bf16.msra.mxu0 %v3202_v38  ;;  %v3212_v38 = vcombine.high %v6001_v47, %v5998_v55 }
 0x928   : > { %1793 = vmatprep.subr.bf16.mxu0 %v3206_v46  ;;  %3628 = vmatpush3.bf16.msra.mxu1 %v3207_v5  ;;  %v3211_v46 = vcombine.low %v6001_v47, %v5998_v55  ;;  %v5157_v5 = vcombine.high %v6005_v31, %v6007_v25 }
 0x929   : > { %3629 = vmatprep.subr.bf16.mxu1 %v3210_v36 }
 0x92b   : > { %1794 = vmatpush1.bf16.msra.mxu0 %v3205_v48  ;;  %v3216_v48 = vcombine.low %v6042_v62, %v6041_v41 }
 0x92c   : > { %1795 = vmatprep.subr.bf16.mxu0 %v3209_v8  ;;  %3630 = vmatpush3.bf16.msra.mxu1 %v3210_v36  ;;  %v3214_v8 = vcombine.low %v6020_v1, %v5994_v59  ;;  %v5166_v36 = vcombine.high %v6009_v22, %v6003_v39  ;;  %v5194_v1 = vcombine.low %v6006_v30, %v6002_v44 }
 0x92d   : > { %3631 = vmatprep.subr.bf16.mxu1 %v3213_v52 }
 0x92f   : > { %1796 = vmatpush1.bf16.msra.mxu0 %v3208_v4  ;;  %v5161_v4 = vcombine.low %v6005_v31, %v6007_v25 }
 0x930   : > { %1797 = vmatprep.subr.bf16.mxu0 %v3212_v38  ;;  %3632 = vmatpush3.bf16.msra.mxu1 %v3213_v52  ;;  %v5170_v38 = vcombine.low %v6044_v37, %v6043_v53  ;;  %v3921_v52 = vld [vmem:[%s5109_s6 + $0x8] sm:$0xff]  }
 0x931   : > { %3633 = vmatprep.subr.bf16.mxu1 %v3216_v48 }
 0x933   : > { %1798 = vmatpush1.bf16.msra.mxu0 %v3211_v46  ;;  %v5175_v46 = vcombine.low %v6009_v22, %v6003_v39  ;;  %v5279_v22 = vcombine.low %v6056_v18, %v5997_v56 }
 0x934   : > { %1799 = vmatprep.subr.bf16.mxu0 %v3215_v42  ;;  %3634 = vmatpush3.bf16.msra.mxu1 %v3216_v48  ;;  %v5182_v42 = vcombine.high %v6006_v30, %v6002_v44  ;;  %v5189_v48 = vcombine.low %v6046_v49, %v6045_v60 }
 0x937   : > { %1800 = vmatpush1.bf16.msra.mxu0 %v3214_v8  ;;  %v5755_v8 = vmov 0.0   ;;  %3636 = vmatmul.mubr.bf16.vlgmr.msra.gmra.mrb[0].mxu1 %v3921_v52 }
 0x938   : > { %2081 = vmatprep.subr.bf16.mxu0 %v5157_v5  ;;  %3643 = vmatprep.subr.bf16.mxu1 %v5755_v8 }
 0x939   : > { %3644 = vmatpush3.bf16.msra.mxu1 %v5170_v38 }
 0x93a   : > { %1818 = vmatmul.mubr.bf16.vlgmr.msra.gmra.mrb[0].mxu0 %v3920_v43  ;;  %v3922_v43 = vld [vmem:[%s5109_s6 + $0x10] sm:$0xff]   ;;  %3645 = vmatprep.subr.bf16.mxu1 %v5755_v8  ;;  %v3923_v8 = vld [vmem:[%s5109_s6 + $0x18] sm:$0xff]  }
 0x93b   : > { %2082 = vmatpush1.bf16.msra.mxu0 %v5161_v4  ;;  %1827 = vmatprep.mubr.bf16.mxu0 %v6033_v6 }
 0x93c   : > { %2083 = vmatprep.subr.bf16.mxu0 %v5166_v36  ;;  %3639 = vmatprep.mubr.bf16.mxu1 %v3922_v43 }
 0x93d   : > { %3646 = vmatpush3.bf16.msra.mxu1 %v5189_v48 }
 0x93e   : > { %3647 = vmatprep.subr.bf16.mxu1 %v6049_v11 }
 0x93f   : > { %2084 = vmatpush1.bf16.msra.mxu0 %v5175_v46  ;;  %3640 = vmatmul.mubr.bf16.gmra.mrb[4].mxu1 %v3923_v8 }
 0x940   : > { %2085 = vmatprep.subr.bf16.mxu0 %v5182_v42  ;;  %3659 = vmatprep.mubr.msk.bf16.mxu1 %vm4131_vm2, %v6049_v11 }
 0x941   : > { %3648 = vmatpush3.bf16.msra.mxu1 %v5205_v9 }
 0x942   : > { %1828 = vmatmul.mubr.bf16.gmra.mrb[4].mxu0 %v3921_v52  ;;  %v5217_v52 = vcombine.high %v6016_v0, %v5999_v51  ;;  %3649 = vmatprep.subr.bf16.mxu1 %v6049_v11  ;;  %v5246_v0 = vcombine.low %v6004_v32, %v6013_v3  ;;  %v5263_v3 = vcombine.low %v5996_v57, %v5995_v58 }
 0x943   : > { %2086 = vmatpush1.bf16.msra.mxu0 %v5194_v1  ;;  %1837 = vmatprep.mubr.bf16.mxu0 %v6033_v6 }
 0x944   : > { %2087 = vmatprep.subr.bf16.mxu0 %v5200_v2 }
 0x945   : > { %3650 = vmatpush3.bf16.msra.mxu1 %v5223_v12 }
 0x946   : > { %3651 = vmatprep.subr.bf16.mxu1 %v6049_v11 }
 0x947   : > { %2088 = vmatpush1.bf16.msra.mxu0 %v5210_v10 }
 0x948   : > { %2089 = vmatprep.subr.bf16.mxu0 %v5217_v52 }
 0x949   : > { %3652 = vmatpush3.bf16.msra.mxu1 %v5241_v15 }
 0x94a   : > { %1838 = vmatmul.mubr.bf16.gmra.mrb[8].mxu0 %v3922_v43  ;;  %v6055_v43 = vld [vmem:[#allocation72_spill] sm:$0xff]  ;;  %3653 = vmatprep.subr.bf16.mxu1 %v6049_v11 }
 0x94b   : > { %2090 = vmatpush1.bf16.msra.mxu0 %v5230_v13  ;;  %1847 = vmatprep.mubr.bf16.mxu0 %v6033_v6  ;;  %v5258_v17 = vcombine.low %v6055_v43, %v6054_v34  ;;  %v6058_v43 = vld [vmem:[#allocation76_spill] sm:$0xff] }
 0x94c   : > { %2091 = vmatprep.subr.bf16.mxu0 %v5236_v14  ;;  %v5274_v21 = vcombine.low %v6058_v43, %v6057_v20  ;;  %v6059_v20 = vld [vmem:[#allocation82_spill] sm:$0xff]  ;;  %v6060_v43 = vld [vmem:[#allocation80_spill] sm:$0xff] }
 0x94d   : > { %3654 = vmatpush3.bf16.msra.mxu1 %v5258_v17  ;;  %v5291_v24 = vcombine.low %v6060_v43, %v6059_v20  ;;  %v1618_v43 = vlaneseq }
 0x94e   : > { %3655 = vmatprep.subr.bf16.mxu1 %v6049_v11 }
 0x94f   : > { %2092 = vmatpush1.bf16.msra.mxu0 %v5246_v0  ;;  %v1619_v18 = vshrl.u32 %v1618_v43, 7 }
 0x950   : > { %2093 = vmatprep.subr.bf16.mxu0 %v5252_v16 }
 0x951   : > { %3656 = vmatpush3.bf16.msra.mxu1 %v5274_v21  ;;  %v1620_v25 = vsub.s32 0, %v1619_v18  ;;  %v1624_v26 = vsub.s32 1, %v1619_v18  ;;  %v1628_v27 = vsub.s32 2, %v1619_v18 }
 0x952   : > { %1848 = vmatmul.mubr.bf16.gmra.mrb[12].mxu0 %v3923_v8  ;;  %v1952_v8 = vpack.c.bf16 %v5282_v23, %v5282_v23  ;;  %3657 = vmatprep.subr.bf16.mxu1 %v6049_v11 }
 0x953   : > { %2094 = vmatpush1.bf16.msra.mxu0 %v5263_v3  ;;  %2113 = vmatprep.mubr.bf16.mxu0 %v6033_v6  ;;  %v1621_v29 = vrot.slane %v6061_v28, %v1620_v25  ;;  %v1625_v30 = vrot.slane %v6061_v28, %v1624_v26  ;;  %v1629_v32 = vrot.slane %v6061_v28, %v1628_v27 }
 0x954   : > { %2095 = vmatprep.subr.bf16.mxu0 %v5269_v19 }
 0x955   : > { %3658 = vmatpush3.bf16.msra.mxu1 %v5291_v24 }
 0x956   : > { %3663 = vmatprep.subr.bf16.mxu1 %v6049_v11 }
 0x957   : > { %2096 = vmatpush1.bf16.msra.mxu0 %v5279_v22 }
 0x958   : > { %2197 = vmatprep.subr.bf16.mxu0 %v5157_v5  ;;  %3660 = vmatmul.mubr.bf16.vlgmr.msra.gmra.mrb[8].mxu1 %v1952_v8 }
 0x959   : > { %3664 = vmatpush3.bf16.msra.mxu1 %v5170_v38  ;;  %3679 = vmatprep.mubr.msk.bf16.mxu1 %vm4131_vm2, %v6049_v11 }
 0x95a   : > { %2114 = vmatmul.mubr.bf16.vlgmr.msra.gmra.mrb[16].mxu0 %v1952_v8  ;;  %3665 = vmatprep.subr.bf16.mxu1 %v6049_v11  ;;  %v2301_v8 = vstv %s2300_s14 }
 0x95b   : > { %2198 = vmatpush1.bf16.msra.mxu0 %v5161_v4  ;;  %2229 = vmatprep.mubr.bf16.mxu0 %v6033_v6  ;;  %vm2302_vm3 = vcmp.eq.s32.totalorder %v6034_v7, %v2301_v8 }
 0x95c   : > { %2199 = vmatprep.subr.bf16.mxu0 %v5166_v36  ;;  %v2303_v20 = vsel %vm2302_vm3, 1, %v6033_v6 }
 0x95d   : > { %3666 = vmatpush3.bf16.msra.mxu1 %v5189_v48  ;;  %2305 = vperm.xlu0 %3918, %v2303_v20  }
 0x95e   : > { %3667 = vmatprep.subr.bf16.mxu1 %v6049_v11 }
 0x95f   : > { %2200 = vmatpush1.bf16.msra.mxu0 %v5175_v46 }
 0x960   : > { %2201 = vmatprep.subr.bf16.mxu0 %v5182_v42 }
 0x961   : > { %3668 = vmatpush3.bf16.msra.mxu1 %v5205_v9 }
 0x962   : > { %3669 = vmatprep.subr.bf16.mxu1 %v6049_v11 }
 0x963   : > { %2202 = vmatpush1.bf16.msra.mxu0 %v5194_v1 }
 0x964   : > { %2203 = vmatprep.subr.bf16.mxu0 %v5200_v2 }
 0x965   : > { %3670 = vmatpush3.bf16.msra.mxu1 %v5223_v12 }
 0x966   : > { %3671 = vmatprep.subr.bf16.mxu1 %v6049_v11 }
 0x967   : > { %2204 = vmatpush1.bf16.msra.mxu0 %v5210_v10 }
 0x968   : > { %2205 = vmatprep.subr.bf16.mxu0 %v5217_v52 }
 0x969   : > { %3672 = vmatpush3.bf16.msra.mxu1 %v5241_v15 }
 0x96a   : > { %3673 = vmatprep.subr.bf16.mxu1 %v6049_v11 }
 0x96b   : > { %2206 = vmatpush1.bf16.msra.mxu0 %v5230_v13 }
 0x96c   : > { %2207 = vmatprep.subr.bf16.mxu0 %v5236_v14 }
 0x96d   : > { %3674 = vmatpush3.bf16.msra.mxu1 %v5258_v17 }
 0x96e   : > { %3675 = vmatprep.subr.bf16.mxu1 %v6049_v11 }
 0x96f   : > { %2208 = vmatpush1.bf16.msra.mxu0 %v5246_v0 }
 0x970   : > { %2209 = vmatprep.subr.bf16.mxu0 %v5252_v16 }
 0x971   : > { %3676 = vmatpush3.bf16.msra.mxu1 %v5274_v21 }
 0x972   : > { %3677 = vmatprep.subr.bf16.mxu1 %v6049_v11 }
 0x973   : > { %2210 = vmatpush1.bf16.msra.mxu0 %v5263_v3 }
 0x974   : > { %2211 = vmatprep.subr.bf16.mxu0 %v5269_v19 }
 0x975   : > { %3678 = vmatpush3.bf16.msra.mxu1 %v5291_v24 }
 0x976   : > { %3683 = vmatprep.subr.bf16.mxu1 %v6049_v11 }
 0x977   : > { %2212 = vmatpush1.bf16.msra.mxu0 %v5279_v22 }
 0x978   : > { %2314 = vmatprep.subr.bf16.mxu0 %v5157_v5 }
 0xa0a   : > { %v3637_v20 = vpop.f32.mrb[0].mxu1 }
 0xa0b   : > { %v5343_v43 = vadd.f32 %v3637_v20, %v1629_v32  ;;  %v1892_v18 = vpop.f32.mrb[1].mxu1 }
 0xa0c   : > { %v5345_v41 = vadd.f32 %v1892_v18, %v1629_v32  ;;  %v3638_v25 = vpop.f32.mrb[2].mxu1 }
 0xa0d   : > { %v1819_v31 = vpop.f32.mrb[0].mxu0  ;;  %v5347_v26 = vadd.f32 %v3638_v25, %v1629_v32  ;;  %v1895_v44 = vpop.f32.mrb[3].mxu1 }
 0xa0e   : > { %v1820_v33 = vadd.f32 %v1819_v31, %v1621_v29  ;;  %v1821_v34 = vpop.f32.mrb[1].mxu0  ;;  %v5349_v27 = vadd.f32 %v1895_v44, %v1629_v32 }
 0xa0f   : > { %v1822_v35 = vadd.f32 %v1821_v34, %v1625_v30  ;;  %v1823_v37 = vpop.f32.mrb[2].mxu0 }
 0xa10   : > { %v5339_v8 = vadd.f32 %v1823_v37, %v1621_v29  ;;  %v1825_v39 = vpop.f32.mrb[3].mxu0 }
 0xa11   : > { %v5341_v40 = vadd.f32 %v1825_v39, %v1625_v30 }
 0xa12   : > { %v3641_v47 = vpop.f32.mrb[4].mxu1 }
 0xa13   : > { %v5359_v18 = vadd.f32 %v3641_v47, %v1629_v32  ;;  %v1908_v25 = vpop.f32.mrb[5].mxu1 }
 0xa14   : > { %v5361_v50 = vadd.f32 %v1908_v25, %v1629_v32  ;;  %v3642_v44 = vpop.f32.mrb[6].mxu1 }
 0xa15   : > { %v1829_v31 = vpop.f32.mrb[4].mxu0  ;;  %6062 = vst [vmem:[#allocation89_spill] sm:$0xff] %v5359_v18  ;;  %v1920_v51 = vadd.f32 %v3642_v44, %v1629_v32  ;;  %v1911_v53 = vpop.f32.mrb[7].mxu1 }
 0xa16   : > { %v5351_v34 = vadd.f32 %v1829_v31, %v1621_v29  ;;  %v1831_v37 = vpop.f32.mrb[5].mxu0  ;;  %v5363_v31 = vadd.f32 %v1911_v53, %v1629_v32 }
 0xa17   : > { %v5353_v28 = vadd.f32 %v1831_v37, %v1625_v30  ;;  %v1833_v45 = vpop.f32.mrb[6].mxu0  ;;  %1946 = vst [vmem:[#allocation3 + $0xb8] sm:$0xff] %v1920_v51 }
 0xa18   : > { %v5355_v39 = vadd.f32 %v1833_v45, %v1621_v29  ;;  %v1835_v20 = vpop.f32.mrb[7].mxu0  ;;  %6063 = vst [vmem:[#allocation90_spill] sm:$0xff] %v5363_v31 }
 0xa19   : > { %v5357_v49 = vadd.f32 %v1835_v20, %v1625_v30 }
 0xa1d   : > { %v1839_v54 = vpop.f32.mrb[8].mxu0 }
 0xa1e   : > { %v5365_v37 = vadd.f32 %v1839_v54, %v1621_v29  ;;  %v1841_v45 = vpop.f32.mrb[9].mxu0 }
 0xa1f   : > { %v5367_v55 = vadd.f32 %v1841_v45, %v1625_v30  ;;  %v1843_v56 = vpop.f32.mrb[10].mxu0 }
 0xa20   : > { %v5369_v20 = vadd.f32 %v1843_v56, %v1621_v29  ;;  %v1845_v47 = vpop.f32.mrb[11].mxu0 }
 0xa21   : > { %v5371_v57 = vadd.f32 %v1845_v47, %v1625_v30 }
 0xa25   : > { %v1849_v25 = vpop.f32.mrb[12].mxu0 }
 0xa26   : > { %v5373_v58 = vadd.f32 %v1849_v25, %v1621_v29  ;;  %v1851_v44 = vpop.f32.mrb[13].mxu0 }
 0xa27   : > { %v5375_v59 = vadd.f32 %v1851_v44, %v1625_v30  ;;  %v1853_v53 = vpop.f32.mrb[14].mxu0 }
 0xa28   : > { %6064 = vst [vmem:[#allocation91_spill] sm:$0xff] %v5373_v58  ;;  %v1854_v32 = vadd.f32 %v1853_v53, %v1621_v29  ;;  %v1855_v51 = vpop.f32.mrb[15].mxu0  ;;  %v6066_v53 = vld [vmem:[#allocation84_spill] sm:$0xff] }
 0xa29   : > { %6065 = vst [vmem:[#allocation92_spill] sm:$0xff] %v5375_v59  ;;  %v1856_v54 = vadd.f32 %v1855_v51, %v1625_v30 }
 0xa2a   : > { %1944 = vst [vmem:[#allocation3 + $0xa8] sm:$0xff] %v1854_v32 }
 0xa2b   : > { %1945 = vst [vmem:[#allocation3 + $0xb0] sm:$0xff] %v1856_v54  ;;  %v2156_v18 = vpop.f32.mrb[8].mxu1 }
 0xa2c   : > { %v3661_v31 = vpop.f32.mrb[9].mxu1  ;;  %v2176_v32 = vadd.f32 %v6066_v53, %v2156_v18 }
 0xa2d   : > { %v2115_v45 = vpop.f32.mrb[16].mxu0  ;;  %v2159_v25 = vpop.f32.mrb[10].mxu1 }
 0xa2e   : > { %v2162_v60 = vadd.f32 %v2115_v45, %v1820_v33  ;;  %v2117_v61 = vpop.f32.mrb[17].mxu0  ;;  %v3662_v58 = vpop.f32.mrb[11].mxu1 }
 0xa2f   : > { %v2163_v56 = vadd.f32 %v2117_v61, %v1822_v35  ;;  %v2119_v62 = vpop.f32.mrb[18].mxu0 }
 0xa30   : > { %v3241_v63 = vmul.f32 -1.442695, %v2162_v60  ;;  %v2120_v47 = vpop.f32.mrb[19].mxu0 }
 0xa31   : > { %v3242_v44 = vmul.f32 -1.442695, %v2163_v56 }
 0xa32   : > { %3924 = vpow2.f32 %v3241_v63 }
 0xa33   : > { %3926 = vpow2.f32 %v3242_v44 }
 0xa3c   : > { %v3925_v59 = vpop.eup %3924 }
 0xa3d   : > { %v2170_v29 = vadd.f32 1.0, %v3925_v59  ;;  %v3927_v30 = vpop.eup %3926 }
 0xa3e   : > { %v2171_v51 = vadd.f32 1.0, %v3927_v30 }
 0xa3f   : > { %3928 = vrcp.f32 %v2170_v29 }
 0xa40   : > { %3930 = vrcp.f32 %v2171_v51 }
 0xa49   : > { %v3929_v33 = vpop.eup %3928 }
 0xa4a   : > { %v2177_v54 = vmul.f32 %v3929_v33, %v2176_v32  ;;  %v3931_v62 = vpop.eup %3930 }
 0xa4b   : > { %v2180_v63 = vsub.f32 1.0, %v3931_v62 }
 0xa4c   : > { %v2178_v61 = vadd.f32 %v2177_v54, %v5345_v41 }
 0xa4e   : > { %3932 = vtanh.f32 %v2178_v61 }
 0xa58   : > { %v3933_v60 = vpop.eup %3932 }
 0xa59   : > { %v2181_v35 = vsub.f32 %v3933_v60, %v5282_v23 }
 0xa5b   : > { %v2182_v58 = vmul.f32 %v2181_v35, %v2180_v63 }
 0xa5d   : > { %v5381_v31 = vadd.f32 %v2182_v58, %v5282_v23  ;;  %v2418_v23 = vstv %s2417_s15 }
 0xa5e   : > { %vm2419_vm4 = vcmp.eq.s32.totalorder %v6034_v7, %v2418_v23 }
 0xa5f   : > { %v2196_v59 = vpack.c.bf16 %v5381_v31, %v5381_v31  ;;  %v2420_v41 = vsel %vm2419_vm4, 1, %v6033_v6 }
 0xa60   : > { %2422 = vperm.xlu1 %3919, %v2420_v41  }
 0xa61   : > { %2230 = vmatmul.mubr.bf16.vlgmr.msra.gmra.mrb[20].mxu0 %v2196_v59  ;;  %3680 = vmatmul.mubr.bf16.vlgmr.msra.gmra.mrb[12].mxu1 %v2196_v59 }
 0xa62   : > { %2315 = vmatpush1.bf16.msra.mxu0 %v5161_v4  ;;  %3684 = vmatpush3.bf16.msra.mxu1 %v5170_v38 }
 0xa63   : > { %2316 = vmatprep.subr.bf16.mxu0 %v5166_v36  ;;  %3685 = vmatprep.subr.bf16.mxu1 %v6049_v11 }
 0xa64   : > { %2346 = vmatprep.mubr.bf16.mxu0 %v6033_v6  ;;  %3699 = vmatprep.mubr.msk.bf16.mxu1 %vm4131_vm2, %v6049_v11 }
 0xa66   : > { %2317 = vmatpush1.bf16.msra.mxu0 %v5175_v46  ;;  %3686 = vmatpush3.bf16.msra.mxu1 %v5189_v48 }
 0xa67   : > { %2318 = vmatprep.subr.bf16.mxu0 %v5182_v42  ;;  %3687 = vmatprep.subr.bf16.mxu1 %v6049_v11 }
 0xa6a   : > { %2319 = vmatpush1.bf16.msra.mxu0 %v5194_v1  ;;  %3688 = vmatpush3.bf16.msra.mxu1 %v5205_v9 }
 0xa6b   : > { %2320 = vmatprep.subr.bf16.mxu0 %v5200_v2  ;;  %3689 = vmatprep.subr.bf16.mxu1 %v6049_v11 }
 0xa6e   : > { %2321 = vmatpush1.bf16.msra.mxu0 %v5210_v10  ;;  %3690 = vmatpush3.bf16.msra.mxu1 %v5223_v12 }
 0xa6f   : > { %2322 = vmatprep.subr.bf16.mxu0 %v5217_v52  ;;  %3691 = vmatprep.subr.bf16.mxu1 %v6049_v11 }
 0xa72   : > { %2323 = vmatpush1.bf16.msra.mxu0 %v5230_v13  ;;  %3692 = vmatpush3.bf16.msra.mxu1 %v5241_v15 }
 0xa73   : > { %2324 = vmatprep.subr.bf16.mxu0 %v5236_v14  ;;  %3693 = vmatprep.subr.bf16.mxu1 %v6049_v11 }
 0xa76   : > { %2325 = vmatpush1.bf16.msra.mxu0 %v5246_v0  ;;  %3694 = vmatpush3.bf16.msra.mxu1 %v5258_v17 }
 0xa77   : > { %2326 = vmatprep.subr.bf16.mxu0 %v5252_v16  ;;  %3695 = vmatprep.subr.bf16.mxu1 %v6049_v11 }
 0xa7a   : > { %2327 = vmatpush1.bf16.msra.mxu0 %v5263_v3  ;;  %3696 = vmatpush3.bf16.msra.mxu1 %v5274_v21 }
 0xa7b   : > { %2328 = vmatprep.subr.bf16.mxu0 %v5269_v19  ;;  %3697 = vmatprep.subr.bf16.mxu1 %v6049_v11 }
 0xa7e   : > { %2329 = vmatpush1.bf16.msra.mxu0 %v5279_v22  ;;  %3698 = vmatpush3.bf16.msra.mxu1 %v5291_v24 }
 0xa7f   : > { %2431 = vmatprep.subr.bf16.mxu0 %v5157_v5  ;;  %3703 = vmatprep.subr.bf16.mxu1 %v6049_v11 }
 0xb34   : > { %v2231_v18 = vpop.f32.mrb[20].mxu0  ;;  %v2272_v45 = vpop.f32.mrb[12].mxu1 }
 0xb35   : > { %v2278_v56 = vadd.f32 %v2231_v18, %v5339_v8  ;;  %v2233_v47 = vpop.f32.mrb[21].mxu0  ;;  %v3681_v25 = vpop.f32.mrb[13].mxu1  ;;  %v2292_v63 = vadd.f32 %v6066_v53, %v2272_v45 }
 0xb36   : > { %v2235_v44 = vpop.f32.mrb[22].mxu0  ;;  %v2275_v29 = vpop.f32.mrb[14].mxu1  ;;  %v2279_v33 = vadd.f32 %v2233_v47, %v5341_v40 }
 0xb37   : > { %v3243_v30 = vmul.f32 -1.442695, %v2278_v56  ;;  %v2236_v32 = vpop.f32.mrb[23].mxu0  ;;  %v3682_v51 = vpop.f32.mrb[15].mxu1 }
 0xb38   : > { %v3244_v54 = vmul.f32 -1.442695, %v2279_v33 }
 0xb39   : > { %3934 = vpow2.f32 %v3243_v30 }
 0xb3a   : > { %3936 = vpow2.f32 %v3244_v54 }
 0xb43   : > { %v3935_v61 = vpop.eup %3934 }
 0xb44   : > { %v2286_v62 = vadd.f32 1.0, %v3935_v61  ;;  %v3937_v60 = vpop.eup %3936 }
 0xb45   : > { %v2287_v35 = vadd.f32 1.0, %v3937_v60 }
 0xb46   : > { %3938 = vrcp.f32 %v2286_v62 }
 0xb47   : > { %3940 = vrcp.f32 %v2287_v35 }
 0xb50   : > { %v3939_v8 = vpop.eup %3938 }
 0xb51   : > { %v2293_v58 = vmul.f32 %v3939_v8, %v2292_v63  ;;  %v3941_v23 = vpop.eup %3940 }
 0xb52   : > { %v2296_v18 = vsub.f32 1.0, %v3941_v23 }
 0xb53   : > { %v2294_v59 = vadd.f32 %v2293_v58, %v5349_v27  ;;  %v2535_v27 = vstv %s2534_s17 }
 0xb54   : > { %vm2536_vm5 = vcmp.eq.s32.totalorder %v6034_v7, %v2535_v27 }
 0xb55   : > { %3942 = vtanh.f32 %v2294_v59  ;;  %v2537_v45 = vsel %vm2536_vm5, 1, %v6033_v6 }
 0xb56   : > { %2539 = vperm.xlu1 %3919, %v2537_v45  }
 0xb5f   : > { %v3943_v41 = vpop.eup %3942 }
 0xb60   : > { %v2297_v40 = vsub.f32 %v3943_v41, %v5381_v31 }
 0xb62   : > { %v2298_v56 = vmul.f32 %v2297_v40, %v2296_v18 }
 0xb64   : > { %v5429_v47 = vadd.f32 %v2298_v56, %v5381_v31 }
 0xb66   : > { %v2313_v25 = vpack.c.bf16 %v5429_v47, %v5429_v47 }
 0xb68   : > { %2347 = vmatmul.mubr.bf16.vlgmr.msra.gmra.mrb[24].mxu0 %v2313_v25  ;;  %3700 = vmatmul.mubr.bf16.vlgmr.msra.gmra.mrb[16].mxu1 %v2313_v25 }
 0xb69   : > { %2432 = vmatpush1.bf16.msra.mxu0 %v5161_v4  ;;  %3704 = vmatpush3.bf16.msra.mxu1 %v5170_v38 }
 0xb6a   : > { %2433 = vmatprep.subr.bf16.mxu0 %v5166_v36  ;;  %3705 = vmatprep.subr.bf16.mxu1 %v6049_v11 }
 0xb6b   : > { %2463 = vmatprep.mubr.bf16.mxu0 %v6033_v6  ;;  %3719 = vmatprep.mubr.msk.bf16.mxu1 %vm4131_vm2, %v6049_v11 }
 0xb6d   : > { %2434 = vmatpush1.bf16.msra.mxu0 %v5175_v46  ;;  %3706 = vmatpush3.bf16.msra.mxu1 %v5189_v48 }
 0xb6e   : > { %2435 = vmatprep.subr.bf16.mxu0 %v5182_v42  ;;  %3707 = vmatprep.subr.bf16.mxu1 %v6049_v11 }
 0xb71   : > { %2436 = vmatpush1.bf16.msra.mxu0 %v5194_v1  ;;  %3708 = vmatpush3.bf16.msra.mxu1 %v5205_v9 }
 0xb72   : > { %2437 = vmatprep.subr.bf16.mxu0 %v5200_v2  ;;  %3709 = vmatprep.subr.bf16.mxu1 %v6049_v11 }
 0xb75   : > { %2438 = vmatpush1.bf16.msra.mxu0 %v5210_v10  ;;  %3710 = vmatpush3.bf16.msra.mxu1 %v5223_v12 }
 0xb76   : > { %2439 = vmatprep.subr.bf16.mxu0 %v5217_v52  ;;  %3711 = vmatprep.subr.bf16.mxu1 %v6049_v11 }
 0xb79   : > { %2440 = vmatpush1.bf16.msra.mxu0 %v5230_v13  ;;  %3712 = vmatpush3.bf16.msra.mxu1 %v5241_v15 }
 0xb7a   : > { %2441 = vmatprep.subr.bf16.mxu0 %v5236_v14  ;;  %3713 = vmatprep.subr.bf16.mxu1 %v6049_v11 }
 0xb7d   : > { %2442 = vmatpush1.bf16.msra.mxu0 %v5246_v0  ;;  %3714 = vmatpush3.bf16.msra.mxu1 %v5258_v17 }
 0xb7e   : > { %2443 = vmatprep.subr.bf16.mxu0 %v5252_v16  ;;  %3715 = vmatprep.subr.bf16.mxu1 %v6049_v11 }
 0xb81   : > { %2444 = vmatpush1.bf16.msra.mxu0 %v5263_v3  ;;  %3716 = vmatpush3.bf16.msra.mxu1 %v5274_v21 }
 0xb82   : > { %2445 = vmatprep.subr.bf16.mxu0 %v5269_v19  ;;  %3717 = vmatprep.subr.bf16.mxu1 %v6049_v11 }
 0xb85   : > { %2446 = vmatpush1.bf16.msra.mxu0 %v5279_v22  ;;  %3718 = vmatpush3.bf16.msra.mxu1 %v5291_v24 }
 0xb86   : > { %2548 = vmatprep.subr.bf16.mxu0 %v5157_v5  ;;  %3723 = vmatprep.subr.bf16.mxu1 %v6049_v11 }
 0xc3b   : > { %v2348_v44 = vpop.f32.mrb[24].mxu0  ;;  %v2389_v29 = vpop.f32.mrb[16].mxu1 }
 0xc3c   : > { %v2395_v30 = vadd.f32 %v2348_v44, %v5351_v34  ;;  %v2350_v32 = vpop.f32.mrb[25].mxu0  ;;  %v3701_v51 = vpop.f32.mrb[17].mxu1  ;;  %v2409_v23 = vadd.f32 %v6066_v53, %v2389_v29 }
 0xc3d   : > { %v2352_v33 = vpop.f32.mrb[26].mxu0  ;;  %v2392_v54 = vpop.f32.mrb[18].mxu1  ;;  %v2396_v63 = vadd.f32 %v2350_v32, %v5353_v28 }
 0xc3e   : > { %v3245_v61 = vmul.f32 -1.442695, %v2395_v30  ;;  %v2353_v62 = vpop.f32.mrb[27].mxu0  ;;  %v3702_v60 = vpop.f32.mrb[19].mxu1 }
 0xc3f   : > { %v3246_v35 = vmul.f32 -1.442695, %v2396_v63 }
 0xc40   : > { %3944 = vpow2.f32 %v3245_v61 }
 0xc41   : > { %3946 = vpow2.f32 %v3246_v35 }
 0xc4a   : > { %v3945_v8 = vpop.eup %3944 }
 0xc4b   : > { %v2403_v58 = vadd.f32 1.0, %v3945_v8  ;;  %v3947_v59 = vpop.eup %3946 }
 0xc4c   : > { %v2404_v41 = vadd.f32 1.0, %v3947_v59 }
 0xc4d   : > { %3948 = vrcp.f32 %v2403_v58 }
 0xc4e   : > { %3950 = vrcp.f32 %v2404_v41 }
 0xc57   : > { %v3949_v34 = vpop.eup %3948 }
 0xc58   : > { %v2410_v18 = vmul.f32 %v3949_v34, %v2409_v23  ;;  %v3951_v56 = vpop.eup %3950 }
 0xc59   : > { %v2413_v27 = vsub.f32 1.0, %v3951_v56 }
 0xc5a   : > { %v2411_v40 = vadd.f32 %v2410_v18, %v5343_v43  ;;  %v2652_v43 = vstv %s2651_s2 }
 0xc5b   : > { %vm2653_vm6 = vcmp.eq.s32.totalorder %v6034_v7, %v2652_v43 }
 0xc5c   : > { %3952 = vtanh.f32 %v2411_v40  ;;  %v2654_v29 = vsel %vm2653_vm6, 1, %v6033_v6 }
 0xc5d   : > { %2656 = vperm.xlu0 %3918, %v2654_v29  }
 0xc66   : > { %v3953_v25 = vpop.eup %3952 }
 0xc67   : > { %v2414_v28 = vsub.f32 %v3953_v25, %v5429_v47 }
 0xc69   : > { %v2415_v45 = vmul.f32 %v2414_v28, %v2413_v27 }
 0xc6b   : > { %v5477_v44 = vadd.f32 %v2415_v45, %v5429_v47 }
 0xc6d   : > { %v2430_v30 = vpack.c.bf16 %v5477_v44, %v5477_v44 }
 0xc6f   : > { %2464 = vmatmul.mubr.bf16.vlgmr.msra.gmra.mrb[28].mxu0 %v2430_v30  ;;  %3720 = vmatmul.mubr.bf16.vlgmr.msra.gmra.mrb[20].mxu1 %v2430_v30 }
 0xc70   : > { %2549 = vmatpush1.bf16.msra.mxu0 %v5161_v4  ;;  %3724 = vmatpush3.bf16.msra.mxu1 %v5170_v38 }
 0xc71   : > { %2550 = vmatprep.subr.bf16.mxu0 %v5166_v36  ;;  %3725 = vmatprep.subr.bf16.mxu1 %v6049_v11 }
 0xc72   : > { %2580 = vmatprep.mubr.bf16.mxu0 %v6033_v6  ;;  %3739 = vmatprep.mubr.msk.bf16.mxu1 %vm4131_vm2, %v6049_v11 }
 0xc74   : > { %2551 = vmatpush1.bf16.msra.mxu0 %v5175_v46  ;;  %3726 = vmatpush3.bf16.msra.mxu1 %v5189_v48 }
 0xc75   : > { %2552 = vmatprep.subr.bf16.mxu0 %v5182_v42  ;;  %3727 = vmatprep.subr.bf16.mxu1 %v6049_v11 }
 0xc78   : > { %2553 = vmatpush1.bf16.msra.mxu0 %v5194_v1  ;;  %3728 = vmatpush3.bf16.msra.mxu1 %v5205_v9 }
 0xc79   : > { %2554 = vmatprep.subr.bf16.mxu0 %v5200_v2  ;;  %3729 = vmatprep.subr.bf16.mxu1 %v6049_v11 }
 0xc7c   : > { %2555 = vmatpush1.bf16.msra.mxu0 %v5210_v10  ;;  %3730 = vmatpush3.bf16.msra.mxu1 %v5223_v12 }
 0xc7d   : > { %2556 = vmatprep.subr.bf16.mxu0 %v5217_v52  ;;  %3731 = vmatprep.subr.bf16.mxu1 %v6049_v11 }
 0xc80   : > { %2557 = vmatpush1.bf16.msra.mxu0 %v5230_v13  ;;  %3732 = vmatpush3.bf16.msra.mxu1 %v5241_v15 }
 0xc81   : > { %2558 = vmatprep.subr.bf16.mxu0 %v5236_v14  ;;  %3733 = vmatprep.subr.bf16.mxu1 %v6049_v11 }
 0xc84   : > { %2559 = vmatpush1.bf16.msra.mxu0 %v5246_v0  ;;  %3734 = vmatpush3.bf16.msra.mxu1 %v5258_v17 }
 0xc85   : > { %2560 = vmatprep.subr.bf16.mxu0 %v5252_v16  ;;  %3735 = vmatprep.subr.bf16.mxu1 %v6049_v11 }
 0xc88   : > { %2561 = vmatpush1.bf16.msra.mxu0 %v5263_v3  ;;  %3736 = vmatpush3.bf16.msra.mxu1 %v5274_v21 }
 0xc89   : > { %2562 = vmatprep.subr.bf16.mxu0 %v5269_v19  ;;  %3737 = vmatprep.subr.bf16.mxu1 %v6049_v11 }
 0xc8c   : > { %2563 = vmatpush1.bf16.msra.mxu0 %v5279_v22  ;;  %3738 = vmatpush3.bf16.msra.mxu1 %v5291_v24 }
 0xc8d   : > { %2665 = vmatprep.subr.bf16.mxu0 %v5157_v5  ;;  %3743 = vmatprep.subr.bf16.mxu1 %v6049_v11 }
 0xd42   : > { %v2465_v32 = vpop.f32.mrb[28].mxu0  ;;  %v2506_v51 = vpop.f32.mrb[20].mxu1 }
 0xd43   : > { %v2512_v33 = vadd.f32 %v2465_v32, %v5355_v39  ;;  %v2467_v54 = vpop.f32.mrb[29].mxu0  ;;  %v3721_v61 = vpop.f32.mrb[21].mxu1  ;;  %v2526_v18 = vadd.f32 %v6066_v53, %v2506_v51 }
 0xd44   : > { %v2469_v62 = vpop.f32.mrb[30].mxu0  ;;  %v2509_v60 = vpop.f32.mrb[22].mxu1  ;;  %v2513_v58 = vadd.f32 %v2467_v54, %v5357_v49 }
 0xd45   : > { %v3247_v63 = vmul.f32 -1.442695, %v2512_v33  ;;  %v2470_v35 = vpop.f32.mrb[31].mxu0  ;;  %v3722_v8 = vpop.f32.mrb[23].mxu1 }
 0xd46   : > { %v3248_v59 = vmul.f32 -1.442695, %v2513_v58 }
 0xd47   : > { %3954 = vpow2.f32 %v3247_v63 }
 0xd48   : > { %3956 = vpow2.f32 %v3248_v59 }
 0xd51   : > { %v3955_v23 = vpop.eup %3954 }
 0xd52   : > { %v2520_v41 = vadd.f32 1.0, %v3955_v23  ;;  %v3957_v34 = vpop.eup %3956 }
 0xd53   : > { %v2521_v40 = vadd.f32 1.0, %v3957_v34 }
 0xd54   : > { %3958 = vrcp.f32 %v2520_v41 }
 0xd55   : > { %3960 = vrcp.f32 %v2521_v40 }
 0xd5e   : > { %v3959_v39 = vpop.eup %3958 }
 0xd5f   : > { %v2527_v56 = vmul.f32 %v3959_v39, %v2526_v18  ;;  %v3961_v27 = vpop.eup %3960 }
 0xd60   : > { %v2530_v45 = vsub.f32 1.0, %v3961_v27 }
 0xd61   : > { %v2528_v25 = vadd.f32 %v2527_v56, %v5347_v26  ;;  %v2769_v26 = vstv %s2768_s16 }
 0xd62   : > { %vm2770_vm7 = vcmp.eq.s32.totalorder %v6034_v7, %v2769_v26 }
 0xd63   : > { %3962 = vtanh.f32 %v2528_v25  ;;  %v2771_v32 = vsel %vm2770_vm7, 1, %v6033_v6 }
 0xd64   : > { %2773 = vperm.xlu1 %3919, %v2771_v32  }
 0xd6d   : > { %v3963_v28 = vpop.eup %3962 }
 0xd6e   : > { %v2531_v49 = vsub.f32 %v3963_v28, %v5477_v44 }
 0xd70   : > { %v2532_v30 = vmul.f32 %v2531_v49, %v2530_v45 }
 0xd72   : > { %v5525_v43 = vadd.f32 %v2532_v30, %v5477_v44 }
 0xd74   : > { %v2547_v29 = vpack.c.bf16 %v5525_v43, %v5525_v43 }
 0xd76   : > { %2581 = vmatmul.mubr.bf16.vlgmr.msra.gmra.mrb[32].mxu0 %v2547_v29  ;;  %3740 = vmatmul.mubr.bf16.vlgmr.msra.gmra.mrb[24].mxu1 %v2547_v29 }
 0xd77   : > { %2666 = vmatpush1.bf16.msra.mxu0 %v5161_v4  ;;  %3744 = vmatpush3.bf16.msra.mxu1 %v5170_v38 }
 0xd78   : > { %2667 = vmatprep.subr.bf16.mxu0 %v5166_v36  ;;  %3745 = vmatprep.subr.bf16.mxu1 %v6049_v11 }
 0xd79   : > { %2697 = vmatprep.mubr.bf16.mxu0 %v6033_v6  ;;  %3759 = vmatprep.mubr.msk.bf16.mxu1 %vm4131_vm2, %v6049_v11 }
 0xd7b   : > { %2668 = vmatpush1.bf16.msra.mxu0 %v5175_v46  ;;  %3746 = vmatpush3.bf16.msra.mxu1 %v5189_v48 }
 0xd7c   : > { %2669 = vmatprep.subr.bf16.mxu0 %v5182_v42  ;;  %3747 = vmatprep.subr.bf16.mxu1 %v6049_v11 }
 0xd7f   : > { %2670 = vmatpush1.bf16.msra.mxu0 %v5194_v1  ;;  %3748 = vmatpush3.bf16.msra.mxu1 %v5205_v9 }
 0xd80   : > { %2671 = vmatprep.subr.bf16.mxu0 %v5200_v2  ;;  %3749 = vmatprep.subr.bf16.mxu1 %v6049_v11 }
 0xd83   : > { %2672 = vmatpush1.bf16.msra.mxu0 %v5210_v10  ;;  %3750 = vmatpush3.bf16.msra.mxu1 %v5223_v12 }
 0xd84   : > { %2673 = vmatprep.subr.bf16.mxu0 %v5217_v52  ;;  %3751 = vmatprep.subr.bf16.mxu1 %v6049_v11 }
 0xd87   : > { %2674 = vmatpush1.bf16.msra.mxu0 %v5230_v13  ;;  %3752 = vmatpush3.bf16.msra.mxu1 %v5241_v15 }
 0xd88   : > { %2675 = vmatprep.subr.bf16.mxu0 %v5236_v14  ;;  %3753 = vmatprep.subr.bf16.mxu1 %v6049_v11 }
 0xd8b   : > { %2676 = vmatpush1.bf16.msra.mxu0 %v5246_v0  ;;  %3754 = vmatpush3.bf16.msra.mxu1 %v5258_v17 }
 0xd8c   : > { %2677 = vmatprep.subr.bf16.mxu0 %v5252_v16  ;;  %3755 = vmatprep.subr.bf16.mxu1 %v6049_v11 }
 0xd8f   : > { %2678 = vmatpush1.bf16.msra.mxu0 %v5263_v3  ;;  %3756 = vmatpush3.bf16.msra.mxu1 %v5274_v21 }
 0xd90   : > { %2679 = vmatprep.subr.bf16.mxu0 %v5269_v19  ;;  %3757 = vmatprep.subr.bf16.mxu1 %v6049_v11 }
 0xd93   : > { %2680 = vmatpush1.bf16.msra.mxu0 %v5279_v22  ;;  %3758 = vmatpush3.bf16.msra.mxu1 %v5291_v24 }
 0xd94   : > { %2782 = vmatprep.subr.bf16.mxu0 %v5157_v5  ;;  %3763 = vmatprep.subr.bf16.mxu1 %v6049_v11 }
 0xe49   : > { %v2582_v51 = vpop.f32.mrb[32].mxu0  ;;  %v2623_v33 = vpop.f32.mrb[24].mxu1 }
 0xe4a   : > { %v2629_v54 = vadd.f32 %v2582_v51, %v5365_v37  ;;  %v2584_v61 = vpop.f32.mrb[33].mxu0  ;;  %v3741_v62 = vpop.f32.mrb[25].mxu1  ;;  %v2643_v40 = vadd.f32 %v6066_v53, %v2623_v33 }
 0xe4b   : > { %v2586_v60 = vpop.f32.mrb[34].mxu0  ;;  %v2626_v63 = vpop.f32.mrb[26].mxu1  ;;  %v2630_v59 = vadd.f32 %v2584_v61, %v5367_v55 }
 0xe4c   : > { %v3249_v35 = vmul.f32 -1.442695, %v2629_v54  ;;  %v2587_v8 = vpop.f32.mrb[35].mxu0  ;;  %v3742_v58 = vpop.f32.mrb[27].mxu1 }
 0xe4d   : > { %v3250_v23 = vmul.f32 -1.442695, %v2630_v59 }
 0xe4e   : > { %3964 = vpow2.f32 %v3249_v35 }
 0xe4f   : > { %3966 = vpow2.f32 %v3250_v23 }
 0xe58   : > { %v3965_v41 = vpop.eup %3964 }
 0xe59   : > { %v2637_v34 = vadd.f32 1.0, %v3965_v41  ;;  %v3967_v18 = vpop.eup %3966 }
 0xe5a   : > { %v2638_v39 = vadd.f32 1.0, %v3967_v18 }
 0xe5b   : > { %3968 = vrcp.f32 %v2637_v34 }
 0xe5c   : > { %3970 = vrcp.f32 %v2638_v39  ;;  %v6067_v39 = vld [vmem:[#allocation90_spill] sm:$0xff] }
 0xe65   : > { %v3969_v37 = vpop.eup %3968 }
 0xe66   : > { %v2644_v56 = vmul.f32 %v3969_v37, %v2643_v40  ;;  %v3971_v27 = vpop.eup %3970 }
 0xe67   : > { %v2647_v45 = vsub.f32 1.0, %v3971_v27 }
 0xe68   : > { %v2645_v25 = vadd.f32 %v2644_v56, %v5361_v50  ;;  %v2886_v50 = vstv %s2885_s18 }
 0xe69   : > { %vm2887_vm8 = vcmp.eq.s32.totalorder %v6034_v7, %v2886_v50 }
 0xe6a   : > { %3972 = vtanh.f32 %v2645_v25  ;;  %v2888_v26 = vsel %vm2887_vm8, 1, %v6033_v6 }
 0xe6b   : > { %2890 = vperm.xlu0 %3918, %v2888_v26  }
 0xe74   : > { %v3973_v28 = vpop.eup %3972 }
 0xe75   : > { %v2648_v55 = vsub.f32 %v3973_v28, %v5525_v43 }
 0xe77   : > { %v2649_v49 = vmul.f32 %v2648_v55, %v2647_v45 }
 0xe79   : > { %v5573_v30 = vadd.f32 %v2649_v49, %v5525_v43 }
 0xe7b   : > { %v2664_v29 = vpack.c.bf16 %v5573_v30, %v5573_v30 }
 0xe7d   : > { %2698 = vmatmul.mubr.bf16.vlgmr.msra.gmra.mrb[36].mxu0 %v2664_v29  ;;  %3760 = vmatmul.mubr.bf16.vlgmr.msra.gmra.mrb[28].mxu1 %v2664_v29 }
 0xe7e   : > { %2783 = vmatpush1.bf16.msra.mxu0 %v5161_v4  ;;  %3764 = vmatpush3.bf16.msra.mxu1 %v5170_v38 }
 0xe7f   : > { %2784 = vmatprep.subr.bf16.mxu0 %v5166_v36  ;;  %3765 = vmatprep.subr.bf16.mxu1 %v6049_v11 }
 0xe80   : > { %2814 = vmatprep.mubr.bf16.mxu0 %v6033_v6  ;;  %3779 = vmatprep.mubr.msk.bf16.mxu1 %vm4131_vm2, %v6049_v11 }
 0xe82   : > { %2785 = vmatpush1.bf16.msra.mxu0 %v5175_v46  ;;  %3766 = vmatpush3.bf16.msra.mxu1 %v5189_v48 }
 0xe83   : > { %2786 = vmatprep.subr.bf16.mxu0 %v5182_v42  ;;  %3767 = vmatprep.subr.bf16.mxu1 %v6049_v11 }
 0xe86   : > { %2787 = vmatpush1.bf16.msra.mxu0 %v5194_v1  ;;  %3768 = vmatpush3.bf16.msra.mxu1 %v5205_v9 }
 0xe87   : > { %2788 = vmatprep.subr.bf16.mxu0 %v5200_v2  ;;  %3769 = vmatprep.subr.bf16.mxu1 %v6049_v11 }
 0xe8a   : > { %2789 = vmatpush1.bf16.msra.mxu0 %v5210_v10  ;;  %3770 = vmatpush3.bf16.msra.mxu1 %v5223_v12 }
 0xe8b   : > { %2790 = vmatprep.subr.bf16.mxu0 %v5217_v52  ;;  %3771 = vmatprep.subr.bf16.mxu1 %v6049_v11 }
 0xe8e   : > { %2791 = vmatpush1.bf16.msra.mxu0 %v5230_v13  ;;  %3772 = vmatpush3.bf16.msra.mxu1 %v5241_v15 }
 0xe8f   : > { %2792 = vmatprep.subr.bf16.mxu0 %v5236_v14  ;;  %3773 = vmatprep.subr.bf16.mxu1 %v6049_v11 }
 0xe92   : > { %2793 = vmatpush1.bf16.msra.mxu0 %v5246_v0  ;;  %3774 = vmatpush3.bf16.msra.mxu1 %v5258_v17 }
 0xe93   : > { %2794 = vmatprep.subr.bf16.mxu0 %v5252_v16  ;;  %3775 = vmatprep.subr.bf16.mxu1 %v6049_v11 }
 0xe96   : > { %2795 = vmatpush1.bf16.msra.mxu0 %v5263_v3  ;;  %3776 = vmatpush3.bf16.msra.mxu1 %v5274_v21 }
 0xe97   : > { %2796 = vmatprep.subr.bf16.mxu0 %v5269_v19  ;;  %3777 = vmatprep.subr.bf16.mxu1 %v6049_v11 }
 0xe9a   : > { %2797 = vmatpush1.bf16.msra.mxu0 %v5279_v22  ;;  %3778 = vmatpush3.bf16.msra.mxu1 %v5291_v24 }
 0xe9b   : > { %2899 = vmatprep.subr.bf16.mxu0 %v5157_v5  ;;  %3783 = vmatprep.subr.bf16.mxu1 %v6049_v11 }
 0xf50   : > { %v2699_v32 = vpop.f32.mrb[36].mxu0  ;;  %v2740_v51 = vpop.f32.mrb[28].mxu1 }
 0xf51   : > { %v2746_v33 = vadd.f32 %v2699_v32, %v5369_v20  ;;  %v2701_v54 = vpop.f32.mrb[37].mxu0  ;;  %v3761_v61 = vpop.f32.mrb[29].mxu1  ;;  %v2760_v34 = vadd.f32 %v6066_v53, %v2740_v51 }
 0xf52   : > { %v2703_v62 = vpop.f32.mrb[38].mxu0  ;;  %v2743_v60 = vpop.f32.mrb[30].mxu1  ;;  %v2747_v8 = vadd.f32 %v2701_v54, %v5371_v57  ;;  %v2895_v54 = vld [vmem:[#allocation3 + $0xa8] sm:$0xff] }
 0xf53   : > { %v3251_v63 = vmul.f32 -1.442695, %v2746_v33  ;;  %v2704_v35 = vpop.f32.mrb[39].mxu0  ;;  %v3762_v5 = vpop.f32.mrb[31].mxu1 }
 0xf54   : > { %v3252_v58 = vmul.f32 -1.442695, %v2747_v8 }
 0xf55   : > { %3974 = vpow2.f32 %v3251_v63 }
 0xf56   : > { %3976 = vpow2.f32 %v3252_v58 }
 0xf5f   : > { %v3975_v59 = vpop.eup %3974 }
 0xf60   : > { %v2754_v23 = vadd.f32 1.0, %v3975_v59  ;;  %v3977_v41 = vpop.eup %3976 }
 0xf61   : > { %v2755_v18 = vadd.f32 1.0, %v3977_v41  ;;  %v2896_v41 = vld [vmem:[#allocation3 + $0xb0] sm:$0xff] }
 0xf62   : > { %3978 = vrcp.f32 %v2754_v23 }
 0xf63   : > { %3980 = vrcp.f32 %v2755_v18 }
 0xf6c   : > { %v3979_v20 = vpop.eup %3978 }
 0xf6d   : > { %v2761_v40 = vmul.f32 %v3979_v20, %v2760_v34  ;;  %v3981_v56 = vpop.eup %3980 }
 0xf6e   : > { %v2764_v27 = vsub.f32 1.0, %v3981_v56 }
 0xf6f   : > { %v2762_v37 = vadd.f32 %v2761_v40, %v6067_v39 }
 0xf71   : > { %3982 = vtanh.f32 %v2762_v37 }
 0xf7b   : > { %v3983_v25 = vpop.eup %3982 }
 0xf7c   : > { %v2765_v57 = vsub.f32 %v3983_v25, %v5573_v30 }
 0xf7e   : > { %v2766_v28 = vmul.f32 %v2765_v57, %v2764_v27  ;;  %v2897_v57 = vld [vmem:[#allocation3 + $0xb8] sm:$0xff] }
 0xf80   : > { %v5621_v45 = vadd.f32 %v2766_v28, %v5573_v30  ;;  %v2189_v28 = vpop.permute.xlu0 %2188 }
 0xf81   : > { %vm2190_vm10 = vcmp.eq.s32.totalorder %v2189_v28, 1 }
 0xf82   : > { %v2781_v55 = vpack.c.bf16 %v5621_v45, %v5621_v45 }
 0xf84   : > { %2815 = vmatmul.mubr.bf16.vlgmr.msra.gmra.mrb[40].mxu0 %v2781_v55  ;;  %3780 = vmatmul.mubr.bf16.vlgmr.msra.gmra.mrb[32].mxu1 %v2781_v55 }
 0xf85   : > { %2900 = vmatpush1.bf16.msra.mxu0 %v5161_v4  ;;  %3784 = vmatpush3.bf16.msra.mxu1 %v5170_v38 }
 0xf86   : > { %2901 = vmatprep.subr.bf16.mxu0 %v5166_v36  ;;  %3785 = vmatprep.subr.bf16.mxu1 %v6049_v11 }
 0xf87   : > { %2931 = vmatprep.mubr.bf16.mxu0 %v6033_v6  ;;  %3799 = vmatprep.mubr.msk.bf16.mxu1 %vm4131_vm2, %v6049_v11 }
 0xf89   : > { %2902 = vmatpush1.bf16.msra.mxu0 %v5175_v46  ;;  %3786 = vmatpush3.bf16.msra.mxu1 %v5189_v48  ;;  %v6070_v48 = vld [vmem:[#allocation89_spill] sm:$0xff] }
 0xf8a   : > { %2903 = vmatprep.subr.bf16.mxu0 %v5182_v42  ;;  %3787 = vmatprep.subr.bf16.mxu1 %v6049_v11 }
 0xf8d   : > { %2904 = vmatpush1.bf16.msra.mxu0 %v5194_v1  ;;  %3788 = vmatpush3.bf16.msra.mxu1 %v5205_v9  ;;  %v3003_v9 = vstv %s3002_s19 }
 0xf8e   : > { %2905 = vmatprep.subr.bf16.mxu0 %v5200_v2  ;;  %3789 = vmatprep.subr.bf16.mxu1 %v6049_v11  ;;  %vm3004_vm9 = vcmp.eq.s32.totalorder %v6034_v7, %v3003_v9  ;;  %v2423_v9 = vpop.permute.xlu1 %2422 }
 0xf8f   : > { %vm2424_vm12 = vcmp.eq.s32.totalorder %v2423_v9, 1 }
 0xf91   : > { %2906 = vmatpush1.bf16.msra.mxu0 %v5210_v10  ;;  %3790 = vmatpush3.bf16.msra.mxu1 %v5223_v12  ;;  %v3005_v12 = vsel %vm3004_vm9, 1, %v6033_v6 }
 0xf92   : > { %2907 = vmatprep.subr.bf16.mxu0 %v5217_v52  ;;  %3791 = vmatprep.subr.bf16.mxu1 %v6049_v11 }
 0xf93   : > { %3007 = vperm.xlu1 %3919, %v3005_v12   ;;  %v2306_v12 = vpop.permute.xlu0 %2305 }
 0xf94   : > { %vm2307_vm11 = vcmp.eq.s32.totalorder %v2306_v12, 1 }
 0xf95   : > { %2908 = vmatpush1.bf16.msra.mxu0 %v5230_v13  ;;  %3792 = vmatpush3.bf16.msra.mxu1 %v5241_v15  ;;  %v6068_v15 = vld [vmem:[#allocation91_spill] sm:$0xff] }
 0xf96   : > { %2909 = vmatprep.subr.bf16.mxu0 %v5236_v14  ;;  %3793 = vmatprep.subr.bf16.mxu1 %v6049_v11 }
 0xf99   : > { %2910 = vmatpush1.bf16.msra.mxu0 %v5246_v0  ;;  %3794 = vmatpush3.bf16.msra.mxu1 %v5258_v17 }
 0xf9a   : > { %2911 = vmatprep.subr.bf16.mxu0 %v5252_v16  ;;  %3795 = vmatprep.subr.bf16.mxu1 %v6049_v11 }
 0xf9d   : > { %2912 = vmatpush1.bf16.msra.mxu0 %v5263_v3  ;;  %3796 = vmatpush3.bf16.msra.mxu1 %v5274_v21 }
 0xf9e   : > { %2913 = vmatprep.subr.bf16.mxu0 %v5269_v19  ;;  %3797 = vmatprep.subr.bf16.mxu1 %v6049_v11 }
 0xfa1   : > { %2914 = vmatpush1.bf16.msra.mxu0 %v5279_v22  ;;  %3798 = vmatpush3.bf16.msra.mxu1 %v5291_v24  ;;  %v6069_v24 = vld [vmem:[#allocation92_spill] sm:$0xff] }
0x1057   : > { %v2816_v13 = vpop.f32.mrb[40].mxu0  ;;  %v2857_v14 = vpop.f32.mrb[32].mxu1 }
0x1058   : > { %v2863_v16 = vadd.f32 %v2816_v13, %v6068_v15  ;;  %v2818_v10 = vpop.f32.mrb[41].mxu0  ;;  %v3781_v17 = vpop.f32.mrb[33].mxu1  ;;  %v2877_v36 = vadd.f32 %v6066_v53, %v2857_v14  ;;  %v1948_v15 = vld [vmem:[#allocation5] sm:$0xff] }
0x1059   : > { %v2820_v21 = vpop.f32.mrb[42].mxu0  ;;  %v2860_v2 = vpop.f32.mrb[34].mxu1  ;;  %v2864_v19 = vadd.f32 %v2818_v10, %v6069_v24 }
0x105a   : > { %v3253_v11 = vmul.f32 -1.442695, %v2863_v16  ;;  %v2821_v1 = vpop.f32.mrb[43].mxu0  ;;  %v3782_v22 = vpop.f32.mrb[35].mxu1  ;;  %v2191_v21 = vsel %vm2190_vm10, %v5381_v31, %v1948_v15 }
0x105b   : > { %v3254_v0 = vmul.f32 -1.442695, %v2864_v19  ;;  %v2540_v13 = vpop.permute.xlu1 %2539  ;;  %v2657_v14 = vpop.permute.xlu0 %2656 }
0x105c   : > { %3984 = vpow2.f32 %v3253_v11  ;;  %vm2541_vm13 = vcmp.eq.s32.totalorder %v2540_v13, 1  ;;  %v2308_v11 = vsel %vm2307_vm11, %v5429_v47, %v2191_v21  ;;  %vm2658_vm14 = vcmp.eq.s32.totalorder %v2657_v14, 1 }
0x105d   : > { %3986 = vpow2.f32 %v3254_v0  ;;  %v2425_v24 = vsel %vm2424_vm12, %v5477_v44, %v2308_v11 }
0x105e   : > { %v2542_v19 = vsel %vm2541_vm13, %v5525_v43, %v2425_v24 }
0x105f   : > { %v2774_v10 = vpop.permute.xlu1 %2773  ;;  %v2891_v2 = vpop.permute.xlu0 %2890 }
0x1060   : > { %vm2775_vm15 = vcmp.eq.s32.totalorder %v2774_v10, 1  ;;  %vm2892_vm0 = vcmp.eq.s32.totalorder %v2891_v2, 1 }
0x1066   : > { %v3985_v3 = vpop.eup %3984 }
0x1067   : > { %v2871_v4 = vadd.f32 1.0, %v3985_v3  ;;  %v3987_v6 = vpop.eup %3986  ;;  %v3008_v3 = vpop.permute.xlu1 %3007 }
0x1068   : > { %v2872_v38 = vadd.f32 1.0, %v3987_v6  ;;  %vm3009_vm1 = vcmp.eq.s32.totalorder %v3008_v3, 1 }
0x1069   : > { %3988 = vrcp.f32 %v2871_v4  ;;  %v2659_v4 = vsel %vm2658_vm14, %v5573_v30, %v2542_v19 }
0x106a   : > { %3990 = vrcp.f32 %v2872_v38  ;;  %v2776_v6 = vsel %vm2775_vm15, %v5621_v45, %v2659_v4 }
0x1073   : > { %v3989_v46 = vpop.eup %3988 }
0x1074   : > { %v2878_v42 = vmul.f32 %v3989_v46, %v2877_v36  ;;  %v3991_v49 = vpop.eup %3990 }
0x1075   : > { %v2881_v50 = vsub.f32 1.0, %v3991_v49 }
0x1076   : > { %v2879_v52 = vadd.f32 %v2878_v42, %v6070_v48 }
0x1078   : > { %3992 = vtanh.f32 %v2879_v52 }
0x1082   : > { %v3993_v29 = vpop.eup %3992 }
0x1083   : > { %v2882_v26 = vsub.f32 %v3993_v29, %v5621_v45 }
0x1085   : > { %v2883_v32 = vmul.f32 %v2882_v26, %v2881_v50 }
0x1087   : > { %v2884_v51 = vadd.f32 %v2883_v32, %v5621_v45 }
0x1089   : > { %v2898_v33 = vpack.c.bf16 %v2884_v51, %v2884_v51  ;;  %v2893_v36 = vsel %vm2892_vm0, %v2884_v51, %v2776_v6 }
0x108b   : > { %2932 = vmatmul.mubr.bf16.vlgmr.msra.gmra.mrb[44].mxu0 %v2898_v33  ;;  %3800 = vmatmul.mubr.bf16.vlgmr.msra.gmra.mrb[36].mxu1 %v2898_v33 }
0x115e   : > { %v2933_v61 = vpop.f32.mrb[44].mxu0  ;;  %v2974_v62 = vpop.f32.mrb[36].mxu1 }
0x115f   : > { %v2980_v60 = vadd.f32 %v2933_v61, %v2895_v54  ;;  %v2935_v63 = vpop.f32.mrb[45].mxu0  ;;  %v3801_v35 = vpop.f32.mrb[37].mxu1  ;;  %v2994_v37 = vadd.f32 %v6066_v53, %v2974_v62 }
0x1160   : > { %v2937_v5 = vpop.f32.mrb[46].mxu0  ;;  %v2977_v8 = vpop.f32.mrb[38].mxu1  ;;  %v2981_v34 = vadd.f32 %v2935_v63, %v2896_v41 }
0x1161   : > { %v3255_v58 = vmul.f32 -1.442695, %v2980_v60  ;;  %v2938_v59 = vpop.f32.mrb[47].mxu0  ;;  %v3802_v23 = vpop.f32.mrb[39].mxu1 }
0x1162   : > { %v3256_v18 = vmul.f32 -1.442695, %v2981_v34 }
0x1163   : > { %3994 = vpow2.f32 %v3255_v58 }
0x1164   : > { %3996 = vpow2.f32 %v3256_v18 }
0x116d   : > { %v3995_v20 = vpop.eup %3994 }
0x116e   : > { %v2988_v40 = vadd.f32 1.0, %v3995_v20  ;;  %v3997_v39 = vpop.eup %3996 }
0x116f   : > { %v2989_v56 = vadd.f32 1.0, %v3997_v39 }
0x1170   : > { %3998 = vrcp.f32 %v2988_v40 }
0x1171   : > { %4000 = vrcp.f32 %v2989_v56 }
0x117a   : > { %v3999_v25 = vpop.eup %3998 }
0x117b   : > { %v2995_v27 = vmul.f32 %v3999_v25, %v2994_v37  ;;  %v4001_v16 = vpop.eup %4000 }
0x117c   : > { %v2998_v1 = vsub.f32 1.0, %v4001_v16 }
0x117d   : > { %v2996_v55 = vadd.f32 %v2995_v27, %v2897_v57 }
0x117f   : > { %4002 = vtanh.f32 %v2996_v55 }
0x1189   : > { %v4003_v17 = vpop.eup %4002 }
0x118a   : > { %v2999_v22 = vsub.f32 %v4003_v17, %v2884_v51 }
0x118b   :  { %1605 = sbr.rel (!%p1602_p13) target bundleno = 2312 (0x908), region = 109 }
0x118c   : > { %v3000_v0 = vmul.f32 %v2999_v22, %v2998_v1 }
0x118e   : > { %v3001_v31 = vadd.f32 %v3000_v0, %v2884_v51 }
0x1190   : > { %3011 = vst [vmem:[#allocation4] sm:$0xff] %v3001_v31  ;;  %v3010_v47 = vsel %vm3009_vm1, %v3001_v31, %v2893_v36 }
0x1191   : > { %3012 = vst [vmem:[#allocation5] sm:$0xff] %v3010_v47 }
0x1192 PF:  { %s4132_s20 = smov [#allocation14]  }
0x1193   :  { %s3034_s21 = sshll.u32 %s4132_s20, 4  ;;  %s3035_s21 = int_to_ptr.vmem [resolvable:$true] %s3034_s21 }
0x1194   :  { %s4074_s22 = scalar_lea.vmem %s3035_s21, 128  ;;  %p4079_p1 = scmp.lt.s32.totalorder %s3035_s21, %s3035_s21 }
0x1195   :  { %p4075_p0 = scmp.ne.s32.totalorder %s3035_s21, %s4074_s22  ;;  %p4080_p2 = scmp.lt.s32.totalorder %s4074_s22, %s4074_s22 }
0x1197   :  { %p4081_p3 = por %p4080_p2, %p4079_p1 }
0x1198   :  { %v3013_v44 = vld [vmem:[#allocation5] sm:$0xff] }
0x1199   :  { %v3014_v43 = vmul.f32 %v3013_v44, %v3013_v44  ;;  %p4082_p4 = pnand %p4081_p3, %p4075_p0 }
0x119b   :  { %3015 = vadd.xlane.f32.xlu0 %v3014_v43 }
0x1228   :  { %v3016_v30 = vpop.xlane.xlu0 %3015 }
0x1229   :  { %4004 = vrsqrt.f32 %v3016_v30  ;;  %vm3019_vm2 = vcmp.eq.f32.partialorder %v3016_v30, inf  ;;  %v3022_v46 = vand.u32 2147483648, %v3016_v30  ;;  %vm3021_vm3 = vcmp.eq.f32.partialorder %v3016_v30, 0.0 }
0x1233   :  { %v4005_v45 = vpop.eup %4004 }
0x1234   :  { %v3018_v38 = vmul.f32 %v4005_v45, %v3016_v30 }
0x1236   :  { %v3020_v42 = vsel %vm3019_vm2, %v3016_v30, %v3018_v38 }
0x1237   :  { %v3023_v48 = vsel %vm3021_vm3, %v3022_v46, %v3020_v42 }
0x1238   :  { %v3024_v52 = vmax.f32 %v3023_v48, 1e-12 }
0x123a   :  { %4006 = vrcp.f32 %v3024_v52 }
0x1244   :  { %v4007_v49 = vpop.eup %4006 }
0x1245   :  { %v3026_v29 = vmul.f32 %v4007_v49, %v3013_v44 }
0x1247   :  { %3027 = vst [vmem:[#allocation14] sm:$0xff] %v3026_v29 }
0x1248   :  { %4085 = shalt.err (!%p4082_p4)
}
0x1249   :  { %s4086_s4 = scalar_lea.hbm %s5697_s7, 128 }
0x124a   :  { %p4087_p5 = scmp.ne.s32.totalorder %s5697_s7, %s4086_s4  ;;  %p4090_p6 = scmp.lt.u32.totalorder %s4086_s4, %s5697_s7 }
0x124c   :  { %p4092_p7 = pnand %p4090_p6, %p4087_p5 }
0x124e   :  { %4095 = shalt.err (!%p4092_p7)
}
0x124f   :  { %3037 = dma.vmem_to_hbm [thread:$0]  %s3035_s21, 128, %s5697_s7, [#allocation10]  }
0x1250   :  { %4108 = dma.done.wait [#allocation10], 128  }
0x1251   :  { %4109 = vsyncadd [#allocation10], 4294967168 }
0x1252   :  { %3041 = vsyncpa [#allocation9], 1 }
0x1253   :  { %3042 = vsyncpa [#allocation12], 1 }
0x1254   :  { %3043 = vsyncpa [#allocation10], 1 }

</bundles_post_ra>
